<compile_context>
chip_gen: v7x
topology: tpu7x:2x2x1
jax: 0.10.0
libtpu: 0.0.40
codegen_flags: <defaults>
</compile_context>

<pallas_src>
import functools
import numpy as np

import jax
import jax.numpy as jnp
from jax.experimental import pallas as pl
from jax.experimental.pallas import tpu as pltpu


def _vmem_limit_bytes():
    cap = 64 * 1024 * 1024
    try:
        cap = int(pltpu.get_tpu_info().vmem_capacity_bytes)
    except Exception:
        pass
    # Leave headroom for Mosaic scratch / double buffers:
    #   v7x (64 MiB physical) -> 48 MiB ; v5e/v6e (128 MiB) -> 96 MiB.
    return max(32 * 1024 * 1024, min(cap * 3 // 4, 96 * 1024 * 1024))


_VMEM_LIMIT = _vmem_limit_bytes()


# ----------------------------------------------------------------------------- helpers
def _round_up(x, m):
    return ((x + m - 1) // m) * m


def _pick_tn(N):
    """Lane-aligned N tile: 256-multiples on v6e/v7x-friendly sizes, else 128, else full."""
    if N % 256 == 0 and N >= 512:
        return 256
    if N % 128 == 0 and N >= 256:
        return 128
    return N


# ----------------------------------------------------------------------------- fused matmul kernel
def _fused_matmul_kernel(*refs, activation, has_ln, has_res, eps):
    it = iter(refs)
    a_ref = next(it)
    g_ref = next(it) if has_ln else None
    beta_ref = next(it) if has_ln else None
    w_ref = next(it)
    bias_ref = next(it)
    r_ref = next(it) if has_res else None
    o_ref = next(it)

    a = a_ref[...]
    if has_ln:                                   # fused pre-LayerNorm (f32 stats)
        a = a.astype(jnp.float32)
        mean = jnp.mean(a, axis=-1, keepdims=True)
        var = jnp.mean(jnp.square(a - mean), axis=-1, keepdims=True)
        a = (a - mean) * jax.lax.rsqrt(var + eps)
        a = a * g_ref[...] + beta_ref[...]

    # bf16 x bf16 on the MXU, f32 accumulate.
    acc = jnp.dot(a.astype(w_ref.dtype), w_ref[...],
                  preferred_element_type=jnp.float32)
    acc = acc + bias_ref[...]

    if activation == "relu":
        acc = jnp.maximum(acc, 0.0)
    elif activation == "gelu":
        # TODO(synk): tanh-approx GELU (EUP-friendly); exact erf GELU of timm's ViT differs by <1e-3.
        c = jnp.float32(0.7978845608028654)
        acc = 0.5 * acc * (1.0 + jnp.tanh(c * (acc + 0.044715 * (acc * acc * acc))))
    elif activation == "sigmoid":
        e = jnp.exp(-jnp.abs(acc))               # numerically stable sigmoid
        acc = jnp.where(acc >= 0.0, 1.0 / (1.0 + e), e / (1.0 + e))

    if has_res:                                  # fused residual add (f32)
        acc = acc + r_ref[...].astype(jnp.float32)
    o_ref[...] = acc.astype(o_ref.dtype)


def fused_matmul(a, w, bias=None, *, ln=None, residual=None, activation="none",
                 out_dtype=jnp.bfloat16, tm=256, eps=1e-6):
    """[M, K] @ [K, N] (+bias) with optional fused pre-LN, activation, residual.

    bf16 MXU operands, f32 accumulation, bf16 (default) HBM output; N is tiled on a
    second grid axis so per-step VMEM stays small and there are >= 2 steps for megacore.
    """
    M, K = a.shape
    N = w.shape[1]
    if bias is None:
        bias = jnp.zeros((N,), jnp.float32)

    # Pad rows only to a multiple of 8 (sublane alignment), not to the row tile.
    Mp = _round_up(M, 8)
    if Mp != M:
        a = jnp.pad(a, ((0, Mp - M), (0, 0)))
        if residual is not None:
            residual = jnp.pad(residual, ((0, Mp - M), (0, 0)))

    tn = _pick_tn(N)
    nt = pl.cdiv(N, tn)
    tm_eff = min(_round_up(tm, 8), Mp)
    mt = pl.cdiv(Mp, tm_eff)
    if mt == 1 and nt == 1 and Mp >= 16:
        # guarantee >= 2 grid steps so both v7x TensorCores get work + pipelining kicks in
        tm_eff = _round_up((Mp + 1) // 2, 8)
        mt = pl.cdiv(Mp, tm_eff)
    grid = (mt, nt)

    has_ln = ln is not None
    has_res = residual is not None

    in_specs = [pl.BlockSpec((tm_eff, K), lambda i, j: (i, 0))]
    args = [a]
    if has_ln:
        g, b = ln
        in_specs += [pl.BlockSpec((1, K), lambda i, j: (0, 0)),
                     pl.BlockSpec((1, K), lambda i, j: (0, 0))]
        args += [g.reshape(1, K).astype(jnp.float32),
                 b.reshape(1, K).astype(jnp.float32)]
    in_specs += [pl.BlockSpec((K, tn), lambda i, j: (0, j)),
                 pl.BlockSpec((1, tn), lambda i, j: (0, j))]
    args += [w, bias.reshape(1, N).astype(jnp.float32)]
    if has_res:
        in_specs += [pl.BlockSpec((tm_eff, tn), lambda i, j: (i, j))]
        args += [residual]

    out = pl.pallas_call(
        functools.partial(_fused_matmul_kernel, activation=activation,
                          has_ln=has_ln, has_res=has_res, eps=eps),
        out_shape=jax.ShapeDtypeStruct((Mp, N), out_dtype),
        grid=grid,
        in_specs=in_specs,
        out_specs=pl.BlockSpec((tm_eff, tn), lambda i, j: (i, j)),
        compiler_params=pltpu.CompilerParams(
            dimension_semantics=("parallel", "parallel"),
            vmem_limit_bytes=_VMEM_LIMIT),
    )(*args)
    return out[:M] if Mp != M else out


# ----------------------------------------------------------------------------- attention kernel
def _attn_kernel(q_ref, k_ref, v_ref, o_ref, *, heads_per_block, dh):
    # q/k/v refs: [1, S, G*dh] slabs read straight out of the fused QKV output.
    q = q_ref[0]
    k = k_ref[0]
    v = v_ref[0]
    outs = []
    for h in range(heads_per_block):                       # small static unroll (G heads)
        sl = slice(h * dh, (h + 1) * dh)
        qh = q[:, sl].astype(jnp.bfloat16)
        kh = k[:, sl].astype(jnp.bfloat16)
        vh = v[:, sl].astype(jnp.bfloat16)
        s = jnp.einsum('qd,kd->qk', qh, kh, preferred_element_type=jnp.float32)
        m = jnp.max(s, axis=-1, keepdims=True)
        p = jnp.exp(s - m)
        p = p * pl.reciprocal(jnp.sum(p, axis=-1, keepdims=True), approx=True)
        outs.append(jnp.dot(p.astype(jnp.bfloat16), vh,
                            preferred_element_type=jnp.float32))
    o_ref[0] = jnp.concatenate(outs, axis=-1).astype(o_ref.dtype)   # lane-dense store


def attention_from_qkv(qkv, B, S, heads, dh):
    """qkv: [B, S, 3*heads*dh] (softmax scale already folded into Q weights) -> [B, S, heads*dh].

    Q/K/V blocks are addressed directly via index maps over the 3*heads*dh axis, so the
    XLA reshape(B,S,3,heads,dh)/transpose round trips are gone and all loads/stores use
    lane-dense [S, G*dh] slabs with (G*dh) % 128 == 0.
    """
    D = heads * dh
    G = None
    for g in range(1, heads + 1):
        if heads % g == 0 and (g * dh) % 128 == 0:
            G = g
            break
    if G is None:
        # TODO(synk): lane-dense grouping needs (G*dh) % 128 == 0 for some divisor of heads;
        # fall back to plain XLA attention for exotic head dims.
        qkv_r = qkv.reshape(B, S, 3, heads, dh)
        q, k, v = qkv_r[:, :, 0], qkv_r[:, :, 1], qkv_r[:, :, 2]
        s = jnp.einsum('bqhd,bkhd->bhqk', q, k).astype(jnp.float32)
        p = jax.nn.softmax(s, axis=-1)
        o = jnp.einsum('bhqk,bkhd->bqhd', p.astype(qkv.dtype), v)
        return o.reshape(B, S, D).astype(jnp.bfloat16)

    ng = heads // G
    gdh = G * dh
    return pl.pallas_call(
        functools.partial(_attn_kernel, heads_per_block=G, dh=dh),
        out_shape=jax.ShapeDtypeStruct((B, S, D), jnp.bfloat16),
        grid=(B, ng),
        in_specs=[
            pl.BlockSpec((1, S, gdh), lambda b, g: (b, 0, g)),            # Q slab
            pl.BlockSpec((1, S, gdh), lambda b, g: (b, 0, ng + g)),       # K slab
            pl.BlockSpec((1, S, gdh), lambda b, g: (b, 0, 2 * ng + g)),   # V slab
        ],
        out_specs=pl.BlockSpec((1, S, gdh), lambda b, g: (b, 0, g)),
        compiler_params=pltpu.CompilerParams(
            dimension_semantics=("parallel", "parallel"),
            vmem_limit_bytes=_VMEM_LIMIT),
    )(qkv, qkv, qkv)


# ----------------------------------------------------------------------------- in-kernel 3x3 conv
def _conv3x3_kernel(x_ref, w_ref, b_ref, o_ref, *, activation):
    # x_ref: [1, H+2, W+2, C] (halo'd), w_ref: [9*C, N] bf16 (tap-major), o_ref: [1, H, W, N]
    H, W, N = o_ref.shape[1], o_ref.shape[2], o_ref.shape[3]
    C = x_ref.shape[3]
    x = x_ref[0].astype(w_ref.dtype)
    # Single K = 9*C matmul (better MXU contraction occupancy than nine K=C matmuls).
    patch = jnp.concatenate(
        [x[kh:kh + H, kw:kw + W, :].reshape(H * W, C)
         for kh in range(3) for kw in range(3)], axis=-1)          # [H*W, 9*C]
    acc = jnp.dot(patch, w_ref[...], preferred_element_type=jnp.float32)
    acc = acc + b_ref[...]
    if activation == "relu":
        acc = jnp.maximum(acc, 0.0)
    o_ref[0] = acc.reshape(H, W, N).astype(o_ref.dtype)


def conv3x3(x, w, bias, act="none"):
    """x: [B, H, W, C]; w: [9*C, N] tap-major; 'same' padding; bf16 output."""
    B, H, W, C = x.shape
    N = w.shape[1]
    xp = jnp.pad(x, ((0, 0), (1, 1), (1, 1), (0, 0)))   # 1-pixel zero halo
    # TODO(synk): row-band spatial tiling (overlapping halo) + lane-padded tiny channels
    # for large decoder resolutions under v7x's 64 MiB VMEM; whole-image blocks are fine
    # at these test sizes.
    return pl.pallas_call(
        functools.partial(_conv3x3_kernel, activation=act),
        out_shape=jax.ShapeDtypeStruct((B, H, W, N), jnp.bfloat16),
        grid=(B,),
        in_specs=[
            pl.BlockSpec((1, H + 2, W + 2, C), lambda b: (b, 0, 0, 0)),
            pl.BlockSpec((9 * C, N), lambda b: (0, 0)),
            pl.BlockSpec((1, N), lambda b: (0, 0)),
        ],
        out_specs=pl.BlockSpec((1, H, W, N), lambda b: (b, 0, 0, 0)),
        compiler_params=pltpu.CompilerParams(
            dimension_semantics=("parallel",),
            vmem_limit_bytes=_VMEM_LIMIT),
    )(xp, w, bias.reshape(1, N).astype(jnp.float32))


# ----------------------------------------------------------------------------- 1x1 / transposed conv
def conv1x1(x, w_mat, bias, act="none", out_dtype=jnp.bfloat16):
    B, H, W, C = x.shape
    out = fused_matmul(x.reshape(B * H * W, C), w_mat, bias, activation=act,
                       out_dtype=out_dtype)
    return out.reshape(B, H, W, -1)


def conv_transpose2x2(x, w_mat, bias4):
    """ConvTranspose2d(k=2, s=2): per-pixel matmul with lane-dense (4*cout) output;
    the 2x2 pixel shuffle is a cheap bf16 reshape/transpose outside the kernel."""
    B, H, W, C = x.shape
    cout = w_mat.shape[1] // 4
    out = fused_matmul(x.reshape(B * H * W, C), w_mat, bias4)          # bf16 output
    # TODO(synk): fuse the 2x2 scatter into the kernel's out index_map to drop this HBM pass.
    out = out.reshape(B, H, W, 2, 2, cout).transpose(0, 1, 3, 2, 4, 5)
    return out.reshape(B, 2 * H, 2 * W, cout)


# ----------------------------------------------------------------------------- bilinear resize + sigmoid
def _bilinear_matrix(out_size, in_size):
    # PyTorch F.interpolate(mode='bilinear', align_corners=False) semantics.
    m = np.zeros((out_size, in_size), np.float32)
    scale = in_size / out_size
    for o in range(out_size):
        src = max((o + 0.5) * scale - 0.5, 0.0)
        i0 = int(np.floor(src))
        t = src - i0
        i0c = min(max(i0, 0), in_size - 1)
        i1c = min(max(i0 + 1, 0), in_size - 1)
        m[o, i0c] += 1.0 - t
        m[o, i1c] += t
    return jnp.asarray(m, dtype=jnp.bfloat16)


def upsample_bilinear_sigmoid(x, out_h, out_w):
    B, H, W, C = x.shape
    Wh = _bilinear_matrix(out_h, H)
    Ww = _bilinear_matrix(out_w, W)
    xr = x.transpose(1, 0, 2, 3).reshape(H, B * W * C)
    xr = fused_matmul(Wh, xr)                                          # rows (bf16)
    x2 = xr.reshape(out_h, B, W, C).transpose(1, 0, 2, 3)
    xc = x2.transpose(2, 0, 1, 3).reshape(W, B * out_h * C)
    xc = fused_matmul(Ww, xc, activation="sigmoid", out_dtype=jnp.float32)  # cols + fused sigmoid
    return xc.reshape(out_w, B, out_h, C).transpose(1, 2, 0, 3)


# ----------------------------------------------------------------------------- parameters
def init_params(key, cfg):
    keys = iter(jax.random.split(key, 256))
    bf16 = jnp.bfloat16

    def nrm(shape, std=0.02):
        return std * jax.random.normal(next(keys), shape, jnp.float32)

    C, p, D, heads = cfg["in_channels"], cfg["patch"], cfg["dim"], cfg["heads"]
    dh = D // heads
    scale = dh ** -0.5
    gh = cfg["img_size"] // p
    S = gh * gh + 1
    params = {}

    # --- ViT encoder ---
    w = nrm((D, C, p, p))                                     # patch-embed conv [D, C, p, p]
    params["patch_w"] = w.reshape(D, C * p * p).T.astype(bf16)
    params["patch_b"] = jnp.zeros((D,), jnp.float32)
    params["cls_token"] = nrm((1, 1, D))
    params["pos_embed"] = nrm((1, S, D))
    hid = cfg["mlp_ratio"] * D

    # softmax scale folded into the Q columns of the QKV projection (and its bias).
    qscale = jnp.concatenate([jnp.full((D,), scale, jnp.float32),
                              jnp.ones((2 * D,), jnp.float32)])
    blocks = []
    for _ in range(cfg["depth"]):
        blocks.append({
            "ln1_g": jnp.ones((D,), jnp.float32), "ln1_b": jnp.zeros((D,), jnp.float32),
            "qkv_w": (nrm((3 * D, D)).T * qscale).astype(bf16),
            "qkv_b": jnp.zeros((3 * D,), jnp.float32) * qscale,
            "proj_w": nrm((D, D)).T.astype(bf16),    "proj_b": jnp.zeros((D,), jnp.float32),
            "ln2_g": jnp.ones((D,), jnp.float32), "ln2_b": jnp.zeros((D,), jnp.float32),
            "fc1_w": nrm((hid, D)).T.astype(bf16),   "fc1_b": jnp.zeros((hid,), jnp.float32),
            "fc2_w": nrm((D, hid)).T.astype(bf16),   "fc2_b": jnp.zeros((D,), jnp.float32),
        })
    params["blocks"] = blocks
    params["norm_g"] = jnp.ones((D,), jnp.float32)
    params["norm_b"] = jnp.zeros((D,), jnp.float32)

    # --- CNN decoder (widths scaled down from 512/1024/256/128/64) ---
    c_head, c_bn, c3, c2, c1 = cfg["c_head"], cfg["c_bn"], cfg["c3"], cfg["c2"], cfg["c1"]

    def conv1x1_w(cin, cout):   # PyTorch [cout, cin, 1, 1] -> [cin, cout]
        return nrm((cout, cin, 1, 1)).reshape(cout, cin).T.astype(bf16)

    def conv3x3_w(cin, cout):   # PyTorch [cout, cin, 3, 3] -> [9*cin, cout], taps (kh, kw) major
        return jnp.transpose(nrm((cout, cin, 3, 3)), (2, 3, 1, 0)).reshape(9 * cin, cout).astype(bf16)

    def convT_w(cin, cout):     # PyTorch [cin, cout, 2, 2] -> [cin, 4*cout], cols (kh, kw, cout)
        return jnp.transpose(nrm((cin, cout, 2, 2)), (0, 2, 3, 1)).reshape(cin, 4 * cout).astype(bf16)

    params["conv_head_w"] = conv1x1_w(D, c_head); params["conv_head_b"] = jnp.zeros((c_head,), jnp.float32)
    params["bn1_w"] = conv3x3_w(c_head, c_bn);    params["bn1_b"] = jnp.zeros((c_bn,), jnp.float32)
    params["bn2_w"] = conv3x3_w(c_bn, c_head);    params["bn2_b"] = jnp.zeros((c_head,), jnp.float32)
    params["up3_w"] = convT_w(c_head, c3);        params["up3_b"] = jnp.zeros((4 * c3,), jnp.float32)
    params["dec3_w"] = conv3x3_w(c3, c3);         params["dec3_b"] = jnp.zeros((c3,), jnp.float32)
    params["up2_w"] = convT_w(c3, c2);            params["up2_b"] = jnp.zeros((4 * c2,), jnp.float32)
    params["dec2_w"] = conv3x3_w(c2, c2);         params["dec2_b"] = jnp.zeros((c2,), jnp.float32)
    params["up1_w"] = convT_w(c2, c1);            params["up1_b"] = jnp.zeros((4 * c1,), jnp.float32)
    params["dec1_w"] = conv3x3_w(c1, c1);         params["dec1_b"] = jnp.zeros((c1,), jnp.float32)
    params["final_w"] = conv1x1_w(c1, cfg["out_channels"])
    params["final_b"] = jnp.zeros((cfg["out_channels"],), jnp.float32)
    return params


# ----------------------------------------------------------------------------- forward
def transunet_forward(x_nchw, params, cfg):
    B, C, H, W = x_nchw.shape
    p = cfg["patch"]
    gh, gw = H // p, W // p
    D, heads = cfg["dim"], cfg["heads"]
    dh = D // heads

    # ---- ViT patch embed: Conv2d(C, D, k=p, s=p) == per-patch matmul (bf16 shuffle) ----
    xb = x_nchw.astype(jnp.bfloat16)
    xp = xb.reshape(B, C, gh, p, gw, p).transpose(0, 2, 4, 1, 3, 5).reshape(B * gh * gw, C * p * p)
    tok = fused_matmul(xp, params["patch_w"], params["patch_b"],
                       out_dtype=jnp.float32).reshape(B, gh * gw, D)

    cls = jnp.broadcast_to(params["cls_token"], (B, 1, D))
    x = jnp.concatenate([cls, tok], axis=1) + params["pos_embed"]          # [B, S, D] f32 residual stream
    S = x.shape[1]
    M = B * S
    x2 = x.reshape(M, D)

    # ---- transformer blocks (LN / GELU / residual fused into the matmul kernels) ----
    for blk in params["blocks"]:
        qkv = fused_matmul(x2, blk["qkv_w"], blk["qkv_b"],
                           ln=(blk["ln1_g"], blk["ln1_b"]))                # LN1 + QKV (bf16)
        ao = attention_from_qkv(qkv.reshape(B, S, 3 * D), B, S, heads, dh) # bf16 [B, S, D]
        x2 = fused_matmul(ao.reshape(M, D), blk["proj_w"], blk["proj_b"],
                          residual=x2, out_dtype=jnp.float32)              # proj + residual (f32 stream)
        h = fused_matmul(x2, blk["fc1_w"], blk["fc1_b"],
                         ln=(blk["ln2_g"], blk["ln2_b"]), activation="gelu")  # LN2 + FC1 + GELU (bf16)
        x2 = fused_matmul(h, blk["fc2_w"], blk["fc2_b"],
                          residual=x2, out_dtype=jnp.float32)              # FC2 + residual (f32 stream)

    # drop cls token first (LN is row-wise), fuse final encoder norm into conv_head 1x1
    x_tok = x2.reshape(B, S, D)[:, 1:].reshape(B * gh * gw, D)
    feat = fused_matmul(x_tok, params["conv_head_w"], params["conv_head_b"],
                        ln=(params["norm_g"], params["norm_b"])).reshape(B, gh, gw, -1)

    # ---- CNN decoder ----
    feat = conv3x3(feat, params["bn1_w"], params["bn1_b"], act="relu")
    feat = conv3x3(feat, params["bn2_w"], params["bn2_b"], act="relu")

    d = conv_transpose2x2(feat, params["up3_w"], params["up3_b"])
    d = conv3x3(d, params["dec3_w"], params["dec3_b"], act="relu")
    d = conv_transpose2x2(d, params["up2_w"], params["up2_b"])
    d = conv3x3(d, params["dec2_w"], params["dec2_b"], act="relu")
    d = conv_transpose2x2(d, params["up1_w"], params["up1_b"])
    d = conv3x3(d, params["dec1_w"], params["dec1_b"], act="relu")

    out = conv1x1(d, params["final_w"], params["final_b"])                 # [B, Hc, Wc, out_ch] bf16
    out = upsample_bilinear_sigmoid(out, cfg["img_size"], cfg["img_size"]) # f32, sigmoid last
    return out.transpose(0, 3, 1, 2)                                       # back to NCHW


# ----------------------------------------------------------------------------- main
if __name__ == "__main__":
    # Scaled-down TransUNet config (original: img 224, patch 16, dim 768, 12 heads, 12 blocks,
    # decoder channels 512/1024/256/128/64).  head_dim=64 matches ViT-B so the lane-dense
    # attention grouping ((G*dh) % 128 == 0) is exercised exactly as for the real model,
    # and spatial ratios preserve the final bilinear 2x resize of the PyTorch forward.
    cfg = dict(
        img_size=32, patch=16, in_channels=3, out_channels=1,
        dim=128, depth=2, heads=2, mlp_ratio=4,
        c_head=64, c_bn=128, c3=32, c2=16, c1=8,
    )
    key = jax.random.PRNGKey(0)
    k_param, k_x = jax.random.split(key)
    params = init_params(k_param, cfg)
    x = jax.random.normal(k_x, (2, cfg["in_channels"], cfg["img_size"], cfg["img_size"]),
                          dtype=jnp.float32)

    fwd = jax.jit(functools.partial(transunet_forward, cfg=cfg))
    out = fwd(x, params)
    out = jax.block_until_ready(out)

    assert out.shape == (2, cfg["out_channels"], cfg["img_size"], cfg["img_size"]), out.shape
    assert bool(jnp.all(jnp.isfinite(out)))
    assert bool(jnp.all((out >= 0.0) & (out <= 1.0)))   # sigmoid output range
    print("KERNEL_OK")
</pallas_src>

<mosaic_0001>
module attributes {stable_mosaic.version = 11 : i64} {
  func.func @_fused_matmul_kernel(%arg0: i32, %arg1: i32, %arg2: memref<8x768xbf16, #tpu.memory_space<vmem>>, %arg3: memref<768x128xbf16, #tpu.memory_space<vmem>>, %arg4: memref<1x128xf32, #tpu.memory_space<vmem>>, %arg5: memref<8x128xf32, #tpu.memory_space<vmem>>) attributes {dimension_semantics = [#tpu.dimension_semantics<parallel>, #tpu.dimension_semantics<parallel>], iteration_bounds = array<i64: 1, 1>, scalar_prefetch = 0 : i64, scratch_operands = 0 : i64, tpu.core_type = #tpu.core_type<tc>, window_params = [{transform_indices = @transform_0, window_bounds = array<i64: 8, 768>}, {transform_indices = @transform_1, window_bounds = array<i64: 768, 128>}, {transform_indices = @transform_2, window_bounds = array<i64: 1, 128>}, {transform_indices = @transform_3, window_bounds = array<i64: 8, 128>}]} {
    %c0 = arith.constant 0 : index
    %c0_0 = arith.constant 0 : index
    %0 = vector.load %arg2[%c0, %c0_0] : memref<8x768xbf16, #tpu.memory_space<vmem>>, vector<8x768xbf16>
    %c0_1 = arith.constant 0 : index
    %c0_2 = arith.constant 0 : index
    %1 = vector.load %arg3[%c0_1, %c0_2] : memref<768x128xbf16, #tpu.memory_space<vmem>>, vector<768x128xbf16>
    %cst = arith.constant dense<0.000000e+00> : vector<8x128xf32>
    %2 = tpu.matmul %0, %1, %cst {dimension_numbers = #tpu.dot_dimension_numbers<[1], [0], [0], [1], [0, 0, 1, 1], [], []>} : vector<8x768xbf16>, vector<768x128xbf16>, vector<8x128xf32> -> vector<8x128xf32>
    %c0_3 = arith.constant 0 : index
    %c0_4 = arith.constant 0 : index
    %3 = vector.load %arg4[%c0_3, %c0_4] : memref<1x128xf32, #tpu.memory_space<vmem>>, vector<1x128xf32>
    %4 = vector.broadcast %3 : vector<1x128xf32> to vector<8x128xf32>
    %5 = arith.addf %2, %4 : vector<8x128xf32>
    %c0_5 = arith.constant 0 : index
    %c0_6 = arith.constant 0 : index
    %6 = vector.load %arg5[%c0_5, %c0_6] : memref<8x128xf32, #tpu.memory_space<vmem>>, vector<8x128xf32>
    tpu.vector_store %arg5[%c0_5, %c0_6], %5 {strides = array<i32>} : memref<8x128xf32, #tpu.memory_space<vmem>>, vector<8x128xf32>,
    return
  }
  func.func @transform_0(%arg0: i32, %arg1: i32) -> (i32, i32) {
    %c0_i32 = arith.constant 0 : i32
    %c0_i32_0 = arith.constant 0 : i32
    return %arg0, %c0_i32 : i32, i32
  }
  func.func @transform_1(%arg0: i32, %arg1: i32) -> (i32, i32) {
    %c0_i32 = arith.constant 0 : i32
    %c0_i32_0 = arith.constant 0 : i32
    return %c0_i32, %arg1 : i32, i32
  }
  func.func @transform_2(%arg0: i32, %arg1: i32) -> (i32, i32) {
    %c0_i32 = arith.constant 0 : i32
    %c0_i32_0 = arith.constant 0 : i32
    return %c0_i32, %arg1 : i32, i32
  }
  func.func @transform_3(%arg0: i32, %arg1: i32) -> (i32, i32) {
    %c0_i32 = arith.constant 0 : i32
    return %arg0, %arg1 : i32, i32
  }
}

module attributes {stable_mosaic.version = 11 : i64} {
  func.func @_fused_matmul_kernel(%arg0: i32, %arg1: i32, %arg2: memref<16x128xf32, #tpu.memory_space<vmem>>, %arg3: memref<1x128xf32, #tpu.memory_space<vmem>>, %arg4: memref<1x128xf32, #tpu.memory_space<vmem>>, %arg5: memref<128x128xbf16, #tpu.memory_space<vmem>>, %arg6: memref<1x128xf32, #tpu.memory_space<vmem>>, %arg7: memref<16x128xbf16, #tpu.memory_space<vmem>>) attributes {dimension_semantics = [#tpu.dimension_semantics<parallel>, #tpu.dimension_semantics<parallel>], iteration_bounds = array<i64: 1, 3>, scalar_prefetch = 0 : i64, scratch_operands = 0 : i64, tpu.core_type = #tpu.core_type<tc>, window_params = [{transform_indices = @transform_0, window_bounds = array<i64: 16, 128>}, {pipeline_mode = #tpu.pipeline_mode<synchronous>, transform_indices = @transform_1, window_bounds = array<i64: 1, 128>}, {pipeline_mode = #tpu.pipeline_mode<synchronous>, transform_indices = @transform_2, window_bounds = array<i64: 1, 128>}, {transform_indices = @transform_3, window_bounds = array<i64: 128, 128>}, {transform_indices = @transform_4, window_bounds = array<i64: 1, 128>}, {transform_indices = @transform_5, window_bounds = array<i64: 16, 128>}]} {
    %c0 = arith.constant 0 : index
    %c0_0 = arith.constant 0 : index
    %0 = vector.load %arg2[%c0, %c0_0] : memref<16x128xf32, #tpu.memory_space<vmem>>, vector<16x128xf32>
    %cst = arith.constant dense<0.000000e+00> : vector<16xf32>
    %1 = vector.multi_reduction <add>, %0, %cst [1] : vector<16x128xf32> to vector<16xf32>
    %2 = vector.shape_cast %1 : vector<16xf32> to vector<16x1xf32>
    %cst_1 = arith.constant 1.280000e+02 : f32
    %3 = vector.broadcast %cst_1 : f32 to vector<16x1xf32>
    %4 = arith.divf %2, %3 : vector<16x1xf32>
    %5 = vector.broadcast %4 : vector<16x1xf32> to vector<16x128xf32>
    %6 = arith.subf %0, %5 : vector<16x128xf32>
    %7 = arith.mulf %6, %6 : vector<16x128xf32>
    %cst_2 = arith.constant dense<0.000000e+00> : vector<16xf32>
    %8 = vector.multi_reduction <add>, %7, %cst_2 [1] : vector<16x128xf32> to vector<16xf32>
    %9 = vector.shape_cast %8 : vector<16xf32> to vector<16x1xf32>
    %cst_3 = arith.constant 1.280000e+02 : f32
    %10 = vector.broadcast %cst_3 : f32 to vector<16x1xf32>
    %11 = arith.divf %9, %10 : vector<16x1xf32>
    %12 = vector.broadcast %4 : vector<16x1xf32> to vector<16x128xf32>
    %13 = arith.subf %0, %12 : vector<16x128xf32>
    %cst_4 = arith.constant 9.99999997E-7 : f32
    %14 = vector.broadcast %cst_4 : f32 to vector<16x1xf32>
    %15 = arith.addf %11, %14 : vector<16x1xf32>
    %16 = math.rsqrt %15 : vector<16x1xf32>
    %17 = vector.broadcast %16 : vector<16x1xf32> to vector<16x128xf32>
    %18 = arith.mulf %13, %17 : vector<16x128xf32>
    %c0_5 = arith.constant 0 : index
    %c0_6 = arith.constant 0 : index
    %19 = vector.load %arg3[%c0_5, %c0_6] : memref<1x128xf32, #tpu.memory_space<vmem>>, vector<1x128xf32>
    %20 = vector.broadcast %19 : vector<1x128xf32> to vector<16x128xf32>
    %21 = arith.mulf %18, %20 : vector<16x128xf32>
    %c0_7 = arith.constant 0 : index
    %c0_8 = arith.constant 0 : index
    %22 = vector.load %arg4[%c0_7, %c0_8] : memref<1x128xf32, #tpu.memory_space<vmem>>, vector<1x128xf32>
    %23 = vector.broadcast %22 : vector<1x128xf32> to vector<16x128xf32>
    %24 = arith.addf %21, %23 : vector<16x128xf32>
    %25 = arith.truncf %24 : vector<16x128xf32> to vector<16x128xbf16>
    %c0_9 = arith.constant 0 : index
    %c0_10 = arith.constant 0 : index
    %26 = vector.load %arg5[%c0_9, %c0_10] : memref<128x128xbf16, #tpu.memory_space<vmem>>, vector<128x128xbf16>
    %cst_11 = arith.constant dense<0.000000e+00> : vector<16x128xf32>
    %27 = tpu.matmul %25, %26, %cst_11 {dimension_numbers = #tpu.dot_dimension_numbers<[1], [0], [0], [1], [0, 0, 1, 1], [], []>} : vector<16x128xbf16>, vector<128x128xbf16>, vector<16x128xf32> -> vector<16x128xf32>
    %c0_12 = arith.constant 0 : index
    %c0_13 = arith.constant 0 : index
    %28 = vector.load %arg6[%c0_12, %c0_13] : memref<1x128xf32, #tpu.memory_space<vmem>>, vector<1x128xf32>
    %29 = vector.broadcast %28 : vector<1x128xf32> to vector<16x128xf32>
    %30 = arith.addf %27, %29 : vector<16x128xf32>
    %31 = arith.truncf %30 : vector<16x128xf32> to vector<16x128xbf16>
    %c0_14 = arith.constant 0 : index
    %c0_15 = arith.constant 0 : index
    %32 = vector.load %arg7[%c0_14, %c0_15] : memref<16x128xbf16, #tpu.memory_space<vmem>>, vector<16x128xbf16>
    tpu.vector_store %arg7[%c0_14, %c0_15], %31 {strides = array<i32>} : memref<16x128xbf16, #tpu.memory_space<vmem>>, vector<16x128xbf16>,
    return
  }
  func.func @transform_0(%arg0: i32, %arg1: i32) -> (i32, i32) {
    %c0_i32 = arith.constant 0 : i32
    %c0_i32_0 = arith.constant 0 : i32
    return %arg0, %c0_i32 : i32, i32
  }
  func.func @transform_1(%arg0: i32, %arg1: i32) -> (i32, i32) {
    %c0_i32 = arith.constant 0 : i32
    %c0_i32_0 = arith.constant 0 : i32
    %c0_i32_1 = arith.constant 0 : i32
    return %c0_i32, %c0_i32_0 : i32, i32
  }
  func.func @transform_2(%arg0: i32, %arg1: i32) -> (i32, i32) {
    %c0_i32 = arith.constant 0 : i32
    %c0_i32_0 = arith.constant 0 : i32
    %c0_i32_1 = arith.constant 0 : i32
    return %c0_i32, %c0_i32_0 : i32, i32
  }
  func.func @transform_3(%arg0: i32, %arg1: i32) -> (i32, i32) {
    %c0_i32 = arith.constant 0 : i32
    %c0_i32_0 = arith.constant 0 : i32
    return %c0_i32, %arg1 : i32, i32
  }
  func.func @transform_4(%arg0: i32, %arg1: i32) -> (i32, i32) {
    %c0_i32 = arith.constant 0 : i32
    %c0_i32_0 = arith.constant 0 : i32
    return %c0_i32, %arg1 : i32, i32
  }
  func.func @transform_5(%arg0: i32, %arg1: i32) -> (i32, i32) {
    %c0_i32 = arith.constant 0 : i32
    return %arg0, %arg1 : i32, i32
  }
}

module attributes {stable_mosaic.version = 11 : i64} {
  func.func @_attn_kernel(%arg0: i32, %arg1: i32, %arg2: memref<1x5x128xbf16, #tpu.memory_space<vmem>>, %arg3: memref<1x5x128xbf16, #tpu.memory_space<vmem>>, %arg4: memref<1x5x128xbf16, #tpu.memory_space<vmem>>, %arg5: memref<1x5x128xbf16, #tpu.memory_space<vmem>>) attributes {dimension_semantics = [#tpu.dimension_semantics<parallel>, #tpu.dimension_semantics<parallel>], iteration_bounds = array<i64: 2, 1>, scalar_prefetch = 0 : i64, scratch_operands = 0 : i64, tpu.core_type = #tpu.core_type<tc>, window_params = [{transform_indices = @transform_0, window_bounds = array<i64: 1, 5, 128>}, {transform_indices = @transform_1, window_bounds = array<i64: 1, 5, 128>}, {transform_indices = @transform_2, window_bounds = array<i64: 1, 5, 128>}, {transform_indices = @transform_3, window_bounds = array<i64: 1, 5, 128>}]} {
    %c0 = arith.constant 0 : index
    %c0_0 = arith.constant 0 : index
    %c0_1 = arith.constant 0 : index
    %0 = vector.load %arg2[%c0, %c0_0, %c0_1] : memref<1x5x128xbf16, #tpu.memory_space<vmem>>, vector<1x5x128xbf16>
    %1 = vector.shape_cast %0 : vector<1x5x128xbf16> to vector<5x128xbf16>
    %c0_2 = arith.constant 0 : index
    %c0_3 = arith.constant 0 : index
    %c0_4 = arith.constant 0 : index
    %2 = vector.load %arg3[%c0_2, %c0_3, %c0_4] : memref<1x5x128xbf16, #tpu.memory_space<vmem>>, vector<1x5x128xbf16>
    %3 = vector.shape_cast %2 : vector<1x5x128xbf16> to vector<5x128xbf16>
    %c0_5 = arith.constant 0 : index
    %c0_6 = arith.constant 0 : index
    %c0_7 = arith.constant 0 : index
    %4 = vector.load %arg4[%c0_5, %c0_6, %c0_7] : memref<1x5x128xbf16, #tpu.memory_space<vmem>>, vector<1x5x128xbf16>
    %5 = vector.shape_cast %4 : vector<1x5x128xbf16> to vector<5x128xbf16>
    %6 = vector.extract_strided_slice %1 {offsets = [0, 0], sizes = [5, 64], strides = [1, 1]} : vector<5x128xbf16> to vector<5x64xbf16>
    %7 = vector.extract_strided_slice %3 {offsets = [0, 0], sizes = [5, 64], strides = [1, 1]} : vector<5x128xbf16> to vector<5x64xbf16>
    %8 = vector.extract_strided_slice %5 {offsets = [0, 0], sizes = [5, 64], strides = [1, 1]} : vector<5x128xbf16> to vector<5x64xbf16>
    "tpu.trace_start"() <{level = 10 : i32, message = "qd,kd->qk"}> : () -> ()
    %cst = arith.constant dense<0.000000e+00> : vector<5x5xf32>
    %9 = tpu.matmul %6, %7, %cst {dimension_numbers = #tpu.dot_dimension_numbers<[1], [1], [0], [0], [0, 0, 1, 0], [], []>} : vector<5x64xbf16>, vector<5x64xbf16>, vector<5x5xf32> -> vector<5x5xf32>
    "tpu.trace_stop"() : () -> ()
    %cst_8 = arith.constant dense<0xFF800000> : vector<5xf32>
    %10 = vector.multi_reduction <maximumf>, %9, %cst_8 [1] : vector<5x5xf32> to vector<5xf32>
    %11 = vector.shape_cast %10 : vector<5xf32> to vector<5x1xf32>
    %12 = vector.broadcast %11 : vector<5x1xf32> to vector<5x5xf32>
    %13 = arith.subf %9, %12 : vector<5x5xf32>
    %14 = math.exp %13 : vector<5x5xf32>
    %cst_9 = arith.constant dense<0.000000e+00> : vector<5xf32>
    %15 = vector.multi_reduction <add>, %14, %cst_9 [1] : vector<5x5xf32> to vector<5xf32>
    %16 = vector.shape_cast %15 : vector<5xf32> to vector<5x1xf32>
    %17 = tpu.reciprocal %16 {approx = true} : vector<5x1xf32> -> vector<5x1xf32>
    %18 = vector.broadcast %17 : vector<5x1xf32> to vector<5x5xf32>
    %19 = arith.mulf %14, %18 : vector<5x5xf32>
    %20 = arith.truncf %19 : vector<5x5xf32> to vector<5x5xbf16>
    %cst_10 = arith.constant dense<0.000000e+00> : vector<5x64xf32>
    %21 = tpu.matmul %20, %8, %cst_10 {dimension_numbers = #tpu.dot_dimension_numbers<[1], [0], [0], [1], [0, 0, 1, 1], [], []>} : vector<5x5xbf16>, vector<5x64xbf16>, vector<5x64xf32> -> vector<5x64xf32>
    %22 = vector.extract_strided_slice %1 {offsets = [0, 64], sizes = [5, 64], strides = [1, 1]} : vector<5x128xbf16> to vector<5x64xbf16>
    %23 = vector.extract_strided_slice %3 {offsets = [0, 64], sizes = [5, 64], strides = [1, 1]} : vector<5x128xbf16> to vector<5x64xbf16>
    %24 = vector.extract_strided_slice %5 {offsets = [0, 64], sizes = [5, 64], strides = [1, 1]} : vector<5x128xbf16> to vector<5x64xbf16>
    "tpu.trace_start"() <{level = 10 : i32, message = "qd,kd->qk"}> : () -> ()
    %cst_11 = arith.constant dense<0.000000e+00> : vector<5x5xf32>
    %25 = tpu.matmul %22, %23, %cst_11 {dimension_numbers = #tpu.dot_dimension_numbers<[1], [1], [0], [0], [0, 0, 1, 0], [], []>} : vector<5x64xbf16>, vector<5x64xbf16>, vector<5x5xf32> -> vector<5x5xf32>
    "tpu.trace_stop"() : () -> ()
    %cst_12 = arith.constant dense<0xFF800000> : vector<5xf32>
    %26 = vector.multi_reduction <maximumf>, %25, %cst_12 [1] : vector<5x5xf32> to vector<5xf32>
    %27 = vector.shape_cast %26 : vector<5xf32> to vector<5x1xf32>
    %28 = vector.broadcast %27 : vector<5x1xf32> to vector<5x5xf32>
    %29 = arith.subf %25, %28 : vector<5x5xf32>
    %30 = math.exp %29 : vector<5x5xf32>
    %cst_13 = arith.constant dense<0.000000e+00> : vector<5xf32>
    %31 = vector.multi_reduction <add>, %30, %cst_13 [1] : vector<5x5xf32> to vector<5xf32>
    %32 = vector.shape_cast %31 : vector<5xf32> to vector<5x1xf32>
    %33 = tpu.reciprocal %32 {approx = true} : vector<5x1xf32> -> vector<5x1xf32>
    %34 = vector.broadcast %33 : vector<5x1xf32> to vector<5x5xf32>
    %35 = arith.mulf %30, %34 : vector<5x5xf32>
    %36 = arith.truncf %35 : vector<5x5xf32> to vector<5x5xbf16>
    %cst_14 = arith.constant dense<0.000000e+00> : vector<5x64xf32>
    %37 = tpu.matmul %36, %24, %cst_14 {dimension_numbers = #tpu.dot_dimension_numbers<[1], [0], [0], [1], [0, 0, 1, 1], [], []>} : vector<5x5xbf16>, vector<5x64xbf16>, vector<5x64xf32> -> vector<5x64xf32>
    %38 = tpu.concatenate %21, %37 in 1 : vector<5x64xf32>, vector<5x64xf32> -> vector<5x128xf32>
    %39 = arith.truncf %38 : vector<5x128xf32> to vector<5x128xbf16>
    %c0_15 = arith.constant 0 : index
    %c0_16 = arith.constant 0 : index
    %c0_17 = arith.constant 0 : index
    %40 = vector.load %arg5[%c0_15, %c0_16, %c0_17] : memref<1x5x128xbf16, #tpu.memory_space<vmem>>, vector<1x5x128xbf16>
    %41 = vector.shape_cast %40 : vector<1x5x128xbf16> to vector<5x128xbf16>
    %42 = vector.shape_cast %39 : vector<5x128xbf16> to vector<1x5x128xbf16>
    tpu.vector_store %arg5[%c0_15, %c0_16, %c0_17], %42 {strides = array<i32>} : memref<1x5x128xbf16, #tpu.memory_space<vmem>>, vector<1x5x128xbf16>,
    return
  }
  func.func @transform_0(%arg0: i32, %arg1: i32) -> (i32, i32, i32) {
    %c0_i32 = arith.constant 0 : i32
    %c0_i32_0 = arith.constant 0 : i32
    return %arg0, %c0_i32, %arg1 : i32, i32, i32
  }
  func.func @transform_1(%arg0: i32, %arg1: i32) -> (i32, i32, i32) {
    %c1_i32 = arith.constant 1 : i32
    %0 = arith.addi %c1_i32, %arg1 : i32
    %c0_i32 = arith.constant 0 : i32
    %c0_i32_0 = arith.constant 0 : i32
    return %arg0, %c0_i32, %0 : i32, i32, i32
  }
  func.func @transform_2(%arg0: i32, %arg1: i32) -> (i32, i32, i32) {
    %c2_i32 = arith.constant 2 : i32
    %0 = arith.addi %c2_i32, %arg1 : i32
    %c0_i32 = arith.constant 0 : i32
    %c0_i32_0 = arith.constant 0 : i32
    return %arg0, %c0_i32, %0 : i32, i32, i32
  }
  func.func @transform_3(%arg0: i32, %arg1: i32) -> (i32, i32, i32) {
    %c0_i32 = arith.constant 0 : i32
    %c0_i32_0 = arith.constant 0 : i32
    return %arg0, %c0_i32, %arg1 : i32, i32, i32
  }
}

module attributes {stable_mosaic.version = 11 : i64} {
  func.func @_fused_matmul_kernel(%arg0: i32, %arg1: i32, %arg2: memref<8x128xbf16, #tpu.memory_space<vmem>>, %arg3: memref<128x128xbf16, #tpu.memory_space<vmem>>, %arg4: memref<1x128xf32, #tpu.memory_space<vmem>>, %arg5: memref<8x128xf32, #tpu.memory_space<vmem>>, %arg6: memref<8x128xf32, #tpu.memory_space<vmem>>) attributes {dimension_semantics = [#tpu.dimension_semantics<parallel>, #tpu.dimension_semantics<parallel>], iteration_bounds = array<i64: 2, 1>, scalar_prefetch = 0 : i64, scratch_operands = 0 : i64, tpu.core_type = #tpu.core_type<tc>, window_params = [{transform_indices = @transform_0, window_bounds = array<i64: 8, 128>}, {transform_indices = @transform_1, window_bounds = array<i64: 128, 128>}, {transform_indices = @transform_2, window_bounds = array<i64: 1, 128>}, {transform_indices = @transform_3, window_bounds = array<i64: 8, 128>}, {transform_indices = @transform_4, window_bounds = array<i64: 8, 128>}]} {
    %c0 = arith.constant 0 : index
    %c0_0 = arith.constant 0 : index
    %0 = vector.load %arg2[%c0, %c0_0] : memref<8x128xbf16, #tpu.memory_space<vmem>>, vector<8x128xbf16>
    %c0_1 = arith.constant 0 : index
    %c0_2 = arith.constant 0 : index
    %1 = vector.load %arg3[%c0_1, %c0_2] : memref<128x128xbf16, #tpu.memory_space<vmem>>, vector<128x128xbf16>
    %cst = arith.constant dense<0.000000e+00> : vector<8x128xf32>
    %2 = tpu.matmul %0, %1, %cst {dimension_numbers = #tpu.dot_dimension_numbers<[1], [0], [0], [1], [0, 0, 1, 1], [], []>} : vector<8x128xbf16>, vector<128x128xbf16>, vector<8x128xf32> -> vector<8x128xf32>
    %c0_3 = arith.constant 0 : index
    %c0_4 = arith.constant 0 : index
    %3 = vector.load %arg4[%c0_3, %c0_4] : memref<1x128xf32, #tpu.memory_space<vmem>>, vector<1x128xf32>
    %4 = vector.broadcast %3 : vector<1x128xf32> to vector<8x128xf32>
    %5 = arith.addf %2, %4 : vector<8x128xf32>
    %c0_5 = arith.constant 0 : index
    %c0_6 = arith.constant 0 : index
    %6 = vector.load %arg5[%c0_5, %c0_6] : memref<8x128xf32, #tpu.memory_space<vmem>>, vector<8x128xf32>
    %7 = arith.addf %5, %6 : vector<8x128xf32>
    %c0_7 = arith.constant 0 : index
    %c0_8 = arith.constant 0 : index
    %8 = vector.load %arg6[%c0_7, %c0_8] : memref<8x128xf32, #tpu.memory_space<vmem>>, vector<8x128xf32>
    tpu.vector_store %arg6[%c0_7, %c0_8], %7 {strides = array<i32>} : memref<8x128xf32, #tpu.memory_space<vmem>>, vector<8x128xf32>,
    return
  }
  func.func @transform_0(%arg0: i32, %arg1: i32) -> (i32, i32) {
    %c0_i32 = arith.constant 0 : i32
    %c0_i32_0 = arith.constant 0 : i32
    return %arg0, %c0_i32 : i32, i32
  }
  func.func @transform_1(%arg0: i32, %arg1: i32) -> (i32, i32) {
    %c0_i32 = arith.constant 0 : i32
    %c0_i32_0 = arith.constant 0 : i32
    return %c0_i32, %arg1 : i32, i32
  }
  func.func @transform_2(%arg0: i32, %arg1: i32) -> (i32, i32) {
    %c0_i32 = arith.constant 0 : i32
    %c0_i32_0 = arith.constant 0 : i32
    return %c0_i32, %arg1 : i32, i32
  }
  func.func @transform_3(%arg0: i32, %arg1: i32) -> (i32, i32) {
    %c0_i32 = arith.constant 0 : i32
    return %arg0, %arg1 : i32, i32
  }
  func.func @transform_4(%arg0: i32, %arg1: i32) -> (i32, i32) {
    %c0_i32 = arith.constant 0 : i32
    return %arg0, %arg1 : i32, i32
  }
}

module attributes {stable_mosaic.version = 11 : i64} {
  func.func @_fused_matmul_kernel(%arg0: i32, %arg1: i32, %arg2: memref<16x128xf32, #tpu.memory_space<vmem>>, %arg3: memref<1x128xf32, #tpu.memory_space<vmem>>, %arg4: memref<1x128xf32, #tpu.memory_space<vmem>>, %arg5: memref<128x256xbf16, #tpu.memory_space<vmem>>, %arg6: memref<1x256xf32, #tpu.memory_space<vmem>>, %arg7: memref<16x256xbf16, #tpu.memory_space<vmem>>) attributes {dimension_semantics = [#tpu.dimension_semantics<parallel>, #tpu.dimension_semantics<parallel>], iteration_bounds = array<i64: 1, 2>, scalar_prefetch = 0 : i64, scratch_operands = 0 : i64, tpu.core_type = #tpu.core_type<tc>, window_params = [{transform_indices = @transform_0, window_bounds = array<i64: 16, 128>}, {pipeline_mode = #tpu.pipeline_mode<synchronous>, transform_indices = @transform_1, window_bounds = array<i64: 1, 128>}, {pipeline_mode = #tpu.pipeline_mode<synchronous>, transform_indices = @transform_2, window_bounds = array<i64: 1, 128>}, {transform_indices = @transform_3, window_bounds = array<i64: 128, 256>}, {transform_indices = @transform_4, window_bounds = array<i64: 1, 256>}, {transform_indices = @transform_5, window_bounds = array<i64: 16, 256>}]} {
    %c0 = arith.constant 0 : index
    %c0_0 = arith.constant 0 : index
    %0 = vector.load %arg2[%c0, %c0_0] : memref<16x128xf32, #tpu.memory_space<vmem>>, vector<16x128xf32>
    %cst = arith.constant dense<0.000000e+00> : vector<16xf32>
    %1 = vector.multi_reduction <add>, %0, %cst [1] : vector<16x128xf32> to vector<16xf32>
    %2 = vector.shape_cast %1 : vector<16xf32> to vector<16x1xf32>
    %cst_1 = arith.constant 1.280000e+02 : f32
    %3 = vector.broadcast %cst_1 : f32 to vector<16x1xf32>
    %4 = arith.divf %2, %3 : vector<16x1xf32>
    %5 = vector.broadcast %4 : vector<16x1xf32> to vector<16x128xf32>
    %6 = arith.subf %0, %5 : vector<16x128xf32>
    %7 = arith.mulf %6, %6 : vector<16x128xf32>
    %cst_2 = arith.constant dense<0.000000e+00> : vector<16xf32>
    %8 = vector.multi_reduction <add>, %7, %cst_2 [1] : vector<16x128xf32> to vector<16xf32>
    %9 = vector.shape_cast %8 : vector<16xf32> to vector<16x1xf32>
    %cst_3 = arith.constant 1.280000e+02 : f32
    %10 = vector.broadcast %cst_3 : f32 to vector<16x1xf32>
    %11 = arith.divf %9, %10 : vector<16x1xf32>
    %12 = vector.broadcast %4 : vector<16x1xf32> to vector<16x128xf32>
    %13 = arith.subf %0, %12 : vector<16x128xf32>
    %cst_4 = arith.constant 9.99999997E-7 : f32
    %14 = vector.broadcast %cst_4 : f32 to vector<16x1xf32>
    %15 = arith.addf %11, %14 : vector<16x1xf32>
    %16 = math.rsqrt %15 : vector<16x1xf32>
    %17 = vector.broadcast %16 : vector<16x1xf32> to vector<16x128xf32>
    %18 = arith.mulf %13, %17 : vector<16x128xf32>
    %c0_5 = arith.constant 0 : index
    %c0_6 = arith.constant 0 : index
    %19 = vector.load %arg3[%c0_5, %c0_6] : memref<1x128xf32, #tpu.memory_space<vmem>>, vector<1x128xf32>
    %20 = vector.broadcast %19 : vector<1x128xf32> to vector<16x128xf32>
    %21 = arith.mulf %18, %20 : vector<16x128xf32>
    %c0_7 = arith.constant 0 : index
    %c0_8 = arith.constant 0 : index
    %22 = vector.load %arg4[%c0_7, %c0_8] : memref<1x128xf32, #tpu.memory_space<vmem>>, vector<1x128xf32>
    %23 = vector.broadcast %22 : vector<1x128xf32> to vector<16x128xf32>
    %24 = arith.addf %21, %23 : vector<16x128xf32>
    %25 = arith.truncf %24 : vector<16x128xf32> to vector<16x128xbf16>
    %c0_9 = arith.constant 0 : index
    %c0_10 = arith.constant 0 : index
    %26 = vector.load %arg5[%c0_9, %c0_10] : memref<128x256xbf16, #tpu.memory_space<vmem>>, vector<128x256xbf16>
    %cst_11 = arith.constant dense<0.000000e+00> : vector<16x256xf32>
    %27 = tpu.matmul %25, %26, %cst_11 {dimension_numbers = #tpu.dot_dimension_numbers<[1], [0], [0], [1], [0, 0, 1, 1], [], []>} : vector<16x128xbf16>, vector<128x256xbf16>, vector<16x256xf32> -> vector<16x256xf32>
    %c0_12 = arith.constant 0 : index
    %c0_13 = arith.constant 0 : index
    %28 = vector.load %arg6[%c0_12, %c0_13] : memref<1x256xf32, #tpu.memory_space<vmem>>, vector<1x256xf32>
    %29 = vector.broadcast %28 : vector<1x256xf32> to vector<16x256xf32>
    %30 = arith.addf %27, %29 : vector<16x256xf32>
    %cst_14 = arith.constant 5.000000e-01 : f32
    %31 = vector.broadcast %cst_14 : f32 to vector<16x256xf32>
    %32 = arith.mulf %31, %30 : vector<16x256xf32>
    %33 = arith.mulf %30, %30 : vector<16x256xf32>
    %34 = arith.mulf %33, %30 : vector<16x256xf32>
    %cst_15 = arith.constant 4.471500e-02 : f32
    %35 = vector.broadcast %cst_15 : f32 to vector<16x256xf32>
    %36 = arith.mulf %35, %34 : vector<16x256xf32>
    %37 = arith.addf %30, %36 : vector<16x256xf32>
    %cst_16 = arith.constant 0.797884583 : f32
    %38 = vector.broadcast %cst_16 : f32 to vector<16x256xf32>
    %39 = arith.mulf %38, %37 : vector<16x256xf32>
    %40 = math.tanh %39 : vector<16x256xf32>
    %cst_17 = arith.constant 1.000000e+00 : f32
    %41 = vector.broadcast %cst_17 : f32 to vector<16x256xf32>
    %42 = arith.addf %41, %40 : vector<16x256xf32>
    %43 = arith.mulf %32, %42 : vector<16x256xf32>
    %44 = arith.truncf %43 : vector<16x256xf32> to vector<16x256xbf16>
    %c0_18 = arith.constant 0 : index
    %c0_19 = arith.constant 0 : index
    %45 = vector.load %arg7[%c0_18, %c0_19] : memref<16x256xbf16, #tpu.memory_space<vmem>>, vector<16x256xbf16>
    tpu.vector_store %arg7[%c0_18, %c0_19], %44 {strides = array<i32>} : memref<16x256xbf16, #tpu.memory_space<vmem>>, vector<16x256xbf16>,
    return
  }
  func.func @transform_0(%arg0: i32, %arg1: i32) -> (i32, i32) {
    %c0_i32 = arith.constant 0 : i32
    %c0_i32_0 = arith.constant 0 : i32
    return %arg0, %c0_i32 : i32, i32
  }
  func.func @transform_1(%arg0: i32, %arg1: i32) -> (i32, i32) {
    %c0_i32 = arith.constant 0 : i32
    %c0_i32_0 = arith.constant 0 : i32
    %c0_i32_1 = arith.constant 0 : i32
    return %c0_i32, %c0_i32_0 : i32, i32
  }
  func.func @transform_2(%arg0: i32, %arg1: i32) -> (i32, i32) {
    %c0_i32 = arith.constant 0 : i32
    %c0_i32_0 = arith.constant 0 : i32
    %c0_i32_1 = arith.constant 0 : i32
    return %c0_i32, %c0_i32_0 : i32, i32
  }
  func.func @transform_3(%arg0: i32, %arg1: i32) -> (i32, i32) {
    %c0_i32 = arith.constant 0 : i32
    %c0_i32_0 = arith.constant 0 : i32
    return %c0_i32, %arg1 : i32, i32
  }
  func.func @transform_4(%arg0: i32, %arg1: i32) -> (i32, i32) {
    %c0_i32 = arith.constant 0 : i32
    %c0_i32_0 = arith.constant 0 : i32
    return %c0_i32, %arg1 : i32, i32
  }
  func.func @transform_5(%arg0: i32, %arg1: i32) -> (i32, i32) {
    %c0_i32 = arith.constant 0 : i32
    return %arg0, %arg1 : i32, i32
  }
}

module attributes {stable_mosaic.version = 11 : i64} {
  func.func @_fused_matmul_kernel(%arg0: i32, %arg1: i32, %arg2: memref<8x512xbf16, #tpu.memory_space<vmem>>, %arg3: memref<512x128xbf16, #tpu.memory_space<vmem>>, %arg4: memref<1x128xf32, #tpu.memory_space<vmem>>, %arg5: memref<8x128xf32, #tpu.memory_space<vmem>>, %arg6: memref<8x128xf32, #tpu.memory_space<vmem>>) attributes {dimension_semantics = [#tpu.dimension_semantics<parallel>, #tpu.dimension_semantics<parallel>], iteration_bounds = array<i64: 2, 1>, scalar_prefetch = 0 : i64, scratch_operands = 0 : i64, tpu.core_type = #tpu.core_type<tc>, window_params = [{transform_indices = @transform_0, window_bounds = array<i64: 8, 512>}, {transform_indices = @transform_1, window_bounds = array<i64: 512, 128>}, {transform_indices = @transform_2, window_bounds = array<i64: 1, 128>}, {transform_indices = @transform_3, window_bounds = array<i64: 8, 128>}, {transform_indices = @transform_4, window_bounds = array<i64: 8, 128>}]} {
    %c0 = arith.constant 0 : index
    %c0_0 = arith.constant 0 : index
    %0 = vector.load %arg2[%c0, %c0_0] : memref<8x512xbf16, #tpu.memory_space<vmem>>, vector<8x512xbf16>
    %c0_1 = arith.constant 0 : index
    %c0_2 = arith.constant 0 : index
    %1 = vector.load %arg3[%c0_1, %c0_2] : memref<512x128xbf16, #tpu.memory_space<vmem>>, vector<512x128xbf16>
    %cst = arith.constant dense<0.000000e+00> : vector<8x128xf32>
    %2 = tpu.matmul %0, %1, %cst {dimension_numbers = #tpu.dot_dimension_numbers<[1], [0], [0], [1], [0, 0, 1, 1], [], []>} : vector<8x512xbf16>, vector<512x128xbf16>, vector<8x128xf32> -> vector<8x128xf32>
    %c0_3 = arith.constant 0 : index
    %c0_4 = arith.constant 0 : index
    %3 = vector.load %arg4[%c0_3, %c0_4] : memref<1x128xf32, #tpu.memory_space<vmem>>, vector<1x128xf32>
    %4 = vector.broadcast %3 : vector<1x128xf32> to vector<8x128xf32>
    %5 = arith.addf %2, %4 : vector<8x128xf32>
    %c0_5 = arith.constant 0 : index
    %c0_6 = arith.constant 0 : index
    %6 = vector.load %arg5[%c0_5, %c0_6] : memref<8x128xf32, #tpu.memory_space<vmem>>, vector<8x128xf32>
    %7 = arith.addf %5, %6 : vector<8x128xf32>
    %c0_7 = arith.constant 0 : index
    %c0_8 = arith.constant 0 : index
    %8 = vector.load %arg6[%c0_7, %c0_8] : memref<8x128xf32, #tpu.memory_space<vmem>>, vector<8x128xf32>
    tpu.vector_store %arg6[%c0_7, %c0_8], %7 {strides = array<i32>} : memref<8x128xf32, #tpu.memory_space<vmem>>, vector<8x128xf32>,
    return
  }
  func.func @transform_0(%arg0: i32, %arg1: i32) -> (i32, i32) {
    %c0_i32 = arith.constant 0 : i32
    %c0_i32_0 = arith.constant 0 : i32
    return %arg0, %c0_i32 : i32, i32
  }
  func.func @transform_1(%arg0: i32, %arg1: i32) -> (i32, i32) {
    %c0_i32 = arith.constant 0 : i32
    %c0_i32_0 = arith.constant 0 : i32
    return %c0_i32, %arg1 : i32, i32
  }
  func.func @transform_2(%arg0: i32, %arg1: i32) -> (i32, i32) {
    %c0_i32 = arith.constant 0 : i32
    %c0_i32_0 = arith.constant 0 : i32
    return %c0_i32, %arg1 : i32, i32
  }
  func.func @transform_3(%arg0: i32, %arg1: i32) -> (i32, i32) {
    %c0_i32 = arith.constant 0 : i32
    return %arg0, %arg1 : i32, i32
  }
  func.func @transform_4(%arg0: i32, %arg1: i32) -> (i32, i32) {
    %c0_i32 = arith.constant 0 : i32
    return %arg0, %arg1 : i32, i32
  }
}

module attributes {stable_mosaic.version = 11 : i64} {
  func.func @_fused_matmul_kernel(%arg0: i32, %arg1: i32, %arg2: memref<8x128xf32, #tpu.memory_space<vmem>>, %arg3: memref<1x128xf32, #tpu.memory_space<vmem>>, %arg4: memref<1x128xf32, #tpu.memory_space<vmem>>, %arg5: memref<128x64xbf16, #tpu.memory_space<vmem>>, %arg6: memref<1x64xf32, #tpu.memory_space<vmem>>, %arg7: memref<8x64xbf16, #tpu.memory_space<vmem>>) attributes {dimension_semantics = [#tpu.dimension_semantics<parallel>, #tpu.dimension_semantics<parallel>], iteration_bounds = array<i64: 1, 1>, scalar_prefetch = 0 : i64, scratch_operands = 0 : i64, tpu.core_type = #tpu.core_type<tc>, window_params = [{transform_indices = @transform_0, window_bounds = array<i64: 8, 128>}, {pipeline_mode = #tpu.pipeline_mode<synchronous>, transform_indices = @transform_1, window_bounds = array<i64: 1, 128>}, {pipeline_mode = #tpu.pipeline_mode<synchronous>, transform_indices = @transform_2, window_bounds = array<i64: 1, 128>}, {transform_indices = @transform_3, window_bounds = array<i64: 128, 64>}, {transform_indices = @transform_4, window_bounds = array<i64: 1, 64>}, {transform_indices = @transform_5, window_bounds = array<i64: 8, 64>}]} {
    %c0 = arith.constant 0 : index
    %c0_0 = arith.constant 0 : index
    %0 = vector.load %arg2[%c0, %c0_0] : memref<8x128xf32, #tpu.memory_space<vmem>>, vector<8x128xf32>
    %cst = arith.constant dense<0.000000e+00> : vector<8xf32>
    %1 = vector.multi_reduction <add>, %0, %cst [1] : vector<8x128xf32> to vector<8xf32>
    %2 = vector.shape_cast %1 : vector<8xf32> to vector<8x1xf32>
    %cst_1 = arith.constant 1.280000e+02 : f32
    %3 = vector.broadcast %cst_1 : f32 to vector<8x1xf32>
    %4 = arith.divf %2, %3 : vector<8x1xf32>
    %5 = vector.broadcast %4 : vector<8x1xf32> to vector<8x128xf32>
    %6 = arith.subf %0, %5 : vector<8x128xf32>
    %7 = arith.mulf %6, %6 : vector<8x128xf32>
    %cst_2 = arith.constant dense<0.000000e+00> : vector<8xf32>
    %8 = vector.multi_reduction <add>, %7, %cst_2 [1] : vector<8x128xf32> to vector<8xf32>
    %9 = vector.shape_cast %8 : vector<8xf32> to vector<8x1xf32>
    %cst_3 = arith.constant 1.280000e+02 : f32
    %10 = vector.broadcast %cst_3 : f32 to vector<8x1xf32>
    %11 = arith.divf %9, %10 : vector<8x1xf32>
    %12 = vector.broadcast %4 : vector<8x1xf32> to vector<8x128xf32>
    %13 = arith.subf %0, %12 : vector<8x128xf32>
    %cst_4 = arith.constant 9.99999997E-7 : f32
    %14 = vector.broadcast %cst_4 : f32 to vector<8x1xf32>
    %15 = arith.addf %11, %14 : vector<8x1xf32>
    %16 = math.rsqrt %15 : vector<8x1xf32>
    %17 = vector.broadcast %16 : vector<8x1xf32> to vector<8x128xf32>
    %18 = arith.mulf %13, %17 : vector<8x128xf32>
    %c0_5 = arith.constant 0 : index
    %c0_6 = arith.constant 0 : index
    %19 = vector.load %arg3[%c0_5, %c0_6] : memref<1x128xf32, #tpu.memory_space<vmem>>, vector<1x128xf32>
    %20 = vector.broadcast %19 : vector<1x128xf32> to vector<8x128xf32>
    %21 = arith.mulf %18, %20 : vector<8x128xf32>
    %c0_7 = arith.constant 0 : index
    %c0_8 = arith.constant 0 : index
    %22 = vector.load %arg4[%c0_7, %c0_8] : memref<1x128xf32, #tpu.memory_space<vmem>>, vector<1x128xf32>
    %23 = vector.broadcast %22 : vector<1x128xf32> to vector<8x128xf32>
    %24 = arith.addf %21, %23 : vector<8x128xf32>
    %25 = arith.truncf %24 : vector<8x128xf32> to vector<8x128xbf16>
    %c0_9 = arith.constant 0 : index
    %c0_10 = arith.constant 0 : index
    %26 = vector.load %arg5[%c0_9, %c0_10] : memref<128x64xbf16, #tpu.memory_space<vmem>>, vector<128x64xbf16>
    %cst_11 = arith.constant dense<0.000000e+00> : vector<8x64xf32>
    %27 = tpu.matmul %25, %26, %cst_11 {dimension_numbers = #tpu.dot_dimension_numbers<[1], [0], [0], [1], [0, 0, 1, 1], [], []>} : vector<8x128xbf16>, vector<128x64xbf16>, vector<8x64xf32> -> vector<8x64xf32>
    %c0_12 = arith.constant 0 : index
    %c0_13 = arith.constant 0 : index
    %28 = vector.load %arg6[%c0_12, %c0_13] : memref<1x64xf32, #tpu.memory_space<vmem>>, vector<1x64xf32>
    %29 = vector.broadcast %28 : vector<1x64xf32> to vector<8x64xf32>
    %30 = arith.addf %27, %29 : vector<8x64xf32>
    %31 = arith.truncf %30 : vector<8x64xf32> to vector<8x64xbf16>
    %c0_14 = arith.constant 0 : index
    %c0_15 = arith.constant 0 : index
    %32 = vector.load %arg7[%c0_14, %c0_15] : memref<8x64xbf16, #tpu.memory_space<vmem>>, vector<8x64xbf16>
    tpu.vector_store %arg7[%c0_14, %c0_15], %31 {strides = array<i32>} : memref<8x64xbf16, #tpu.memory_space<vmem>>, vector<8x64xbf16>,
    return
  }
  func.func @transform_0(%arg0: i32, %arg1: i32) -> (i32, i32) {
    %c0_i32 = arith.constant 0 : i32
    %c0_i32_0 = arith.constant 0 : i32
    return %arg0, %c0_i32 : i32, i32
  }
  func.func @transform_1(%arg0: i32, %arg1: i32) -> (i32, i32) {
    %c0_i32 = arith.constant 0 : i32
    %c0_i32_0 = arith.constant 0 : i32
    %c0_i32_1 = arith.constant 0 : i32
    return %c0_i32, %c0_i32_0 : i32, i32
  }
  func.func @transform_2(%arg0: i32, %arg1: i32) -> (i32, i32) {
    %c0_i32 = arith.constant 0 : i32
    %c0_i32_0 = arith.constant 0 : i32
    %c0_i32_1 = arith.constant 0 : i32
    return %c0_i32, %c0_i32_0 : i32, i32
  }
  func.func @transform_3(%arg0: i32, %arg1: i32) -> (i32, i32) {
    %c0_i32 = arith.constant 0 : i32
    %c0_i32_0 = arith.constant 0 : i32
    return %c0_i32, %arg1 : i32, i32
  }
  func.func @transform_4(%arg0: i32, %arg1: i32) -> (i32, i32) {
    %c0_i32 = arith.constant 0 : i32
    %c0_i32_0 = arith.constant 0 : i32
    return %c0_i32, %arg1 : i32, i32
  }
  func.func @transform_5(%arg0: i32, %arg1: i32) -> (i32, i32) {
    %c0_i32 = arith.constant 0 : i32
    return %arg0, %arg1 : i32, i32
  }
}

module attributes {stable_mosaic.version = 11 : i64} {
  func.func @_conv3x3_kernel(%arg0: i32, %arg1: memref<1x4x4x64xbf16, #tpu.memory_space<vmem>>, %arg2: memref<576x128xbf16, #tpu.memory_space<vmem>>, %arg3: memref<1x128xf32, #tpu.memory_space<vmem>>, %arg4: memref<1x2x2x128xbf16, #tpu.memory_space<vmem>>) attributes {dimension_semantics = [#tpu.dimension_semantics<parallel>], iteration_bounds = array<i64: 2>, scalar_prefetch = 0 : i64, scratch_operands = 0 : i64, tpu.core_type = #tpu.core_type<tc>, window_params = [{transform_indices = @transform_0, window_bounds = array<i64: 1, 4, 4, 64>}, {pipeline_mode = #tpu.pipeline_mode<synchronous>, transform_indices = @transform_1, window_bounds = array<i64: 576, 128>}, {pipeline_mode = #tpu.pipeline_mode<synchronous>, transform_indices = @transform_2, window_bounds = array<i64: 1, 128>}, {transform_indices = @transform_3, window_bounds = array<i64: 1, 2, 2, 128>}]} {
    %c0 = arith.constant 0 : index
    %c0_0 = arith.constant 0 : index
    %c0_1 = arith.constant 0 : index
    %c0_2 = arith.constant 0 : index
    %0 = vector.load %arg1[%c0, %c0_0, %c0_1, %c0_2] : memref<1x4x4x64xbf16, #tpu.memory_space<vmem>>, vector<1x4x4x64xbf16>
    %1 = vector.shape_cast %0 : vector<1x4x4x64xbf16> to vector<4x4x64xbf16>
    %2 = vector.extract_strided_slice %1 {offsets = [0, 0, 0], sizes = [2, 2, 64], strides = [1, 1, 1]} : vector<4x4x64xbf16> to vector<2x2x64xbf16>
    %3 = vector.shape_cast %2 : vector<2x2x64xbf16> to vector<4x64xbf16>
    %4 = vector.extract_strided_slice %1 {offsets = [0, 1, 0], sizes = [2, 2, 64], strides = [1, 1, 1]} : vector<4x4x64xbf16> to vector<2x2x64xbf16>
    %5 = vector.shape_cast %4 : vector<2x2x64xbf16> to vector<4x64xbf16>
    %6 = vector.extract_strided_slice %1 {offsets = [0, 2, 0], sizes = [2, 2, 64], strides = [1, 1, 1]} : vector<4x4x64xbf16> to vector<2x2x64xbf16>
    %7 = vector.shape_cast %6 : vector<2x2x64xbf16> to vector<4x64xbf16>
    %8 = vector.extract_strided_slice %1 {offsets = [1, 0, 0], sizes = [2, 2, 64], strides = [1, 1, 1]} : vector<4x4x64xbf16> to vector<2x2x64xbf16>
    %9 = vector.shape_cast %8 : vector<2x2x64xbf16> to vector<4x64xbf16>
    %10 = vector.extract_strided_slice %1 {offsets = [1, 1, 0], sizes = [2, 2, 64], strides = [1, 1, 1]} : vector<4x4x64xbf16> to vector<2x2x64xbf16>
    %11 = vector.shape_cast %10 : vector<2x2x64xbf16> to vector<4x64xbf16>
    %12 = vector.extract_strided_slice %1 {offsets = [1, 2, 0], sizes = [2, 2, 64], strides = [1, 1, 1]} : vector<4x4x64xbf16> to vector<2x2x64xbf16>
    %13 = vector.shape_cast %12 : vector<2x2x64xbf16> to vector<4x64xbf16>
    %14 = vector.extract_strided_slice %1 {offsets = [2, 0, 0], sizes = [2, 2, 64], strides = [1, 1, 1]} : vector<4x4x64xbf16> to vector<2x2x64xbf16>
    %15 = vector.shape_cast %14 : vector<2x2x64xbf16> to vector<4x64xbf16>
    %16 = vector.extract_strided_slice %1 {offsets = [2, 1, 0], sizes = [2, 2, 64], strides = [1, 1, 1]} : vector<4x4x64xbf16> to vector<2x2x64xbf16>
    %17 = vector.shape_cast %16 : vector<2x2x64xbf16> to vector<4x64xbf16>
    %18 = vector.extract_strided_slice %1 {offsets = [2, 2, 0], sizes = [2, 2, 64], strides = [1, 1, 1]} : vector<4x4x64xbf16> to vector<2x2x64xbf16>
    %19 = vector.shape_cast %18 : vector<2x2x64xbf16> to vector<4x64xbf16>
    %20 = tpu.concatenate %3, %5, %7, %9, %11, %13, %15, %17, %19 in 1 : vector<4x64xbf16>, vector<4x64xbf16>, vector<4x64xbf16>, vector<4x64xbf16>, vector<4x64xbf16>, vector<4x64xbf16>, vector<4x64xbf16>, vector<4x64xbf16>, vector<4x64xbf16> -> vector<4x576xbf16>
    %c0_3 = arith.constant 0 : index
    %c0_4 = arith.constant 0 : index
    %21 = vector.load %arg2[%c0_3, %c0_4] : memref<576x128xbf16, #tpu.memory_space<vmem>>, vector<576x128xbf16>
    %cst = arith.constant dense<0.000000e+00> : vector<4x128xf32>
    %22 = tpu.matmul %20, %21, %cst {dimension_numbers = #tpu.dot_dimension_numbers<[1], [0], [0], [1], [0, 0, 1, 1], [], []>} : vector<4x576xbf16>, vector<576x128xbf16>, vector<4x128xf32> -> vector<4x128xf32>
    %c0_5 = arith.constant 0 : index
    %c0_6 = arith.constant 0 : index
    %23 = vector.load %arg3[%c0_5, %c0_6] : memref<1x128xf32, #tpu.memory_space<vmem>>, vector<1x128xf32>
    %24 = vector.broadcast %23 : vector<1x128xf32> to vector<4x128xf32>
    %25 = arith.addf %22, %24 : vector<4x128xf32>
    %cst_7 = arith.constant 0.000000e+00 : f32
    %26 = vector.broadcast %cst_7 : f32 to vector<4x128xf32>
    %27 = arith.maximumf %25, %26 : vector<4x128xf32>
    %28 = vector.shape_cast %27 : vector<4x128xf32> to vector<2x2x128xf32>
    %29 = arith.truncf %28 : vector<2x2x128xf32> to vector<2x2x128xbf16>
    %c0_8 = arith.constant 0 : index
    %c0_9 = arith.constant 0 : index
    %c0_10 = arith.constant 0 : index
    %c0_11 = arith.constant 0 : index
    %30 = vector.load %arg4[%c0_8, %c0_9, %c0_10, %c0_11] : memref<1x2x2x128xbf16, #tpu.memory_space<vmem>>, vector<1x2x2x128xbf16>
    %31 = vector.shape_cast %30 : vector<1x2x2x128xbf16> to vector<2x2x128xbf16>
    %32 = vector.shape_cast %29 : vector<2x2x128xbf16> to vector<1x2x2x128xbf16>
    tpu.vector_store %arg4[%c0_8, %c0_9, %c0_10, %c0_11], %32 {strides = array<i32>} : memref<1x2x2x128xbf16, #tpu.memory_space<vmem>>, vector<1x2x2x128xbf16>,
    return
  }
  func.func @transform_0(%arg0: i32) -> (i32, i32, i32, i32) {
    %c0_i32 = arith.constant 0 : i32
    %c0_i32_0 = arith.constant 0 : i32
    %c0_i32_1 = arith.constant 0 : i32
    %c0_i32_2 = arith.constant 0 : i32
    return %arg0, %c0_i32, %c0_i32_0, %c0_i32_1 : i32, i32, i32, i32
  }
  func.func @transform_1(%arg0: i32) -> (i32, i32) {
    %c0_i32 = arith.constant 0 : i32
    %c0_i32_0 = arith.constant 0 : i32
    %c0_i32_1 = arith.constant 0 : i32
    return %c0_i32, %c0_i32_0 : i32, i32
  }
  func.func @transform_2(%arg0: i32) -> (i32, i32) {
    %c0_i32 = arith.constant 0 : i32
    %c0_i32_0 = arith.constant 0 : i32
    %c0_i32_1 = arith.constant 0 : i32
    return %c0_i32, %c0_i32_0 : i32, i32
  }
  func.func @transform_3(%arg0: i32) -> (i32, i32, i32, i32) {
    %c0_i32 = arith.constant 0 : i32
    %c0_i32_0 = arith.constant 0 : i32
    %c0_i32_1 = arith.constant 0 : i32
    %c0_i32_2 = arith.constant 0 : i32
    return %arg0, %c0_i32, %c0_i32_0, %c0_i32_1 : i32, i32, i32, i32
  }
}

module attributes {stable_mosaic.version = 11 : i64} {
  func.func @_conv3x3_kernel(%arg0: i32, %arg1: memref<1x4x4x128xbf16, #tpu.memory_space<vmem>>, %arg2: memref<1152x64xbf16, #tpu.memory_space<vmem>>, %arg3: memref<1x64xf32, #tpu.memory_space<vmem>>, %arg4: memref<1x2x2x64xbf16, #tpu.memory_space<vmem>>) attributes {dimension_semantics = [#tpu.dimension_semantics<parallel>], iteration_bounds = array<i64: 2>, scalar_prefetch = 0 : i64, scratch_operands = 0 : i64, tpu.core_type = #tpu.core_type<tc>, window_params = [{transform_indices = @transform_0, window_bounds = array<i64: 1, 4, 4, 128>}, {pipeline_mode = #tpu.pipeline_mode<synchronous>, transform_indices = @transform_1, window_bounds = array<i64: 1152, 64>}, {pipeline_mode = #tpu.pipeline_mode<synchronous>, transform_indices = @transform_2, window_bounds = array<i64: 1, 64>}, {transform_indices = @transform_3, window_bounds = array<i64: 1, 2, 2, 64>}]} {
    %c0 = arith.constant 0 : index
    %c0_0 = arith.constant 0 : index
    %c0_1 = arith.constant 0 : index
    %c0_2 = arith.constant 0 : index
    %0 = vector.load %arg1[%c0, %c0_0, %c0_1, %c0_2] : memref<1x4x4x128xbf16, #tpu.memory_space<vmem>>, vector<1x4x4x128xbf16>
    %1 = vector.shape_cast %0 : vector<1x4x4x128xbf16> to vector<4x4x128xbf16>
    %2 = vector.extract_strided_slice %1 {offsets = [0, 0, 0], sizes = [2, 2, 128], strides = [1, 1, 1]} : vector<4x4x128xbf16> to vector<2x2x128xbf16>
    %3 = vector.shape_cast %2 : vector<2x2x128xbf16> to vector<4x128xbf16>
    %4 = vector.extract_strided_slice %1 {offsets = [0, 1, 0], sizes = [2, 2, 128], strides = [1, 1, 1]} : vector<4x4x128xbf16> to vector<2x2x128xbf16>
    %5 = vector.shape_cast %4 : vector<2x2x128xbf16> to vector<4x128xbf16>
    %6 = vector.extract_strided_slice %1 {offsets = [0, 2, 0], sizes = [2, 2, 128], strides = [1, 1, 1]} : vector<4x4x128xbf16> to vector<2x2x128xbf16>
    %7 = vector.shape_cast %6 : vector<2x2x128xbf16> to vector<4x128xbf16>
    %8 = vector.extract_strided_slice %1 {offsets = [1, 0, 0], sizes = [2, 2, 128], strides = [1, 1, 1]} : vector<4x4x128xbf16> to vector<2x2x128xbf16>
    %9 = vector.shape_cast %8 : vector<2x2x128xbf16> to vector<4x128xbf16>
    %10 = vector.extract_strided_slice %1 {offsets = [1, 1, 0], sizes = [2, 2, 128], strides = [1, 1, 1]} : vector<4x4x128xbf16> to vector<2x2x128xbf16>
    %11 = vector.shape_cast %10 : vector<2x2x128xbf16> to vector<4x128xbf16>
    %12 = vector.extract_strided_slice %1 {offsets = [1, 2, 0], sizes = [2, 2, 128], strides = [1, 1, 1]} : vector<4x4x128xbf16> to vector<2x2x128xbf16>
    %13 = vector.shape_cast %12 : vector<2x2x128xbf16> to vector<4x128xbf16>
    %14 = vector.extract_strided_slice %1 {offsets = [2, 0, 0], sizes = [2, 2, 128], strides = [1, 1, 1]} : vector<4x4x128xbf16> to vector<2x2x128xbf16>
    %15 = vector.shape_cast %14 : vector<2x2x128xbf16> to vector<4x128xbf16>
    %16 = vector.extract_strided_slice %1 {offsets = [2, 1, 0], sizes = [2, 2, 128], strides = [1, 1, 1]} : vector<4x4x128xbf16> to vector<2x2x128xbf16>
    %17 = vector.shape_cast %16 : vector<2x2x128xbf16> to vector<4x128xbf16>
    %18 = vector.extract_strided_slice %1 {offsets = [2, 2, 0], sizes = [2, 2, 128], strides = [1, 1, 1]} : vector<4x4x128xbf16> to vector<2x2x128xbf16>
    %19 = vector.shape_cast %18 : vector<2x2x128xbf16> to vector<4x128xbf16>
    %20 = tpu.concatenate %3, %5, %7, %9, %11, %13, %15, %17, %19 in 1 : vector<4x128xbf16>, vector<4x128xbf16>, vector<4x128xbf16>, vector<4x128xbf16>, vector<4x128xbf16>, vector<4x128xbf16>, vector<4x128xbf16>, vector<4x128xbf16>, vector<4x128xbf16> -> vector<4x1152xbf16>
    %c0_3 = arith.constant 0 : index
    %c0_4 = arith.constant 0 : index
    %21 = vector.load %arg2[%c0_3, %c0_4] : memref<1152x64xbf16, #tpu.memory_space<vmem>>, vector<1152x64xbf16>
    %cst = arith.constant dense<0.000000e+00> : vector<4x64xf32>
    %22 = tpu.matmul %20, %21, %cst {dimension_numbers = #tpu.dot_dimension_numbers<[1], [0], [0], [1], [0, 0, 1, 1], [], []>} : vector<4x1152xbf16>, vector<1152x64xbf16>, vector<4x64xf32> -> vector<4x64xf32>
    %c0_5 = arith.constant 0 : index
    %c0_6 = arith.constant 0 : index
    %23 = vector.load %arg3[%c0_5, %c0_6] : memref<1x64xf32, #tpu.memory_space<vmem>>, vector<1x64xf32>
    %24 = vector.broadcast %23 : vector<1x64xf32> to vector<4x64xf32>
    %25 = arith.addf %22, %24 : vector<4x64xf32>
    %cst_7 = arith.constant 0.000000e+00 : f32
    %26 = vector.broadcast %cst_7 : f32 to vector<4x64xf32>
    %27 = arith.maximumf %25, %26 : vector<4x64xf32>
    %28 = vector.shape_cast %27 : vector<4x64xf32> to vector<2x2x64xf32>
    %29 = arith.truncf %28 : vector<2x2x64xf32> to vector<2x2x64xbf16>
    %c0_8 = arith.constant 0 : index
    %c0_9 = arith.constant 0 : index
    %c0_10 = arith.constant 0 : index
    %c0_11 = arith.constant 0 : index
    %30 = vector.load %arg4[%c0_8, %c0_9, %c0_10, %c0_11] : memref<1x2x2x64xbf16, #tpu.memory_space<vmem>>, vector<1x2x2x64xbf16>
    %31 = vector.shape_cast %30 : vector<1x2x2x64xbf16> to vector<2x2x64xbf16>
    %32 = vector.shape_cast %29 : vector<2x2x64xbf16> to vector<1x2x2x64xbf16>
    tpu.vector_store %arg4[%c0_8, %c0_9, %c0_10, %c0_11], %32 {strides = array<i32>} : memref<1x2x2x64xbf16, #tpu.memory_space<vmem>>, vector<1x2x2x64xbf16>,
    return
  }
  func.func @transform_0(%arg0: i32) -> (i32, i32, i32, i32) {
    %c0_i32 = arith.constant 0 : i32
    %c0_i32_0 = arith.constant 0 : i32
    %c0_i32_1 = arith.constant 0 : i32
    %c0_i32_2 = arith.constant 0 : i32
    return %arg0, %c0_i32, %c0_i32_0, %c0_i32_1 : i32, i32, i32, i32
  }
  func.func @transform_1(%arg0: i32) -> (i32, i32) {
    %c0_i32 = arith.constant 0 : i32
    %c0_i32_0 = arith.constant 0 : i32
    %c0_i32_1 = arith.constant 0 : i32
    return %c0_i32, %c0_i32_0 : i32, i32
  }
  func.func @transform_2(%arg0: i32) -> (i32, i32) {
    %c0_i32 = arith.constant 0 : i32
    %c0_i32_0 = arith.constant 0 : i32
    %c0_i32_1 = arith.constant 0 : i32
    return %c0_i32, %c0_i32_0 : i32, i32
  }
  func.func @transform_3(%arg0: i32) -> (i32, i32, i32, i32) {
    %c0_i32 = arith.constant 0 : i32
    %c0_i32_0 = arith.constant 0 : i32
    %c0_i32_1 = arith.constant 0 : i32
    %c0_i32_2 = arith.constant 0 : i32
    return %arg0, %c0_i32, %c0_i32_0, %c0_i32_1 : i32, i32, i32, i32
  }
}

module attributes {stable_mosaic.version = 11 : i64} {
  func.func @_fused_matmul_kernel(%arg0: i32, %arg1: i32, %arg2: memref<8x64xbf16, #tpu.memory_space<vmem>>, %arg3: memref<64x128xbf16, #tpu.memory_space<vmem>>, %arg4: memref<1x128xf32, #tpu.memory_space<vmem>>, %arg5: memref<8x128xbf16, #tpu.memory_space<vmem>>) attributes {dimension_semantics = [#tpu.dimension_semantics<parallel>, #tpu.dimension_semantics<parallel>], iteration_bounds = array<i64: 1, 1>, scalar_prefetch = 0 : i64, scratch_operands = 0 : i64, tpu.core_type = #tpu.core_type<tc>, window_params = [{transform_indices = @transform_0, window_bounds = array<i64: 8, 64>}, {transform_indices = @transform_1, window_bounds = array<i64: 64, 128>}, {transform_indices = @transform_2, window_bounds = array<i64: 1, 128>}, {transform_indices = @transform_3, window_bounds = array<i64: 8, 128>}]} {
    %c0 = arith.constant 0 : index
    %c0_0 = arith.constant 0 : index
    %0 = vector.load %arg2[%c0, %c0_0] : memref<8x64xbf16, #tpu.memory_space<vmem>>, vector<8x64xbf16>
    %c0_1 = arith.constant 0 : index
    %c0_2 = arith.constant 0 : index
    %1 = vector.load %arg3[%c0_1, %c0_2] : memref<64x128xbf16, #tpu.memory_space<vmem>>, vector<64x128xbf16>
    %cst = arith.constant dense<0.000000e+00> : vector<8x128xf32>
    %2 = tpu.matmul %0, %1, %cst {dimension_numbers = #tpu.dot_dimension_numbers<[1], [0], [0], [1], [0, 0, 1, 1], [], []>} : vector<8x64xbf16>, vector<64x128xbf16>, vector<8x128xf32> -> vector<8x128xf32>
    %c0_3 = arith.constant 0 : index
    %c0_4 = arith.constant 0 : index
    %3 = vector.load %arg4[%c0_3, %c0_4] : memref<1x128xf32, #tpu.memory_space<vmem>>, vector<1x128xf32>
    %4 = vector.broadcast %3 : vector<1x128xf32> to vector<8x128xf32>
    %5 = arith.addf %2, %4 : vector<8x128xf32>
    %6 = arith.truncf %5 : vector<8x128xf32> to vector<8x128xbf16>
    %c0_5 = arith.constant 0 : index
    %c0_6 = arith.constant 0 : index
    %7 = vector.load %arg5[%c0_5, %c0_6] : memref<8x128xbf16, #tpu.memory_space<vmem>>, vector<8x128xbf16>
    tpu.vector_store %arg5[%c0_5, %c0_6], %6 {strides = array<i32>} : memref<8x128xbf16, #tpu.memory_space<vmem>>, vector<8x128xbf16>,
    return
  }
  func.func @transform_0(%arg0: i32, %arg1: i32) -> (i32, i32) {
    %c0_i32 = arith.constant 0 : i32
    %c0_i32_0 = arith.constant 0 : i32
    return %arg0, %c0_i32 : i32, i32
  }
  func.func @transform_1(%arg0: i32, %arg1: i32) -> (i32, i32) {
    %c0_i32 = arith.constant 0 : i32
    %c0_i32_0 = arith.constant 0 : i32
    return %c0_i32, %arg1 : i32, i32
  }
  func.func @transform_2(%arg0: i32, %arg1: i32) -> (i32, i32) {
    %c0_i32 = arith.constant 0 : i32
    %c0_i32_0 = arith.constant 0 : i32
    return %c0_i32, %arg1 : i32, i32
  }
  func.func @transform_3(%arg0: i32, %arg1: i32) -> (i32, i32) {
    %c0_i32 = arith.constant 0 : i32
    return %arg0, %arg1 : i32, i32
  }
}

module attributes {stable_mosaic.version = 11 : i64} {
  func.func @_conv3x3_kernel(%arg0: i32, %arg1: memref<1x6x6x32xbf16, #tpu.memory_space<vmem>>, %arg2: memref<288x32xbf16, #tpu.memory_space<vmem>>, %arg3: memref<1x32xf32, #tpu.memory_space<vmem>>, %arg4: memref<1x4x4x32xbf16, #tpu.memory_space<vmem>>) attributes {dimension_semantics = [#tpu.dimension_semantics<parallel>], iteration_bounds = array<i64: 2>, scalar_prefetch = 0 : i64, scratch_operands = 0 : i64, tpu.core_type = #tpu.core_type<tc>, window_params = [{transform_indices = @transform_0, window_bounds = array<i64: 1, 6, 6, 32>}, {pipeline_mode = #tpu.pipeline_mode<synchronous>, transform_indices = @transform_1, window_bounds = array<i64: 288, 32>}, {pipeline_mode = #tpu.pipeline_mode<synchronous>, transform_indices = @transform_2, window_bounds = array<i64: 1, 32>}, {transform_indices = @transform_3, window_bounds = array<i64: 1, 4, 4, 32>}]} {
    %c0 = arith.constant 0 : index
    %c0_0 = arith.constant 0 : index
    %c0_1 = arith.constant 0 : index
    %c0_2 = arith.constant 0 : index
    %0 = vector.load %arg1[%c0, %c0_0, %c0_1, %c0_2] : memref<1x6x6x32xbf16, #tpu.memory_space<vmem>>, vector<1x6x6x32xbf16>
    %1 = vector.shape_cast %0 : vector<1x6x6x32xbf16> to vector<6x6x32xbf16>
    %2 = vector.extract_strided_slice %1 {offsets = [0, 0, 0], sizes = [4, 4, 32], strides = [1, 1, 1]} : vector<6x6x32xbf16> to vector<4x4x32xbf16>
    %3 = vector.shape_cast %2 : vector<4x4x32xbf16> to vector<16x32xbf16>
    %4 = vector.extract_strided_slice %1 {offsets = [0, 1, 0], sizes = [4, 4, 32], strides = [1, 1, 1]} : vector<6x6x32xbf16> to vector<4x4x32xbf16>
    %5 = vector.shape_cast %4 : vector<4x4x32xbf16> to vector<16x32xbf16>
    %6 = vector.extract_strided_slice %1 {offsets = [0, 2, 0], sizes = [4, 4, 32], strides = [1, 1, 1]} : vector<6x6x32xbf16> to vector<4x4x32xbf16>
    %7 = vector.shape_cast %6 : vector<4x4x32xbf16> to vector<16x32xbf16>
    %8 = vector.extract_strided_slice %1 {offsets = [1, 0, 0], sizes = [4, 4, 32], strides = [1, 1, 1]} : vector<6x6x32xbf16> to vector<4x4x32xbf16>
    %9 = vector.shape_cast %8 : vector<4x4x32xbf16> to vector<16x32xbf16>
    %10 = vector.extract_strided_slice %1 {offsets = [1, 1, 0], sizes = [4, 4, 32], strides = [1, 1, 1]} : vector<6x6x32xbf16> to vector<4x4x32xbf16>
    %11 = vector.shape_cast %10 : vector<4x4x32xbf16> to vector<16x32xbf16>
    %12 = vector.extract_strided_slice %1 {offsets = [1, 2, 0], sizes = [4, 4, 32], strides = [1, 1, 1]} : vector<6x6x32xbf16> to vector<4x4x32xbf16>
    %13 = vector.shape_cast %12 : vector<4x4x32xbf16> to vector<16x32xbf16>
    %14 = vector.extract_strided_slice %1 {offsets = [2, 0, 0], sizes = [4, 4, 32], strides = [1, 1, 1]} : vector<6x6x32xbf16> to vector<4x4x32xbf16>
    %15 = vector.shape_cast %14 : vector<4x4x32xbf16> to vector<16x32xbf16>
    %16 = vector.extract_strided_slice %1 {offsets = [2, 1, 0], sizes = [4, 4, 32], strides = [1, 1, 1]} : vector<6x6x32xbf16> to vector<4x4x32xbf16>
    %17 = vector.shape_cast %16 : vector<4x4x32xbf16> to vector<16x32xbf16>
    %18 = vector.extract_strided_slice %1 {offsets = [2, 2, 0], sizes = [4, 4, 32], strides = [1, 1, 1]} : vector<6x6x32xbf16> to vector<4x4x32xbf16>
    %19 = vector.shape_cast %18 : vector<4x4x32xbf16> to vector<16x32xbf16>
    %20 = tpu.concatenate %3, %5, %7, %9, %11, %13, %15, %17, %19 in 1 : vector<16x32xbf16>, vector<16x32xbf16>, vector<16x32xbf16>, vector<16x32xbf16>, vector<16x32xbf16>, vector<16x32xbf16>, vector<16x32xbf16>, vector<16x32xbf16>, vector<16x32xbf16> -> vector<16x288xbf16>
    %c0_3 = arith.constant 0 : index
    %c0_4 = arith.constant 0 : index
    %21 = vector.load %arg2[%c0_3, %c0_4] : memref<288x32xbf16, #tpu.memory_space<vmem>>, vector<288x32xbf16>
    %cst = arith.constant dense<0.000000e+00> : vector<16x32xf32>
    %22 = tpu.matmul %20, %21, %cst {dimension_numbers = #tpu.dot_dimension_numbers<[1], [0], [0], [1], [0, 0, 1, 1], [], []>} : vector<16x288xbf16>, vector<288x32xbf16>, vector<16x32xf32> -> vector<16x32xf32>
    %c0_5 = arith.constant 0 : index
    %c0_6 = arith.constant 0 : index
    %23 = vector.load %arg3[%c0_5, %c0_6] : memref<1x32xf32, #tpu.memory_space<vmem>>, vector<1x32xf32>
    %24 = vector.broadcast %23 : vector<1x32xf32> to vector<16x32xf32>
    %25 = arith.addf %22, %24 : vector<16x32xf32>
    %cst_7 = arith.constant 0.000000e+00 : f32
    %26 = vector.broadcast %cst_7 : f32 to vector<16x32xf32>
    %27 = arith.maximumf %25, %26 : vector<16x32xf32>
    %28 = vector.shape_cast %27 : vector<16x32xf32> to vector<4x4x32xf32>
    %29 = arith.truncf %28 : vector<4x4x32xf32> to vector<4x4x32xbf16>
    %c0_8 = arith.constant 0 : index
    %c0_9 = arith.constant 0 : index
    %c0_10 = arith.constant 0 : index
    %c0_11 = arith.constant 0 : index
    %30 = vector.load %arg4[%c0_8, %c0_9, %c0_10, %c0_11] : memref<1x4x4x32xbf16, #tpu.memory_space<vmem>>, vector<1x4x4x32xbf16>
    %31 = vector.shape_cast %30 : vector<1x4x4x32xbf16> to vector<4x4x32xbf16>
    %32 = vector.shape_cast %29 : vector<4x4x32xbf16> to vector<1x4x4x32xbf16>
    tpu.vector_store %arg4[%c0_8, %c0_9, %c0_10, %c0_11], %32 {strides = array<i32>} : memref<1x4x4x32xbf16, #tpu.memory_space<vmem>>, vector<1x4x4x32xbf16>,
    return
  }
  func.func @transform_0(%arg0: i32) -> (i32, i32, i32, i32) {
    %c0_i32 = arith.constant 0 : i32
    %c0_i32_0 = arith.constant 0 : i32
    %c0_i32_1 = arith.constant 0 : i32
    %c0_i32_2 = arith.constant 0 : i32
    return %arg0, %c0_i32, %c0_i32_0, %c0_i32_1 : i32, i32, i32, i32
  }
  func.func @transform_1(%arg0: i32) -> (i32, i32) {
    %c0_i32 = arith.constant 0 : i32
    %c0_i32_0 = arith.constant 0 : i32
    %c0_i32_1 = arith.constant 0 : i32
    return %c0_i32, %c0_i32_0 : i32, i32
  }
  func.func @transform_2(%arg0: i32) -> (i32, i32) {
    %c0_i32 = arith.constant 0 : i32
    %c0_i32_0 = arith.constant 0 : i32
    %c0_i32_1 = arith.constant 0 : i32
    return %c0_i32, %c0_i32_0 : i32, i32
  }
  func.func @transform_3(%arg0: i32) -> (i32, i32, i32, i32) {
    %c0_i32 = arith.constant 0 : i32
    %c0_i32_0 = arith.constant 0 : i32
    %c0_i32_1 = arith.constant 0 : i32
    %c0_i32_2 = arith.constant 0 : i32
    return %arg0, %c0_i32, %c0_i32_0, %c0_i32_1 : i32, i32, i32, i32
  }
}

module attributes {stable_mosaic.version = 11 : i64} {
  func.func @_fused_matmul_kernel(%arg0: i32, %arg1: i32, %arg2: memref<16x32xbf16, #tpu.memory_space<vmem>>, %arg3: memref<32x64xbf16, #tpu.memory_space<vmem>>, %arg4: memref<1x64xf32, #tpu.memory_space<vmem>>, %arg5: memref<16x64xbf16, #tpu.memory_space<vmem>>) attributes {dimension_semantics = [#tpu.dimension_semantics<parallel>, #tpu.dimension_semantics<parallel>], iteration_bounds = array<i64: 2, 1>, scalar_prefetch = 0 : i64, scratch_operands = 0 : i64, tpu.core_type = #tpu.core_type<tc>, window_params = [{transform_indices = @transform_0, window_bounds = array<i64: 16, 32>}, {transform_indices = @transform_1, window_bounds = array<i64: 32, 64>}, {transform_indices = @transform_2, window_bounds = array<i64: 1, 64>}, {transform_indices = @transform_3, window_bounds = array<i64: 16, 64>}]} {
    %c0 = arith.constant 0 : index
    %c0_0 = arith.constant 0 : index
    %0 = vector.load %arg2[%c0, %c0_0] : memref<16x32xbf16, #tpu.memory_space<vmem>>, vector<16x32xbf16>
    %c0_1 = arith.constant 0 : index
    %c0_2 = arith.constant 0 : index
    %1 = vector.load %arg3[%c0_1, %c0_2] : memref<32x64xbf16, #tpu.memory_space<vmem>>, vector<32x64xbf16>
    %cst = arith.constant dense<0.000000e+00> : vector<16x64xf32>
    %2 = tpu.matmul %0, %1, %cst {dimension_numbers = #tpu.dot_dimension_numbers<[1], [0], [0], [1], [0, 0, 1, 1], [], []>} : vector<16x32xbf16>, vector<32x64xbf16>, vector<16x64xf32> -> vector<16x64xf32>
    %c0_3 = arith.constant 0 : index
    %c0_4 = arith.constant 0 : index
    %3 = vector.load %arg4[%c0_3, %c0_4] : memref<1x64xf32, #tpu.memory_space<vmem>>, vector<1x64xf32>
    %4 = vector.broadcast %3 : vector<1x64xf32> to vector<16x64xf32>
    %5 = arith.addf %2, %4 : vector<16x64xf32>
    %6 = arith.truncf %5 : vector<16x64xf32> to vector<16x64xbf16>
    %c0_5 = arith.constant 0 : index
    %c0_6 = arith.constant 0 : index
    %7 = vector.load %arg5[%c0_5, %c0_6] : memref<16x64xbf16, #tpu.memory_space<vmem>>, vector<16x64xbf16>
    tpu.vector_store %arg5[%c0_5, %c0_6], %6 {strides = array<i32>} : memref<16x64xbf16, #tpu.memory_space<vmem>>, vector<16x64xbf16>,
    return
  }
  func.func @transform_0(%arg0: i32, %arg1: i32) -> (i32, i32) {
    %c0_i32 = arith.constant 0 : i32
    %c0_i32_0 = arith.constant 0 : i32
    return %arg0, %c0_i32 : i32, i32
  }
  func.func @transform_1(%arg0: i32, %arg1: i32) -> (i32, i32) {
    %c0_i32 = arith.constant 0 : i32
    %c0_i32_0 = arith.constant 0 : i32
    return %c0_i32, %arg1 : i32, i32
  }
  func.func @transform_2(%arg0: i32, %arg1: i32) -> (i32, i32) {
    %c0_i32 = arith.constant 0 : i32
    %c0_i32_0 = arith.constant 0 : i32
    return %c0_i32, %arg1 : i32, i32
  }
  func.func @transform_3(%arg0: i32, %arg1: i32) -> (i32, i32) {
    %c0_i32 = arith.constant 0 : i32
    return %arg0, %arg1 : i32, i32
  }
}

module attributes {stable_mosaic.version = 11 : i64} {
  func.func @_fused_matmul_kernel(%arg0: i32, %arg1: i32, %arg2: memref<64x16xbf16, #tpu.memory_space<vmem>>, %arg3: memref<16x32xbf16, #tpu.memory_space<vmem>>, %arg4: memref<1x32xf32, #tpu.memory_space<vmem>>, %arg5: memref<64x32xbf16, #tpu.memory_space<vmem>>) attributes {dimension_semantics = [#tpu.dimension_semantics<parallel>, #tpu.dimension_semantics<parallel>], iteration_bounds = array<i64: 2, 1>, scalar_prefetch = 0 : i64, scratch_operands = 0 : i64, tpu.core_type = #tpu.core_type<tc>, window_params = [{transform_indices = @transform_0, window_bounds = array<i64: 64, 16>}, {transform_indices = @transform_1, window_bounds = array<i64: 16, 32>}, {transform_indices = @transform_2, window_bounds = array<i64: 1, 32>}, {transform_indices = @transform_3, window_bounds = array<i64: 64, 32>}]} {
    %c0 = arith.constant 0 : index
    %c0_0 = arith.constant 0 : index
    %0 = vector.load %arg2[%c0, %c0_0] : memref<64x16xbf16, #tpu.memory_space<vmem>>, vector<64x16xbf16>
    %c0_1 = arith.constant 0 : index
    %c0_2 = arith.constant 0 : index
    %1 = vector.load %arg3[%c0_1, %c0_2] : memref<16x32xbf16, #tpu.memory_space<vmem>>, vector<16x32xbf16>
    %cst = arith.constant dense<0.000000e+00> : vector<64x32xf32>
    %2 = tpu.matmul %0, %1, %cst {dimension_numbers = #tpu.dot_dimension_numbers<[1], [0], [0], [1], [0, 0, 1, 1], [], []>} : vector<64x16xbf16>, vector<16x32xbf16>, vector<64x32xf32> -> vector<64x32xf32>
    %c0_3 = arith.constant 0 : index
    %c0_4 = arith.constant 0 : index
    %3 = vector.load %arg4[%c0_3, %c0_4] : memref<1x32xf32, #tpu.memory_space<vmem>>, vector<1x32xf32>
    %4 = vector.broadcast %3 : vector<1x32xf32> to vector<64x32xf32>
    %5 = arith.addf %2, %4 : vector<64x32xf32>
    %6 = arith.truncf %5 : vector<64x32xf32> to vector<64x32xbf16>
    %c0_5 = arith.constant 0 : index
    %c0_6 = arith.constant 0 : index
    %7 = vector.load %arg5[%c0_5, %c0_6] : memref<64x32xbf16, #tpu.memory_space<vmem>>, vector<64x32xbf16>
    tpu.vector_store %arg5[%c0_5, %c0_6], %6 {strides = array<i32>} : memref<64x32xbf16, #tpu.memory_space<vmem>>, vector<64x32xbf16>,
    return
  }
  func.func @transform_0(%arg0: i32, %arg1: i32) -> (i32, i32) {
    %c0_i32 = arith.constant 0 : i32
    %c0_i32_0 = arith.constant 0 : i32
    return %arg0, %c0_i32 : i32, i32
  }
  func.func @transform_1(%arg0: i32, %arg1: i32) -> (i32, i32) {
    %c0_i32 = arith.constant 0 : i32
    %c0_i32_0 = arith.constant 0 : i32
    return %c0_i32, %arg1 : i32, i32
  }
  func.func @transform_2(%arg0: i32, %arg1: i32) -> (i32, i32) {
    %c0_i32 = arith.constant 0 : i32
    %c0_i32_0 = arith.constant 0 : i32
    return %c0_i32, %arg1 : i32, i32
  }
  func.func @transform_3(%arg0: i32, %arg1: i32) -> (i32, i32) {
    %c0_i32 = arith.constant 0 : i32
    return %arg0, %arg1 : i32, i32
  }
}

module attributes {stable_mosaic.version = 11 : i64} {
  func.func @_conv3x3_kernel(%arg0: i32, %arg1: memref<1x10x10x16xbf16, #tpu.memory_space<vmem>>, %arg2: memref<144x16xbf16, #tpu.memory_space<vmem>>, %arg3: memref<1x16xf32, #tpu.memory_space<vmem>>, %arg4: memref<1x8x8x16xbf16, #tpu.memory_space<vmem>>) attributes {dimension_semantics = [#tpu.dimension_semantics<parallel>], iteration_bounds = array<i64: 2>, scalar_prefetch = 0 : i64, scratch_operands = 0 : i64, tpu.core_type = #tpu.core_type<tc>, window_params = [{transform_indices = @transform_0, window_bounds = array<i64: 1, 10, 10, 16>}, {pipeline_mode = #tpu.pipeline_mode<synchronous>, transform_indices = @transform_1, window_bounds = array<i64: 144, 16>}, {pipeline_mode = #tpu.pipeline_mode<synchronous>, transform_indices = @transform_2, window_bounds = array<i64: 1, 16>}, {transform_indices = @transform_3, window_bounds = array<i64: 1, 8, 8, 16>}]} {
    %c0 = arith.constant 0 : index
    %c0_0 = arith.constant 0 : index
    %c0_1 = arith.constant 0 : index
    %c0_2 = arith.constant 0 : index
    %0 = vector.load %arg1[%c0, %c0_0, %c0_1, %c0_2] : memref<1x10x10x16xbf16, #tpu.memory_space<vmem>>, vector<1x10x10x16xbf16>
    %1 = vector.shape_cast %0 : vector<1x10x10x16xbf16> to vector<10x10x16xbf16>
    %2 = vector.extract_strided_slice %1 {offsets = [0, 0, 0], sizes = [8, 8, 16], strides = [1, 1, 1]} : vector<10x10x16xbf16> to vector<8x8x16xbf16>
    %3 = vector.shape_cast %2 : vector<8x8x16xbf16> to vector<64x16xbf16>
    %4 = vector.extract_strided_slice %1 {offsets = [0, 1, 0], sizes = [8, 8, 16], strides = [1, 1, 1]} : vector<10x10x16xbf16> to vector<8x8x16xbf16>
    %5 = vector.shape_cast %4 : vector<8x8x16xbf16> to vector<64x16xbf16>
    %6 = vector.extract_strided_slice %1 {offsets = [0, 2, 0], sizes = [8, 8, 16], strides = [1, 1, 1]} : vector<10x10x16xbf16> to vector<8x8x16xbf16>
    %7 = vector.shape_cast %6 : vector<8x8x16xbf16> to vector<64x16xbf16>
    %8 = vector.extract_strided_slice %1 {offsets = [1, 0, 0], sizes = [8, 8, 16], strides = [1, 1, 1]} : vector<10x10x16xbf16> to vector<8x8x16xbf16>
    %9 = vector.shape_cast %8 : vector<8x8x16xbf16> to vector<64x16xbf16>
    %10 = vector.extract_strided_slice %1 {offsets = [1, 1, 0], sizes = [8, 8, 16], strides = [1, 1, 1]} : vector<10x10x16xbf16> to vector<8x8x16xbf16>
    %11 = vector.shape_cast %10 : vector<8x8x16xbf16> to vector<64x16xbf16>
    %12 = vector.extract_strided_slice %1 {offsets = [1, 2, 0], sizes = [8, 8, 16], strides = [1, 1, 1]} : vector<10x10x16xbf16> to vector<8x8x16xbf16>
    %13 = vector.shape_cast %12 : vector<8x8x16xbf16> to vector<64x16xbf16>
    %14 = vector.extract_strided_slice %1 {offsets = [2, 0, 0], sizes = [8, 8, 16], strides = [1, 1, 1]} : vector<10x10x16xbf16> to vector<8x8x16xbf16>
    %15 = vector.shape_cast %14 : vector<8x8x16xbf16> to vector<64x16xbf16>
    %16 = vector.extract_strided_slice %1 {offsets = [2, 1, 0], sizes = [8, 8, 16], strides = [1, 1, 1]} : vector<10x10x16xbf16> to vector<8x8x16xbf16>
    %17 = vector.shape_cast %16 : vector<8x8x16xbf16> to vector<64x16xbf16>
    %18 = vector.extract_strided_slice %1 {offsets = [2, 2, 0], sizes = [8, 8, 16], strides = [1, 1, 1]} : vector<10x10x16xbf16> to vector<8x8x16xbf16>
    %19 = vector.shape_cast %18 : vector<8x8x16xbf16> to vector<64x16xbf16>
    %20 = tpu.concatenate %3, %5, %7, %9, %11, %13, %15, %17, %19 in 1 : vector<64x16xbf16>, vector<64x16xbf16>, vector<64x16xbf16>, vector<64x16xbf16>, vector<64x16xbf16>, vector<64x16xbf16>, vector<64x16xbf16>, vector<64x16xbf16>, vector<64x16xbf16> -> vector<64x144xbf16>
    %c0_3 = arith.constant 0 : index
    %c0_4 = arith.constant 0 : index
    %21 = vector.load %arg2[%c0_3, %c0_4] : memref<144x16xbf16, #tpu.memory_space<vmem>>, vector<144x16xbf16>
    %cst = arith.constant dense<0.000000e+00> : vector<64x16xf32>
    %22 = tpu.matmul %20, %21, %cst {dimension_numbers = #tpu.dot_dimension_numbers<[1], [0], [0], [1], [0, 0, 1, 1], [], []>} : vector<64x144xbf16>, vector<144x16xbf16>, vector<64x16xf32> -> vector<64x16xf32>
    %c0_5 = arith.constant 0 : index
    %c0_6 = arith.constant 0 : index
    %23 = vector.load %arg3[%c0_5, %c0_6] : memref<1x16xf32, #tpu.memory_space<vmem>>, vector<1x16xf32>
    %24 = vector.broadcast %23 : vector<1x16xf32> to vector<64x16xf32>
    %25 = arith.addf %22, %24 : vector<64x16xf32>
    %cst_7 = arith.constant 0.000000e+00 : f32
    %26 = vector.broadcast %cst_7 : f32 to vector<64x16xf32>
    %27 = arith.maximumf %25, %26 : vector<64x16xf32>
    %28 = vector.shape_cast %27 : vector<64x16xf32> to vector<8x8x16xf32>
    %29 = arith.truncf %28 : vector<8x8x16xf32> to vector<8x8x16xbf16>
    %c0_8 = arith.constant 0 : index
    %c0_9 = arith.constant 0 : index
    %c0_10 = arith.constant 0 : index
    %c0_11 = arith.constant 0 : index
    %30 = vector.load %arg4[%c0_8, %c0_9, %c0_10, %c0_11] : memref<1x8x8x16xbf16, #tpu.memory_space<vmem>>, vector<1x8x8x16xbf16>
    %31 = vector.shape_cast %30 : vector<1x8x8x16xbf16> to vector<8x8x16xbf16>
    %32 = vector.shape_cast %29 : vector<8x8x16xbf16> to vector<1x8x8x16xbf16>
    tpu.vector_store %arg4[%c0_8, %c0_9, %c0_10, %c0_11], %32 {strides = array<i32>} : memref<1x8x8x16xbf16, #tpu.memory_space<vmem>>, vector<1x8x8x16xbf16>,
    return
  }
  func.func @transform_0(%arg0: i32) -> (i32, i32, i32, i32) {
    %c0_i32 = arith.constant 0 : i32
    %c0_i32_0 = arith.constant 0 : i32
    %c0_i32_1 = arith.constant 0 : i32
    %c0_i32_2 = arith.constant 0 : i32
    return %arg0, %c0_i32, %c0_i32_0, %c0_i32_1 : i32, i32, i32, i32
  }
  func.func @transform_1(%arg0: i32) -> (i32, i32) {
    %c0_i32 = arith.constant 0 : i32
    %c0_i32_0 = arith.constant 0 : i32
    %c0_i32_1 = arith.constant 0 : i32
    return %c0_i32, %c0_i32_0 : i32, i32
  }
  func.func @transform_2(%arg0: i32) -> (i32, i32) {
    %c0_i32 = arith.constant 0 : i32
    %c0_i32_0 = arith.constant 0 : i32
    %c0_i32_1 = arith.constant 0 : i32
    return %c0_i32, %c0_i32_0 : i32, i32
  }
  func.func @transform_3(%arg0: i32) -> (i32, i32, i32, i32) {
    %c0_i32 = arith.constant 0 : i32
    %c0_i32_0 = arith.constant 0 : i32
    %c0_i32_1 = arith.constant 0 : i32
    %c0_i32_2 = arith.constant 0 : i32
    return %arg0, %c0_i32, %c0_i32_0, %c0_i32_1 : i32, i32, i32, i32
  }
}

module attributes {stable_mosaic.version = 11 : i64} {
  func.func @_conv3x3_kernel(%arg0: i32, %arg1: memref<1x18x18x8xbf16, #tpu.memory_space<vmem>>, %arg2: memref<72x8xbf16, #tpu.memory_space<vmem>>, %arg3: memref<1x8xf32, #tpu.memory_space<vmem>>, %arg4: memref<1x16x16x8xbf16, #tpu.memory_space<vmem>>) attributes {dimension_semantics = [#tpu.dimension_semantics<parallel>], iteration_bounds = array<i64: 2>, scalar_prefetch = 0 : i64, scratch_operands = 0 : i64, tpu.core_type = #tpu.core_type<tc>, window_params = [{transform_indices = @transform_0, window_bounds = array<i64: 1, 18, 18, 8>}, {pipeline_mode = #tpu.pipeline_mode<synchronous>, transform_indices = @transform_1, window_bounds = array<i64: 72, 8>}, {pipeline_mode = #tpu.pipeline_mode<synchronous>, transform_indices = @transform_2, window_bounds = array<i64: 1, 8>}, {transform_indices = @transform_3, window_bounds = array<i64: 1, 16, 16, 8>}]} {
    %c0 = arith.constant 0 : index
    %c0_0 = arith.constant 0 : index
    %c0_1 = arith.constant 0 : index
    %c0_2 = arith.constant 0 : index
    %0 = vector.load %arg1[%c0, %c0_0, %c0_1, %c0_2] : memref<1x18x18x8xbf16, #tpu.memory_space<vmem>>, vector<1x18x18x8xbf16>
    %1 = vector.shape_cast %0 : vector<1x18x18x8xbf16> to vector<18x18x8xbf16>
    %2 = vector.extract_strided_slice %1 {offsets = [0, 0, 0], sizes = [16, 16, 8], strides = [1, 1, 1]} : vector<18x18x8xbf16> to vector<16x16x8xbf16>
    %3 = vector.shape_cast %2 : vector<16x16x8xbf16> to vector<256x8xbf16>
    %4 = vector.extract_strided_slice %1 {offsets = [0, 1, 0], sizes = [16, 16, 8], strides = [1, 1, 1]} : vector<18x18x8xbf16> to vector<16x16x8xbf16>
    %5 = vector.shape_cast %4 : vector<16x16x8xbf16> to vector<256x8xbf16>
    %6 = vector.extract_strided_slice %1 {offsets = [0, 2, 0], sizes = [16, 16, 8], strides = [1, 1, 1]} : vector<18x18x8xbf16> to vector<16x16x8xbf16>
    %7 = vector.shape_cast %6 : vector<16x16x8xbf16> to vector<256x8xbf16>
    %8 = vector.extract_strided_slice %1 {offsets = [1, 0, 0], sizes = [16, 16, 8], strides = [1, 1, 1]} : vector<18x18x8xbf16> to vector<16x16x8xbf16>
    %9 = vector.shape_cast %8 : vector<16x16x8xbf16> to vector<256x8xbf16>
    %10 = vector.extract_strided_slice %1 {offsets = [1, 1, 0], sizes = [16, 16, 8], strides = [1, 1, 1]} : vector<18x18x8xbf16> to vector<16x16x8xbf16>
    %11 = vector.shape_cast %10 : vector<16x16x8xbf16> to vector<256x8xbf16>
    %12 = vector.extract_strided_slice %1 {offsets = [1, 2, 0], sizes = [16, 16, 8], strides = [1, 1, 1]} : vector<18x18x8xbf16> to vector<16x16x8xbf16>
    %13 = vector.shape_cast %12 : vector<16x16x8xbf16> to vector<256x8xbf16>
    %14 = vector.extract_strided_slice %1 {offsets = [2, 0, 0], sizes = [16, 16, 8], strides = [1, 1, 1]} : vector<18x18x8xbf16> to vector<16x16x8xbf16>
    %15 = vector.shape_cast %14 : vector<16x16x8xbf16> to vector<256x8xbf16>
    %16 = vector.extract_strided_slice %1 {offsets = [2, 1, 0], sizes = [16, 16, 8], strides = [1, 1, 1]} : vector<18x18x8xbf16> to vector<16x16x8xbf16>
    %17 = vector.shape_cast %16 : vector<16x16x8xbf16> to vector<256x8xbf16>
    %18 = vector.extract_strided_slice %1 {offsets = [2, 2, 0], sizes = [16, 16, 8], strides = [1, 1, 1]} : vector<18x18x8xbf16> to vector<16x16x8xbf16>
    %19 = vector.shape_cast %18 : vector<16x16x8xbf16> to vector<256x8xbf16>
    %20 = tpu.concatenate %3, %5, %7, %9, %11, %13, %15, %17, %19 in 1 : vector<256x8xbf16>, vector<256x8xbf16>, vector<256x8xbf16>, vector<256x8xbf16>, vector<256x8xbf16>, vector<256x8xbf16>, vector<256x8xbf16>, vector<256x8xbf16>, vector<256x8xbf16> -> vector<256x72xbf16>
    %c0_3 = arith.constant 0 : index
    %c0_4 = arith.constant 0 : index
    %21 = vector.load %arg2[%c0_3, %c0_4] : memref<72x8xbf16, #tpu.memory_space<vmem>>, vector<72x8xbf16>
    %cst = arith.constant dense<0.000000e+00> : vector<256x8xf32>
    %22 = tpu.matmul %20, %21, %cst {dimension_numbers = #tpu.dot_dimension_numbers<[1], [0], [0], [1], [0, 0, 1, 1], [], []>} : vector<256x72xbf16>, vector<72x8xbf16>, vector<256x8xf32> -> vector<256x8xf32>
    %c0_5 = arith.constant 0 : index
    %c0_6 = arith.constant 0 : index
    %23 = vector.load %arg3[%c0_5, %c0_6] : memref<1x8xf32, #tpu.memory_space<vmem>>, vector<1x8xf32>
    %24 = vector.broadcast %23 : vector<1x8xf32> to vector<256x8xf32>
    %25 = arith.addf %22, %24 : vector<256x8xf32>
    %cst_7 = arith.constant 0.000000e+00 : f32
    %26 = vector.broadcast %cst_7 : f32 to vector<256x8xf32>
    %27 = arith.maximumf %25, %26 : vector<256x8xf32>
    %28 = vector.shape_cast %27 : vector<256x8xf32> to vector<16x16x8xf32>
    %29 = arith.truncf %28 : vector<16x16x8xf32> to vector<16x16x8xbf16>
    %c0_8 = arith.constant 0 : index
    %c0_9 = arith.constant 0 : index
    %c0_10 = arith.constant 0 : index
    %c0_11 = arith.constant 0 : index
    %30 = vector.load %arg4[%c0_8, %c0_9, %c0_10, %c0_11] : memref<1x16x16x8xbf16, #tpu.memory_space<vmem>>, vector<1x16x16x8xbf16>
    %31 = vector.shape_cast %30 : vector<1x16x16x8xbf16> to vector<16x16x8xbf16>
    %32 = vector.shape_cast %29 : vector<16x16x8xbf16> to vector<1x16x16x8xbf16>
    tpu.vector_store %arg4[%c0_8, %c0_9, %c0_10, %c0_11], %32 {strides = array<i32>} : memref<1x16x16x8xbf16, #tpu.memory_space<vmem>>, vector<1x16x16x8xbf16>,
    return
  }
  func.func @transform_0(%arg0: i32) -> (i32, i32, i32, i32) {
    %c0_i32 = arith.constant 0 : i32
    %c0_i32_0 = arith.constant 0 : i32
    %c0_i32_1 = arith.constant 0 : i32
    %c0_i32_2 = arith.constant 0 : i32
    return %arg0, %c0_i32, %c0_i32_0, %c0_i32_1 : i32, i32, i32, i32
  }
  func.func @transform_1(%arg0: i32) -> (i32, i32) {
    %c0_i32 = arith.constant 0 : i32
    %c0_i32_0 = arith.constant 0 : i32
    %c0_i32_1 = arith.constant 0 : i32
    return %c0_i32, %c0_i32_0 : i32, i32
  }
  func.func @transform_2(%arg0: i32) -> (i32, i32) {
    %c0_i32 = arith.constant 0 : i32
    %c0_i32_0 = arith.constant 0 : i32
    %c0_i32_1 = arith.constant 0 : i32
    return %c0_i32, %c0_i32_0 : i32, i32
  }
  func.func @transform_3(%arg0: i32) -> (i32, i32, i32, i32) {
    %c0_i32 = arith.constant 0 : i32
    %c0_i32_0 = arith.constant 0 : i32
    %c0_i32_1 = arith.constant 0 : i32
    %c0_i32_2 = arith.constant 0 : i32
    return %arg0, %c0_i32, %c0_i32_0, %c0_i32_1 : i32, i32, i32, i32
  }
}

module attributes {stable_mosaic.version = 11 : i64} {
  func.func @_fused_matmul_kernel(%arg0: i32, %arg1: i32, %arg2: memref<256x8xbf16, #tpu.memory_space<vmem>>, %arg3: memref<8x1xbf16, #tpu.memory_space<vmem>>, %arg4: memref<1x1xf32, #tpu.memory_space<vmem>>, %arg5: memref<256x1xbf16, #tpu.memory_space<vmem>>) attributes {dimension_semantics = [#tpu.dimension_semantics<parallel>, #tpu.dimension_semantics<parallel>], iteration_bounds = array<i64: 2, 1>, scalar_prefetch = 0 : i64, scratch_operands = 0 : i64, tpu.core_type = #tpu.core_type<tc>, window_params = [{transform_indices = @transform_0, window_bounds = array<i64: 256, 8>}, {transform_indices = @transform_1, window_bounds = array<i64: 8, 1>}, {transform_indices = @transform_2, window_bounds = array<i64: 1, 1>}, {transform_indices = @transform_3, window_bounds = array<i64: 256, 1>}]} {
    %c0 = arith.constant 0 : index
    %c0_0 = arith.constant 0 : index
    %0 = vector.load %arg2[%c0, %c0_0] : memref<256x8xbf16, #tpu.memory_space<vmem>>, vector<256x8xbf16>
    %c0_1 = arith.constant 0 : index
    %c0_2 = arith.constant 0 : index
    %1 = vector.load %arg3[%c0_1, %c0_2] : memref<8x1xbf16, #tpu.memory_space<vmem>>, vector<8x1xbf16>
    %cst = arith.constant dense<0.000000e+00> : vector<256x1xf32>
    %2 = tpu.matmul %0, %1, %cst {dimension_numbers = #tpu.dot_dimension_numbers<[1], [0], [0], [1], [0, 0, 1, 1], [], []>} : vector<256x8xbf16>, vector<8x1xbf16>, vector<256x1xf32> -> vector<256x1xf32>
    %c0_3 = arith.constant 0 : index
    %c0_4 = arith.constant 0 : index
    %3 = vector.load %arg4[%c0_3, %c0_4] : memref<1x1xf32, #tpu.memory_space<vmem>>, vector<1x1xf32>
    %4 = vector.broadcast %3 : vector<1x1xf32> to vector<256x1xf32>
    %5 = arith.addf %2, %4 : vector<256x1xf32>
    %6 = arith.truncf %5 : vector<256x1xf32> to vector<256x1xbf16>
    %c0_5 = arith.constant 0 : index
    %c0_6 = arith.constant 0 : index
    %7 = vector.load %arg5[%c0_5, %c0_6] : memref<256x1xbf16, #tpu.memory_space<vmem>>, vector<256x1xbf16>
    tpu.vector_store %arg5[%c0_5, %c0_6], %6 {strides = array<i32>} : memref<256x1xbf16, #tpu.memory_space<vmem>>, vector<256x1xbf16>,
    return
  }
  func.func @transform_0(%arg0: i32, %arg1: i32) -> (i32, i32) {
    %c0_i32 = arith.constant 0 : i32
    %c0_i32_0 = arith.constant 0 : i32
    return %arg0, %c0_i32 : i32, i32
  }
  func.func @transform_1(%arg0: i32, %arg1: i32) -> (i32, i32) {
    %c0_i32 = arith.constant 0 : i32
    %c0_i32_0 = arith.constant 0 : i32
    return %c0_i32, %arg1 : i32, i32
  }
  func.func @transform_2(%arg0: i32, %arg1: i32) -> (i32, i32) {
    %c0_i32 = arith.constant 0 : i32
    %c0_i32_0 = arith.constant 0 : i32
    return %c0_i32, %arg1 : i32, i32
  }
  func.func @transform_3(%arg0: i32, %arg1: i32) -> (i32, i32) {
    %c0_i32 = arith.constant 0 : i32
    return %arg0, %arg1 : i32, i32
  }
}

module attributes {stable_mosaic.version = 11 : i64} {
  func.func @_fused_matmul_kernel(%arg0: i32, %arg1: i32, %arg2: memref<16x16xbf16, #tpu.memory_space<vmem>>, %arg3: memref<16x32xbf16, #tpu.memory_space<vmem>>, %arg4: memref<1x32xf32, #tpu.memory_space<vmem>>, %arg5: memref<16x32xbf16, #tpu.memory_space<vmem>>) attributes {dimension_semantics = [#tpu.dimension_semantics<parallel>, #tpu.dimension_semantics<parallel>], iteration_bounds = array<i64: 2, 1>, scalar_prefetch = 0 : i64, scratch_operands = 0 : i64, tpu.core_type = #tpu.core_type<tc>, window_params = [{transform_indices = @transform_0, window_bounds = array<i64: 16, 16>}, {transform_indices = @transform_1, window_bounds = array<i64: 16, 32>}, {transform_indices = @transform_2, window_bounds = array<i64: 1, 32>}, {transform_indices = @transform_3, window_bounds = array<i64: 16, 32>}]} {
    %c0 = arith.constant 0 : index
    %c0_0 = arith.constant 0 : index
    %0 = vector.load %arg2[%c0, %c0_0] : memref<16x16xbf16, #tpu.memory_space<vmem>>, vector<16x16xbf16>
    %c0_1 = arith.constant 0 : index
    %c0_2 = arith.constant 0 : index
    %1 = vector.load %arg3[%c0_1, %c0_2] : memref<16x32xbf16, #tpu.memory_space<vmem>>, vector<16x32xbf16>
    %cst = arith.constant dense<0.000000e+00> : vector<16x32xf32>
    %2 = tpu.matmul %0, %1, %cst {dimension_numbers = #tpu.dot_dimension_numbers<[1], [0], [0], [1], [0, 0, 1, 1], [], []>} : vector<16x16xbf16>, vector<16x32xbf16>, vector<16x32xf32> -> vector<16x32xf32>
    %c0_3 = arith.constant 0 : index
    %c0_4 = arith.constant 0 : index
    %3 = vector.load %arg4[%c0_3, %c0_4] : memref<1x32xf32, #tpu.memory_space<vmem>>, vector<1x32xf32>
    %4 = vector.broadcast %3 : vector<1x32xf32> to vector<16x32xf32>
    %5 = arith.addf %2, %4 : vector<16x32xf32>
    %6 = arith.truncf %5 : vector<16x32xf32> to vector<16x32xbf16>
    %c0_5 = arith.constant 0 : index
    %c0_6 = arith.constant 0 : index
    %7 = vector.load %arg5[%c0_5, %c0_6] : memref<16x32xbf16, #tpu.memory_space<vmem>>, vector<16x32xbf16>
    tpu.vector_store %arg5[%c0_5, %c0_6], %6 {strides = array<i32>} : memref<16x32xbf16, #tpu.memory_space<vmem>>, vector<16x32xbf16>,
    return
  }
  func.func @transform_0(%arg0: i32, %arg1: i32) -> (i32, i32) {
    %c0_i32 = arith.constant 0 : i32
    %c0_i32_0 = arith.constant 0 : i32
    return %arg0, %c0_i32 : i32, i32
  }
  func.func @transform_1(%arg0: i32, %arg1: i32) -> (i32, i32) {
    %c0_i32 = arith.constant 0 : i32
    %c0_i32_0 = arith.constant 0 : i32
    return %c0_i32, %arg1 : i32, i32
  }
  func.func @transform_2(%arg0: i32, %arg1: i32) -> (i32, i32) {
    %c0_i32 = arith.constant 0 : i32
    %c0_i32_0 = arith.constant 0 : i32
    return %c0_i32, %arg1 : i32, i32
  }
  func.func @transform_3(%arg0: i32, %arg1: i32) -> (i32, i32) {
    %c0_i32 = arith.constant 0 : i32
    return %arg0, %arg1 : i32, i32
  }
}

module attributes {stable_mosaic.version = 11 : i64} {
  func.func @_fused_matmul_kernel(%arg0: i32, %arg1: i32, %arg2: memref<16x16xbf16, #tpu.memory_space<vmem>>, %arg3: memref<16x64xbf16, #tpu.memory_space<vmem>>, %arg4: memref<1x64xf32, #tpu.memory_space<vmem>>, %arg5: memref<16x64xf32, #tpu.memory_space<vmem>>) attributes {dimension_semantics = [#tpu.dimension_semantics<parallel>, #tpu.dimension_semantics<parallel>], iteration_bounds = array<i64: 2, 1>, scalar_prefetch = 0 : i64, scratch_operands = 0 : i64, tpu.core_type = #tpu.core_type<tc>, window_params = [{transform_indices = @transform_0, window_bounds = array<i64: 16, 16>}, {transform_indices = @transform_1, window_bounds = array<i64: 16, 64>}, {transform_indices = @transform_2, window_bounds = array<i64: 1, 64>}, {transform_indices = @transform_3, window_bounds = array<i64: 16, 64>}]} {
    %c0 = arith.constant 0 : index
    %c0_0 = arith.constant 0 : index
    %0 = vector.load %arg2[%c0, %c0_0] : memref<16x16xbf16, #tpu.memory_space<vmem>>, vector<16x16xbf16>
    %c0_1 = arith.constant 0 : index
    %c0_2 = arith.constant 0 : index
    %1 = vector.load %arg3[%c0_1, %c0_2] : memref<16x64xbf16, #tpu.memory_space<vmem>>, vector<16x64xbf16>
    %cst = arith.constant dense<0.000000e+00> : vector<16x64xf32>
    %2 = tpu.matmul %0, %1, %cst {dimension_numbers = #tpu.dot_dimension_numbers<[1], [0], [0], [1], [0, 0, 1, 1], [], []>} : vector<16x16xbf16>, vector<16x64xbf16>, vector<16x64xf32> -> vector<16x64xf32>
    %c0_3 = arith.constant 0 : index
    %c0_4 = arith.constant 0 : index
    %3 = vector.load %arg4[%c0_3, %c0_4] : memref<1x64xf32, #tpu.memory_space<vmem>>, vector<1x64xf32>
    %4 = vector.broadcast %3 : vector<1x64xf32> to vector<16x64xf32>
    %5 = arith.addf %2, %4 : vector<16x64xf32>
    %6 = math.absf %5 : vector<16x64xf32>
    %cst_5 = arith.constant 0.000000e+00 : f32
    %7 = vector.broadcast %cst_5 : f32 to vector<16x64xf32>
    %8 = arith.subf %7, %6 : vector<16x64xf32>
    %9 = math.exp %8 : vector<16x64xf32>
    %cst_6 = arith.constant 0.000000e+00 : f32
    %10 = vector.broadcast %cst_6 : f32 to vector<16x64xf32>
    %11 = arith.cmpf oge, %5, %10 : vector<16x64xf32>
    %cst_7 = arith.constant 1.000000e+00 : f32
    %12 = vector.broadcast %cst_7 : f32 to vector<16x64xf32>
    %13 = arith.addf %12, %9 : vector<16x64xf32>
    %cst_8 = arith.constant 1.000000e+00 : f32
    %14 = vector.broadcast %cst_8 : f32 to vector<16x64xf32>
    %15 = arith.divf %14, %13 : vector<16x64xf32>
    %cst_9 = arith.constant 1.000000e+00 : f32
    %16 = vector.broadcast %cst_9 : f32 to vector<16x64xf32>
    %17 = arith.addf %16, %9 : vector<16x64xf32>
    %18 = arith.divf %9, %17 : vector<16x64xf32>
    %19 = arith.select %11, %15, %18 : vector<16x64xi1>, vector<16x64xf32>
    %c0_10 = arith.constant 0 : index
    %c0_11 = arith.constant 0 : index
    %20 = vector.load %arg5[%c0_10, %c0_11] : memref<16x64xf32, #tpu.memory_space<vmem>>, vector<16x64xf32>
    tpu.vector_store %arg5[%c0_10, %c0_11], %19 {strides = array<i32>} : memref<16x64xf32, #tpu.memory_space<vmem>>, vector<16x64xf32>,
    return
  }
  func.func @transform_0(%arg0: i32, %arg1: i32) -> (i32, i32) {
    %c0_i32 = arith.constant 0 : i32
    %c0_i32_0 = arith.constant 0 : i32
    return %arg0, %c0_i32 : i32, i32
  }
  func.func @transform_1(%arg0: i32, %arg1: i32) -> (i32, i32) {
    %c0_i32 = arith.constant 0 : i32
    %c0_i32_0 = arith.constant 0 : i32
    return %c0_i32, %arg1 : i32, i32
  }
  func.func @transform_2(%arg0: i32, %arg1: i32) -> (i32, i32) {
    %c0_i32 = arith.constant 0 : i32
    %c0_i32_0 = arith.constant 0 : i32
    return %c0_i32, %arg1 : i32, i32
  }
  func.func @transform_3(%arg0: i32, %arg1: i32) -> (i32, i32) {
    %c0_i32 = arith.constant 0 : i32
    return %arg0, %arg1 : i32, i32
  }
}

</mosaic_0001>

<bundles_post_ra>
// kernel: transunet_forward.24
= control target key start
LH: loop header
LB: loop body
LE: loop exit
PB: predicated region body
PF: predicated region fallthrough
CT: control target
= control target key end

     0   :  { %s873_s18 = smov 0   ;;  %s875_s19 = smov 0   ;;  %s994_s0 = inlined_call_operand.vmem [shape: f32[16,128], index: 0, kind: input, shape index: {}]   ;;  %s995_s1 = inlined_call_operand.vmem [shape: f32[1,128], index: 1, kind: input, shape index: {}]   ;;  %s996_s2 = inlined_call_operand.vmem [shape: f32[1,128], index: 2, kind: input, shape index: {}]   ;;  %s997_s3 = inlined_call_operand.vmem [shape: bf16[128,384], index: 3, kind: input, shape index: {}]   ;;  %s998_s4 = inlined_call_operand.vmem [shape: f32[1,384], index: 4, kind: input, shape index: {}]   ;;  %s999_s5 = inlined_call_operand.vmem [shape: bf16[16,384], index: 5, kind: output, shape index: {}]  }
   0x1   :  { %s877_s20 = smov 0   ;;  %s879_s21 = smov 0  }
   0x2   :  { %s881_s22 = smov 0  }
   0x3 LB: > { %s24_s23 = sadd.s32 1, %s835_s21  ;;  %s684_s24 = sadd.s32 4294967295, %s839_s22   ;;  %s839_s22 = sphi %s881_s22, %s15_s22   ;;  %s835_s21 = sphi %s879_s21, %s1004_s21   ;;  %s831_s20 = sphi %s877_s20, %s1003_s20   ;;  %s827_s19 = sphi %s875_s19, %s1002_s19   ;;  %s823_s18 = sphi %s873_s18, %s1001_s18  }
   0x4   : > { %p25_p0 = scmp.ge.s32.totalorder %s24_s23, 3  ;;  %p109_p1 = scmp.ne.s32.totalorder %s827_s19, %s823_s18 }
   0x5   : > { %p110_p2 = scmp.eq.s32.totalorder %s839_s22, 0  ;;  %p167_p4 = scmp.eq.s32.totalorder %s684_s24, 2 }
   0x6   : > { %s1006_s23 = smov (%p25_p0, %s24_s23), 0  ;;  %s102_s26 = sadd.s32 1, %s827_s19 }
   0x7   : > { %p111_p3 = por %p110_p2, %p109_p1  ;;  %s99_s25 = ssub.s32 %s835_s21, %s1006_s23 }
   0x8   : > { %p100_p5 = scmp.eq.s32.totalorder %s99_s25, 0  ;;  %p908_p6 = por %p167_p4, %p109_p1 }
   0x9   : > { %p688_p7 = scmp.ge.s32.totalorder %s839_s22, 3 }
   0xa   : > { %s913_s28 = scalar_select %p100_p5, %s827_s19, %s102_s26  }
   0xb   : > { %204 = sbr.rel (%p688_p7) target bundleno = 32 (0x20), region = 28 }
  0x12   : > { %207 = sbr.rel (!%p111_p3) target bundleno = 32 (0x20), region = 32  ;;  %s209_s29 = sand.u32 (%p111_p3), 1, %s827_s19  }
  0x13   : > { %s690_s30 = sshll.u32 (%p111_p3), %s835_s21, 2  ;;  %s689_s6 = sshll.u32 (%p111_p3), %s209_s29, 6 }
  0x14   : > { %s921_s9 = scalar_lea.vmem (%p111_p3), %s997_s3, %s690_s30  ;;  %s211_s10 = scalar_lea.vmem (%p111_p3), [#allocation2], %s689_s6 }
  0x15   : > { %v229_v0 = vld [vmem:[%s921_s9] sm:$0xf] (%p111_p3)  ;;  %v231_v1 = vld [vmem:[%s921_s9 + $0xc] sm:$0xf] (%p111_p3)  ;;  %v233_v2 = vld [vmem:[%s921_s9 + $0x18] sm:$0xf] (%p111_p3) }
  0x16   : > { %230 = vst [vmem:[%s211_s10] sm:$0xf] (%p111_p3), %v229_v0  ;;  %232 = vst [vmem:[%s211_s10 + $0x4] sm:$0xf] (%p111_p3), %v231_v1  ;;  %v235_v3 = vld [vmem:[%s921_s9 + $0x24] sm:$0xf] (%p111_p3) }
  0x17   : > { %v237_v4 = vld [vmem:[%s921_s9 + $0x30] sm:$0xf] (%p111_p3)  ;;  %234 = vst [vmem:[%s211_s10 + $0x8] sm:$0xf] (%p111_p3), %v233_v2  ;;  %236 = vst [vmem:[%s211_s10 + $0xc] sm:$0xf] (%p111_p3), %v235_v3 }
  0x18   : > { %238 = vst [vmem:[%s211_s10 + $0x10] sm:$0xf] (%p111_p3), %v237_v4  ;;  %v239_v5 = vld [vmem:[%s921_s9 + $0x3c] sm:$0xf] (%p111_p3)  ;;  %v241_v6 = vld [vmem:[%s921_s9 + $0x48] sm:$0xf] (%p111_p3) }
  0x19   : > { %v243_v7 = vld [vmem:[%s921_s9 + $0x54] sm:$0xf]  ;;  %240 = vst [vmem:[%s211_s10 + $0x14] sm:$0xf] %v239_v5  ;;  %242 = vst [vmem:[%s211_s10 + $0x18] sm:$0xf] %v241_v6 }
  0x1a   : > { %244 = vst [vmem:[%s211_s10 + $0x1c] sm:$0xf] %v243_v7  ;;  %v245_v8 = vld [vmem:[%s921_s9 + $0x60] sm:$0xf]  ;;  %v247_v9 = vld [vmem:[%s921_s9 + $0x6c] sm:$0xf] }
  0x1b   : > { %v249_v10 = vld [vmem:[%s921_s9 + $0x78] sm:$0xf]  ;;  %246 = vst [vmem:[%s211_s10 + $0x20] sm:$0xf] %v245_v8  ;;  %248 = vst [vmem:[%s211_s10 + $0x24] sm:$0xf] %v247_v9 }
  0x1c   : > { %250 = vst [vmem:[%s211_s10 + $0x28] sm:$0xf] %v249_v10  ;;  %v251_v11 = vld [vmem:[%s921_s9 + $0x84] sm:$0xf]  ;;  %v253_v12 = vld [vmem:[%s921_s9 + $0x90] sm:$0xf] }
  0x1d   : > { %v255_v13 = vld [vmem:[%s921_s9 + $0x9c] sm:$0xf]  ;;  %252 = vst [vmem:[%s211_s10 + $0x2c] sm:$0xf] %v251_v11  ;;  %254 = vst [vmem:[%s211_s10 + $0x30] sm:$0xf] %v253_v12 }
  0x1e   : > { %256 = vst [vmem:[%s211_s10 + $0x34] sm:$0xf] %v255_v13  ;;  %v257_v14 = vld [vmem:[%s921_s9 + $0xa8] sm:$0xf]  ;;  %v259_v15 = vld [vmem:[%s921_s9 + $0xb4] sm:$0xf] }
  0x1f   : > { %258 = vst [vmem:[%s211_s10 + $0x38] sm:$0xf] %v257_v14  ;;  %260 = vst [vmem:[%s211_s10 + $0x3c] sm:$0xf] %v259_v15 }
  0x20 PF: > { %p691_p8 = scmp.ge.s32.totalorder %s839_s22, 1  ;;  %p320_p9 = scmp.lt.s32.totalorder %s839_s22, 4 }
  0x22   : > { %p321_p10 = pnand %p691_p8, %p320_p9 }
  0x23   : > { %v372_v16 = vld [vmem:[%s994_s0] sm:$0xff] (!%p321_p10)  ;;  %v373_v17 = vld [vmem:[%s994_s0 + $0x8] sm:$0xff] (!%p321_p10)  ;;  %s327_s15 = sand.u32 (!%p321_p10), 1, %s823_s18   ;;  %v841_v18 = vmov (!%p321_p10), 0.0   ;;  %vm842_vm0 = vmmov (!%p321_p10), 0   ;;  %p367_p11 = scmp.lt.s32.totalorder (!%p321_p10), %s831_s20, 2 }
  0x24   : > { %324 = sbr.rel (%p321_p10) target bundleno = 580 (0x244), region = 77  ;;  %374 = vadd.xlane.f32.xlu0 (!%p321_p10), %v372_v16  ;;  %727 = vmatprep.subr.bf16.mxu0 (!%p321_p10), %v841_v18  ;;  %s692_s16 = sshll.u32 (!%p321_p10), %s327_s15, 6  ;;  %v694_v43 = vld [vmem:[%s995_s1] ss:$0 sm:$0xff] (!%p321_p10) }
  0x25   : > { %s950_s17 = scalar_lea.vmem (!%p321_p10), [#allocation2], %s692_s16  ;;  %743 = vmatprep.mubr.msk.bf16.mxu0 (!%p321_p10), %vm842_vm0, %v841_v18  ;;  %v695_v47 = vld [vmem:[%s996_s2] ss:$0 sm:$0xff] (!%p321_p10)  ;;  %s693_s9 = sshll.u32 (!%p321_p10), %s327_s15, 3 }
  0x26   : > { %v789_v19 = vld [vmem:[%s950_s17] sm:$0xff] (!%p321_p10)   ;;  %v790_v28 = vld [vmem:[%s950_s17 + $0x8] sm:$0xff] (!%p321_p10)   ;;  %v791_v29 = vld [vmem:[%s950_s17 + $0x10] sm:$0xff] (!%p321_p10)   ;;  %s360_s10 = scalar_lea.vmem (!%p321_p10), [#allocation3], %s693_s9 }
  0x27   : > { %728 = vmatpush3.bf16.msra.mxu0 (!%p321_p10), %v789_v19  ;;  %v792_v30 = vld [vmem:[%s950_s17 + $0x18] sm:$0xff] (!%p321_p10)   ;;  %v793_v31 = vld [vmem:[%s950_s17 + $0x20] sm:$0xff] (!%p321_p10)   ;;  %v794_v32 = vld [vmem:[%s950_s17 + $0x28] sm:$0xff] (!%p321_p10)  }
  0x28   : > { %376 = vadd.xlane.f32.xlu0 (!%p321_p10), %v373_v17  ;;  %729 = vmatprep.subr.bf16.mxu0 (!%p321_p10), %v841_v18  ;;  %v795_v33 = vld [vmem:[%s950_s17 + $0x30] sm:$0xff] (!%p321_p10)   ;;  %v796_v34 = vld [vmem:[%s950_s17 + $0x38] sm:$0xff] (!%p321_p10)  }
  0x2b   : > { %730 = vmatpush3.bf16.msra.mxu0 %v790_v28  ;;  %s368_s30 = scalar_select %p367_p11, %s831_s20, 2 }
  0x2c   : > { %731 = vmatprep.subr.bf16.mxu0 %v841_v18  ;;  %s708_s11 = sshll.u32 (%p908_p6), %s831_s20, 2 }
  0x2d   : > { %s369_s8 = scalar_lea.vmem %s998_s4, %s368_s30  ;;  %s549_s14 = scalar_lea.vmem (%p908_p6), %s999_s5, %s708_s11 }
  0x2e   : > { %v696_v52 = vld [vmem:[%s369_s8] ss:$0 sm:$0xff] }
  0x2f   : > { %732 = vmatpush3.bf16.msra.mxu0 %v791_v29 }
  0x30   : > { %733 = vmatprep.subr.bf16.mxu0 %v841_v18 }
  0x33   : > { %734 = vmatpush3.bf16.msra.mxu0 %v792_v30 }
  0x34   : > { %735 = vmatprep.subr.bf16.mxu0 %v841_v18 }
  0x37   : > { %736 = vmatpush3.bf16.msra.mxu0 %v793_v31 }
  0x38   : > { %737 = vmatprep.subr.bf16.mxu0 %v841_v18 }
  0x3b   : > { %738 = vmatpush3.bf16.msra.mxu0 %v794_v32 }
  0x3c   : > { %739 = vmatprep.subr.bf16.mxu0 %v841_v18 }
  0x3f   : > { %740 = vmatpush3.bf16.msra.mxu0 %v795_v33 }
  0x40   : > { %741 = vmatprep.subr.bf16.mxu0 %v841_v18 }
  0x43   : > { %742 = vmatpush3.bf16.msra.mxu0 %v796_v34 }
  0xb1   : > { %v375_v20 = vpop.xlane.xlu0 %374 }
  0xb2   : > { %v379_v21 = vmul.f32 0.0078125, %v375_v20 }
  0xb4   : > { %v381_v22 = vsub.f32 %v372_v16, %v379_v21 }
  0xb5   : > { %v377_v23 = vpop.xlane.xlu0 %376 }
  0xb6   : > { %v380_v24 = vmul.f32 0.0078125, %v377_v23  ;;  %v383_v25 = vmul.f32 %v381_v22, %v381_v22 }
  0xb8   : > { %v382_v26 = vsub.f32 %v373_v17, %v380_v24  ;;  %385 = vadd.xlane.f32.xlu1 %v383_v25 }
  0xba   : > { %v384_v27 = vmul.f32 %v382_v26, %v382_v26 }
  0xbc   : > { %387 = vadd.xlane.f32.xlu1 %v384_v27 }
 0x145   : > { %v386_v35 = vpop.xlane.xlu1 %385 }
 0x146   : > { %v389_v36 = vmul.f32 0.0078125, %v386_v35 }
 0x148   : > { %v391_v37 = vadd.f32 1e-06, %v389_v36 }
 0x149   : > { %v388_v38 = vpop.xlane.xlu1 %387 }
 0x14a   : > { %797 = vrsqrt.f32 %v391_v37  ;;  %v390_v39 = vmul.f32 0.0078125, %v388_v38 }
 0x14c   : > { %v392_v40 = vadd.f32 1e-06, %v390_v39 }
 0x14e   : > { %799 = vrsqrt.f32 %v392_v40 }
 0x154   : > { %v798_v41 = vpop.eup %797 }
 0x155   : > { %v395_v42 = vmul.f32 %v798_v41, %v381_v22 }
 0x157   : > { %v404_v46 = vmul.f32 %v694_v43, %v395_v42 }
 0x158   : > { %v800_v44 = vpop.eup %799 }
 0x159   : > { %v396_v45 = vmul.f32 %v800_v44, %v382_v26  ;;  %v413_v49 = vadd.f32 %v695_v47, %v404_v46 }
 0x15b   : > { %v405_v48 = vmul.f32 %v694_v43, %v396_v45 }
 0x15d   : > { %v414_v50 = vadd.f32 %v695_v47, %v405_v48 }
 0x15f   : > { %v415_v51 = vpack.c.bf16 %v414_v50, %v413_v49 }
 0x161   : > { %744 = vmatmul.mubr.bf16.vlgmr.msra.gmra.mrb[0].mxu0 %v415_v51 }
 0x234   : > { %v521_v53 = vpop.f32.mrb[0].mxu0 }
 0x235   : > { %v745_v54 = vpop.f32.mrb[1].mxu0  ;;  %v522_v56 = vadd.f32 %v696_v52, %v521_v53  ;;  %544 = sbr.rel (!%p908_p6) target bundleno = 580 (0x244), region = 85 }
 0x236   : > { %v524_v55 = vpop.f32.mrb[2].mxu0 }
 0x237   : > { %v525_v57 = vadd.f32 %v696_v52, %v524_v55  ;;  %v746_v58 = vpop.f32.mrb[3].mxu0 }
 0x239   : > { %v716_v59 = vpack.c.bf16 %v525_v57, %v522_v56 }
 0x23b   : > { %717 = vst [vmem:[%s360_s10] sm:$0xff] %v716_v59  }
 0x242   : > { %v565_v60 = vld [vmem:[%s360_s10] sm:$0xf]  ;;  %v567_v61 = vld [vmem:[%s360_s10 + $0x4] sm:$0xf] }
 0x243   : > { %566 = vst [vmem:[%s549_s14] sm:$0xf] %v565_v60  ;;  %568 = vst [vmem:[%s549_s14 + $0xc] sm:$0xf] %v567_v61 }
 0x244 PF: > { %s15_s22 = sadd.s32 1, %s839_s22   ;;  %s1001_s18 = smov %s827_s19 }
 0x245   : > { %p12_p12 = scmp.ge.s32.totalorder %s15_s22, 5   ;;  %s1002_s19 = smov %s913_s28 }
 0x246   : > { %s1003_s20 = smov %s835_s21  ;;  %s1004_s21 = smov %s1006_s23 }
 0x247   :  { %14 = sbr.rel (!%p12_p12) target bundleno = 3 (0x3), region = 163 }

// kernel: transunet_forward.23
= control target key start
LH: loop header
LB: loop body
LE: loop exit
PB: predicated region body
PF: predicated region fallthrough
CT: control target
= control target key end

     0   :  { %s909_s1 = inlined_call_operand.vmem [shape: bf16[768,128], index: 1, kind: input, shape index: {}]   ;;  %s910_s0 = inlined_call_operand.vmem [shape: bf16[8,768], index: 0, kind: input, shape index: {}]   ;;  %s911_s2 = inlined_call_operand.vmem [shape: f32[1,128], index: 2, kind: input, shape index: {}]   ;;  %s912_s3 = inlined_call_operand.vmem [shape: f32[8,128], index: 3, kind: output, shape index: {}]  }
   0x1   :  { %v676_v0 = vld [vmem:[%s909_s1 + $0x40] sm:$0xff]   ;;  %v680_v4 = vld [vmem:[%s909_s1 + $0x48] sm:$0xff]   ;;  %v684_v8 = vld [vmem:[%s909_s1 + $0x50] sm:$0xff]  }
   0x2   :  { %v677_v1 = vld [vmem:[%s909_s1] sm:$0xff]   ;;  %610 = vmatprep.subr.bf16.mxu0 %v676_v0  ;;  %v681_v5 = vld [vmem:[%s909_s1 + $0x8] sm:$0xff]   ;;  %v685_v9 = vld [vmem:[%s909_s1 + $0x10] sm:$0xff]  }
   0x3   :  { %v678_v2 = vld [vmem:[%s909_s1 + $0xc0] sm:$0xff]   ;;  %611 = vmatpush3.bf16.msra.mxu0 %v677_v1  ;;  %v682_v6 = vld [vmem:[%s909_s1 + $0xc8] sm:$0xff]   ;;  %v686_v10 = vld [vmem:[%s909_s1 + $0xd0] sm:$0xff]  }
   0x4   :  { %v679_v3 = vld [vmem:[%s909_s1 + $0x80] sm:$0xff]   ;;  %632 = vmatprep.subr.bf16.mxu1 %v678_v2  ;;  %612 = vmatprep.subr.bf16.mxu0 %v680_v4  ;;  %v683_v7 = vld [vmem:[%s909_s1 + $0x88] sm:$0xff]   ;;  %v687_v11 = vld [vmem:[%s909_s1 + $0x90] sm:$0xff]  }
   0x5   :  { %633 = vmatpush3.bf16.msra.mxu1 %v679_v3  ;;  %v688_v12 = vld [vmem:[%s909_s1 + $0x58] sm:$0xff]   ;;  %v692_v16 = vld [vmem:[%s909_s1 + $0x60] sm:$0xff]   ;;  %v696_v20 = vld [vmem:[%s909_s1 + $0x68] sm:$0xff]  }
   0x6   :  { %634 = vmatprep.subr.bf16.mxu1 %v682_v6  ;;  %v689_v13 = vld [vmem:[%s909_s1 + $0x18] sm:$0xff]   ;;  %v693_v17 = vld [vmem:[%s909_s1 + $0x20] sm:$0xff]   ;;  %v697_v21 = vld [vmem:[%s909_s1 + $0x28] sm:$0xff]  }
   0x7   :  { %613 = vmatpush3.bf16.msra.mxu0 %v681_v5  ;;  %v690_v14 = vld [vmem:[%s909_s1 + $0xd8] sm:$0xff]   ;;  %v694_v18 = vld [vmem:[%s909_s1 + $0xe0] sm:$0xff]   ;;  %v698_v22 = vld [vmem:[%s909_s1 + $0xe8] sm:$0xff]  }
   0x8   :  { %614 = vmatprep.subr.bf16.mxu0 %v684_v8  ;;  %v691_v15 = vld [vmem:[%s909_s1 + $0x98] sm:$0xff]   ;;  %v695_v19 = vld [vmem:[%s909_s1 + $0xa0] sm:$0xff]   ;;  %v699_v23 = vld [vmem:[%s909_s1 + $0xa8] sm:$0xff]  }
   0x9   :  { %635 = vmatpush3.bf16.msra.mxu1 %v683_v7  ;;  %v700_v24 = vld [vmem:[%s909_s1 + $0x70] sm:$0xff]   ;;  %v704_v28 = vld [vmem:[%s909_s1 + $0x78] sm:$0xff]   ;;  %v15_v31 = vld [vmem:[%s910_s0] sm:$0xff] }
   0xa   :  { %636 = vmatprep.subr.bf16.mxu1 %v686_v10  ;;  %v701_v25 = vld [vmem:[%s909_s1 + $0x30] sm:$0xff]   ;;  %v705_v29 = vld [vmem:[%s909_s1 + $0x38] sm:$0xff]   ;;  %v556_v32 = vcombine.low %v15_v31, %v15_v31  ;;  %v557_v33 = vcombine.high %v15_v31, %v15_v31  ;;  %v710_v35 = vld [vmem:[%s909_s1 + $0x140] sm:$0xff]  }
   0xb   :  { %615 = vmatpush3.bf16.msra.mxu0 %v685_v9  ;;  %v702_v26 = vld [vmem:[%s909_s1 + $0xf0] sm:$0xff]   ;;  %v706_v30 = vld [vmem:[%s909_s1 + $0xf8] sm:$0xff]   ;;  %v16_v36 = vld [vmem:[%s910_s0 + $0x8] sm:$0xff] }
   0xc   :  { %616 = vmatprep.subr.bf16.mxu0 %v688_v12  ;;  %v703_v27 = vld [vmem:[%s909_s1 + $0xb0] sm:$0xff]   ;;  %v709_v34 = vld [vmem:[%s909_s1 + $0xb8] sm:$0xff]   ;;  %462 = vmatprep.mubr.bf16.mxu0 %v557_v33  ;;  %v558_v37 = vcombine.low %v16_v36, %v16_v36  ;;  %v559_v38 = vcombine.high %v16_v36, %v16_v36  ;;  %v713_v39 = vld [vmem:[%s909_s1 + $0x100] sm:$0xff]  }
   0xd   :  { %637 = vmatpush3.bf16.msra.mxu1 %v687_v11  ;;  %v714_v40 = vld [vmem:[%s909_s1 + $0x148] sm:$0xff]   ;;  %v716_v42 = vld [vmem:[%s909_s1 + $0x150] sm:$0xff]   ;;  %v718_v44 = vld [vmem:[%s909_s1 + $0x158] sm:$0xff]  }
   0xe   :  { %638 = vmatprep.subr.bf16.mxu1 %v690_v14  ;;  %502 = vmatprep.mubr.bf16.mxu1 %v559_v38  ;;  %v715_v41 = vld [vmem:[%s909_s1 + $0x108] sm:$0xff]   ;;  %v717_v43 = vld [vmem:[%s909_s1 + $0x110] sm:$0xff]   ;;  %v719_v45 = vld [vmem:[%s909_s1 + $0x118] sm:$0xff]  }
   0xf   :  { %617 = vmatpush3.bf16.msra.mxu0 %v689_v13  ;;  %v720_v46 = vld [vmem:[%s909_s1 + $0x160] sm:$0xff]   ;;  %v17_v48 = vld [vmem:[%s910_s0 + $0x10] sm:$0xff]  ;;  %v722_v49 = vld [vmem:[%s909_s1 + $0x168] sm:$0xff]  }
  0x10   :  { %618 = vmatprep.subr.bf16.mxu0 %v692_v16  ;;  %v721_v47 = vld [vmem:[%s909_s1 + $0x120] sm:$0xff]   ;;  %v561_v50 = vcombine.high %v17_v48, %v17_v48  ;;  %v723_v51 = vld [vmem:[%s909_s1 + $0x128] sm:$0xff]   ;;  %v724_v52 = vld [vmem:[%s909_s1 + $0x170] sm:$0xff]   ;;  %v560_v56 = vcombine.low %v17_v48, %v17_v48 }
  0x11   :  { %639 = vmatpush3.bf16.msra.mxu1 %v691_v15  ;;  %v725_v53 = vld [vmem:[%s909_s1 + $0x130] sm:$0xff]   ;;  %v726_v54 = vld [vmem:[%s909_s1 + $0x178] sm:$0xff]   ;;  %v555_v58 = vld [vmem:[%s911_s2] ss:$0 sm:$0xff] }
  0x12   :  { %640 = vmatprep.subr.bf16.mxu1 %v694_v18  ;;  %v727_v55 = vld [vmem:[%s909_s1 + $0x138] sm:$0xff]  }
  0x13   :  { %619 = vmatpush3.bf16.msra.mxu0 %v693_v17 }
  0x14   :  { %620 = vmatprep.subr.bf16.mxu0 %v696_v20 }
  0x15   :  { %641 = vmatpush3.bf16.msra.mxu1 %v695_v19 }
  0x16   :  { %642 = vmatprep.subr.bf16.mxu1 %v698_v22 }
  0x17   :  { %621 = vmatpush3.bf16.msra.mxu0 %v697_v21 }
  0x18   :  { %622 = vmatprep.subr.bf16.mxu0 %v700_v24 }
  0x19   :  { %643 = vmatpush3.bf16.msra.mxu1 %v699_v23 }
  0x1a   :  { %644 = vmatprep.subr.bf16.mxu1 %v702_v26 }
  0x1b   :  { %623 = vmatpush3.bf16.msra.mxu0 %v701_v25 }
  0x1c   :  { %624 = vmatprep.subr.bf16.mxu0 %v704_v28 }
  0x1d   :  { %645 = vmatpush3.bf16.msra.mxu1 %v703_v27 }
  0x1e   :  { %646 = vmatprep.subr.bf16.mxu1 %v706_v30 }
  0x1f   :  { %625 = vmatpush3.bf16.msra.mxu0 %v705_v29 }
  0x20   :  { %654 = vmatprep.subr.bf16.mxu0 %v710_v35 }
  0x21   :  { %647 = vmatpush3.bf16.msra.mxu1 %v709_v34 }
  0x22   :  { %463 = vmatmul.mubr.bf16.vlgmr.msra.gmra.mrb[0].mxu0 %v556_v32 }
  0x23   :  { %655 = vmatpush3.bf16.msra.mxu0 %v713_v39  ;;  %542 = vmatprep.mubr.bf16.mxu0 %v561_v50 }
  0x24   :  { %503 = vmatmul.mubr.bf16.vlgmr.msra.gmra.mrb[0].mxu1 %v558_v37  ;;  %656 = vmatprep.subr.bf16.mxu0 %v714_v40 }
  0x27   :  { %657 = vmatpush3.bf16.msra.mxu0 %v715_v41 }
  0x28   :  { %658 = vmatprep.subr.bf16.mxu0 %v716_v42 }
  0x2b   :  { %659 = vmatpush3.bf16.msra.mxu0 %v717_v43 }
  0x2c   :  { %660 = vmatprep.subr.bf16.mxu0 %v718_v44 }
  0x2f   :  { %661 = vmatpush3.bf16.msra.mxu0 %v719_v45 }
  0x30   :  { %662 = vmatprep.subr.bf16.mxu0 %v720_v46 }
  0x33   :  { %663 = vmatpush3.bf16.msra.mxu0 %v721_v47 }
  0x34   :  { %664 = vmatprep.subr.bf16.mxu0 %v722_v49 }
  0x37   :  { %665 = vmatpush3.bf16.msra.mxu0 %v723_v51 }
  0x38   :  { %666 = vmatprep.subr.bf16.mxu0 %v724_v52 }
  0x3b   :  { %667 = vmatpush3.bf16.msra.mxu0 %v725_v53 }
  0x3c   :  { %668 = vmatprep.subr.bf16.mxu0 %v726_v54 }
  0x3f   :  { %669 = vmatpush3.bf16.msra.mxu0 %v727_v55 }
  0x42   :  { %543 = vmatmul.mubr.bf16.vlgmr.msra.gmra.mrb[4].mxu0 %v560_v56 }
  0xf5   :  { %v626_v57 = vpop.f32.mrb[0].mxu0 }
  0xf6   :  { %v627_v59 = vpop.f32.mrb[1].mxu0 }
  0xf7   :  { %v628_v60 = vadd.f32 %v627_v59, %v626_v57  ;;  %v629_v61 = vpop.f32.mrb[2].mxu0  ;;  %v648_v62 = vpop.f32.mrb[0].mxu1 }
  0xf8   :  { %v630_v63 = vpop.f32.mrb[3].mxu0  ;;  %v649_v0 = vpop.f32.mrb[1].mxu1 }
  0xf9   :  { %v465_v1 = vadd.f32 %v628_v60, %v555_v58  ;;  %v650_v2 = vadd.f32 %v649_v0, %v648_v62  ;;  %v651_v3 = vpop.f32.mrb[2].mxu1 }
  0xfa   :  { %v652_v4 = vpop.f32.mrb[3].mxu1 }
  0xfb   :  { %v505_v5 = vadd.f32 %v650_v2, %v465_v1 }
 0x115   :  { %v670_v6 = vpop.f32.mrb[4].mxu0 }
 0x116   :  { %v671_v7 = vpop.f32.mrb[5].mxu0 }
 0x117   :  { %v672_v8 = vadd.f32 %v671_v7, %v670_v6  ;;  %v673_v9 = vpop.f32.mrb[6].mxu0 }
 0x118   :  { %v674_v10 = vpop.f32.mrb[7].mxu0 }
 0x119   :  { %v545_v11 = vadd.f32 %v672_v8, %v505_v5 }
 0x11b   :  { %550 = vst [vmem:[%s912_s3] sm:$0xff] %v545_v11 }

// kernel: transunet_forward.25
= control target key start
LH: loop header
LB: loop body
LE: loop exit
PB: predicated region body
PF: predicated region fallthrough
CT: control target
= control target key end

     0   :  { %s779_s12 = smov 0   ;;  %s781_s13 = smov 0   ;;  %s848_s0 = inlined_call_operand.vmem [shape: bf16[2,5,384], index: 0, kind: input, shape index: {}, may-alias: {0,1,2}]   ;;  %s849_s1 = inlined_call_operand.vmem [shape: bf16[2,5,384], index: 1, kind: input, shape index: {}, may-alias: {0,1,2}]   ;;  %s850_s2 = inlined_call_operand.vmem [shape: bf16[2,5,384], index: 2, kind: input, shape index: {}, may-alias: {0,1,2}]   ;;  %s851_s3 = inlined_call_operand.vmem [shape: bf16[2,5,128], index: 3, kind: output, shape index: {}]  }
   0x1   :  { %s783_s14 = smov 0  }
   0x2 LB: > { %s25_s15 = sadd.s32 1, %s749_s13  ;;  %p639_p0 = scmp.ge.s32.totalorder %s753_s14, 1  ;;  %s753_s14 = sphi %s783_s14, %s13_s14   ;;  %s749_s13 = sphi %s781_s13, %s853_s13   ;;  %s745_s12 = sphi %s779_s12, %s852_s12  }
   0x3   : > { %p27_p1 = scmp.ge.s32.totalorder %s25_s15, 2  ;;  %p194_p2 = scmp.lt.s32.totalorder %s753_s14, 3 }
   0x5   : > { %s855_s15 = smov (%p27_p1, %s25_s15), 0  ;;  %p195_p3 = pnand %p639_p0, %p194_p2 }
   0x6   : > { %p241_p4 = scmp.lt.s32.totalorder (!%p195_p3), %s745_s12, 1  ;;  %v755_v0 = vmov (!%p195_p3), 0.0   ;;  %vm756_vm0 = vmmov (!%p195_p3), 0   ;;  %vm280_vm1 = vcmask (!%p195_p3), 523264   ;;  %vm327_vm2 = vcmask (!%p195_p3), 36864   ;;  %s757_s24 = smov (!%p195_p3), 64  }
   0x7   : > { %198 = sbr.rel (%p195_p3) target bundleno = 1424 (0x590), region = 32  ;;  %665 = vmatprep.subr.bf16.mxu0 (!%p195_p3), %v755_v0  ;;  %667 = vmatprep.mubr.msk.bf16.mxu0 (!%p195_p3), %vm756_vm0, %v755_v0  ;;  %vm344_vm3 = vcmask (!%p195_p3), 1041408   ;;  %vm345_vm4 = vcmask (!%p195_p3), 1042432   ;;  %v758_v16 = vmov (!%p195_p3), 65535   ;;  %vm340_vm5 = vcmask (!%p195_p3), 39936  }
   0x8   : > { %671 = vmatprep.subr.bf16.mxu1 (!%p195_p3), %v755_v0  ;;  %673 = vmatprep.mubr.msk.bf16.mxu1 (!%p195_p3), %vm756_vm0, %v755_v0  ;;  %v346_v17 = vsel (!%p195_p3), %vm344_vm3, 4294967295, %v758_v16  ;;  %vm517_vm6 = vsmask.f32 (!%p195_p3), 2304 }
   0x9   : > { %v347_v19 = vsel (!%p195_p3), %vm345_vm4, %v346_v17, 0  ;;  %vm518_vm7 = vmand (!%p195_p3), %vm345_vm4, %vm517_vm6 }
   0xe   : > { %s857_s12 = smov (!%p241_p4, %s745_s12), 1 }
   0xf   : > { %s802_s16 = smul.u32 12, %s857_s12  ;;  %s643_s29 = sshll.u32 %s857_s12, 2 }
  0x10   : > { %s275_s5 = scalar_lea.vmem %s851_s3, %s643_s29 }
  0x11   : > { %s654_s17 = sadd.s32 4, %s802_s16  ;;  %s248_s23 = scalar_lea.vmem %s848_s0, %s802_s16  ;;  %v519_v54 = vld [vmem:[%s275_s5] sm:$0x7] }
  0x12   : > { %s257_s20 = scalar_lea.vmem %s849_s1, %s654_s17  ;;  %v277_v3 = vld [vmem:[%s248_s23] sm:$0x7]  ;;  %s656_s25 = sadd.s32 8, %s802_s16 }
  0x13   : > { %v278_v1 = vld [vmem:[%s257_s20] sm:$0x7]  ;;  %v646_v10 = vcombine.low %v277_v3, %v277_v3  ;;  %s267_s28 = scalar_lea.vmem %s850_s2, %s656_s25 }
  0x14   : > { %v285_v2 = vsel %vm280_vm1, %v278_v1, 0  ;;  %v647_v9 = vcombine.low %v278_v1, %v278_v1  ;;  %v279_v18 = vld [vmem:[%s267_s28] sm:$0x7] }
  0x15   : > { %666 = vmatpush3.bf16.xpose.msra.mxu0 %v285_v2  ;;  %v349_v20 = vand.u32 %v347_v19, %v279_v18  ;;  %v649_v37 = vcombine.low %v279_v18, %v279_v18 }
  0x16   : > { %683 = vmatprep.subr.bf16.mxu0 %v755_v0  ;;  %399 = vrot.lane.b32.xlu1 %v647_v9, %s757_s24 }
  0x17   : > { %672 = vmatpush3.bf16.msra.mxu1 %v349_v20 }
  0x18   : > { %677 = vmatprep.subr.bf16.mxu1 %v755_v0 }
  0x1a   : > { %394 = vrot.lane.b32.xlu1 %v646_v10, %s757_s24 }
  0x1c   : > { %668 = vmatmul.mubr.msk.bf16.vlgmr.msra.gmra.mrb[0].mxu0 %vm280_vm1, %v277_v3 }
  0x1d   : > { %685 = vmatprep.mubr.msk.bf16.mxu0 %vm756_vm0, %v755_v0 }
  0x88   : > { %v400_v23 = vpop.permute.xlu1 %399 }
  0x89   : > { %v405_v25 = vsel %vm280_vm1, %v400_v23, 0 }
  0x8c   : > { %v395_v27 = vpop.permute.xlu1 %394 }
  0xef   : > { %v321_v4 = vpop.f32.mrb[0].mxu0 }
  0xf0   : > { %v669_v5 = vpop.f32.mrb[1].mxu0  ;;  %v328_v6 = vsel %vm327_vm2, %v321_v4, -inf }
  0xf1   : > { %329 = vmax.xlane.f32.xlu0 %v328_v6  ;;  %v324_v7 = vpop.f32.mrb[2].mxu0 }
  0xf2   : > { %v670_v8 = vpop.f32.mrb[3].mxu0 }
 0x17e   : > { %v330_v11 = vpop.xlane.xlu0 %329 }
 0x17f   : > { %v331_v12 = vsub.f32 %v321_v4, %v330_v11 }
 0x181   : > { %v332_v13 = vmul.f32 1.442695, %v331_v12 }
 0x183   : > { %723 = vpow2.f32 %v332_v13 }
 0x18d   : > { %v724_v14 = vpop.eup %723 }
 0x18e   : > { %v334_v15 = vsel %vm327_vm2, %v724_v14, 0.0 }
 0x18f   : > { %335 = vadd.xlane.f32.xlu0 %v334_v15 }
 0x21c   : > { %v336_v21 = vpop.xlane.xlu0 %335 }
 0x21d   : > { %725 = vrcp.f32 %v336_v21 }
 0x227   : > { %v726_v22 = vpop.eup %725 }
 0x228   : > { %v338_v24 = vmul.f32 %v726_v22, %v724_v14 }
 0x22a   : > { %v339_v26 = vpack.c.bf16 %v338_v24, %v338_v24 }
 0x22c   : > { %674 = vmatmul.mubr.msk.bf16.vlgmr.msra.gmra.mrb[0].mxu1 %vm340_vm5, %v339_v26 }
 0x22d   : > { %678 = vmatpush3.bf16.xpose.msra.mxu1 %v405_v25  ;;  %679 = vmatprep.mubr.msk.bf16.mxu1 %vm756_vm0, %v755_v0 }
 0x234   : > { %680 = vmatmul.mubr.msk.bf16.vlgmr.msra.gmra.mrb[4].mxu1 %vm280_vm1, %v395_v27 }
 0x2ff   : > { %v385_v28 = vpop.f32.mrb[0].mxu1 }
 0x300   : > { %v675_v29 = vpop.f32.mrb[1].mxu1 }
 0x301   : > { %v388_v30 = vpop.f32.mrb[2].mxu1 }
 0x302   : > { %v676_v31 = vpop.f32.mrb[3].mxu1 }
 0x307   : > { %v441_v32 = vpop.f32.mrb[4].mxu1 }
 0x308   : > { %v681_v33 = vpop.f32.mrb[5].mxu1  ;;  %v447_v34 = vsel %vm327_vm2, %v441_v32, -inf }
 0x309   : > { %448 = vmax.xlane.f32.xlu0 %v447_v34  ;;  %v444_v35 = vpop.f32.mrb[6].mxu1 }
 0x30a   : > { %v682_v36 = vpop.f32.mrb[7].mxu1 }
 0x31f   : > { %462 = vrot.lane.b32.xlu0 %v649_v37, %s757_s24 }
 0x396   : > { %v449_v38 = vpop.xlane.xlu0 %448 }
 0x397   : > { %v450_v39 = vsub.f32 %v441_v32, %v449_v38 }
 0x399   : > { %v451_v40 = vmul.f32 1.442695, %v450_v39 }
 0x39a   : > { %v463_v43 = vpop.permute.xlu0 %462 }
 0x39b   : > { %727 = vpow2.f32 %v451_v40  ;;  %v468_v44 = vand.u32 %v463_v43, %v347_v19 }
 0x39d   : > { %684 = vmatpush3.bf16.msra.mxu0 %v468_v44 }
 0x3a5   : > { %v728_v41 = vpop.eup %727 }
 0x3a6   : > { %v453_v42 = vsel %vm327_vm2, %v728_v41, 0.0 }
 0x3a7   : > { %454 = vadd.xlane.f32.xlu1 %v453_v42 }
 0x434   : > { %v455_v45 = vpop.xlane.xlu1 %454 }
 0x435   : > { %729 = vrcp.f32 %v455_v45 }
 0x43f   : > { %v730_v46 = vpop.eup %729 }
 0x440   : > { %v457_v47 = vmul.f32 %v730_v46, %v728_v41 }
 0x442   : > { %v458_v48 = vpack.c.bf16 %v457_v47, %v457_v47 }
 0x444   : > { %686 = vmatmul.mubr.msk.bf16.vlgmr.msra.gmra.mrb[4].mxu0 %vm340_vm5, %v458_v48 }
 0x517   : > { %v504_v49 = vpop.f32.mrb[4].mxu0 }
 0x518   : > { %511 = vrot.lane.b32.xlu0 %v504_v49, %s757_s24  ;;  %v687_v50 = vpop.f32.mrb[5].mxu0 }
 0x519   : > { %v507_v51 = vpop.f32.mrb[6].mxu0 }
 0x51a   : > { %v688_v52 = vpop.f32.mrb[7].mxu0 }
 0x58a   : > { %v512_v53 = vpop.permute.xlu0 %511 }
 0x58b   : > { %v514_v55 = vsel %vm280_vm1, %v385_v28, %v512_v53 }
 0x58c   : > { %v515_v56 = vpack.c.bf16 %v514_v55, %v514_v55 }
 0x58e   : > { %v520_v57 = vsel %vm518_vm7, %v515_v56, %v519_v54 }
 0x58f   : > { %521 = vst [vmem:[%s275_s5] sm:$0x7] %v520_v57 }
 0x590 PF: > { %s13_s14 = sadd.s32 1, %s753_s14   ;;  %s852_s12 = smov %s749_s13 }
 0x591   : > { %p10_p5 = scmp.ge.s32.totalorder %s13_s14, 4   ;;  %s853_s13 = smov %s855_s15 }
 0x593   :  { %12 = sbr.rel (!%p10_p5) target bundleno = 2 (0x2), region = 68 }

// kernel: transunet_forward.26
= control target key start
LH: loop header
LB: loop body
LE: loop exit
PB: predicated region body
PF: predicated region fallthrough
CT: control target
= control target key end

     0   :  { %s637_s15 = smov 0   ;;  %s639_s16 = smov 0   ;;  %s704_s0 = inlined_call_operand.vmem [shape: bf16[16,128], index: 0, kind: input, shape index: {}]   ;;  %s705_s1 = inlined_call_operand.vmem [shape: bf16[128,128], index: 1, kind: input, shape index: {}]   ;;  %s706_s2 = inlined_call_operand.vmem [shape: f32[1,128], index: 2, kind: input, shape index: {}]   ;;  %s707_s3 = inlined_call_operand.vmem [shape: f32[16,128], index: 3, kind: input, shape index: {}]   ;;  %s708_s4 = inlined_call_operand.vmem [shape: f32[16,128], index: 4, kind: output, shape index: {}]  }
   0x1   :  { %s641_s17 = smov 0  }
   0x2 LB: > { %s26_s18 = sadd.s32 1, %s604_s16  ;;  %p508_p0 = scmp.ge.s32.totalorder %s608_s17, 1  ;;  %s608_s17 = sphi %s641_s17, %s14_s17   ;;  %s604_s16 = sphi %s639_s16, %s710_s16   ;;  %s600_s15 = sphi %s637_s15, %s709_s15  }
   0x3   : > { %p28_p1 = scmp.ge.s32.totalorder %s26_s18, 2  ;;  %p206_p2 = scmp.lt.s32.totalorder %s608_s17, 3 }
   0x5   : > { %s712_s18 = smov (%p28_p1, %s26_s18), 0  ;;  %p207_p3 = pnand %p508_p0, %p206_p2 }
   0x6   : > { %v578_v0 = vld [vmem:[%s705_s1] sm:$0xff] (!%p207_p3)   ;;  %v610_v1 = vmov (!%p207_p3), 0.0   ;;  %v579_v2 = vld [vmem:[%s705_s1 + $0x8] sm:$0xff] (!%p207_p3)   ;;  %vm611_vm0 = vmmov (!%p207_p3), 0   ;;  %v580_v3 = vld [vmem:[%s705_s1 + $0x10] sm:$0xff] (!%p207_p3)   ;;  %p247_p4 = scmp.lt.s32.totalorder (!%p207_p3), %s600_s15, 1 }
   0x7   : > { %210 = sbr.rel (%p207_p3) target bundleno = 256 (0x100), region = 36  ;;  %532 = vmatprep.subr.bf16.mxu0 (!%p207_p3), %v610_v1  ;;  %548 = vmatprep.mubr.msk.bf16.mxu0 (!%p207_p3), %vm611_vm0, %v610_v1  ;;  %v581_v4 = vld [vmem:[%s705_s1 + $0x18] sm:$0xff] (!%p207_p3)   ;;  %v582_v5 = vld [vmem:[%s705_s1 + $0x20] sm:$0xff] (!%p207_p3)   ;;  %v583_v6 = vld [vmem:[%s705_s1 + $0x28] sm:$0xff] (!%p207_p3)  }
   0x8   : > { %533 = vmatpush3.bf16.msra.mxu0 (!%p207_p3), %v578_v0  ;;  %v584_v7 = vld [vmem:[%s705_s1 + $0x30] sm:$0xff] (!%p207_p3)   ;;  %v585_v8 = vld [vmem:[%s705_s1 + $0x38] sm:$0xff] (!%p207_p3)   ;;  %v512_v10 = vld [vmem:[%s706_s2] ss:$0 sm:$0xff] (!%p207_p3) }
   0x9   : > { %534 = vmatprep.subr.bf16.mxu0 (!%p207_p3), %v610_v1 }
   0xc   : > { %535 = vmatpush3.bf16.msra.mxu0 (!%p207_p3), %v579_v2 }
   0xd   : > { %536 = vmatprep.subr.bf16.mxu0 (!%p207_p3), %v610_v1 }
   0xe   : > { %s714_s15 = smov (!%p247_p4, %s600_s15), 1 }
   0xf   : > { %s509_s7 = sshll.u32 %s714_s15, 2  ;;  %s510_s13 = sshll.u32 %s714_s15, 3 }
  0x10   : > { %537 = vmatpush3.bf16.msra.mxu0 %v580_v3  ;;  %s250_s12 = scalar_lea.vmem %s704_s0, %s509_s7  ;;  %s264_s20 = scalar_lea.vmem %s707_s3, %s510_s13 }
  0x11   : > { %538 = vmatprep.subr.bf16.mxu0 %v610_v1  ;;  %v273_v9 = vld [vmem:[%s250_s12] sm:$0xf]  ;;  %s271_s25 = scalar_lea.vmem %s708_s4, %s510_s13 }
  0x12   : > { %v385_v12 = vld [vmem:[%s264_s20] sm:$0xff] }
  0x14   : > { %539 = vmatpush3.bf16.msra.mxu0 %v581_v4 }
  0x15   : > { %540 = vmatprep.subr.bf16.mxu0 %v610_v1 }
  0x18   : > { %541 = vmatpush3.bf16.msra.mxu0 %v582_v5 }
  0x19   : > { %542 = vmatprep.subr.bf16.mxu0 %v610_v1 }
  0x1c   : > { %543 = vmatpush3.bf16.msra.mxu0 %v583_v6 }
  0x1d   : > { %544 = vmatprep.subr.bf16.mxu0 %v610_v1 }
  0x20   : > { %545 = vmatpush3.bf16.msra.mxu0 %v584_v7 }
  0x21   : > { %546 = vmatprep.subr.bf16.mxu0 %v610_v1 }
  0x24   : > { %547 = vmatpush3.bf16.msra.mxu0 %v585_v8 }
  0x27   : > { %549 = vmatmul.mubr.bf16.vlgmr.msra.gmra.mrb[0].mxu0 %v273_v9 }
  0xfa   : > { %v379_v11 = vpop.f32.mrb[0].mxu0 }
  0xfb   : > { %v380_v13 = vadd.f32 %v512_v10, %v379_v11  ;;  %v550_v14 = vpop.f32.mrb[1].mxu0 }
  0xfc   : > { %v382_v15 = vpop.f32.mrb[2].mxu0 }
  0xfd   : > { %v386_v16 = vadd.f32 %v385_v12, %v380_v13  ;;  %v551_v17 = vpop.f32.mrb[3].mxu0 }
  0xff   : > { %387 = vst [vmem:[%s271_s25] sm:$0xff] %v386_v16 }
 0x100 PF: > { %s14_s17 = sadd.s32 1, %s608_s17   ;;  %s709_s15 = smov %s604_s16 }
 0x101   : > { %p11_p5 = scmp.ge.s32.totalorder %s14_s17, 4   ;;  %s710_s16 = smov %s712_s18 }
 0x103   :  { %13 = sbr.rel (!%p11_p5) target bundleno = 2 (0x2), region = 75 }

// kernel: transunet_forward.27
= control target key start
LH: loop header
LB: loop body
LE: loop exit
PB: predicated region body
PF: predicated region fallthrough
CT: control target
= control target key end

     0   :  { %s948_s18 = smov 0   ;;  %s950_s19 = smov 0   ;;  %s1076_s0 = inlined_call_operand.vmem [shape: f32[16,128], index: 0, kind: input, shape index: {}]   ;;  %s1077_s1 = inlined_call_operand.vmem [shape: f32[1,128], index: 1, kind: input, shape index: {}]   ;;  %s1078_s2 = inlined_call_operand.vmem [shape: f32[1,128], index: 2, kind: input, shape index: {}]   ;;  %s1079_s3 = inlined_call_operand.vmem [shape: bf16[128,512], index: 3, kind: input, shape index: {}]   ;;  %s1080_s4 = inlined_call_operand.vmem [shape: f32[1,512], index: 4, kind: input, shape index: {}]   ;;  %s1081_s5 = inlined_call_operand.vmem [shape: bf16[16,512], index: 5, kind: output, shape index: {}]  }
   0x1   :  { %s952_s20 = smov 0   ;;  %s954_s21 = smov 0  }
   0x2   :  { %s956_s22 = smov 0  }
   0x3 LB: > { %s24_s23 = sadd.s32 1, %s911_s21  ;;  %s759_s24 = sadd.s32 4294967295, %s915_s22   ;;  %s915_s22 = sphi %s956_s22, %s15_s22   ;;  %s911_s21 = sphi %s954_s21, %s1086_s21   ;;  %s907_s20 = sphi %s952_s20, %s1085_s20   ;;  %s903_s19 = sphi %s950_s19, %s1084_s19   ;;  %s899_s18 = sphi %s948_s18, %s1083_s18  }
   0x4   : > { %p25_p0 = scmp.ge.s32.totalorder %s24_s23, 2  ;;  %p109_p1 = scmp.ne.s32.totalorder %s903_s19, %s899_s18 }
   0x5   : > { %p110_p2 = scmp.eq.s32.totalorder %s915_s22, 0  ;;  %p167_p4 = scmp.eq.s32.totalorder %s759_s24, 1 }
   0x6   : > { %s1088_s23 = smov (%p25_p0, %s24_s23), 0  ;;  %s102_s26 = sadd.s32 1, %s903_s19 }
   0x7   : > { %p111_p3 = por %p110_p2, %p109_p1  ;;  %s99_s25 = ssub.s32 %s911_s21, %s1088_s23 }
   0x8   : > { %p100_p5 = scmp.eq.s32.totalorder %s99_s25, 0  ;;  %p983_p6 = por %p167_p4, %p109_p1 }
   0x9   : > { %p763_p7 = scmp.ge.s32.totalorder %s915_s22, 2 }
   0xa   : > { %s988_s28 = scalar_select %p100_p5, %s903_s19, %s102_s26  }
   0xb   : > { %204 = sbr.rel (%p763_p7) target bundleno = 30 (0x1e), region = 28 }
  0x12   : > { %207 = sbr.rel (!%p111_p3) target bundleno = 30 (0x1e), region = 32  ;;  %s209_s29 = sand.u32 (%p111_p3), 1, %s903_s19  }
  0x13   : > { %s796_s30 = sshll.u32 (%p111_p3), %s911_s21, 3  ;;  %s764_s6 = sshll.u32 (%p111_p3), %s209_s29, 7 }
  0x14   : > { %s996_s9 = scalar_lea.vmem (%p111_p3), %s1079_s3, %s796_s30  ;;  %s211_s10 = scalar_lea.vmem (%p111_p3), [#allocation2], %s764_s6 }
  0x15   : > { %v272_v0 = vld [vmem:[%s996_s9] sm:$0xff] (%p111_p3)  ;;  %v274_v1 = vld [vmem:[%s996_s9 + $0x10] sm:$0xff] (%p111_p3) }
  0x16   : > { %v276_v2 = vld [vmem:[%s996_s9 + $0x20] sm:$0xff] (%p111_p3)  ;;  %273 = vst [vmem:[%s211_s10] sm:$0xff] (%p111_p3), %v272_v0  ;;  %275 = vst [vmem:[%s211_s10 + $0x8] sm:$0xff] (%p111_p3), %v274_v1  ;;  %v278_v3 = vld [vmem:[%s996_s9 + $0x30] sm:$0xff] (%p111_p3) }
  0x17   : > { %277 = vst [vmem:[%s211_s10 + $0x10] sm:$0xff] (%p111_p3), %v276_v2  ;;  %v280_v4 = vld [vmem:[%s996_s9 + $0x40] sm:$0xff] (%p111_p3)  ;;  %v282_v5 = vld [vmem:[%s996_s9 + $0x50] sm:$0xff] (%p111_p3)  ;;  %279 = vst [vmem:[%s211_s10 + $0x18] sm:$0xff] (%p111_p3), %v278_v3 }
  0x18   : > { %281 = vst [vmem:[%s211_s10 + $0x20] sm:$0xff] (%p111_p3), %v280_v4  ;;  %283 = vst [vmem:[%s211_s10 + $0x28] sm:$0xff] (%p111_p3), %v282_v5  ;;  %v284_v6 = vld [vmem:[%s996_s9 + $0x60] sm:$0xff] (%p111_p3)  ;;  %v286_v7 = vld [vmem:[%s996_s9 + $0x70] sm:$0xff] (%p111_p3) }
  0x19   : > { %v288_v8 = vld [vmem:[%s996_s9 + $0x80] sm:$0xff]  ;;  %285 = vst [vmem:[%s211_s10 + $0x30] sm:$0xff] %v284_v6  ;;  %287 = vst [vmem:[%s211_s10 + $0x38] sm:$0xff] %v286_v7  ;;  %v290_v9 = vld [vmem:[%s996_s9 + $0x90] sm:$0xff] }
  0x1a   : > { %289 = vst [vmem:[%s211_s10 + $0x40] sm:$0xff] %v288_v8  ;;  %v292_v10 = vld [vmem:[%s996_s9 + $0xa0] sm:$0xff]  ;;  %v294_v11 = vld [vmem:[%s996_s9 + $0xb0] sm:$0xff]  ;;  %291 = vst [vmem:[%s211_s10 + $0x48] sm:$0xff] %v290_v9 }
  0x1b   : > { %293 = vst [vmem:[%s211_s10 + $0x50] sm:$0xff] %v292_v10  ;;  %295 = vst [vmem:[%s211_s10 + $0x58] sm:$0xff] %v294_v11  ;;  %v296_v12 = vld [vmem:[%s996_s9 + $0xc0] sm:$0xff]  ;;  %v298_v13 = vld [vmem:[%s996_s9 + $0xd0] sm:$0xff] }
  0x1c   : > { %v300_v14 = vld [vmem:[%s996_s9 + $0xe0] sm:$0xff]  ;;  %297 = vst [vmem:[%s211_s10 + $0x60] sm:$0xff] %v296_v12  ;;  %299 = vst [vmem:[%s211_s10 + $0x68] sm:$0xff] %v298_v13  ;;  %v302_v15 = vld [vmem:[%s996_s9 + $0xf0] sm:$0xff] }
  0x1d   : > { %301 = vst [vmem:[%s211_s10 + $0x70] sm:$0xff] %v300_v14  ;;  %303 = vst [vmem:[%s211_s10 + $0x78] sm:$0xff] %v302_v15 }
  0x1e PF: > { %p767_p8 = scmp.ge.s32.totalorder %s915_s22, 1  ;;  %p316_p9 = scmp.lt.s32.totalorder %s915_s22, 3 }
  0x20   : > { %p317_p10 = pnand %p767_p8, %p316_p9 }
  0x21   : > { %v373_v16 = vld [vmem:[%s1076_s0] sm:$0xff] (!%p317_p10)  ;;  %v374_v17 = vld [vmem:[%s1076_s0 + $0x8] sm:$0xff] (!%p317_p10)  ;;  %s323_s15 = sand.u32 (!%p317_p10), 1, %s899_s18   ;;  %v917_v37 = vmov (!%p317_p10), 0   ;;  %s770_s30 = sshll.u32 (!%p317_p10), %s907_s20, 1  ;;  %v435_v60 = vlaneseq (!%p317_p10) }
  0x22   : > { %320 = sbr.rel (%p317_p10) target bundleno = 604 (0x25c), region = 74  ;;  %375 = vadd.xlane.f32.xlu0 (!%p317_p10), %v373_v16  ;;  %s768_s16 = sshll.u32 (!%p317_p10), %s323_s15, 7  ;;  %557 = vmatprep.mubr.bf16.mxu0 (!%p317_p10), %v917_v37  ;;  %v771_v51 = vld [vmem:[%s1077_s1] ss:$0 sm:$0xff] (!%p317_p10) }
  0x23   : > { %s1025_s17 = scalar_lea.vmem (!%p317_p10), [#allocation2], %s768_s16  ;;  %v772_v55 = vld [vmem:[%s1078_s2] ss:$0 sm:$0xff] (!%p317_p10)  ;;  %p366_p11 = scmp.lt.s32.totalorder (!%p317_p10), %s770_s30, 3  ;;  %v436_v61 = vshrl.u32 (!%p317_p10), %v435_v60, 7 }
  0x24   : > { %v841_v18 = vld [vmem:[%s1025_s17 + $0x4] ss:$8 sps:$4 sm:$0xff] (!%p317_p10)   ;;  %v843_v19 = vld [vmem:[%s1025_s17] ss:$8 sps:$4 sm:$0xff] (!%p317_p10)   ;;  %v844_v28 = vld [vmem:[%s1025_s17 + $0x14] ss:$8 sps:$4 sm:$0xff] (!%p317_p10)  }
  0x25   : > { %525 = vmatprep.subr.bf16.mxu0 (!%p317_p10), %v841_v18  ;;  %v846_v29 = vld [vmem:[%s1025_s17 + $0x10] ss:$8 sps:$4 sm:$0xff] (!%p317_p10)   ;;  %v847_v30 = vld [vmem:[%s1025_s17 + $0x24] ss:$8 sps:$4 sm:$0xff] (!%p317_p10)   ;;  %v849_v31 = vld [vmem:[%s1025_s17 + $0x20] ss:$8 sps:$4 sm:$0xff] (!%p317_p10)  }
  0x26   : > { %377 = vadd.xlane.f32.xlu0 (!%p317_p10), %v374_v17  ;;  %526 = vmatpush1.bf16.msra.mxu0 (!%p317_p10), %v843_v19  ;;  %v850_v32 = vld [vmem:[%s1025_s17 + $0x34] ss:$8 sps:$4 sm:$0xff] (!%p317_p10)   ;;  %v852_v33 = vld [vmem:[%s1025_s17 + $0x30] ss:$8 sps:$4 sm:$0xff] (!%p317_p10)   ;;  %v853_v34 = vld [vmem:[%s1025_s17 + $0x44] ss:$8 sps:$4 sm:$0xff] (!%p317_p10)  }
  0x27   : > { %527 = vmatprep.subr.bf16.mxu0 (!%p317_p10), %v844_v28  ;;  %v855_v35 = vld [vmem:[%s1025_s17 + $0x40] ss:$8 sps:$4 sm:$0xff] (!%p317_p10)   ;;  %v856_v36 = vld [vmem:[%s1025_s17 + $0x54] ss:$8 sps:$4 sm:$0xff] (!%p317_p10)   ;;  %v858_v38 = vld [vmem:[%s1025_s17 + $0x50] ss:$8 sps:$4 sm:$0xff] (!%p317_p10)  }
  0x28   : > { %v859_v39 = vld [vmem:[%s1025_s17 + $0x64] ss:$8 sps:$4 sm:$0xff] (!%p317_p10)   ;;  %v861_v40 = vld [vmem:[%s1025_s17 + $0x60] ss:$8 sps:$4 sm:$0xff] (!%p317_p10)   ;;  %v862_v41 = vld [vmem:[%s1025_s17 + $0x74] ss:$8 sps:$4 sm:$0xff] (!%p317_p10)  }
  0x29   : > { %v864_v42 = vld [vmem:[%s1025_s17 + $0x70] ss:$8 sps:$4 sm:$0xff]   ;;  %s1090_s30 = smov (!%p366_p11, %s770_s30), 3  ;;  %v437_v62 = vsub.s32 0, %v436_v61  ;;  %v441_v0 = vsub.s32 1, %v436_v61  ;;  %s769_s9 = sshll.u32 %s323_s15, 4 }
  0x2a   : > { %528 = vmatpush1.bf16.msra.mxu0 %v846_v29  ;;  %s368_s8 = scalar_lea.vmem %s1080_s4, %s1090_s30  ;;  %s357_s10 = scalar_lea.vmem [#allocation3], %s769_s9 }
  0x2b   : > { %529 = vmatprep.subr.bf16.mxu0 %v847_v30  ;;  %v433_v63 = vld [vmem:[%s368_s8] sm:$0x3]  ;;  %s799_s18 = sshll.u32 (%p983_p6), %s907_s20, 3 }
  0x2c   : > { %v438_v1 = vrot.slane %v433_v63, %v437_v62  ;;  %v442_v2 = vrot.slane %v433_v63, %v441_v0  ;;  %s630_s13 = scalar_lea.vmem (%p983_p6), %s1081_s5, %s799_s18 }
  0x2e   : > { %530 = vmatpush1.bf16.msra.mxu0 %v849_v31 }
  0x2f   : > { %531 = vmatprep.subr.bf16.mxu0 %v850_v32 }
  0x32   : > { %532 = vmatpush1.bf16.msra.mxu0 %v852_v33 }
  0x33   : > { %533 = vmatprep.subr.bf16.mxu0 %v853_v34 }
  0x36   : > { %534 = vmatpush1.bf16.msra.mxu0 %v855_v35 }
  0x37   : > { %535 = vmatprep.subr.bf16.mxu0 %v856_v36 }
  0x3a   : > { %536 = vmatpush1.bf16.msra.mxu0 %v858_v38 }
  0x3b   : > { %537 = vmatprep.subr.bf16.mxu0 %v859_v39 }
  0x3e   : > { %538 = vmatpush1.bf16.msra.mxu0 %v861_v40 }
  0x3f   : > { %539 = vmatprep.subr.bf16.mxu0 %v862_v41 }
  0x42   : > { %540 = vmatpush1.bf16.msra.mxu0 %v864_v42 }
  0xaf   : > { %v376_v20 = vpop.xlane.xlu0 %375 }
  0xb0   : > { %v380_v21 = vmul.f32 0.0078125, %v376_v20 }
  0xb2   : > { %v382_v22 = vsub.f32 %v373_v16, %v380_v21 }
  0xb3   : > { %v378_v23 = vpop.xlane.xlu0 %377 }
  0xb4   : > { %v381_v24 = vmul.f32 0.0078125, %v378_v23  ;;  %v384_v25 = vmul.f32 %v382_v22, %v382_v22 }
  0xb6   : > { %v383_v26 = vsub.f32 %v374_v17, %v381_v24  ;;  %386 = vadd.xlane.f32.xlu1 %v384_v25 }
  0xb8   : > { %v385_v27 = vmul.f32 %v383_v26, %v383_v26 }
  0xba   : > { %388 = vadd.xlane.f32.xlu1 %v385_v27 }
 0x143   : > { %v387_v43 = vpop.xlane.xlu1 %386 }
 0x144   : > { %v390_v44 = vmul.f32 0.0078125, %v387_v43 }
 0x146   : > { %v392_v45 = vadd.f32 1e-06, %v390_v44 }
 0x147   : > { %v389_v46 = vpop.xlane.xlu1 %388 }
 0x148   : > { %865 = vrsqrt.f32 %v392_v45  ;;  %v391_v47 = vmul.f32 0.0078125, %v389_v46 }
 0x14a   : > { %v393_v48 = vadd.f32 1e-06, %v391_v47 }
 0x14c   : > { %867 = vrsqrt.f32 %v393_v48 }
 0x152   : > { %v866_v49 = vpop.eup %865 }
 0x153   : > { %v396_v50 = vmul.f32 %v866_v49, %v382_v22 }
 0x155   : > { %v405_v54 = vmul.f32 %v771_v51, %v396_v50 }
 0x156   : > { %v868_v52 = vpop.eup %867 }
 0x157   : > { %v397_v53 = vmul.f32 %v868_v52, %v383_v26  ;;  %v414_v57 = vadd.f32 %v772_v55, %v405_v54 }
 0x159   : > { %v406_v56 = vmul.f32 %v771_v51, %v397_v53 }
 0x15b   : > { %v415_v58 = vadd.f32 %v772_v55, %v406_v56 }
 0x15d   : > { %v416_v59 = vpack.c.bf16 %v415_v58, %v414_v57 }
 0x15f   : > { %558 = vmatmul.mubr.bf16.vlgmr.msra.gmra.mrb[0].mxu0 %v416_v59 }
 0x232   : > { %v559_v3 = vpop.f32.mrb[0].mxu0 }
 0x233   : > { %v560_v4 = vadd.f32 %v559_v3, %v438_v1  ;;  %v561_v5 = vpop.f32.mrb[1].mxu0 }
 0x234   : > { %v562_v6 = vadd.f32 %v561_v5, %v442_v2  ;;  %v563_v7 = vpop.f32.mrb[2].mxu0 }
 0x235   : > { %v572_v8 = vmul.f32 %v560_v4, %v560_v4  ;;  %v564_v9 = vadd.f32 %v563_v7, %v438_v1  ;;  %v565_v10 = vpop.f32.mrb[3].mxu0  ;;  %v568_v33 = vmul.f32 0.5, %v560_v4 }
 0x236   : > { %v573_v11 = vmul.f32 %v562_v6, %v562_v6  ;;  %v566_v12 = vadd.f32 %v565_v10, %v442_v2  ;;  %v569_v36 = vmul.f32 0.5, %v562_v6 }
 0x237   : > { %v576_v13 = vmul.f32 %v572_v8, %v560_v4  ;;  %v574_v14 = vmul.f32 %v564_v9, %v564_v9  ;;  %v570_v40 = vmul.f32 0.5, %v564_v9 }
 0x238   : > { %v577_v15 = vmul.f32 %v573_v11, %v562_v6  ;;  %v575_v16 = vmul.f32 %v566_v12, %v566_v12  ;;  %v571_v43 = vmul.f32 0.5, %v566_v12 }
 0x239   : > { %v580_v17 = vmul.f32 0.044715, %v576_v13  ;;  %v578_v18 = vmul.f32 %v574_v14, %v564_v9 }
 0x23a   : > { %v581_v19 = vmul.f32 0.044715, %v577_v15  ;;  %v579_v20 = vmul.f32 %v575_v16, %v566_v12 }
 0x23b   : > { %v584_v21 = vadd.f32 %v580_v17, %v560_v4  ;;  %v582_v22 = vmul.f32 0.044715, %v578_v18 }
 0x23c   : > { %v585_v23 = vadd.f32 %v581_v19, %v562_v6  ;;  %v583_v24 = vmul.f32 0.044715, %v579_v20 }
 0x23d   : > { %v588_v25 = vmul.f32 0.7978846, %v584_v21  ;;  %v586_v26 = vadd.f32 %v582_v22, %v564_v9 }
 0x23e   : > { %v589_v27 = vmul.f32 0.7978846, %v585_v23  ;;  %v587_v28 = vadd.f32 %v583_v24, %v566_v12 }
 0x23f   : > { %869 = vtanh.f32 %v588_v25  ;;  %v590_v29 = vmul.f32 0.7978846, %v586_v26 }
 0x240   : > { %871 = vtanh.f32 %v589_v27  ;;  %v591_v30 = vmul.f32 0.7978846, %v587_v28 }
 0x241   : > { %873 = vtanh.f32 %v590_v29 }
 0x242   : > { %875 = vtanh.f32 %v591_v30 }
 0x249   : > { %v870_v31 = vpop.eup %869 }
 0x24a   : > { %v872_v32 = vpop.eup %871  ;;  %v596_v34 = vadd.f32 1.0, %v870_v31 }
 0x24b   : > { %v874_v35 = vpop.eup %873  ;;  %v597_v37 = vadd.f32 1.0, %v872_v32 }
 0x24c   : > { %v876_v38 = vpop.eup %875  ;;  %v600_v39 = vmul.f32 %v596_v34, %v568_v33  ;;  %v598_v41 = vadd.f32 1.0, %v874_v35 }
 0x24d   : > { %v601_v42 = vmul.f32 %v597_v37, %v569_v36  ;;  %v599_v44 = vadd.f32 1.0, %v876_v38  ;;  %624 = sbr.rel (!%p983_p6) target bundleno = 604 (0x25c), region = 82 }
 0x24e   : > { %v602_v45 = vmul.f32 %v598_v41, %v570_v40 }
 0x24f   : > { %v797_v46 = vpack.c.bf16 %v601_v42, %v600_v39  ;;  %v603_v47 = vmul.f32 %v599_v44, %v571_v43 }
 0x251   : > { %616 = vst [vmem:[%s357_s10] sm:$0xff] %v797_v46  ;;  %v798_v48 = vpack.c.bf16 %v603_v47, %v602_v45 }
 0x253   : > { %617 = vst [vmem:[%s357_s10 + $0x8] sm:$0xff] %v798_v48 }
 0x258   : > { %v660_v49 = vld [vmem:[%s357_s10] sm:$0xff] }
 0x259   : > { %661 = vst [vmem:[%s630_s13] sm:$0xff] %v660_v49 }
 0x25a   : > { %v662_v50 = vld [vmem:[%s357_s10 + $0x8] sm:$0xff] }
 0x25b   : > { %663 = vst [vmem:[%s630_s13 + $0x10] sm:$0xff] %v662_v50 }
 0x25c PF: > { %s15_s22 = sadd.s32 1, %s915_s22   ;;  %s1083_s18 = smov %s903_s19 }
 0x25d   : > { %p12_p12 = scmp.ge.s32.totalorder %s15_s22, 4   ;;  %s1084_s19 = smov %s988_s28 }
 0x25e   : > { %s1085_s20 = smov %s911_s21  ;;  %s1086_s21 = smov %s1088_s23 }
 0x25f   :  { %14 = sbr.rel (!%p12_p12) target bundleno = 3 (0x3), region = 157 }

// kernel: transunet_forward.28
= control target key start
LH: loop header
LB: loop body
LE: loop exit
PB: predicated region body
PF: predicated region fallthrough
CT: control target
= control target key end

     0   :  { %s956_s15 = smov 0   ;;  %s958_s16 = smov 0   ;;  %s1099_s0 = inlined_call_operand.vmem [shape: bf16[16,512], index: 0, kind: input, shape index: {}]   ;;  %s1100_s1 = inlined_call_operand.vmem [shape: bf16[512,128], index: 1, kind: input, shape index: {}]   ;;  %s1101_s2 = inlined_call_operand.vmem [shape: f32[1,128], index: 2, kind: input, shape index: {}]   ;;  %s1102_s3 = inlined_call_operand.vmem [shape: f32[16,128], index: 3, kind: input, shape index: {}]   ;;  %s1103_s4 = inlined_call_operand.vmem [shape: f32[16,128], index: 4, kind: output, shape index: {}]  }
   0x1   :  { %s960_s17 = smov 0  }
   0x2 LB: > { %s26_s18 = sadd.s32 1, %s925_s16  ;;  %p758_p0 = scmp.ge.s32.totalorder %s929_s17, 1  ;;  %s929_s17 = sphi %s960_s17, %s14_s17   ;;  %s925_s16 = sphi %s958_s16, %s1105_s16   ;;  %s921_s15 = sphi %s956_s15, %s1104_s15  }
   0x3   : > { %p28_p1 = scmp.ge.s32.totalorder %s26_s18, 2  ;;  %p207_p2 = scmp.lt.s32.totalorder %s929_s17, 3 }
   0x5   : > { %s1107_s18 = smov (%p28_p1, %s26_s18), 0  ;;  %p208_p3 = pnand %p758_p0, %p207_p2 }
   0x6   : > { %v871_v0 = vld [vmem:[%s1100_s1 + $0x40] sm:$0xff] (!%p208_p3)   ;;  %v875_v4 = vld [vmem:[%s1100_s1 + $0x48] sm:$0xff] (!%p208_p3)   ;;  %v879_v8 = vld [vmem:[%s1100_s1 + $0x50] sm:$0xff] (!%p208_p3)   ;;  %p249_p4 = scmp.lt.s32.totalorder (!%p208_p3), %s921_s15, 1 }
   0x7   : > { %211 = sbr.rel (%p208_p3) target bundleno = 262 (0x106), region = 36  ;;  %v872_v1 = vld [vmem:[%s1100_s1 + $0xc0] sm:$0xff] (!%p208_p3)   ;;  %803 = vmatprep.subr.bf16.mxu0 (!%p208_p3), %v871_v0  ;;  %v876_v5 = vld [vmem:[%s1100_s1 + $0xc8] sm:$0xff] (!%p208_p3)   ;;  %v880_v9 = vld [vmem:[%s1100_s1 + $0xd0] sm:$0xff] (!%p208_p3)  }
   0x8   : > { %v873_v2 = vld [vmem:[%s1100_s1] sm:$0xff] (!%p208_p3)   ;;  %825 = vmatprep.subr.bf16.mxu1 (!%p208_p3), %v872_v1  ;;  %v877_v6 = vld [vmem:[%s1100_s1 + $0x8] sm:$0xff] (!%p208_p3)   ;;  %v881_v10 = vld [vmem:[%s1100_s1 + $0x10] sm:$0xff] (!%p208_p3)  }
   0x9   : > { %v874_v3 = vld [vmem:[%s1100_s1 + $0x80] sm:$0xff] (!%p208_p3)   ;;  %804 = vmatpush3.bf16.msra.mxu0 (!%p208_p3), %v873_v2  ;;  %v878_v7 = vld [vmem:[%s1100_s1 + $0x88] sm:$0xff] (!%p208_p3)   ;;  %v882_v11 = vld [vmem:[%s1100_s1 + $0x90] sm:$0xff] (!%p208_p3)  }
   0xa   : > { %826 = vmatpush3.bf16.msra.mxu1 (!%p208_p3), %v874_v3  ;;  %805 = vmatprep.subr.bf16.mxu0 (!%p208_p3), %v875_v4  ;;  %v883_v12 = vld [vmem:[%s1100_s1 + $0x58] sm:$0xff] (!%p208_p3)   ;;  %v887_v16 = vld [vmem:[%s1100_s1 + $0x60] sm:$0xff] (!%p208_p3)   ;;  %v891_v20 = vld [vmem:[%s1100_s1 + $0x68] sm:$0xff] (!%p208_p3)  }
   0xb   : > { %827 = vmatprep.subr.bf16.mxu1 (!%p208_p3), %v876_v5  ;;  %v884_v13 = vld [vmem:[%s1100_s1 + $0xd8] sm:$0xff] (!%p208_p3)   ;;  %v888_v17 = vld [vmem:[%s1100_s1 + $0xe0] sm:$0xff] (!%p208_p3)   ;;  %v892_v21 = vld [vmem:[%s1100_s1 + $0xe8] sm:$0xff] (!%p208_p3)  }
   0xc   : > { %v885_v14 = vld [vmem:[%s1100_s1 + $0x18] sm:$0xff] (!%p208_p3)   ;;  %v889_v18 = vld [vmem:[%s1100_s1 + $0x20] sm:$0xff] (!%p208_p3)   ;;  %v893_v22 = vld [vmem:[%s1100_s1 + $0x28] sm:$0xff] (!%p208_p3)  }
   0xd   : > { %806 = vmatpush3.bf16.msra.mxu0 (!%p208_p3), %v877_v6  ;;  %v886_v15 = vld [vmem:[%s1100_s1 + $0x98] sm:$0xff] (!%p208_p3)   ;;  %v890_v19 = vld [vmem:[%s1100_s1 + $0xa0] sm:$0xff] (!%p208_p3)   ;;  %v894_v23 = vld [vmem:[%s1100_s1 + $0xa8] sm:$0xff] (!%p208_p3)  }
   0xe   : > { %828 = vmatpush3.bf16.msra.mxu1 %v878_v7  ;;  %807 = vmatprep.subr.bf16.mxu0 %v879_v8  ;;  %s1109_s15 = smov (!%p249_p4, %s921_s15), 1  ;;  %v895_v24 = vld [vmem:[%s1100_s1 + $0x70] sm:$0xff]   ;;  %v899_v28 = vld [vmem:[%s1100_s1 + $0x78] sm:$0xff]   ;;  %v763_v40 = vld [vmem:[%s1101_s2] ss:$0 sm:$0xff] }
   0xf   : > { %829 = vmatprep.subr.bf16.mxu1 %v880_v9  ;;  %v896_v25 = vld [vmem:[%s1100_s1 + $0xf0] sm:$0xff]   ;;  %s802_s29 = sshll.u32 %s1109_s15, 4  ;;  %v900_v29 = vld [vmem:[%s1100_s1 + $0xf8] sm:$0xff]   ;;  %s761_s21 = sshll.u32 %s1109_s15, 3 }
  0x10   : > { %v897_v26 = vld [vmem:[%s1100_s1 + $0x30] sm:$0xff]   ;;  %s253_s12 = scalar_lea.vmem %s1099_s0, %s802_s29  ;;  %v901_v30 = vld [vmem:[%s1100_s1 + $0x38] sm:$0xff]   ;;  %s267_s26 = scalar_lea.vmem %s1102_s3, %s761_s21 }
  0x11   : > { %808 = vmatpush3.bf16.msra.mxu0 %v881_v10  ;;  %v898_v27 = vld [vmem:[%s1100_s1 + $0xb0] sm:$0xff]   ;;  %v902_v31 = vld [vmem:[%s1100_s1 + $0xb8] sm:$0xff]   ;;  %v276_v32 = vld [vmem:[%s253_s12] sm:$0xff]  ;;  %s274_s28 = scalar_lea.vmem %s1103_s4, %s761_s21 }
  0x12   : > { %830 = vmatpush3.bf16.msra.mxu1 %v882_v11  ;;  %809 = vmatprep.subr.bf16.mxu0 %v883_v12  ;;  %v277_v33 = vld [vmem:[%s253_s12 + $0x8] sm:$0xff]  ;;  %v764_v34 = vcombine.low %v276_v32, %v276_v32  ;;  %v765_v35 = vcombine.high %v276_v32, %v276_v32  ;;  %v635_v50 = vld [vmem:[%s267_s26] sm:$0xff] }
  0x13   : > { %831 = vmatprep.subr.bf16.mxu1 %v884_v13  ;;  %v766_v36 = vcombine.low %v277_v33, %v277_v33  ;;  %v767_v37 = vcombine.high %v277_v33, %v277_v33 }
  0x14   : > { %587 = vmatprep.mubr.bf16.mxu0 %v765_v35 }
  0x15   : > { %810 = vmatpush3.bf16.msra.mxu0 %v885_v14  ;;  %627 = vmatprep.mubr.bf16.mxu1 %v767_v37 }
  0x16   : > { %832 = vmatpush3.bf16.msra.mxu1 %v886_v15  ;;  %811 = vmatprep.subr.bf16.mxu0 %v887_v16 }
  0x17   : > { %833 = vmatprep.subr.bf16.mxu1 %v888_v17 }
  0x19   : > { %812 = vmatpush3.bf16.msra.mxu0 %v889_v18 }
  0x1a   : > { %834 = vmatpush3.bf16.msra.mxu1 %v890_v19  ;;  %813 = vmatprep.subr.bf16.mxu0 %v891_v20 }
  0x1b   : > { %835 = vmatprep.subr.bf16.mxu1 %v892_v21 }
  0x1d   : > { %814 = vmatpush3.bf16.msra.mxu0 %v893_v22 }
  0x1e   : > { %836 = vmatpush3.bf16.msra.mxu1 %v894_v23  ;;  %815 = vmatprep.subr.bf16.mxu0 %v895_v24 }
  0x1f   : > { %837 = vmatprep.subr.bf16.mxu1 %v896_v25 }
  0x21   : > { %816 = vmatpush3.bf16.msra.mxu0 %v897_v26 }
  0x22   : > { %838 = vmatpush3.bf16.msra.mxu1 %v898_v27  ;;  %817 = vmatprep.subr.bf16.mxu0 %v899_v28 }
  0x23   : > { %839 = vmatprep.subr.bf16.mxu1 %v900_v29 }
  0x25   : > { %818 = vmatpush3.bf16.msra.mxu0 %v901_v30 }
  0x26   : > { %840 = vmatpush3.bf16.msra.mxu1 %v902_v31 }
  0x28   : > { %588 = vmatmul.mubr.bf16.vlgmr.msra.gmra.mrb[0].mxu0 %v764_v34 }
  0x29   : > { %628 = vmatmul.mubr.bf16.vlgmr.msra.gmra.mrb[0].mxu1 %v766_v36 }
  0xfb   : > { %v819_v38 = vpop.f32.mrb[0].mxu0 }
  0xfc   : > { %v841_v39 = vpop.f32.mrb[0].mxu1  ;;  %v820_v41 = vpop.f32.mrb[1].mxu0 }
  0xfd   : > { %v842_v42 = vpop.f32.mrb[1].mxu1  ;;  %v821_v43 = vadd.f32 %v820_v41, %v819_v38  ;;  %v822_v45 = vpop.f32.mrb[2].mxu0 }
  0xfe   : > { %v843_v44 = vadd.f32 %v842_v42, %v841_v39  ;;  %v844_v46 = vpop.f32.mrb[2].mxu1  ;;  %v823_v47 = vpop.f32.mrb[3].mxu0 }
  0xff   : > { %v845_v48 = vpop.f32.mrb[3].mxu1  ;;  %v590_v49 = vadd.f32 %v821_v43, %v763_v40 }
 0x101   : > { %v630_v51 = vadd.f32 %v843_v44, %v590_v49 }
 0x103   : > { %v636_v52 = vadd.f32 %v635_v50, %v630_v51 }
 0x105   : > { %637 = vst [vmem:[%s274_s28] sm:$0xff] %v636_v52 }
 0x106 PF: > { %s14_s17 = sadd.s32 1, %s929_s17   ;;  %s1104_s15 = smov %s925_s16 }
 0x107   : > { %p11_p5 = scmp.ge.s32.totalorder %s14_s17, 4   ;;  %s1105_s16 = smov %s1107_s18 }
 0x109   :  { %13 = sbr.rel (!%p11_p5) target bundleno = 2 (0x2), region = 75 }

// kernel: transunet_forward.34
= control target key start
LH: loop header
LB: loop body
LE: loop exit
PB: predicated region body
PF: predicated region fallthrough
CT: control target
= control target key end

     0   :  { %v221_v1 = vmov 0.0   ;;  %vm222_vm0 = vmmov 0   ;;  %vm163_vm1 = vcmask 519168   ;;  %s292_s0 = inlined_call_operand.vmem [shape: f32[8,128], index: 0, kind: input, shape index: {}]   ;;  %s293_s3 = inlined_call_operand.vmem [shape: bf16[128,64], index: 3, kind: input, shape index: {}]   ;;  %s294_s1 = inlined_call_operand.vmem [shape: f32[1,128], index: 1, kind: input, shape index: {}]   ;;  %s295_s2 = inlined_call_operand.vmem [shape: f32[1,128], index: 2, kind: input, shape index: {}]   ;;  %s296_s4 = inlined_call_operand.vmem [shape: f32[1,64], index: 4, kind: input, shape index: {}]   ;;  %s297_s5 = inlined_call_operand.vmem [shape: bf16[8,64], index: 5, kind: output, shape index: {}]  }
   0x1   :  { %v21_v0 = vld [vmem:[%s292_s0] sm:$0xff]  ;;  %189 = vmatprep.subr.bf16.mxu0 %v221_v1  ;;  %v212_v3 = vld [vmem:[%s293_s3 + $0x8] sm:$0xff]   ;;  %v213_v8 = vld [vmem:[%s293_s3 + $0x10] sm:$0xff]   ;;  %205 = vmatprep.mubr.msk.bf16.mxu0 %vm222_vm0, %v221_v1 }
   0x2   :  { %22 = vadd.xlane.f32.xlu0 %v21_v0  ;;  %v211_v2 = vld [vmem:[%s293_s3] sm:$0xff]   ;;  %v214_v9 = vld [vmem:[%s293_s3 + $0x18] sm:$0xff]   ;;  %v216_v11 = vld [vmem:[%s293_s3 + $0x28] sm:$0xff]  }
   0x3   :  { %190 = vmatpush3.bf16.msra.mxu0 %v211_v2  ;;  %v215_v10 = vld [vmem:[%s293_s3 + $0x20] sm:$0xff]   ;;  %v217_v12 = vld [vmem:[%s293_s3 + $0x30] sm:$0xff]   ;;  %v218_v13 = vld [vmem:[%s293_s3 + $0x38] sm:$0xff]  }
   0x4   :  { %191 = vmatprep.subr.bf16.mxu0 %v221_v1  ;;  %v169_v18 = vld [vmem:[%s294_s1] ss:$0 sm:$0xff] }
   0x5   :  { %v170_v20 = vld [vmem:[%s295_s2] ss:$0 sm:$0xff] }
   0x6   :  { %v171_v24 = vld [vmem:[%s296_s4] ss:$0 sm:$0xff] }
   0x7   :  { %192 = vmatpush3.bf16.msra.mxu0 %v212_v3 }
   0x8   :  { %193 = vmatprep.subr.bf16.mxu0 %v221_v1 }
   0xb   :  { %194 = vmatpush3.bf16.msra.mxu0 %v213_v8 }
   0xc   :  { %195 = vmatprep.subr.bf16.mxu0 %v221_v1 }
   0xf   :  { %196 = vmatpush3.bf16.msra.mxu0 %v214_v9 }
  0x10   :  { %197 = vmatprep.subr.bf16.mxu0 %v221_v1 }
  0x13   :  { %198 = vmatpush3.bf16.msra.mxu0 %v215_v10 }
  0x14   :  { %199 = vmatprep.subr.bf16.mxu0 %v221_v1 }
  0x17   :  { %200 = vmatpush3.bf16.msra.mxu0 %v216_v11 }
  0x18   :  { %201 = vmatprep.subr.bf16.mxu0 %v221_v1 }
  0x1b   :  { %202 = vmatpush3.bf16.msra.mxu0 %v217_v12 }
  0x1c   :  { %203 = vmatprep.subr.bf16.mxu0 %v221_v1 }
  0x1f   :  { %204 = vmatpush3.bf16.msra.mxu0 %v218_v13 }
  0x8f   :  { %v23_v4 = vpop.xlane.xlu0 %22 }
  0x90   :  { %v25_v5 = vmul.f32 0.0078125, %v23_v4 }
  0x92   :  { %v26_v6 = vsub.f32 %v21_v0, %v25_v5 }
  0x94   :  { %v27_v7 = vmul.f32 %v26_v6, %v26_v6 }
  0x96   :  { %28 = vadd.xlane.f32.xlu0 %v27_v7 }
 0x123   :  { %v29_v14 = vpop.xlane.xlu0 %28 }
 0x124   :  { %v30_v15 = vmul.f32 0.0078125, %v29_v14 }
 0x126   :  { %v31_v16 = vadd.f32 1e-06, %v30_v15 }
 0x128   :  { %219 = vrsqrt.f32 %v31_v16 }
 0x132   :  { %v220_v17 = vpop.eup %219 }
 0x133   :  { %v33_v19 = vmul.f32 %v220_v17, %v26_v6 }
 0x135   :  { %v41_v21 = vmul.f32 %v169_v18, %v33_v19 }
 0x137   :  { %v49_v22 = vadd.f32 %v170_v20, %v41_v21 }
 0x139   :  { %v50_v23 = vpack.c.bf16 %v49_v22, %v49_v22 }
 0x13b   :  { %206 = vmatmul.mubr.bf16.vlgmr.msra.gmra.mrb[0].mxu0 %v50_v23 }
 0x20e   :  { %v156_v25 = vpop.f32.mrb[0].mxu0 }
 0x20f   :  { %v157_v26 = vadd.f32 %v171_v24, %v156_v25  ;;  %v207_v27 = vpop.f32.mrb[1].mxu0 }
 0x210   :  { %v159_v28 = vpop.f32.mrb[2].mxu0 }
 0x211   :  { %v162_v29 = vpack.c.bf16 %v157_v26, %v157_v26  ;;  %v208_v30 = vpop.f32.mrb[3].mxu0 }
 0x213   :  { %164 = vst.msk [vmem:[%s297_s5] sm:$0xf] %vm163_vm1, %v162_v29 }

// kernel: transunet_forward.37
= control target key start
LH: loop header
LB: loop body
LE: loop exit
PB: predicated region body
PF: predicated region fallthrough
CT: control target
= control target key end

     0   :  { %v134_v0 = vmov 0.0   ;;  %vm135_vm0 = vmmov 0   ;;  %vm55_vm1 = vcmask 523264   ;;  %s177_s1 = inlined_call_operand.vmem [shape: bf16[64,128], index: 1, kind: input, shape index: {}]   ;;  %s178_s0 = inlined_call_operand.vmem [shape: bf16[8,64], index: 0, kind: input, shape index: {}]   ;;  %s179_s2 = inlined_call_operand.vmem [shape: f32[1,128], index: 2, kind: input, shape index: {}]   ;;  %s180_s3 = inlined_call_operand.vmem [shape: bf16[8,128], index: 3, kind: output, shape index: {}]  }
   0x1   :  { %116 = vmatprep.subr.bf16.mxu0 %v134_v0  ;;  %v130_v1 = vld [vmem:[%s177_s1] sm:$0xff]   ;;  %124 = vmatprep.mubr.msk.bf16.mxu0 %vm135_vm0, %v134_v0  ;;  %v131_v2 = vld [vmem:[%s177_s1 + $0x8] sm:$0xff]   ;;  %v132_v3 = vld [vmem:[%s177_s1 + $0x10] sm:$0xff]  }
   0x2   :  { %117 = vmatpush3.bf16.msra.mxu0 %v130_v1  ;;  %v133_v4 = vld [vmem:[%s177_s1 + $0x18] sm:$0xff]   ;;  %v15_v5 = vld [vmem:[%s178_s0] sm:$0xf] }
   0x3   :  { %118 = vmatprep.subr.bf16.mxu0 %v134_v0  ;;  %v105_v6 = vld [vmem:[%s179_s2] ss:$0 sm:$0xff] }
   0x6   :  { %119 = vmatpush3.bf16.msra.mxu0 %v131_v2 }
   0x7   :  { %120 = vmatprep.subr.bf16.mxu0 %v134_v0 }
   0xa   :  { %121 = vmatpush3.bf16.msra.mxu0 %v132_v3 }
   0xb   :  { %122 = vmatprep.subr.bf16.mxu0 %v134_v0 }
   0xe   :  { %123 = vmatpush3.bf16.msra.mxu0 %v133_v4 }
  0x11   :  { %125 = vmatmul.mubr.msk.bf16.vlgmr.msra.gmra.mrb[0].mxu0 %vm55_vm1, %v15_v5 }
  0xe4   :  { %v93_v7 = vpop.f32.mrb[0].mxu0 }
  0xe5   :  { %v94_v8 = vadd.f32 %v105_v6, %v93_v7  ;;  %v126_v9 = vpop.f32.mrb[1].mxu0 }
  0xe6   :  { %v96_v10 = vpop.f32.mrb[2].mxu0 }
  0xe7   :  { %v99_v11 = vpack.c.bf16 %v94_v8, %v94_v8  ;;  %v127_v12 = vpop.f32.mrb[3].mxu0 }
  0xe9   :  { %100 = vst [vmem:[%s180_s3] sm:$0xf] %v99_v11 }

// kernel: transunet_forward.35
= control target key start
LH: loop header
LB: loop body
LE: loop exit
PB: predicated region body
PF: predicated region fallthrough
CT: control target
= control target key end

     0   :  { %s1107_s12 = smov 0   ;;  %s1334_s0 = inlined_call_operand.vmem [shape: bf16[2,4,4,64], index: 0, kind: input, shape index: {}]   ;;  %s1335_s1 = inlined_call_operand.vmem [shape: bf16[576,128], index: 1, kind: input, shape index: {}]   ;;  %s1336_s2 = inlined_call_operand.vmem [shape: f32[1,128], index: 2, kind: input, shape index: {}]   ;;  %s1337_s3 = inlined_call_operand.vmem [shape: bf16[2,2,2,128], index: 3, kind: output, shape index: {}]  }
   0x1 LB: > { %s908_s13 = sadd.s32 4294967295, %s1080_s12   ;;  %p912_p0 = scmp.ge.s32.totalorder %s1080_s12, 1  ;;  %s1080_s12 = sphi %s1107_s12, %s13_s12  }
   0x2   : > { %p137_p1 = scmp.lt.s32.totalorder %s1080_s12, 3 }
   0x4   : > { %p138_p2 = pnand %p912_p0, %p137_p1 }
   0x5   : > { %p160_p3 = scmp.lt.s32.totalorder (!%p138_p2), %s908_s13, 1  ;;  %v179_v0 = vlaneseq (!%p138_p2)  ;;  %vm192_vm0 = vsmask.f32 (!%p138_p2), 256  ;;  %v1082_v1 = vmov (!%p138_p2), 1966171168   ;;  %v1038_v5 = vld [vmem:[%s1335_s1 + $0x40] sm:$0xff] (!%p138_p2)  }
   0x6   : > { %141 = sbr.rel (%p138_p2) target bundleno = 386 (0x182), region = 32  ;;  %v177_v2 = vunpack.c.l.s4 (!%p138_p2), %v1082_v1  ;;  %vm193_vm1 = vsmask.f32 (!%p138_p2), 1284  ;;  %vm195_vm2 = vsmask.f32 (!%p138_p2), 2312  ;;  %964 = vmatprep.subr.bf16.mxu0 (!%p138_p2), %v1038_v5  ;;  %v1039_v15 = vld [vmem:[%s1335_s1] sm:$0xff] (!%p138_p2)  }
   0x7   : > { %vm197_vm3 = vsmask.f32 (!%p138_p2), 3340  ;;  %v1117_v3 = vshrl.u32 (!%p138_p2), %v179_v0, 7  ;;  %vm194_vm4 = vmor (!%p138_p2), %vm192_vm0, %vm193_vm1  ;;  %vm199_vm5 = vsmask.f32 (!%p138_p2), 4368  ;;  %965 = vmatpush3.bf16.msra.mxu0 (!%p138_p2), %v1039_v15  ;;  %v1040_v24 = vld [vmem:[%s1335_s1 + $0x48] sm:$0xff] (!%p138_p2)  }
   0x8   : > { %v178_v4 = vunpack.c.0.s8 (!%p138_p2), %v177_v2  ;;  %vm196_vm6 = vmor (!%p138_p2), %vm194_vm4, %vm195_vm2  ;;  %vm201_vm7 = vsmask.f32 (!%p138_p2), 5396  ;;  %vm203_vm9 = vsmask.f32 (!%p138_p2), 6424  ;;  %vm205_vm11 = vsmask.f32 (!%p138_p2), 7452  ;;  %966 = vmatprep.subr.bf16.mxu0 (!%p138_p2), %v1040_v24 }
   0x9   : > { %vm198_vm8 = vmor (!%p138_p2), %vm196_vm6, %vm197_vm3  ;;  %v1041_v29 = vld [vmem:[%s1335_s1 + $0x8] sm:$0xff] (!%p138_p2)   ;;  %v1042_v30 = vld [vmem:[%s1335_s1 + $0xc0] sm:$0xff] (!%p138_p2)   ;;  %s1083_s30 = smov (!%p138_p2), 64   ;;  %vm404_vm15 = vcmask (!%p138_p2), 523264   ;;  %vm1085_vm0 = vmmov (!%p138_p2), 0  }
   0xa   : > { %v1127_v6 = vsub.s32 (!%p138_p2), %v178_v4, %v1117_v3  ;;  %vm200_vm10 = vmor (!%p138_p2), %vm198_vm8, %vm199_vm5  ;;  %v1043_v35 = vld [vmem:[%s1335_s1 + $0x80] sm:$0xff] (!%p138_p2)   ;;  %986 = vmatprep.subr.bf16.mxu1 (!%p138_p2), %v1042_v30  ;;  %v1044_v46 = vld [vmem:[%s1335_s1 + $0x50] sm:$0xff] (!%p138_p2)  }
   0xb   : > { %vm202_vm12 = vmor (!%p138_p2), %vm200_vm10, %vm201_vm7  ;;  %967 = vmatpush3.bf16.msra.mxu0 (!%p138_p2), %v1041_v29  ;;  %987 = vmatpush3.bf16.msra.mxu1 (!%p138_p2), %v1043_v35  ;;  %v1045_v49 = vld [vmem:[%s1335_s1 + $0x10] sm:$0xff] (!%p138_p2)   ;;  %v1046_v54 = vld [vmem:[%s1335_s1 + $0xc8] sm:$0xff] (!%p138_p2)  }
   0xc   : > { %vm204_vm13 = vmor (!%p138_p2), %vm202_vm12, %vm203_vm9  ;;  %968 = vmatprep.subr.bf16.mxu0 (!%p138_p2), %v1044_v46  ;;  %v1047_v57 = vld [vmem:[%s1335_s1 + $0x88] sm:$0xff] (!%p138_p2)   ;;  %988 = vmatprep.subr.bf16.mxu1 (!%p138_p2), %v1046_v54  ;;  %v1048_v61 = vld [vmem:[%s1335_s1 + $0x58] sm:$0xff] (!%p138_p2)  }
   0xd   : > { %s1341_s13 = smov (!%p160_p3, %s908_s13), 1  ;;  %vm1144_vm14 = vmor %vm204_vm13, %vm205_vm11  ;;  %v1049_v0 = vld [vmem:[%s1335_s1 + $0x18] sm:$0xff]   ;;  %v1050_v5 = vld [vmem:[%s1335_s1 + $0xd0] sm:$0xff]  }
   0xe   : > { %s963_s14 = sshll.u32 %s1341_s13, 3  ;;  %v1057_v15 = vld [vmem:[%s1335_s1 + $0x28] sm:$0xff]   ;;  %v1066_v24 = vld [vmem:[%s1335_s1 + $0xf0] sm:$0xff]   ;;  %s915_s18 = sshll.u32 %s1341_s13, 1 }
   0xf   : > { %s164_s19 = scalar_lea.vmem %s1334_s0, %s963_s14  ;;  %969 = vmatpush3.bf16.msra.mxu0 %v1045_v49  ;;  %989 = vmatpush3.bf16.msra.mxu1 %v1047_v57  ;;  %v1062_v20 = vld [vmem:[%s1335_s1 + $0xe8] sm:$0xff]   ;;  %s168_s21 = scalar_lea.vmem %s1337_s3, %s915_s18 }
  0x10   : > { %v171_v7 = vld [vmem:[%s164_s19 + $0x2] sm:$0x3]  ;;  %v172_v8 = vld [vmem:[%s164_s19 + $0x4] sm:$0x3]  ;;  %v173_v9 = vld [vmem:[%s164_s19 + $0x6] sm:$0x3]  ;;  %970 = vmatprep.subr.bf16.mxu0 %v1048_v61  ;;  %990 = vmatprep.subr.bf16.mxu1 %v1050_v5 }
  0x11   : > { %v1130_v10 = vrot.slane %v172_v8, %v1127_v6  ;;  %v308_v11 = vcombine.low %v171_v7, %v172_v8  ;;  %v170_v12 = vld [vmem:[%s164_s19] sm:$0x3]  ;;  %v190_v13 = vrot.slane %v171_v7, %v1127_v6  ;;  %v1135_v14 = vrot.slane %v173_v9, %v1127_v6 }
  0x12   : > { %v182_v16 = vrot.slane %v170_v12, %v1127_v6  ;;  %v261_v17 = vcombine.low %v170_v12, %v171_v7  ;;  %v357_v18 = vcombine.low %v172_v8, %v173_v9  ;;  %v1051_v7 = vld [vmem:[%s1335_s1 + $0x90] sm:$0xff]   ;;  %v1052_v9 = vld [vmem:[%s1335_s1 + $0x60] sm:$0xff]   ;;  %v1054_v12 = vld [vmem:[%s1335_s1 + $0xd8] sm:$0xff]  }
  0x13   : > { %v315_v19 = vrot.slane %v308_v11, %v1127_v6  ;;  %v233_v21 = vcombine.high %v1130_v10, %v1130_v10  ;;  %v235_v22 = vshrl.u32 %v1130_v10, 16  ;;  %v251_v23 = vcombine.high %v1135_v14, %v1135_v14  ;;  %971 = vmatpush3.bf16.msra.mxu0 %v1049_v0  ;;  %991 = vmatpush3.bf16.msra.mxu1 %v1051_v7 }
  0x14   : > { %v253_v25 = vshrl.u32 %v1135_v14, 16  ;;  %v191_v26 = vcombine.high %v190_v13, %v190_v13  ;;  %v217_v27 = vshrl.u32 %v190_v13, 16  ;;  %v183_v28 = vcombine.high %v182_v16, %v182_v16  ;;  %972 = vmatprep.subr.bf16.mxu0 %v1052_v9  ;;  %992 = vmatprep.subr.bf16.mxu1 %v1054_v12 }
  0x15   : > { %v322_v31 = vrot.slane %v315_v19, %v1127_v6  ;;  %v240_v32 = vshll.u32 %v233_v21, 16  ;;  %v258_v33 = vshll.u32 %v251_v23, 16  ;;  %v208_v34 = vshrl.u32 %v182_v16, 16  ;;  %v1061_v19 = vld [vmem:[%s1335_s1 + $0x30] sm:$0xff]   ;;  %v1063_v21 = vld [vmem:[%s1335_s1 + $0xa8] sm:$0xff]   ;;  %v1065_v23 = vld [vmem:[%s1335_s1 + $0x38] sm:$0xff]  }
  0x16   : > { %v222_v36 = vshll.u32 %v191_v26, 16  ;;  %v213_v37 = vshll.u32 %v183_v28, 16  ;;  %v921_v38 = vcombine.high %v190_v13, %v1130_v10  ;;  %v920_v39 = vcombine.high %v182_v16, %v190_v13  ;;  %v1055_v13 = vld [vmem:[%s1335_s1 + $0x98] sm:$0xff]   ;;  %v1058_v16 = vld [vmem:[%s1335_s1 + $0xe0] sm:$0xff]  }
  0x17   : > { %323 = vrot.lane.b32.xlu0 %v322_v31, %s1083_s30  ;;  %v242_v40 = vsel %vm1144_vm14, %v235_v22, %v240_v32  ;;  %v260_v41 = vsel %vm1144_vm14, %v253_v25, %v258_v33  ;;  %v1174_v42 = vrot.slane %v261_v17, %v1127_v6  ;;  %v1197_v55 = vrot.slane %v357_v18, %v1127_v6  ;;  %v1059_v17 = vld [vmem:[%s1335_s1 + $0xa0] sm:$0xff]   ;;  %v1060_v18 = vld [vmem:[%s1335_s1 + $0x70] sm:$0xff]   ;;  %v1064_v22 = vld [vmem:[%s1335_s1 + $0x78] sm:$0xff]  }
  0x18   : > { %v372_v43 = vcombine.low %v242_v40, %v260_v41  ;;  %v224_v44 = vsel %vm1144_vm14, %v217_v27, %v222_v36  ;;  %v215_v45 = vsel %vm1144_vm14, %v208_v34, %v213_v37  ;;  %v1187_v50 = vrot.slane %v920_v39, %v1127_v6  ;;  %993 = vmatpush3.bf16.msra.mxu1 %v1055_v13  ;;  %v1067_v25 = vld [vmem:[%s1335_s1 + $0xb0] sm:$0xff]   ;;  %v1068_v27 = vld [vmem:[%s1335_s1 + $0xf8] sm:$0xff]   ;;  %v1069_v32 = vld [vmem:[%s1335_s1 + $0x100] sm:$0xff]  }
  0x19   : > { %v325_v47 = vcombine.low %v224_v44, %v242_v40  ;;  %v276_v48 = vcombine.low %v215_v45, %v224_v44  ;;  %v275_v51 = vrot.slane %v1174_v42, %v1127_v6  ;;  %v347_v53 = vrot.slane %v921_v38, %v1127_v6  ;;  %994 = vmatprep.subr.bf16.mxu1 %v1058_v16  ;;  %v1070_v28 = vld [vmem:[%s1335_s1 + $0xb8] sm:$0xff]   ;;  %v1071_v37 = vld [vmem:[%s1335_s1 + $0x108] sm:$0xff]   ;;  %v1072_v39 = vld [vmem:[%s1335_s1 + $0x110] sm:$0xff]  }
  0x1a   : > { %v379_v52 = vrot.slane %v372_v43, %v1127_v6  ;;  %v307_v58 = vrot.slane %v1187_v50, %v1127_v6  ;;  %v371_v62 = vrot.slane %v1197_v55, %v1127_v6  ;;  %v922_v2 = vcombine.high %v1130_v10, %v1135_v14  ;;  %v1053_v10 = vld [vmem:[%s1335_s1 + $0x20] sm:$0xff]   ;;  %v1056_v14 = vld [vmem:[%s1335_s1 + $0x68] sm:$0xff]   ;;  %v1073_v40 = vld [vmem:[%s1335_s1 + $0x118] sm:$0xff]  }
  0x1b   : > { %v283_v56 = vrot.slane %v276_v48, %v1127_v6  ;;  %v1206_v59 = vrot.slane %v325_v47, %v1127_v6  ;;  %v354_v4 = vrot.slane %v347_v53, %v1127_v6  ;;  %973 = vmatpush3.bf16.msra.mxu0 %v1053_v10  ;;  %v1084_v26 = vmov 0.0   ;;  %v923_v43 = vld [vmem:[%s1336_s2] ss:$0 sm:$0xff] }
  0x1c   : > { %v386_v60 = vrot.slane %v379_v52, %v1127_v6  ;;  %v1232_v8 = vrot.slane %v922_v2, %v1127_v6  ;;  %974 = vmatprep.subr.bf16.mxu0 %v1056_v14  ;;  %995 = vmatpush3.bf16.msra.mxu1 %v1059_v17 }
  0x1d   : > { %v290_v63 = vrot.slane %v283_v56, %v1127_v6  ;;  %v339_v1 = vrot.slane %v1206_v59, %v1127_v6  ;;  %996 = vmatprep.subr.bf16.mxu1 %v1062_v20 }
  0x1e   : > { %387 = vrot.lane.b32.xlu1 %v386_v60, %s1083_s30  ;;  %v403_v11 = vrot.slane %v1232_v8, %v1127_v6  ;;  %v1086_v6 = vmov 1983009808  }
  0x1f   : > { %291 = vrot.lane.b32.xlu0 %v290_v63, %s1083_s30  ;;  %975 = vmatpush3.bf16.msra.mxu0 %v1057_v15  ;;  %v842_v54 = vunpack.c.l.s4 %v1086_v6 }
  0x20   : > { %976 = vmatprep.subr.bf16.mxu0 %v1060_v18  ;;  %997 = vmatpush3.bf16.msra.mxu1 %v1063_v21 }
  0x21   : > { %998 = vmatprep.subr.bf16.mxu1 %v1066_v24  ;;  %v843_v55 = vunpack.c.0.s8 %v842_v54 }
  0x22   : > { %355 = vrot.lane.b32.xlu1 %v354_v4, %s1083_s30 }
  0x23   : > { %977 = vmatpush3.bf16.msra.mxu0 %v1061_v19 }
  0x24   : > { %978 = vmatprep.subr.bf16.mxu0 %v1064_v22  ;;  %999 = vmatpush3.bf16.msra.mxu1 %v1067_v25 }
  0x25   : > { %1000 = vmatprep.subr.bf16.mxu1 %v1068_v27 }
  0x27   : > { %979 = vmatpush3.bf16.msra.mxu0 %v1065_v23 }
  0x28   : > { %1013 = vmatprep.subr.bf16.mxu0 %v1084_v26  ;;  %1001 = vmatpush3.bf16.msra.mxu1 %v1070_v28 }
  0x89   : > { %v324_v29 = vpop.permute.xlu0 %323 }
  0x8a   : > { %v411_v30 = vsel %vm404_vm15, %v307_v58, %v324_v29  ;;  %v846_v58 = vsub.s32 %v843_v55, %v1117_v3 }
  0x8b   : > { %751 = vmatprep.mubr.bf16.mxu0 %v411_v30 }
  0x90   : > { %v388_v31 = vpop.permute.xlu1 %387 }
  0x91   : > { %v292_v33 = vpop.permute.xlu0 %291  ;;  %v419_v34 = vsel %vm404_vm15, %v371_v62, %v388_v31 }
  0x92   : > { %v407_v35 = vsel %vm404_vm15, %v275_v51, %v292_v33  ;;  %791 = vmatprep.mubr.bf16.mxu1 %v419_v34 }
  0x93   : > { %752 = vmatmul.mubr.bf16.vlgmr.msra.gmra.mrb[0].mxu0 %v407_v35 }
  0x94   : > { %1014 = vmatpush3.bf16.msra.mxu0 %v1069_v32  ;;  %v356_v36 = vpop.permute.xlu1 %355  ;;  %1021 = vmatprep.mubr.msk.bf16.mxu0 %vm1085_vm0, %v1084_v26 }
  0x95   : > { %1015 = vmatprep.subr.bf16.mxu0 %v1084_v26  ;;  %v415_v38 = vsel %vm404_vm15, %v339_v1, %v356_v36 }
  0x96   : > { %792 = vmatmul.mubr.bf16.vlgmr.msra.gmra.mrb[0].mxu1 %v415_v38 }
  0x98   : > { %1016 = vmatpush3.bf16.msra.mxu0 %v1071_v37 }
  0x99   : > { %1017 = vmatprep.subr.bf16.mxu0 %v1084_v26 }
  0x9c   : > { %1018 = vmatpush3.bf16.msra.mxu0 %v1072_v39 }
  0x9d   : > { %1019 = vmatprep.subr.bf16.mxu0 %v1084_v26 }
  0xa0   : > { %1020 = vmatpush3.bf16.msra.mxu0 %v1073_v40 }
  0xa3   : > { %1022 = vmatmul.mubr.msk.bf16.vlgmr.msra.gmra.mrb[4].mxu0 %vm404_vm15, %v403_v11 }
 0x166   : > { %v980_v41 = vpop.f32.mrb[0].mxu0 }
 0x167   : > { %v981_v42 = vpop.f32.mrb[1].mxu0 }
 0x168   : > { %v982_v44 = vadd.f32 %v981_v42, %v980_v41  ;;  %v983_v45 = vpop.f32.mrb[2].mxu0 }
 0x169   : > { %v984_v46 = vpop.f32.mrb[3].mxu0  ;;  %v1002_v47 = vpop.f32.mrb[0].mxu1 }
 0x16a   : > { %v1003_v48 = vpop.f32.mrb[1].mxu1  ;;  %v754_v49 = vadd.f32 %v982_v44, %v923_v43 }
 0x16b   : > { %v1004_v50 = vadd.f32 %v1003_v48, %v1002_v47  ;;  %v1005_v51 = vpop.f32.mrb[2].mxu1 }
 0x16c   : > { %v1006_v52 = vpop.f32.mrb[3].mxu1 }
 0x16d   : > { %v794_v53 = vadd.f32 %v1004_v50, %v754_v49 }
 0x176   : > { %v833_v56 = vpop.f32.mrb[4].mxu0 }
 0x177   : > { %v834_v57 = vadd.f32 %v833_v56, %v794_v53  ;;  %v1023_v59 = vpop.f32.mrb[5].mxu0 }
 0x178   : > { %v836_v60 = vpop.f32.mrb[6].mxu0 }
 0x179   : > { %v839_v61 = vmax.f32 %v834_v57, 0.0  ;;  %v1024_v62 = vpop.f32.mrb[7].mxu0 }
 0x17b   : > { %v847_v63 = vrot.slane %v839_v61, %v846_v58 }
 0x17d   : > { %v848_v0 = vcombine.high %v847_v63, %v847_v63  ;;  %v851_v1 = vpack.c.bf16 %v847_v63, %v847_v63 }
 0x17f   : > { %v852_v2 = vpack.c.bf16 %v848_v0, %v848_v0  ;;  %853 = vst [vmem:[%s168_s21] sm:$0x1] %v851_v1 }
 0x181   : > { %854 = vst [vmem:[%s168_s21 + $0x1] sm:$0x1] %v852_v2 }
 0x182 PF: > { %s13_s12 = sadd.s32 1, %s1080_s12  }
 0x183   : > { %p10_p4 = scmp.ge.s32.totalorder %s13_s12, 4  }
 0x185   :  { %12 = sbr.rel (!%p10_p4) target bundleno = 1 (0x1), region = 62 }

// kernel: transunet_forward.36
= control target key start
LH: loop header
LB: loop body
LE: loop exit
PB: predicated region body
PF: predicated region fallthrough
CT: control target
= control target key end

     0   :  { %s1582_s12 = smov 0   ;;  %s1888_s0 = inlined_call_operand.vmem [shape: bf16[2,4,4,128], index: 0, kind: input, shape index: {}]   ;;  %s1889_s1 = inlined_call_operand.vmem [shape: bf16[1152,64], index: 1, kind: input, shape index: {}]   ;;  %s1890_s2 = inlined_call_operand.vmem [shape: f32[1,64], index: 2, kind: input, shape index: {}]   ;;  %s1891_s3 = inlined_call_operand.vmem [shape: bf16[2,2,2,64], index: 3, kind: output, shape index: {}]  }
   0x1 LB: > { %s1258_s13 = sadd.s32 4294967295, %s1556_s12   ;;  %p1262_p0 = scmp.ge.s32.totalorder %s1556_s12, 1  ;;  %s1556_s12 = sphi %s1582_s12, %s13_s12  }
   0x2   : > { %p137_p1 = scmp.lt.s32.totalorder %s1556_s12, 3 }
   0x4   : > { %p138_p2 = pnand %p1262_p0, %p137_p1 }
   0x5   : > { %v1478_v0 = vld [vmem:[%s1889_s1 + $0x40] sm:$0xff] (!%p138_p2)   ;;  %v1482_v4 = vld [vmem:[%s1889_s1 + $0x48] sm:$0xff] (!%p138_p2)   ;;  %v1486_v8 = vld [vmem:[%s1889_s1 + $0x50] sm:$0xff] (!%p138_p2)   ;;  %p160_p3 = scmp.lt.s32.totalorder (!%p138_p2), %s1258_s13, 1  ;;  %v179_v28 = vlaneseq (!%p138_p2)  ;;  %vm192_vm0 = vsmask.f32 (!%p138_p2), 256 }
   0x6   : > { %141 = sbr.rel (%p138_p2) target bundleno = 325 (0x145), region = 32  ;;  %v1479_v1 = vld [vmem:[%s1889_s1] sm:$0xff] (!%p138_p2)   ;;  %1349 = vmatprep.subr.bf16.mxu0 (!%p138_p2), %v1478_v0  ;;  %v1483_v5 = vld [vmem:[%s1889_s1 + $0x8] sm:$0xff] (!%p138_p2)   ;;  %v1487_v9 = vld [vmem:[%s1889_s1 + $0x10] sm:$0xff] (!%p138_p2)   ;;  %vm193_vm1 = vsmask.f32 (!%p138_p2), 1284 }
   0x7   : > { %v1480_v2 = vld [vmem:[%s1889_s1 + $0xc0] sm:$0xff] (!%p138_p2)   ;;  %1350 = vmatpush3.bf16.msra.mxu0 (!%p138_p2), %v1479_v1  ;;  %v1484_v6 = vld [vmem:[%s1889_s1 + $0xc8] sm:$0xff] (!%p138_p2)   ;;  %v1488_v10 = vld [vmem:[%s1889_s1 + $0xd0] sm:$0xff] (!%p138_p2)   ;;  %v1698_v33 = vshrl.u32 (!%p138_p2), %v179_v28, 7  ;;  %v1558_v34 = vmov (!%p138_p2), 1966171168  }
   0x8   : > { %v1481_v3 = vld [vmem:[%s1889_s1 + $0x80] sm:$0xff] (!%p138_p2)   ;;  %1371 = vmatprep.subr.bf16.mxu1 (!%p138_p2), %v1480_v2  ;;  %1351 = vmatprep.subr.bf16.mxu0 (!%p138_p2), %v1482_v4  ;;  %v1485_v7 = vld [vmem:[%s1889_s1 + $0x88] sm:$0xff] (!%p138_p2)   ;;  %v1489_v11 = vld [vmem:[%s1889_s1 + $0x90] sm:$0xff] (!%p138_p2)   ;;  %v177_v35 = vunpack.c.l.s4 (!%p138_p2), %v1558_v34  ;;  %vm195_vm3 = vsmask.f32 (!%p138_p2), 2312  ;;  %vm1560_vm15 = vmmov (!%p138_p2), 0  }
   0x9   : > { %1372 = vmatpush3.bf16.msra.mxu1 (!%p138_p2), %v1481_v3  ;;  %v1490_v12 = vld [vmem:[%s1889_s1 + $0x58] sm:$0xff] (!%p138_p2)   ;;  %v1494_v16 = vld [vmem:[%s1889_s1 + $0x60] sm:$0xff] (!%p138_p2)   ;;  %v1498_v20 = vld [vmem:[%s1889_s1 + $0x68] sm:$0xff] (!%p138_p2)   ;;  %vm197_vm4 = vsmask.f32 (!%p138_p2), 3340 }
   0xa   : > { %1373 = vmatprep.subr.bf16.mxu1 (!%p138_p2), %v1484_v6  ;;  %v1491_v13 = vld [vmem:[%s1889_s1 + $0x18] sm:$0xff] (!%p138_p2)   ;;  %v1495_v17 = vld [vmem:[%s1889_s1 + $0x20] sm:$0xff] (!%p138_p2)   ;;  %v1499_v21 = vld [vmem:[%s1889_s1 + $0x28] sm:$0xff] (!%p138_p2)   ;;  %vm199_vm5 = vsmask.f32 (!%p138_p2), 4368  ;;  %v178_v38 = vunpack.c.0.s8 (!%p138_p2), %v177_v35 }
   0xb   : > { %1352 = vmatpush3.bf16.msra.mxu0 (!%p138_p2), %v1483_v5  ;;  %v1492_v14 = vld [vmem:[%s1889_s1 + $0xd8] sm:$0xff] (!%p138_p2)   ;;  %v1496_v18 = vld [vmem:[%s1889_s1 + $0xe0] sm:$0xff] (!%p138_p2)   ;;  %v1500_v22 = vld [vmem:[%s1889_s1 + $0xe8] sm:$0xff] (!%p138_p2)   ;;  %vm201_vm7 = vsmask.f32 (!%p138_p2), 5396 }
   0xc   : > { %1353 = vmatprep.subr.bf16.mxu0 (!%p138_p2), %v1486_v8  ;;  %v1493_v15 = vld [vmem:[%s1889_s1 + $0x98] sm:$0xff] (!%p138_p2)   ;;  %v1497_v19 = vld [vmem:[%s1889_s1 + $0xa0] sm:$0xff] (!%p138_p2)   ;;  %v1501_v23 = vld [vmem:[%s1889_s1 + $0xa8] sm:$0xff] (!%p138_p2)   ;;  %vm203_vm10 = vsmask.f32 (!%p138_p2), 6424  ;;  %v1707_v41 = vsub.s32 (!%p138_p2), %v178_v38, %v1698_v33 }
   0xd   : > { %1374 = vmatpush3.bf16.msra.mxu1 %v1485_v7  ;;  %s1895_s13 = smov (!%p160_p3, %s1258_s13), 1  ;;  %v1502_v24 = vld [vmem:[%s1889_s1 + $0x70] sm:$0xff]   ;;  %v1506_v29 = vld [vmem:[%s1889_s1 + $0x78] sm:$0xff]   ;;  %vm194_vm2 = vmor %vm192_vm0, %vm193_vm1  ;;  %vm205_vm13 = vsmask.f32 7452  ;;  %vm1202_vm0 = vcmask 516096  }
   0xe   : > { %1375 = vmatprep.subr.bf16.mxu1 %v1488_v10  ;;  %v1503_v25 = vld [vmem:[%s1889_s1 + $0x30] sm:$0xff]   ;;  %s1348_s20 = sshll.u32 %s1895_s13, 3  ;;  %v1507_v30 = vld [vmem:[%s1889_s1 + $0x38] sm:$0xff]   ;;  %vm196_vm6 = vmor %vm194_vm2, %vm195_vm3  ;;  %s1265_s16 = sshll.u32 %s1895_s13, 1 }
   0xf   : > { %1354 = vmatpush3.bf16.msra.mxu0 %v1487_v9  ;;  %v1504_v26 = vld [vmem:[%s1889_s1 + $0xf0] sm:$0xff]   ;;  %v1508_v31 = vld [vmem:[%s1889_s1 + $0xf8] sm:$0xff]   ;;  %s1693_s29 = scalar_lea.vmem %s1888_s0, %s1348_s20  ;;  %vm198_vm8 = vmor %vm196_vm6, %vm197_vm4  ;;  %s168_s18 = scalar_lea.vmem %s1891_s3, %s1265_s16 }
  0x10   : > { %1355 = vmatprep.subr.bf16.mxu0 %v1490_v12  ;;  %v1505_v27 = vld [vmem:[%s1889_s1 + $0xb0] sm:$0xff]   ;;  %v1696_v32 = vld [vmem:[%s1693_s29 + $0x4] sm:$0x3]  ;;  %v170_v36 = vld [vmem:[%s1693_s29] sm:$0x3] }
  0x11   : > { %1376 = vmatpush3.bf16.msra.mxu1 %v1489_v11  ;;  %v171_v37 = vld [vmem:[%s1693_s29 + $0x2] sm:$0x3]  ;;  %vm200_vm9 = vmor %vm198_vm8, %vm199_vm5  ;;  %v1509_v39 = vld [vmem:[%s1889_s1 + $0xb8] sm:$0xff]   ;;  %v182_v43 = vrot.slane %v170_v36, %v1707_v41  ;;  %v1724_v53 = vrot.slane %v1696_v32, %v1707_v41 }
  0x12   : > { %1377 = vmatprep.subr.bf16.mxu1 %v1492_v14  ;;  %v309_v40 = vcombine.low %v171_v37, %v1696_v32  ;;  %vm202_vm11 = vmor %vm200_vm9, %vm201_vm7  ;;  %v1510_v42 = vld [vmem:[%s1889_s1 + $0x140] sm:$0xff]   ;;  %v190_v44 = vrot.slane %v171_v37, %v1707_v41  ;;  %v261_v45 = vcombine.low %v170_v36, %v171_v37  ;;  %v1516_v2 = vld [vmem:[%s1889_s1 + $0x1c8] sm:$0xff]  }
  0x13   : > { %1356 = vmatpush3.bf16.msra.mxu0 %v1491_v13  ;;  %vm204_vm12 = vmor %vm202_vm11, %vm203_vm10  ;;  %v1512_v47 = vld [vmem:[%s1889_s1 + $0x1c0] sm:$0xff]   ;;  %v183_v48 = vcombine.high %v182_v43, %v182_v43  ;;  %v208_v50 = vshrl.u32 %v182_v43, 16  ;;  %v1514_v7 = vld [vmem:[%s1889_s1 + $0x148] sm:$0xff]  }
  0x14   : > { %1357 = vmatprep.subr.bf16.mxu0 %v1494_v16  ;;  %v316_v46 = vrot.slane %v309_v40, %v1707_v41  ;;  %v191_v49 = vcombine.high %v190_v44, %v190_v44  ;;  %v217_v51 = vshrl.u32 %v190_v44, 16  ;;  %vm1718_vm14 = vmor %vm204_vm12, %vm205_vm13  ;;  %v1270_v57 = vcombine.high %v182_v43, %v190_v44  ;;  %v1513_v0 = vld [vmem:[%s1889_s1 + $0x180] sm:$0xff]   ;;  %v1517_v9 = vld [vmem:[%s1889_s1 + $0x188] sm:$0xff]  }
  0x15   : > { %1378 = vmatpush3.bf16.msra.mxu1 %v1493_v15  ;;  %v213_v55 = vshll.u32 %v183_v48, 16  ;;  %v1271_v58 = vcombine.high %v190_v44, %v1724_v53  ;;  %v268_v61 = vrot.slane %v261_v45, %v1707_v41  ;;  %v1511_v4 = vld [vmem:[%s1889_s1 + $0x100] sm:$0xff]   ;;  %v1520_v10 = vld [vmem:[%s1889_s1 + $0x1d0] sm:$0xff]   ;;  %v1515_v11 = vld [vmem:[%s1889_s1 + $0x108] sm:$0xff]  }
  0x16   : > { %1379 = vmatprep.subr.bf16.mxu1 %v1496_v18  ;;  %v323_v54 = vrot.slane %v316_v46, %v1707_v41  ;;  %v222_v56 = vshll.u32 %v191_v49, 16  ;;  %v300_v62 = vrot.slane %v1270_v57, %v1707_v41  ;;  %v1518_v13 = vld [vmem:[%s1889_s1 + $0x150] sm:$0xff]   ;;  %v1524_v15 = vld [vmem:[%s1889_s1 + $0x1d8] sm:$0xff]   ;;  %v173_v37 = vld [vmem:[%s1693_s29 + $0x6] sm:$0x3] }
  0x17   : > { %1358 = vmatpush3.bf16.msra.mxu0 %v1495_v17  ;;  %v215_v59 = vsel %vm1718_vm14, %v208_v50, %v213_v55  ;;  %v348_v5 = vrot.slane %v1271_v58, %v1707_v41  ;;  %v275_v6 = vrot.slane %v268_v61, %v1707_v41  ;;  %v1521_v14 = vld [vmem:[%s1889_s1 + $0x190] sm:$0xff]   ;;  %v1522_v17 = vld [vmem:[%s1889_s1 + $0x158] sm:$0xff]   ;;  %v357_v45 = vcombine.low %v1696_v32, %v173_v37  ;;  %v1542_v58 = vld [vmem:[%s1889_s1 + $0x200] sm:$0xff]  }
  0x18   : > { %1359 = vmatprep.subr.bf16.mxu0 %v1498_v20  ;;  %1060 = vmatprep.mubr.bf16.mxu1 %v323_v54  ;;  %v1732_v60 = vsel %vm1718_vm14, %v217_v51, %v222_v56  ;;  %v307_v1 = vrot.slane %v300_v62, %v1707_v41  ;;  %v1519_v16 = vld [vmem:[%s1889_s1 + $0x110] sm:$0xff]   ;;  %v1525_v18 = vld [vmem:[%s1889_s1 + $0x198] sm:$0xff]  }
  0x19   : > { %1380 = vmatpush3.bf16.msra.mxu1 %v1497_v19  ;;  %v277_v63 = vcombine.low %v215_v59, %v1732_v60  ;;  %v355_v12 = vrot.slane %v348_v5, %v1707_v41  ;;  %v1528_v19 = vld [vmem:[%s1889_s1 + $0x1e0] sm:$0xff]   ;;  %v1523_v20 = vld [vmem:[%s1889_s1 + $0x118] sm:$0xff]   ;;  %v1534_v34 = vld [vmem:[%s1889_s1 + $0x170] sm:$0xff]   ;;  %v364_v32 = vrot.slane %v357_v45, %v1707_v41  ;;  %v1559_v59 = vmov 0.0  }
  0x1a   : > { %1381 = vmatprep.subr.bf16.mxu1 %v1500_v22  ;;  %v233_v22 = vcombine.high %v1724_v53, %v1724_v53  ;;  %v1537_v35 = vld [vmem:[%s1889_s1 + $0x1b0] sm:$0xff]   ;;  %v1540_v38 = vld [vmem:[%s1889_s1 + $0x1f8] sm:$0xff]  }
  0x1b   : > { %1360 = vmatpush3.bf16.msra.mxu0 %v1499_v21  ;;  %v284_v3 = vrot.slane %v277_v63, %v1707_v41  ;;  %v1526_v21 = vld [vmem:[%s1889_s1 + $0x160] sm:$0xff]   ;;  %v1541_v46 = vld [vmem:[%s1889_s1 + $0x1b8] sm:$0xff]   ;;  %v371_v57 = vrot.slane %v364_v32, %v1707_v41  ;;  %v1544_v61 = vld [vmem:[%s1889_s1 + $0x210] sm:$0xff]  }
  0x1c   : > { %1361 = vmatprep.subr.bf16.mxu0 %v1502_v24  ;;  %v1532_v24 = vld [vmem:[%s1889_s1 + $0x1e8] sm:$0xff]   ;;  %v240_v28 = vshll.u32 %v233_v22, 16  ;;  %v1539_v51 = vld [vmem:[%s1889_s1 + $0x138] sm:$0xff]   ;;  %v1546_v63 = vld [vmem:[%s1889_s1 + $0x220] sm:$0xff]  }
  0x1d   : > { %1382 = vmatpush3.bf16.msra.mxu1 %v1501_v23  ;;  %v291_v8 = vrot.slane %v284_v3, %v1707_v41  ;;  %v1529_v23 = vld [vmem:[%s1889_s1 + $0x1a0] sm:$0xff]   ;;  %v1545_v62 = vld [vmem:[%s1889_s1 + $0x218] sm:$0xff]  }
  0x1e   : > { %1383 = vmatprep.subr.bf16.mxu1 %v1504_v26  ;;  %v235_v26 = vshrl.u32 %v1724_v53, 16 }
  0x1f   : > { %1362 = vmatpush3.bf16.msra.mxu0 %v1503_v25  ;;  %1020 = vmatprep.mubr.bf16.mxu0 %v291_v8  ;;  %v1527_v25 = vld [vmem:[%s1889_s1 + $0x120] sm:$0xff]  }
  0x20   : > { %1363 = vmatprep.subr.bf16.mxu0 %v1506_v29  ;;  %v1533_v29 = vld [vmem:[%s1889_s1 + $0x1a8] sm:$0xff]   ;;  %v242_v36 = vsel %vm1718_vm14, %v235_v26, %v240_v28 }
  0x21   : > { %1384 = vmatpush3.bf16.msra.mxu1 %v1505_v27  ;;  %v1530_v27 = vld [vmem:[%s1889_s1 + $0x168] sm:$0xff]   ;;  %v325_v40 = vcombine.low %v1732_v60, %v242_v36 }
  0x22   : > { %1385 = vmatprep.subr.bf16.mxu1 %v1508_v31  ;;  %v1531_v31 = vld [vmem:[%s1889_s1 + $0x128] sm:$0xff]  }
  0x23   : > { %1364 = vmatpush3.bf16.msra.mxu0 %v1507_v30  ;;  %v1536_v30 = vld [vmem:[%s1889_s1 + $0x1f0] sm:$0xff]   ;;  %v332_v49 = vrot.slane %v325_v40, %v1707_v41  ;;  %v1543_v60 = vld [vmem:[%s1889_s1 + $0x208] sm:$0xff]  }
  0x24   : > { %1393 = vmatprep.subr.bf16.mxu0 %v1510_v42  ;;  %v1535_v42 = vld [vmem:[%s1889_s1 + $0x130] sm:$0xff]  }
  0x25   : > { %1386 = vmatpush3.bf16.msra.mxu1 %v1509_v39  ;;  %v250_v39 = vrot.slane %v173_v37, %v1707_v41  ;;  %v339_v56 = vrot.slane %v332_v49, %v1707_v41 }
  0x26   : > { %1415 = vmatprep.subr.bf16.mxu1 %v1512_v47  ;;  %1021 = vmatmul.mubr.bf16.vlgmr.msra.gmra.mrb[0].mxu0 %v275_v6  ;;  %v1538_v47 = vld [vmem:[%s1889_s1 + $0x178] sm:$0xff]  }
  0x27   : > { %1394 = vmatpush3.bf16.msra.mxu0 %v1511_v4  ;;  %1100 = vmatprep.mubr.bf16.mxu0 %v355_v12  ;;  %v251_v43 = vcombine.high %v250_v39, %v250_v39  ;;  %v253_v44 = vshrl.u32 %v250_v39, 16  ;;  %v1549_v4 = vld [vmem:[%s1889_s1 + $0x238] sm:$0xff]  }
  0x28   : > { %1061 = vmatmul.mubr.bf16.vlgmr.msra.gmra.mrb[0].mxu1 %v307_v1  ;;  %1395 = vmatprep.subr.bf16.mxu0 %v1514_v7  ;;  %v1272_v1 = vcombine.high %v1724_v53, %v250_v39 }
  0x29   : > { %1416 = vmatpush3.bf16.msra.mxu1 %v1513_v0  ;;  %v258_v48 = vshll.u32 %v251_v43, 16  ;;  %v1547_v0 = vld [vmem:[%s1889_s1 + $0x228] sm:$0xff]  }
  0x2a   : > { %1417 = vmatprep.subr.bf16.mxu1 %v1516_v2  ;;  %v1548_v2 = vld [vmem:[%s1889_s1 + $0x230] sm:$0xff]   ;;  %v396_v3 = vrot.slane %v1272_v1, %v1707_v41 }
  0x2b   : > { %1396 = vmatpush3.bf16.msra.mxu0 %v1515_v11  ;;  %v260_v50 = vsel %vm1718_vm14, %v253_v44, %v258_v48  ;;  %v1273_v11 = vld [vmem:[%s1890_s2] ss:$0 sm:$0xff] }
  0x2c   : > { %1397 = vmatprep.subr.bf16.mxu0 %v1518_v13  ;;  %v373_v54 = vcombine.low %v242_v36, %v260_v50  ;;  %v403_v5 = vrot.slane %v396_v3, %v1707_v41 }
  0x2d   : > { %1418 = vmatpush3.bf16.msra.mxu1 %v1517_v9 }
  0x2e   : > { %1419 = vmatprep.subr.bf16.mxu1 %v1520_v10  ;;  %v380_v55 = vrot.slane %v373_v54, %v1707_v41 }
  0x2f   : > { %1398 = vmatpush3.bf16.msra.mxu0 %v1519_v16 }
  0x30   : > { %1399 = vmatprep.subr.bf16.mxu0 %v1522_v17  ;;  %v387_v52 = vrot.slane %v380_v55, %v1707_v41 }
  0x31   : > { %1420 = vmatpush3.bf16.msra.mxu1 %v1521_v14 }
  0x32   : > { %1421 = vmatprep.subr.bf16.mxu1 %v1524_v15  ;;  %1140 = vmatprep.mubr.bf16.mxu1 %v387_v52 }
  0x33   : > { %1400 = vmatpush3.bf16.msra.mxu0 %v1523_v20 }
  0x34   : > { %1401 = vmatprep.subr.bf16.mxu0 %v1526_v21 }
  0x35   : > { %1422 = vmatpush3.bf16.msra.mxu1 %v1525_v18 }
  0x36   : > { %1423 = vmatprep.subr.bf16.mxu1 %v1528_v19 }
  0x37   : > { %1402 = vmatpush3.bf16.msra.mxu0 %v1527_v25 }
  0x38   : > { %1403 = vmatprep.subr.bf16.mxu0 %v1530_v27 }
  0x39   : > { %1424 = vmatpush3.bf16.msra.mxu1 %v1529_v23 }
  0x3a   : > { %1425 = vmatprep.subr.bf16.mxu1 %v1532_v24 }
  0x3b   : > { %1404 = vmatpush3.bf16.msra.mxu0 %v1531_v31 }
  0x3c   : > { %1405 = vmatprep.subr.bf16.mxu0 %v1534_v34 }
  0x3d   : > { %1426 = vmatpush3.bf16.msra.mxu1 %v1533_v29  ;;  %v1561_v29 = vmov 1983009808  }
  0x3e   : > { %1427 = vmatprep.subr.bf16.mxu1 %v1536_v30  ;;  %v1191_v30 = vunpack.c.l.s4 %v1561_v29 }
  0x3f   : > { %1406 = vmatpush3.bf16.msra.mxu0 %v1535_v42 }
  0x40   : > { %1407 = vmatprep.subr.bf16.mxu0 %v1538_v47  ;;  %v1192_v31 = vunpack.c.0.s8 %v1191_v30 }
  0x41   : > { %1428 = vmatpush3.bf16.msra.mxu1 %v1537_v35 }
  0x42   : > { %1429 = vmatprep.subr.bf16.mxu1 %v1540_v38  ;;  %v1195_v36 = vsub.s32 %v1192_v31, %v1698_v33 }
  0x43   : > { %1408 = vmatpush3.bf16.msra.mxu0 %v1539_v51 }
  0x44   : > { %1446 = vmatprep.subr.bf16.mxu0 %v1559_v59 }
  0x45   : > { %1430 = vmatpush3.bf16.msra.mxu1 %v1541_v46 }
  0x46   : > { %1101 = vmatmul.mubr.bf16.vlgmr.msra.gmra.mrb[4].mxu0 %v339_v56 }
  0x47   : > { %1447 = vmatpush3.bf16.msra.mxu0 %v1542_v58  ;;  %1462 = vmatprep.mubr.msk.bf16.mxu0 %vm1560_vm15, %v1559_v59 }
  0x48   : > { %1141 = vmatmul.mubr.bf16.vlgmr.msra.gmra.mrb[4].mxu1 %v371_v57  ;;  %1448 = vmatprep.subr.bf16.mxu0 %v1559_v59 }
  0x4b   : > { %1449 = vmatpush3.bf16.msra.mxu0 %v1543_v60 }
  0x4c   : > { %1450 = vmatprep.subr.bf16.mxu0 %v1559_v59 }
  0x4f   : > { %1451 = vmatpush3.bf16.msra.mxu0 %v1544_v61 }
  0x50   : > { %1452 = vmatprep.subr.bf16.mxu0 %v1559_v59 }
  0x53   : > { %1453 = vmatpush3.bf16.msra.mxu0 %v1545_v62 }
  0x54   : > { %1454 = vmatprep.subr.bf16.mxu0 %v1559_v59 }
  0x57   : > { %1455 = vmatpush3.bf16.msra.mxu0 %v1546_v63 }
  0x58   : > { %1456 = vmatprep.subr.bf16.mxu0 %v1559_v59 }
  0x5b   : > { %1457 = vmatpush3.bf16.msra.mxu0 %v1547_v0 }
  0x5c   : > { %1458 = vmatprep.subr.bf16.mxu0 %v1559_v59 }
  0x5f   : > { %1459 = vmatpush3.bf16.msra.mxu0 %v1548_v2 }
  0x60   : > { %1460 = vmatprep.subr.bf16.mxu0 %v1559_v59 }
  0x63   : > { %1461 = vmatpush3.bf16.msra.mxu0 %v1549_v4 }
  0x66   : > { %1463 = vmatmul.mubr.bf16.vlgmr.msra.gmra.mrb[8].mxu0 %v403_v5 }
  0xf9   : > { %v1365_v10 = vpop.f32.mrb[0].mxu0 }
  0xfa   : > { %v1366_v12 = vpop.f32.mrb[1].mxu0 }
  0xfb   : > { %v1387_v6 = vpop.f32.mrb[0].mxu1  ;;  %v1367_v13 = vadd.f32 %v1366_v12, %v1365_v10  ;;  %v1368_v14 = vpop.f32.mrb[2].mxu0 }
  0xfc   : > { %v1388_v53 = vpop.f32.mrb[1].mxu1  ;;  %v1369_v15 = vpop.f32.mrb[3].mxu0 }
  0xfd   : > { %v1389_v7 = vadd.f32 %v1388_v53, %v1387_v6  ;;  %v1390_v8 = vpop.f32.mrb[2].mxu1  ;;  %v1023_v16 = vadd.f32 %v1367_v13, %v1273_v11 }
  0xfe   : > { %v1391_v9 = vpop.f32.mrb[3].mxu1 }
  0xff   : > { %v1063_v17 = vadd.f32 %v1389_v7, %v1023_v16 }
 0x119   : > { %v1409_v18 = vpop.f32.mrb[4].mxu0 }
 0x11a   : > { %v1410_v19 = vpop.f32.mrb[5].mxu0 }
 0x11b   : > { %v1431_v41 = vpop.f32.mrb[4].mxu1  ;;  %v1411_v21 = vadd.f32 %v1410_v19, %v1409_v18  ;;  %v1412_v22 = vpop.f32.mrb[6].mxu0 }
 0x11c   : > { %v1432_v20 = vpop.f32.mrb[5].mxu1  ;;  %v1413_v25 = vpop.f32.mrb[7].mxu0 }
 0x11d   : > { %v1433_v23 = vadd.f32 %v1432_v20, %v1431_v41  ;;  %v1434_v24 = vpop.f32.mrb[6].mxu1  ;;  %v1103_v27 = vadd.f32 %v1411_v21, %v1063_v17 }
 0x11e   : > { %v1435_v26 = vpop.f32.mrb[7].mxu1 }
 0x11f   : > { %v1143_v28 = vadd.f32 %v1433_v23, %v1103_v27 }
 0x139   : > { %v1182_v34 = vpop.f32.mrb[8].mxu0 }
 0x13a   : > { %v1183_v35 = vadd.f32 %v1182_v34, %v1143_v28  ;;  %v1464_v37 = vpop.f32.mrb[9].mxu0 }
 0x13b   : > { %v1185_v38 = vpop.f32.mrb[10].mxu0 }
 0x13c   : > { %v1188_v39 = vmax.f32 %v1183_v35, 0.0  ;;  %v1465_v40 = vpop.f32.mrb[11].mxu0 }
 0x13e   : > { %v1196_v42 = vrot.slane %v1188_v39, %v1195_v36 }
 0x140   : > { %v1197_v43 = vcombine.high %v1196_v42, %v1196_v42  ;;  %v1200_v44 = vpack.c.bf16 %v1196_v42, %v1196_v42 }
 0x142   : > { %v1201_v45 = vpack.c.bf16 %v1197_v43, %v1197_v43  ;;  %1203 = vst.msk [vmem:[%s168_s18] sm:$0x1] %vm1202_vm0, %v1200_v44 }
 0x144   : > { %1204 = vst.msk [vmem:[%s168_s18 + $0x1] sm:$0x1] %vm1202_vm0, %v1201_v45 }
 0x145 PF: > { %s13_s12 = sadd.s32 1, %s1556_s12  }
 0x146   : > { %p10_p4 = scmp.ge.s32.totalorder %s13_s12, 4  }
 0x148   :  { %12 = sbr.rel (!%p10_p4) target bundleno = 1 (0x1), region = 62 }

// kernel: transunet_forward.39
= control target key start
LH: loop header
LB: loop body
LE: loop exit
PB: predicated region body
PF: predicated region fallthrough
CT: control target
= control target key end

     0   :  { %s522_s12 = smov 0   ;;  %s524_s13 = smov 0   ;;  %s564_s0 = inlined_call_operand.vmem [shape: bf16[32,32], index: 0, kind: input, shape index: {}]   ;;  %s565_s1 = inlined_call_operand.vmem [shape: bf16[32,64], index: 1, kind: input, shape index: {}]   ;;  %s566_s2 = inlined_call_operand.vmem [shape: f32[1,64], index: 2, kind: input, shape index: {}]   ;;  %s567_s3 = inlined_call_operand.vmem [shape: bf16[32,64], index: 3, kind: output, shape index: {}]  }
   0x1   :  { %s526_s14 = smov 0  }
   0x2 LB: > { %s25_s15 = sadd.s32 1, %s494_s13  ;;  %p420_p0 = scmp.ge.s32.totalorder %s498_s14, 1  ;;  %s498_s14 = sphi %s526_s14, %s13_s14   ;;  %s494_s13 = sphi %s524_s13, %s569_s13   ;;  %s490_s12 = sphi %s522_s12, %s568_s12  }
   0x3   : > { %p27_p1 = scmp.ge.s32.totalorder %s25_s15, 2  ;;  %p169_p2 = scmp.lt.s32.totalorder %s498_s14, 3 }
   0x5   : > { %s571_s15 = smov (%p27_p1, %s25_s15), 0  ;;  %p170_p3 = pnand %p420_p0, %p169_p2 }
   0x6   : > { %v473_v0 = vld [vmem:[%s565_s1] sm:$0xff] (!%p170_p3)   ;;  %v500_v1 = vmov (!%p170_p3), 0.0   ;;  %v474_v2 = vld [vmem:[%s565_s1 + $0x8] sm:$0xff] (!%p170_p3)   ;;  %vm501_vm0 = vmmov (!%p170_p3), 0   ;;  %s421_s20 = sshll.u32 (!%p170_p3), %s490_s12, 1  ;;  %vm256_vm1 = vcmask (!%p170_p3), 261120  }
   0x7   : > { %173 = sbr.rel (%p170_p3) target bundleno = 237 (0xed), region = 32  ;;  %439 = vmatprep.subr.bf16.mxu0 (!%p170_p3), %v500_v1  ;;  %443 = vmatprep.mubr.msk.bf16.mxu0 (!%p170_p3), %vm501_vm0, %v500_v1  ;;  %p204_p4 = scmp.lt.s32.totalorder (!%p170_p3), %s421_s20, 3  ;;  %v425_v4 = vld [vmem:[%s566_s2] ss:$0 sm:$0xff] (!%p170_p3)  ;;  %vm309_vm2 = vcmask (!%p170_p3), 519168  }
   0x8   : > { %440 = vmatpush3.bf16.msra.mxu0 (!%p170_p3), %v473_v0 }
   0x9   : > { %441 = vmatprep.subr.bf16.mxu0 (!%p170_p3), %v500_v1 }
   0xc   : > { %442 = vmatpush3.bf16.msra.mxu0 (!%p170_p3), %v474_v2 }
   0xe   : > { %s573_s20 = smov (!%p204_p4, %s421_s20), 3 }
   0xf   : > { %s422_s21 = sshll.u32 %s573_s20, 2 }
  0x10   : > { %s207_s24 = scalar_lea.vmem %s564_s0, %s422_s21  ;;  %s223_s29 = scalar_lea.vmem %s567_s3, %s422_s21 }
  0x11   : > { %v475_v3 = vld [vmem:[%s207_s24] sm:$0xff]  }
  0x12   : > { %444 = vmatmul.mubr.msk.bf16.vlgmr.msra.gmra.mrb[0].mxu0 %vm256_vm1, %v475_v3 }
  0xe5   : > { %v294_v5 = vpop.f32.mrb[0].mxu0 }
  0xe6   : > { %v295_v6 = vadd.f32 %v425_v4, %v294_v5  ;;  %v445_v7 = vpop.f32.mrb[1].mxu0 }
  0xe7   : > { %v297_v8 = vpop.f32.mrb[2].mxu0 }
  0xe8   : > { %v434_v9 = vpack.c.bf16 %v295_v6, %v295_v6  ;;  %v298_v10 = vadd.f32 %v425_v4, %v297_v8  ;;  %v446_v11 = vpop.f32.mrb[3].mxu0 }
  0xea   : > { %310 = vst.msk [vmem:[%s223_s29] sm:$0xf] %vm309_vm2, %v434_v9  ;;  %v435_v12 = vpack.c.bf16 %v298_v10, %v298_v10 }
  0xec   : > { %311 = vst.msk [vmem:[%s223_s29 + $0x4] sm:$0xf] %vm309_vm2, %v435_v12 }
  0xed PF: > { %s13_s14 = sadd.s32 1, %s498_s14   ;;  %s568_s12 = smov %s494_s13 }
  0xee   : > { %p10_p5 = scmp.ge.s32.totalorder %s13_s14, 4   ;;  %s569_s13 = smov %s571_s15 }
  0xf0   :  { %12 = sbr.rel (!%p10_p5) target bundleno = 2 (0x2), region = 68 }

// kernel: transunet_forward.38
= control target key start
LH: loop header
LB: loop body
LE: loop exit
PB: predicated region body
PF: predicated region fallthrough
CT: control target
= control target key end

     0   :  { %s964_s12 = smov 0   ;;  %s1227_s0 = inlined_call_operand.vmem [shape: bf16[2,6,6,32], index: 0, kind: input, shape index: {}]   ;;  %s1228_s1 = inlined_call_operand.vmem [shape: bf16[288,32], index: 1, kind: input, shape index: {}]   ;;  %s1229_s2 = inlined_call_operand.vmem [shape: f32[1,32], index: 2, kind: input, shape index: {}]   ;;  %s1230_s3 = inlined_call_operand.vmem [shape: bf16[2,4,4,32], index: 3, kind: output, shape index: {}]  }
   0x1 LB: > { %s822_s13 = sadd.s32 4294967295, %s936_s12   ;;  %p826_p0 = scmp.ge.s32.totalorder %s936_s12, 1  ;;  %s936_s12 = sphi %s964_s12, %s13_s12  }
   0x2   : > { %p137_p1 = scmp.lt.s32.totalorder %s936_s12, 3 }
   0x4   : > { %p138_p2 = pnand %p826_p0, %p137_p1 }
   0x5   : > { %p161_p3 = scmp.lt.s32.totalorder (!%p138_p2), %s822_s13, 1  ;;  %v185_v0 = vlaneseq (!%p138_p2)  ;;  %vm277_vm0 = vcmask (!%p138_p2), 1040384   ;;  %vm278_vm1 = vcmask (!%p138_p2), 1042434   ;;  %v938_v1 = vmov (!%p138_p2), 1983009808   ;;  %v912_v5 = vld [vmem:[%s1228_s1 + $0x40] sm:$0xff] (!%p138_p2)  }
   0x6   : > { %141 = sbr.rel (%p138_p2) target bundleno = 400 (0x190), region = 32  ;;  %v183_v2 = vunpack.c.l.s4 (!%p138_p2), %v938_v1  ;;  %vm279_vm2 = vmor (!%p138_p2), %vm277_vm0, %vm278_vm1  ;;  %vm280_vm3 = vcmask (!%p138_p2), 1044484   ;;  %vm282_vm4 = vcmask (!%p138_p2), 1046534   ;;  %vm214_vm5 = vsmask.f32 (!%p138_p2), 1280  ;;  %v913_v7 = vld [vmem:[%s1228_s1] sm:$0xff] (!%p138_p2)   ;;  %859 = vmatprep.subr.bf16.mxu0 (!%p138_p2), %v912_v5 }
   0x7   : > { %v186_v3 = vshrl.u32 (!%p138_p2), %v185_v0, 7  ;;  %vm986_vm6 = vmor (!%p138_p2), %vm279_vm2, %vm280_vm3  ;;  %vm215_vm7 = vsmask.f32 (!%p138_p2), 3336  ;;  %860 = vmatpush3.bf16.msra.mxu0 (!%p138_p2), %v913_v7  ;;  %vm217_vm8 = vsmask.f32 (!%p138_p2), 5392  ;;  %v914_v23 = vld [vmem:[%s1228_s1 + $0x48] sm:$0xff] (!%p138_p2)  }
   0x8   : > { %v184_v4 = vunpack.c.0.s8 (!%p138_p2), %v183_v2  ;;  %v915_v28 = vld [vmem:[%s1228_s1 + $0x8] sm:$0xff] (!%p138_p2)   ;;  %vm1051_vm9 = vmor (!%p138_p2), %vm986_vm6, %vm282_vm4  ;;  %vm219_vm10 = vsmask.f32 (!%p138_p2), 7448  ;;  %861 = vmatprep.subr.bf16.mxu0 (!%p138_p2), %v914_v23  ;;  %v916_v34 = vld [vmem:[%s1228_s1 + $0x50] sm:$0xff] (!%p138_p2)   ;;  %s939_s5 = smov (!%p138_p2), 64   ;;  %s940_s18 = smov (!%p138_p2), 32  }
   0x9   : > { %v917_v39 = vld [vmem:[%s1228_s1 + $0x10] sm:$0xff] (!%p138_p2)   ;;  %v918_v44 = vld [vmem:[%s1228_s1 + $0x58] sm:$0xff] (!%p138_p2)   ;;  %vm1085_vm11 = vmor (!%p138_p2), %vm214_vm5, %vm215_vm7  ;;  %s941_s29 = smov (!%p138_p2), 96   ;;  %vm943_vm14 = vmmov (!%p138_p2), 0   ;;  %vm495_vm15 = vcmask (!%p138_p2), 261120   ;;  %vm499_vm0 = vcmask (!%p138_p2), 523264  }
   0xa   : > { %v978_v6 = vsub.s32 (!%p138_p2), %v184_v4, %v186_v3  ;;  %v919_v54 = vld [vmem:[%s1228_s1 + $0x18] sm:$0xff] (!%p138_p2)   ;;  %v920_v59 = vld [vmem:[%s1228_s1 + $0x60] sm:$0xff] (!%p138_p2)   ;;  %vm218_vm12 = vmor (!%p138_p2), %vm1085_vm11, %vm217_vm8  ;;  %vm502_vm1 = vcmask (!%p138_p2), 785408   ;;  %vm762_vm2 = vcmask (!%p138_p2), 254976  }
   0xb   : > { %862 = vmatpush3.bf16.msra.mxu0 (!%p138_p2), %v915_v28  ;;  %v921_v3 = vld [vmem:[%s1228_s1 + $0x20] sm:$0xff] (!%p138_p2)   ;;  %vm1140_vm13 = vmor (!%p138_p2), %vm218_vm12, %vm219_vm10 }
   0xc   : > { %863 = vmatprep.subr.bf16.mxu0 (!%p138_p2), %v916_v34 }
   0xd   : > { %s1240_s13 = smov (!%p161_p3, %s822_s13), 1 }
   0xe   : > { %s892_s14 = smul.u32 24, %s1240_s13  ;;  %s858_s7 = sshll.u32 %s1240_s13, 3 }
   0xf   : > { %864 = vmatpush3.bf16.msra.mxu0 %v917_v39  ;;  %s170_s10 = scalar_lea.vmem %s1230_s3, %s858_s7 }
  0x10   : > { %s165_s21 = scalar_lea.vmem %s1227_s0, %s892_s14  ;;  %865 = vmatprep.subr.bf16.mxu0 %v918_v44 }
  0x11   : > { %v990_v9 = vld [vmem:[%s165_s21 + $0x8] sm:$0x7]  ;;  %v992_v10 = vld [vmem:[%s165_s21 + $0xc] sm:$0x7]  ;;  %v994_v11 = vld [vmem:[%s165_s21 + $0x10] sm:$0x7] }
  0x12   : > { %v177_v12 = vld [vmem:[%s165_s21 + $0x14] sm:$0x7]  ;;  %v998_v13 = vrot.slane %v992_v10, %v978_v6  ;;  %v1002_v14 = vrot.slane %v994_v11, %v978_v6  ;;  %v355_v15 = vcombine.low %v990_v9, %v992_v10  ;;  %v172_v16 = vld [vmem:[%s165_s21] sm:$0x7]  ;;  %v1006_v17 = vld [vmem:[%s165_s21 + $0x4] sm:$0x7]  ;;  %v1010_v18 = vrot.slane %v990_v9, %v978_v6 }
  0x13   : > { %v1013_v19 = vrot.slane %v177_v12, %v978_v6  ;;  %v464_v20 = vcombine.low %v994_v11, %v177_v12  ;;  %v1017_v21 = vrot.slane %v172_v16, %v978_v6  ;;  %v1021_v22 = vrot.slane %v1006_v17, %v978_v6  ;;  %866 = vmatpush3.bf16.msra.mxu0 %v919_v54 }
  0x14   : > { %v1027_v24 = vrot.slane %v355_v15, %v978_v6  ;;  %v354_v25 = vcombine.low %v172_v16, %v1006_v17  ;;  %v1032_v26 = vcombine.high %v1010_v18, %v1010_v18  ;;  %v1036_v27 = vcombine.high %v998_v13, %v998_v13  ;;  %867 = vmatprep.subr.bf16.mxu0 %v920_v59 }
  0x15   : > { %v337_v29 = vshrl.u32 %v1013_v19, 16  ;;  %v340_v30 = vshll.u32 %v1013_v19, 16  ;;  %v471_v31 = vrot.slane %v464_v20, %v978_v6  ;;  %v1046_v32 = vcombine.high %v1021_v22, %v1021_v22 }
  0x16   : > { %v1059_v35 = vrot.slane %v354_v25, %v978_v6  ;;  %v831_v36 = vrot.slane %v1021_v22, 9  ;;  %v832_v37 = vrot.slane %v1010_v18, 9  ;;  %v294_v38 = vrot.slane %v1032_v26, 7 }
  0x17   : > { %v472_v40 = vcombine.low %v1027_v24, %v471_v31  ;;  %v290_v41 = vrot.slane %v1046_v32, 7  ;;  %v833_v42 = vrot.slane %v998_v13, 9  ;;  %v298_v43 = vrot.slane %v1036_v27, 7  ;;  %v922_v31 = vld [vmem:[%s1228_s1 + $0x68] sm:$0xff]   ;;  %868 = vmatpush3.bf16.msra.mxu0 %v921_v3 }
  0x18   : > { %v370_v45 = vcombine.low %v1059_v35, %v1027_v24  ;;  %v295_v46 = vsel %vm1051_vm9, %v832_v37, %v294_v38  ;;  %v1080_v47 = vcombine.high %v1002_v14, %v1002_v14  ;;  %v834_v48 = vrot.slane %v1002_v14, 9  ;;  %869 = vmatprep.subr.bf16.mxu0 %v922_v31  ;;  %v836_v24 = vld [vmem:[%s1229_s2] ss:$0 sm:$0xff] }
  0x19   : > { %473 = vrot.lane.b32.xlu1 %v472_v40, %s939_s5  ;;  %v291_v50 = vsel %vm1051_vm9, %v831_v36, %v290_v41  ;;  %v299_v51 = vsel %vm1051_vm9, %v833_v42, %v298_v43  ;;  %v1096_v52 = vcombine.high %v1013_v19, %v1013_v19  ;;  %v835_v53 = vrot.slane %v1013_v19, 9 }
  0x1a   : > { %v325_v55 = vrot.slane %v1080_v47, 7  ;;  %v391_v56 = vcombine.low %v295_v46, %v299_v51  ;;  %v445_v57 = vcombine.low %v291_v50, %v295_v46  ;;  %v189_v58 = vcombine.high %v1017_v21, %v1017_v21 }
  0x1b   : > { %v352_v60 = vrot.slane %v1096_v52, 7  ;;  %v830_v61 = vrot.slane %v1017_v21, 9  ;;  %v222_v62 = vshrl.u32 %v1017_v21, 16  ;;  %v225_v63 = vshll.u32 %v1017_v21, 16 }
  0x1c   : > { %v1114_v0 = vsel %vm1051_vm9, %v834_v48, %v325_v55  ;;  %v453_v1 = vrot.slane %v445_v57, %v978_v6  ;;  %v286_v2 = vrot.slane %v189_v58, 7  ;;  %v1122_v5 = vrot.slane %v391_v56, %v978_v6 }
  0x1d   : > { %v446_v4 = vcombine.low %v299_v51, %v1114_v0  ;;  %v224_v7 = vrot.slane %v222_v62, 6  ;;  %v227_v8 = vrot.slane %v225_v63, 7  ;;  %v1129_v12 = vsel %vm1051_vm9, %v835_v53, %v352_v60  ;;  %v924_v53 = vld [vmem:[%s1228_s1 + $0x70] sm:$0xff]  }
  0x1e   : > { %v287_v15 = vsel %vm1051_vm9, %v830_v61, %v286_v2  ;;  %v231_v16 = vshll.u32 %v189_v58, 16  ;;  %v236_v20 = vshrl.u32 %v1021_v22, 16  ;;  %v239_v28 = vshll.u32 %v1021_v22, 16  ;;  %v923_v22 = vld [vmem:[%s1228_s1 + $0x28] sm:$0xff]  }
  0x1f   : > { %v460_v21 = vrot.slane %v446_v4, %v978_v6  ;;  %v390_v23 = vcombine.low %v287_v15, %v291_v50  ;;  %v228_v25 = vor.u32 %v227_v8, %v224_v7  ;;  %v245_v37 = vshll.u32 %v1046_v32, 16  ;;  %870 = vmatpush3.bf16.msra.mxu0 %v923_v22 }
  0x20   : > { %v233_v33 = vrot.slane %v231_v16, 7  ;;  %v238_v36 = vrot.slane %v236_v20, 6  ;;  %v250_v38 = vshrl.u32 %v1010_v18, 16  ;;  %v241_v42 = vrot.slane %v239_v28, 7  ;;  %871 = vmatprep.subr.bf16.mxu0 %v924_v53 }
  0x21   : > { %v461_v39 = vcombine.low %v453_v1, %v460_v21  ;;  %v398_v40 = vrot.slane %v390_v23, %v978_v6  ;;  %v229_v41 = vrot.slane %v228_v25, 2  ;;  %v247_v43 = vrot.slane %v245_v37, 7  ;;  %v926_v25 = vld [vmem:[%s1228_s1 + $0x80] sm:$0xff]  }
  0x22   : > { %v252_v44 = vrot.slane %v250_v38, 6  ;;  %v253_v46 = vshll.u32 %v1010_v18, 16  ;;  %v259_v48 = vshll.u32 %v1032_v26, 16  ;;  %v242_v50 = vor.u32 %v241_v42, %v238_v36 }
  0x23   : > { %462 = vrot.lane.b32.xlu0 %v461_v39, %s940_s18  ;;  %v406_v32 = vcombine.low %v398_v40, %v1122_v5  ;;  %v234_v49 = vsel %vm1140_vm13, %v229_v41, %v233_v33  ;;  %v264_v51 = vshrl.u32 %v998_v13, 16  ;;  %v267_v26 = vshll.u32 %v998_v13, 16  ;;  %v925_v13 = vld [vmem:[%s1228_s1 + $0x30] sm:$0xff]  }
  0x24   : > { %v255_v18 = vrot.slane %v253_v46, 7  ;;  %v261_v54 = vrot.slane %v259_v48, 7  ;;  %v273_v55 = vshll.u32 %v1036_v27, 16  ;;  %v243_v56 = vrot.slane %v242_v50, 2  ;;  %872 = vmatpush3.bf16.msra.mxu0 %v925_v13 }
  0x25   : > { %407 = vrot.lane.b32.xlu1 %v406_v32, %s939_s5  ;;  %v266_v57 = vrot.slane %v264_v51, 6  ;;  %v409_v58 = vcombine.low %v1006_v17, %v990_v9  ;;  %v410_v59 = vcombine.low %v992_v10, %v994_v11  ;;  %v269_v61 = vrot.slane %v267_v26, 7  ;;  %v927_v10 = vld [vmem:[%s1228_s1 + $0x78] sm:$0xff]  }
  0x26   : > { %v256_v60 = vor.u32 %v255_v18, %v252_v44  ;;  %v275_v62 = vrot.slane %v273_v55, 7  ;;  %v310_v63 = vshrl.u32 %v1002_v14, 16  ;;  %v248_v27 = vsel %vm1140_vm13, %v243_v56, %v247_v43  ;;  %873 = vmatprep.subr.bf16.mxu0 %v927_v10 }
  0x27   : > { %v417_v1 = vrot.slane %v409_v58, %v978_v6  ;;  %v424_v9 = vrot.slane %v410_v59, %v978_v6  ;;  %v313_v17 = vshll.u32 %v1002_v14, 16  ;;  %v270_v2 = vor.u32 %v269_v61, %v266_v57 }
  0x28   : > { %v257_v11 = vrot.slane %v256_v60, 2  ;;  %v371_v3 = vcombine.low %v234_v49, %v248_v27  ;;  %v312_v4 = vrot.slane %v310_v63, 6  ;;  %v319_v15 = vshll.u32 %v1080_v47, 16  ;;  %v928_v47 = vld [vmem:[%s1228_s1 + $0x38] sm:$0xff]  }
  0x29   : > { %v425_v7 = vcombine.low %v417_v1, %v424_v9  ;;  %v315_v8 = vrot.slane %v313_v17, 7  ;;  %v339_v16 = vrot.slane %v337_v29, 6  ;;  %v486_v20 = vcombine.low %v1114_v0, %v1129_v12  ;;  %874 = vmatpush3.bf16.msra.mxu0 %v928_v47 }
  0x2a   : > { %v262_v14 = vsel %vm1140_vm13, %v257_v11, %v261_v54  ;;  %v271_v21 = vrot.slane %v270_v2, 2  ;;  %v342_v23 = vrot.slane %v340_v30, 7  ;;  %v321_v12 = vrot.slane %v319_v15, 7 }
  0x2b   : > { %v428_v29 = vcombine.low %v248_v27, %v262_v14  ;;  %426 = vrot.lane.b32.xlu1 %v425_v7, %s941_s29  ;;  %v316_v0 = vor.u32 %v315_v8, %v312_v4  ;;  %v346_v28 = vshll.u32 %v1096_v52, 16  ;;  %v379_v30 = vrot.slane %v371_v3, %v978_v6  ;;  %v929_v52 = vld [vmem:[%s1228_s1 + $0x88] sm:$0xff]  }
  0x2c   : > { %v276_v19 = vsel %vm1140_vm13, %v271_v21, %v275_v62  ;;  %v343_v31 = vor.u32 %v342_v23, %v339_v16  ;;  %v942_v22 = vmov 0.0   ;;  %v493_v40 = vrot.slane %v486_v20, %v978_v6 }
  0x2d   : > { %v372_v33 = vcombine.low %v262_v14, %v276_v19  ;;  %v317_v36 = vrot.slane %v316_v0, 2  ;;  %v348_v37 = vrot.slane %v346_v28, 7  ;;  %v436_v38 = vrot.slane %v428_v29, %v978_v6  ;;  %884 = vmatprep.subr.bf16.mxu1 %v942_v22  ;;  %888 = vmatprep.mubr.msk.bf16.mxu1 %vm943_vm14, %v942_v22 }
  0x2e   : > { %v344_v39 = vrot.slane %v343_v31, 2  ;;  %885 = vmatpush3.bf16.msra.mxu1 %v926_v25  ;;  %v494_v32 = vcombine.low %v1122_v5, %v493_v40 }
  0x2f   : > { %v386_v41 = vrot.slane %v372_v33, %v978_v6  ;;  %v322_v42 = vsel %vm1140_vm13, %v317_v36, %v321_v12  ;;  %886 = vmatprep.subr.bf16.mxu1 %v942_v22 }
  0x30   : > { %v349_v43 = vsel %vm1140_vm13, %v344_v39, %v348_v37  ;;  %v429_v44 = vcombine.low %v276_v19, %v322_v42 }
  0x31   : > { %v387_v46 = vcombine.low %v379_v30, %v386_v41  ;;  %v475_v48 = vcombine.low %v322_v42, %v349_v43 }
  0x32   : > { %v443_v49 = vrot.slane %v429_v44, %v978_v6  ;;  %887 = vmatpush3.bf16.msra.mxu1 %v929_v52 }
  0x33   : > { %388 = vrot.lane.b32.xlu0 %v387_v46, %s940_s18  ;;  %v482_v50 = vrot.slane %v475_v48, %v978_v6 }
  0x34   : > { %v444_v51 = vcombine.low %v436_v38, %v443_v49 }
  0x35   : > { %v483_v53 = vcombine.low %v386_v41, %v482_v50  ;;  %889 = vmatmul.mubr.msk.bf16.vlgmr.msra.gmra.mrb[0].mxu1 %vm495_vm15, %v494_v32 }
  0x37   : > { %484 = vrot.lane.b32.xlu0 %v483_v53, %s941_s29 }
  0x8b   : > { %v474_v34 = vpop.permute.xlu1 %473 }
  0x95   : > { %v463_v18 = vpop.permute.xlu0 %462 }
  0x96   : > { %v508_v55 = vsel %vm495_vm15, %v444_v51, %v463_v18 }
  0x97   : > { %v408_v54 = vpop.permute.xlu1 %407  ;;  %v510_v58 = vsel %vm499_vm0, %v508_v55, %v474_v34 }
  0x9d   : > { %v427_v56 = vpop.permute.xlu1 %426 }
  0xa5   : > { %v389_v26 = vpop.permute.xlu0 %388 }
  0xa6   : > { %v498_v5 = vsel %vm495_vm15, %v370_v45, %v389_v26 }
  0xa7   : > { %v501_v57 = vsel %vm499_vm0, %v498_v5, %v408_v54 }
  0xa8   : > { %v504_v60 = vsel %vm502_vm1, %v501_v57, %v427_v56 }
  0xa9   : > { %v485_v6 = vpop.permute.xlu0 %484 }
  0xaa   : > { %v512_v59 = vsel %vm502_vm1, %v510_v58, %v485_v6 }
  0xab   : > { %700 = vmatprep.mubr.bf16.mxu0 %v512_v59 }
  0xac   : > { %701 = vmatmul.mubr.bf16.vlgmr.msra.gmra.mrb[0].mxu0 %v504_v60 }
 0x108   : > { %v743_v61 = vpop.f32.mrb[0].mxu1 }
 0x109   : > { %v890_v62 = vpop.f32.mrb[1].mxu1 }
 0x10a   : > { %v746_v63 = vpop.f32.mrb[2].mxu1 }
 0x10b   : > { %v891_v13 = vpop.f32.mrb[3].mxu1 }
 0x17f   : > { %v875_v27 = vpop.f32.mrb[0].mxu0 }
 0x180   : > { %v876_v1 = vpop.f32.mrb[1].mxu0 }
 0x181   : > { %v877_v35 = vadd.f32 %v876_v1, %v875_v27  ;;  %v878_v45 = vpop.f32.mrb[2].mxu0 }
 0x182   : > { %v879_v9 = vpop.f32.mrb[3].mxu0 }
 0x183   : > { %v703_v17 = vadd.f32 %v877_v35, %v836_v24  ;;  %v880_v10 = vadd.f32 %v879_v9, %v878_v45 }
 0x185   : > { %v744_v11 = vadd.f32 %v743_v61, %v703_v17  ;;  %v706_v2 = vadd.f32 %v880_v10, %v836_v24 }
 0x187   : > { %v750_v3 = vmax.f32 %v744_v11, 0.0  ;;  %v747_v4 = vadd.f32 %v746_v63, %v706_v2 }
 0x189   : > { %v754_v7 = vcombine.high %v750_v3, %v750_v3  ;;  %v758_v8 = vpack.c.bf16 %v750_v3, %v750_v3  ;;  %v751_v15 = vmax.f32 %v747_v4, 0.0 }
 0x18b   : > { %v759_v16 = vpack.c.bf16 %v754_v7, %v754_v7  ;;  %763 = vst.msk [vmem:[%s170_s10] sm:$0x3] %vm762_vm2, %v758_v8  ;;  %v755_v20 = vcombine.high %v751_v15, %v751_v15  ;;  %v760_v14 = vpack.c.bf16 %v751_v15, %v751_v15 }
 0x18d   : > { %764 = vst.msk [vmem:[%s170_s10 + $0x2] sm:$0x3] %vm762_vm2, %v759_v16  ;;  %v761_v21 = vpack.c.bf16 %v755_v20, %v755_v20  ;;  %765 = vst.msk [vmem:[%s170_s10 + $0x4] sm:$0x3] %vm762_vm2, %v760_v14 }
 0x18f   : > { %766 = vst.msk [vmem:[%s170_s10 + $0x6] sm:$0x3] %vm762_vm2, %v761_v21 }
 0x190 PF: > { %s13_s12 = sadd.s32 1, %s936_s12  }
 0x191   : > { %p10_p4 = scmp.ge.s32.totalorder %s13_s12, 4  }
 0x193   :  { %12 = sbr.rel (!%p10_p4) target bundleno = 1 (0x1), region = 62 }

// kernel: transunet_forward.41
= control target key start
LH: loop header
LB: loop body
LE: loop exit
PB: predicated region body
PF: predicated region fallthrough
CT: control target
= control target key end

     0   :  { %s619_s12 = smov 0   ;;  %s621_s13 = smov 0   ;;  %s666_s0 = inlined_call_operand.vmem [shape: bf16[128,16], index: 0, kind: input, shape index: {}]   ;;  %s667_s1 = inlined_call_operand.vmem [shape: bf16[16,32], index: 1, kind: input, shape index: {}]   ;;  %s668_s2 = inlined_call_operand.vmem [shape: f32[1,32], index: 2, kind: input, shape index: {}]   ;;  %s669_s3 = inlined_call_operand.vmem [shape: bf16[128,32], index: 3, kind: output, shape index: {}]  }
   0x1   :  { %s623_s14 = smov 0  }
   0x2 LB: > { %s25_s15 = sadd.s32 1, %s593_s13  ;;  %p496_p0 = scmp.ge.s32.totalorder %s597_s14, 1  ;;  %s597_s14 = sphi %s623_s14, %s13_s14   ;;  %s593_s13 = sphi %s621_s13, %s671_s13   ;;  %s589_s12 = sphi %s619_s12, %s670_s12  }
   0x3   : > { %p27_p1 = scmp.ge.s32.totalorder %s25_s15, 2  ;;  %p169_p2 = scmp.lt.s32.totalorder %s597_s14, 3 }
   0x5   : > { %s673_s15 = smov (%p27_p1, %s25_s15), 0  ;;  %p170_p3 = pnand %p496_p0, %p169_p2 }
   0x6   : > { %v570_v0 = vld [vmem:[%s667_s1] sm:$0xff] (!%p170_p3)   ;;  %s497_s18 = sshll.u32 (!%p170_p3), %s589_s12, 3  ;;  %vm269_vm0 = vcmask (!%p170_p3), 130048   ;;  %vm379_vm1 = vcmask (!%p170_p3), 257024  }
   0x7   : > { %173 = sbr.rel (%p170_p3) target bundleno = 239 (0xef), region = 32  ;;  %p204_p4 = scmp.lt.s32.totalorder (!%p170_p3), %s497_s18, 15  ;;  %534 = vmatprep.subr.bf16.mxu0 (!%p170_p3), %v570_v0  ;;  %544 = vmatprep.subr.bf16.mxu1 (!%p170_p3), %v570_v0  ;;  %v501_v5 = vld [vmem:[%s668_s2] ss:$0 sm:$0xff] (!%p170_p3) }
   0x8   : > { %535 = vmatpush3.bf16.msra.mxu0 (!%p170_p3), %v570_v0  ;;  %545 = vmatpush3.bf16.msra.mxu1 (!%p170_p3), %v570_v0 }
   0xe   : > { %s675_s18 = smov (!%p204_p4, %s497_s18), 15 }
   0xf   : > { %s498_s19 = sshll.u32 %s675_s18, 2 }
  0x10   : > { %s207_s22 = scalar_lea.vmem %s666_s0, %s498_s19  ;;  %s223_s27 = scalar_lea.vmem %s669_s3, %s498_s19 }
  0x11   : > { %v571_v1 = vld [vmem:[%s207_s22] sm:$0xff]   ;;  %v572_v2 = vld [vmem:[%s207_s22 + $0x10] sm:$0xff]   ;;  %v573_v3 = vld [vmem:[%s207_s22 + $0x8] sm:$0xff]  }
  0x12   : > { %536 = vmatprep.mubr.msk.bf16.mxu0 %vm269_vm0, %v571_v1  ;;  %540 = vmatprep.mubr.msk.bf16.mxu1 %vm269_vm0, %v572_v2  ;;  %v574_v4 = vld [vmem:[%s207_s22 + $0x18] sm:$0xff]  }
  0x13   : > { %537 = vmatmul.mubr.msk.bf16.vlgmr.msra.gmra.mrb[0].mxu0 %vm269_vm0, %v573_v3  ;;  %541 = vmatmul.mubr.msk.bf16.vlgmr.msra.gmra.mrb[0].mxu1 %vm269_vm0, %v574_v4 }
  0xe6   : > { %v538_v6 = vpop.f32.mrb[0].mxu0  ;;  %v542_v8 = vpop.f32.mrb[0].mxu1 }
  0xe7   : > { %v325_v7 = vadd.f32 %v538_v6, %v501_v5  ;;  %v316_v9 = vpop.f32.mrb[1].mxu0  ;;  %v341_v10 = vadd.f32 %v542_v8, %v501_v5  ;;  %v332_v12 = vpop.f32.mrb[1].mxu1 }
  0xe8   : > { %v317_v11 = vadd.f32 %v501_v5, %v316_v9  ;;  %v539_v13 = vpop.f32.mrb[2].mxu0  ;;  %v333_v15 = vadd.f32 %v501_v5, %v332_v12  ;;  %v543_v17 = vpop.f32.mrb[2].mxu1 }
  0xe9   : > { %v523_v14 = vpack.c.bf16 %v325_v7, %v325_v7  ;;  %v328_v16 = vadd.f32 %v539_v13, %v501_v5  ;;  %v319_v18 = vpop.f32.mrb[3].mxu0  ;;  %v527_v19 = vpack.c.bf16 %v341_v10, %v341_v10  ;;  %v344_v21 = vadd.f32 %v543_v17, %v501_v5  ;;  %v335_v23 = vpop.f32.mrb[3].mxu1 }
  0xea   : > { %v521_v20 = vpack.c.bf16 %v317_v11, %v317_v11  ;;  %v320_v22 = vadd.f32 %v501_v5, %v319_v18  ;;  %v525_v24 = vpack.c.bf16 %v333_v15, %v333_v15  ;;  %v336_v26 = vadd.f32 %v501_v5, %v335_v23 }
  0xeb   : > { %382 = vst.msk [vmem:[%s223_s27 + $0x8] sm:$0xf] %vm379_vm1, %v523_v14  ;;  %v524_v25 = vpack.c.bf16 %v328_v16, %v328_v16  ;;  %386 = vst.msk [vmem:[%s223_s27 + $0x18] sm:$0xf] %vm379_vm1, %v527_v19  ;;  %v528_v27 = vpack.c.bf16 %v344_v21, %v344_v21 }
  0xec   : > { %380 = vst.msk [vmem:[%s223_s27] sm:$0xf] %vm379_vm1, %v521_v20  ;;  %v522_v28 = vpack.c.bf16 %v320_v22, %v320_v22  ;;  %384 = vst.msk [vmem:[%s223_s27 + $0x10] sm:$0xf] %vm379_vm1, %v525_v24  ;;  %v526_v29 = vpack.c.bf16 %v336_v26, %v336_v26 }
  0xed   : > { %383 = vst.msk [vmem:[%s223_s27 + $0xc] sm:$0xf] %vm379_vm1, %v524_v25  ;;  %387 = vst.msk [vmem:[%s223_s27 + $0x1c] sm:$0xf] %vm379_vm1, %v528_v27 }
  0xee   : > { %381 = vst.msk [vmem:[%s223_s27 + $0x4] sm:$0xf] %vm379_vm1, %v522_v28  ;;  %385 = vst.msk [vmem:[%s223_s27 + $0x14] sm:$0xf] %vm379_vm1, %v526_v29 }
  0xef PF: > { %s13_s14 = sadd.s32 1, %s597_s14   ;;  %s670_s12 = smov %s593_s13 }
  0xf0   : > { %p10_p5 = scmp.ge.s32.totalorder %s13_s14, 4   ;;  %s671_s13 = smov %s673_s15 }
  0xf2   :  { %12 = sbr.rel (!%p10_p5) target bundleno = 2 (0x2), region = 68 }

// kernel: transunet_forward.40
= control target key start
LH: loop header
LB: loop body
LE: loop exit
PB: predicated region body
PF: predicated region fallthrough
CT: control target
= control target key end

     0   :  { %s969_s12 = smov 0   ;;  %s1319_s0 = inlined_call_operand.vmem [shape: bf16[2,10,10,16], index: 0, kind: input, shape index: {}]   ;;  %s1320_s1 = inlined_call_operand.vmem [shape: bf16[144,16], index: 1, kind: input, shape index: {}]   ;;  %s1321_s2 = inlined_call_operand.vmem [shape: f32[1,16], index: 2, kind: input, shape index: {}]   ;;  %s1322_s3 = inlined_call_operand.vmem [shape: bf16[2,8,8,16], index: 3, kind: output, shape index: {}]  }
   0x1 LB: > { %s818_s13 = sadd.s32 4294967295, %s939_s12   ;;  %p822_p0 = scmp.ge.s32.totalorder %s939_s12, 1  ;;  %s939_s12 = sphi %s969_s12, %s13_s12  }
   0x2   : > { %p137_p1 = scmp.lt.s32.totalorder %s939_s12, 3 }
   0x4   : > { %p138_p2 = pnand %p822_p0, %p137_p1 }
   0x5   : > { %p161_p3 = scmp.lt.s32.totalorder (!%p138_p2), %s818_s13, 1  ;;  %vm323_vm0 = vcmask (!%p138_p2), 1042432   ;;  %vm324_vm1 = vcmask (!%p138_p2), 1046532   ;;  %v923_v0 = vld [vmem:[%s1320_s1] sm:$0xff] (!%p138_p2)   ;;  %v941_v1 = vmov (!%p138_p2), 0   ;;  %v924_v3 = vld [vmem:[%s1320_s1 + $0x8] sm:$0xff] (!%p138_p2)  }
   0x6   : > { %141 = sbr.rel (%p138_p2) target bundleno = 420 (0x1a4), region = 32  ;;  %880 = vmatprep.subr.bf16.mxu1 (!%p138_p2), %v941_v1  ;;  %673 = vmatprep.subr.bf16.mxu0 (!%p138_p2), %v941_v1  ;;  %vm985_vm2 = vmor (!%p138_p2), %vm323_vm0, %vm324_vm1  ;;  %v925_v4 = vld [vmem:[%s1320_s1 + $0x10] sm:$0xff] (!%p138_p2)   ;;  %vm192_vm3 = vsmask.f32 (!%p138_p2), 3328  ;;  %vm193_vm4 = vsmask.f32 (!%p138_p2), 7440 }
   0x7   : > { %889 = vmatpush1.bf16.msra.mxu1 (!%p138_p2), %v923_v0  ;;  %674 = vmatpush1.bf16.msra.mxu0 (!%p138_p2), %v923_v0  ;;  %v926_v17 = vld [vmem:[%s1320_s1 + $0x18] sm:$0xff] (!%p138_p2)   ;;  %s942_s26 = smov (!%p138_p2), 48   ;;  %s943_s27 = smov (!%p138_p2), 32   ;;  %v927_v45 = vld [vmem:[%s1320_s1 + $0x20] sm:$0xff] (!%p138_p2)   ;;  %vm1095_vm5 = vmor (!%p138_p2), %vm192_vm3, %vm193_vm4  ;;  %vm511_vm6 = vcmask (!%p138_p2), 130048   ;;  %vm524_vm7 = vcmask (!%p138_p2), 261120  }
   0x8   : > { %881 = vmatprep.subr.bf16.mxu1 (!%p138_p2), %v941_v1  ;;  %675 = vmatprep.subr.bf16.mxu0 (!%p138_p2), %v941_v1  ;;  %s944_s30 = smov (!%p138_p2), 80   ;;  %v929_v62 = vld [vmem:[%s1320_s1 + $0x28] sm:$0xff] (!%p138_p2)   ;;  %s945_s8 = smov (!%p138_p2), 16   ;;  %vm533_vm8 = vcmask (!%p138_p2), 392192   ;;  %vm542_vm9 = vcmask (!%p138_p2), 523264   ;;  %vm551_vm10 = vcmask (!%p138_p2), 654336  }
   0x9   : > { %s946_s15 = smov (!%p138_p2), 64   ;;  %s948_s17 = smov (!%p138_p2), 112   ;;  %vm560_vm11 = vcmask (!%p138_p2), 785408   ;;  %vm569_vm12 = vcmask (!%p138_p2), 916480   ;;  %vm754_vm13 = vcmask (!%p138_p2), 125952  }
   0xb   : > { %890 = vmatpush1.bf16.msra.mxu1 (!%p138_p2), %v924_v3  ;;  %676 = vmatpush1.bf16.msra.mxu0 (!%p138_p2), %v924_v3 }
   0xc   : > { %882 = vmatprep.subr.bf16.mxu1 (!%p138_p2), %v941_v1  ;;  %677 = vmatprep.subr.bf16.mxu0 (!%p138_p2), %v941_v1 }
   0xd   : > { %s1328_s13 = smov (!%p161_p3, %s818_s13), 1 }
   0xe   : > { %s898_s16 = smul.u32 80, %s1328_s13  ;;  %s879_s20 = sshll.u32 %s1328_s13, 5 }
   0xf   : > { %891 = vmatpush1.bf16.msra.mxu1 %v925_v4  ;;  %678 = vmatpush1.bf16.msra.mxu0 %v925_v4 }
  0x10   : > { %s1000_s23 = scalar_lea.vmem %s1319_s0, %s898_s16  ;;  %883 = vmatprep.subr.bf16.mxu1 %v941_v1  ;;  %679 = vmatprep.subr.bf16.mxu0 %v941_v1  ;;  %s947_s16 = smov 96  }
  0x11   : > { %v1003_v5 = vld [vmem:[%s1000_s23 + $0x28] sm:$0xf]  ;;  %v1006_v6 = vld [vmem:[%s1000_s23 + $0x30] sm:$0xf]  ;;  %v1017_v10 = vld [vmem:[%s1000_s23] sm:$0xf] }
  0x12   : > { %v1009_v7 = vld [vmem:[%s1000_s23 + $0x8] sm:$0xf]  ;;  %v850_v8 = vcombine.low %v1003_v5, %v1006_v6  ;;  %v1014_v9 = vld [vmem:[%s1000_s23 + $0x10] sm:$0xf]  ;;  %v173_v11 = vld [vmem:[%s1000_s23 + $0x4] sm:$0x1] }
  0x13   : > { %v848_v12 = vcombine.low %v1009_v7, %v1014_v9  ;;  %v1025_v13 = vld [vmem:[%s1000_s23 + $0xc] sm:$0x1]  ;;  %v826_v14 = vrot.slane %v1017_v10, 9  ;;  %v328_v15 = vrot.slane %v173_v11, 5  ;;  %v827_v16 = vrot.slane %v1009_v7, 9  ;;  %892 = vmatpush1.bf16.msra.mxu1 %v926_v17  ;;  %680 = vmatpush1.bf16.msra.mxu0 %v926_v17 }
  0x14   : > { %459 = vrot.lane.b32.xlu1 %v850_v8, %s942_s26  ;;  %v332_v18 = vrot.slane %v1025_v13, 5  ;;  %v1035_v19 = vld [vmem:[%s1000_s23 + $0x14] sm:$0x1]  ;;  %v828_v20 = vrot.slane %v1014_v9, 9  ;;  %v1039_v21 = vld [vmem:[%s1000_s23 + $0x20] sm:$0xf]  ;;  %v836_v22 = vcombine.low %v1017_v10, %v1009_v7  ;;  %884 = vmatprep.subr.bf16.mxu1 %v941_v1 }
  0x15   : > { %455 = vrot.lane.b32.xlu0 %v848_v12, %s942_s26  ;;  %v329_v23 = vsel %vm985_vm2, %v826_v14, %v328_v15  ;;  %v336_v24 = vrot.slane %v1035_v19, 5  ;;  %v1048_v25 = vld [vmem:[%s1000_s23 + $0x24] sm:$0x1]  ;;  %v1051_v26 = vld [vmem:[%s1000_s23 + $0x2c] sm:$0x1]  ;;  %v830_v27 = vrot.slane %v1039_v21, 9  ;;  %681 = vmatprep.subr.bf16.mxu0 %v941_v1 }
  0x16   : > { %v333_v28 = vsel %vm985_vm2, %v827_v16, %v332_v18  ;;  %v344_v29 = vrot.slane %v1048_v25, 5  ;;  %v831_v30 = vrot.slane %v1003_v5, 9  ;;  %v348_v31 = vrot.slane %v1051_v26, 5  ;;  %v1075_v40 = vld [vmem:[%s1000_s23 + $0x34] sm:$0x1] }
  0x17   : > { %v844_v32 = vcombine.low %v329_v23, %v333_v28  ;;  %v1062_v33 = vsel %vm985_vm2, %v828_v20, %v336_v24  ;;  %v196_v34 = vshrl.u32 %v1017_v10, 16  ;;  %v199_v35 = vshll.u32 %v1017_v10, 16  ;;  %893 = vmatpush1.bf16.msra.mxu1 %v927_v45  ;;  %682 = vmatpush1.bf16.msra.mxu0 %v927_v45  ;;  %v1121_v18 = vld [vmem:[%s1000_s23 + $0x38] sm:$0xf]  ;;  %v930_v20 = vld [vmem:[%s1320_s1 + $0x30] sm:$0xff]  }
  0x18   : > { %v856_v36 = vcombine.low %v333_v28, %v1062_v33  ;;  %v1070_v37 = vsel %vm985_vm2, %v830_v27, %v344_v29  ;;  %v349_v38 = vsel %vm985_vm2, %v831_v30, %v348_v31  ;;  %v205_v39 = vshll.u32 %v173_v11, 16  ;;  %885 = vmatprep.subr.bf16.mxu1 %v941_v1  ;;  %683 = vmatprep.subr.bf16.mxu0 %v941_v1 }
  0x19   : > { %442 = vrot.lane.b32.xlu1 %v844_v32, %s943_s27  ;;  %v1079_v41 = vcombine.low %v1070_v37, %v349_v38  ;;  %v198_v42 = vrot.slane %v196_v34, 4  ;;  %v201_v43 = vrot.slane %v199_v35, 5  ;;  %v210_v44 = vshrl.u32 %v1009_v7, 16 }
  0x1a   : > { %481 = vrot.lane.b32.xlu0 %v856_v36, %s944_s30  ;;  %v207_v46 = vrot.slane %v205_v39, 5  ;;  %v213_v47 = vshll.u32 %v1009_v7, 16  ;;  %v219_v48 = vshll.u32 %v1025_v13, 16  ;;  %v832_v49 = vrot.slane %v1006_v6, 9  ;;  %v1136_v36 = vld [vmem:[%s1000_s23 + $0x18] sm:$0xf] }
  0x1b   : > { %v202_v50 = vor.u32 %v201_v43, %v198_v42  ;;  %v212_v51 = vrot.slane %v210_v44, 4  ;;  %v352_v52 = vrot.slane %v1075_v40, 5  ;;  %v252_v53 = vshrl.u32 %v1039_v21, 16  ;;  %894 = vmatpush1.bf16.msra.mxu1 %v929_v62  ;;  %684 = vmatpush1.bf16.msra.mxu0 %v929_v62  ;;  %v187_v43 = vld [vmem:[%s1000_s23 + $0x3c] sm:$0x1] }
  0x1c   : > { %v215_v55 = vrot.slane %v213_v47, 5  ;;  %v255_v56 = vshll.u32 %v1039_v21, 16  ;;  %v261_v57 = vshll.u32 %v1048_v25, 16  ;;  %v266_v61 = vshrl.u32 %v1003_v5, 16  ;;  %886 = vmatprep.subr.bf16.mxu1 %v941_v1  ;;  %685 = vmatprep.subr.bf16.mxu0 %v941_v1  ;;  %v931_v47 = vld [vmem:[%s1320_s1 + $0x38] sm:$0xff]  }
  0x1d   : > { %446 = vrot.lane.b32.xlu1 %v1079_v41, %s943_s27  ;;  %v203_v58 = vrot.slane %v202_v50, 4  ;;  %v1105_v59 = vsel %vm985_vm2, %v832_v49, %v352_v52  ;;  %v254_v60 = vrot.slane %v252_v53, 4  ;;  %v221_v0 = vrot.slane %v219_v48, 5 }
  0x1e   : > { %v216_v63 = vor.u32 %v215_v55, %v212_v51  ;;  %v858_v3 = vcombine.low %v349_v38, %v1105_v59  ;;  %v257_v4 = vrot.slane %v255_v56, 5  ;;  %v268_v11 = vrot.slane %v266_v61, 4  ;;  %v179_v55 = vld [vmem:[%s1000_s23 + $0x1c] sm:$0x1] }
  0x1f   : > { %v208_v8 = vsel %vm1095_vm5, %v203_v58, %v207_v46  ;;  %v269_v12 = vshll.u32 %v1003_v5, 16  ;;  %v275_v13 = vshll.u32 %v1051_v26, 16  ;;  %v280_v16 = vshrl.u32 %v1006_v6, 16  ;;  %895 = vmatpush1.bf16.msra.mxu1 %v930_v20  ;;  %686 = vmatpush1.bf16.msra.mxu0 %v930_v20 }
  0x20   : > { %v217_v14 = vrot.slane %v216_v63, 4  ;;  %v258_v15 = vor.u32 %v257_v4, %v254_v60  ;;  %v283_v17 = vshll.u32 %v1006_v6, 16  ;;  %v263_v23 = vrot.slane %v261_v57, 5  ;;  %887 = vmatprep.subr.bf16.mxu1 %v941_v1  ;;  %687 = vmatprep.subr.bf16.mxu0 %v941_v1  ;;  %v932_v4 = vld [vmem:[%s1320_s1 + $0x40] sm:$0xff]  }
  0x21   : > { %485 = vrot.lane.b32.xlu1 %v858_v3, %s944_s30  ;;  %v271_v24 = vrot.slane %v269_v12, 5  ;;  %v289_v25 = vshll.u32 %v1075_v40, 16  ;;  %v224_v26 = vshrl.u32 %v1014_v9, 16  ;;  %v282_v29 = vrot.slane %v280_v16, 4 }
  0x22   : > { %v1131_v27 = vsel %vm1095_vm5, %v217_v14, %v221_v0  ;;  %v259_v28 = vrot.slane %v258_v15, 4  ;;  %v285_v30 = vrot.slane %v283_v17, 5  ;;  %v277_v34 = vrot.slane %v275_v13, 5 }
  0x23   : > { %v840_v31 = vcombine.low %v208_v8, %v1131_v27  ;;  %v272_v32 = vor.u32 %v271_v24, %v268_v11  ;;  %v291_v35 = vrot.slane %v289_v25, 5  ;;  %v226_v39 = vrot.slane %v224_v26, 4  ;;  %896 = vmatpush1.bf16.msra.mxu1 %v931_v47  ;;  %688 = vmatpush1.bf16.msra.mxu0 %v931_v47  ;;  %v1180_v25 = vld [vmem:[%s1000_s23 + $0x40] sm:$0xf] }
  0x24   : > { %v286_v38 = vor.u32 %v285_v30, %v282_v29  ;;  %v227_v40 = vshll.u32 %v1014_v9, 16  ;;  %v233_v42 = vshll.u32 %v1035_v19, 16  ;;  %v1145_v44 = vsel %vm1095_vm5, %v259_v28, %v263_v23  ;;  %888 = vmatprep.subr.bf16.mxu1 %v941_v1  ;;  %689 = vmatprep.subr.bf16.mxu0 %v941_v1 }
  0x25   : > { %422 = vrot.lane.b32.xlu0 %v840_v31, %s945_s8  ;;  %v273_v45 = vrot.slane %v272_v32, 4  ;;  %v294_v46 = vshrl.u32 %v1121_v18, 16  ;;  %v297_v50 = vshll.u32 %v1121_v18, 16  ;;  %v303_v53 = vshll.u32 %v187_v43, 16  ;;  %v189_v32 = vld [vmem:[%s1000_s23 + $0x44] sm:$0x1] }
  0x26   : > { %v287_v48 = vrot.slane %v286_v38, 4  ;;  %v229_v49 = vrot.slane %v227_v40, 5  ;;  %v235_v19 = vrot.slane %v233_v42, 5  ;;  %v238_v56 = vshrl.u32 %v1136_v36, 16 }
  0x27   : > { %v278_v51 = vsel %vm1095_vm5, %v273_v45, %v277_v34  ;;  %v296_v52 = vrot.slane %v294_v46, 4  ;;  %v299_v61 = vrot.slane %v297_v50, 5  ;;  %v305_v63 = vrot.slane %v303_v53, 5  ;;  %897 = vmatpush1.bf16.msra.mxu1 %v932_v4  ;;  %690 = vmatpush1.bf16.msra.mxu0 %v932_v4 }
  0x28   : > { %v1159_v57 = vcombine.low %v1145_v44, %v278_v51  ;;  %v292_v58 = vsel %vm1095_vm5, %v287_v48, %v291_v35  ;;  %v230_v60 = vor.u32 %v229_v49, %v226_v39  ;;  %v240_v0 = vrot.slane %v238_v56, 4  ;;  %v190_v35 = vld [vmem:[%s1000_s23 + $0x48] sm:$0xf]  ;;  %v191_v39 = vld [vmem:[%s1000_s23 + $0x4c] sm:$0x1]  ;;  %s1298_s23 = scalar_lea.vmem %s1322_s3, %s879_s20 }
  0x29   : > { %v854_v62 = vcombine.low %v278_v51, %v292_v58  ;;  %v241_v3 = vshll.u32 %v1136_v36, 16  ;;  %v300_v11 = vor.u32 %v299_v61, %v296_v52  ;;  %v247_v12 = vshll.u32 %v179_v55, 16 }
  0x2a   : > { %426 = vrot.lane.b32.xlu0 %v1159_v57, %s945_s8  ;;  %v231_v8 = vrot.slane %v230_v60, 4  ;;  %v833_v13 = vrot.slane %v1121_v18, 9  ;;  %v1173_v14 = vcombine.low %v1006_v6, %v1121_v18  ;;  %v356_v16 = vrot.slane %v187_v43, 5 }
  0x2b   : > { %472 = vrot.lane.b32.xlu1 %v854_v62, %s946_s15  ;;  %v243_v15 = vrot.slane %v241_v3, 5  ;;  %v301_v20 = vrot.slane %v300_v11, 4  ;;  %v829_v23 = vrot.slane %v1136_v36, 9  ;;  %v340_v24 = vrot.slane %v179_v55, 5 }
  0x2c   : > { %v236_v17 = vsel %vm1095_vm5, %v231_v8, %v235_v19  ;;  %v249_v28 = vrot.slane %v247_v12, 5  ;;  %v1186_v29 = vcombine.low %v1014_v9, %v1136_v36  ;;  %v357_v31 = vsel %vm985_vm2, %v833_v13, %v356_v16 }
  0x2d   : > { %v852_v26 = vcombine.low %v1131_v27, %v236_v17  ;;  %v244_v6 = vor.u32 %v243_v15, %v240_v0  ;;  %v306_v30 = vsel %vm1095_vm5, %v301_v20, %v305_v63  ;;  %v359_v34 = vshrl.u32 %v1180_v25, 16 }
  0x2e   : > { %v843_v1 = vcombine.low %v292_v58, %v306_v30  ;;  %v362_v9 = vshll.u32 %v1180_v25, 16  ;;  %v341_v38 = vsel %vm985_vm2, %v829_v23, %v340_v24  ;;  %v834_v40 = vrot.slane %v1180_v25, 9 }
  0x2f   : > { %468 = vrot.lane.b32.xlu0 %v852_v26, %s946_s15  ;;  %495 = vrot.lane.b32.xlu1 %v1173_v14, %s947_s16  ;;  %v245_v27 = vrot.slane %v244_v6, 4  ;;  %v376_v42 = vrot.slane %v189_v32, 5  ;;  %v835_v43 = vrot.slane %v190_v35, 9  ;;  %v361_v46 = vrot.slane %v359_v34, 4 }
  0x30   : > { %v364_v47 = vrot.slane %v362_v9, 5  ;;  %v396_v48 = vrot.slane %v191_v39, 5  ;;  %v847_v49 = vcombine.low %v1105_v59, %v357_v31  ;;  %v845_v52 = vcombine.low %v1062_v33, %v341_v38 }
  0x31   : > { %v250_v45 = vsel %vm1095_vm5, %v245_v27, %v249_v28  ;;  %v1211_v50 = vsel %vm985_vm2, %v834_v40, %v376_v42  ;;  %v368_v55 = vshll.u32 %v189_v32, 16  ;;  %v379_v58 = vshrl.u32 %v190_v35, 16 }
  0x32   : > { %v841_v19 = vcombine.low %v236_v17, %v250_v45  ;;  %v1215_v51 = vsel %vm985_vm2, %v835_v43, %v396_v48  ;;  %v365_v53 = vor.u32 %v364_v47, %v361_v46  ;;  %875 = vmatprep.mubr.msk.bf16.mxu1 %vm511_vm6, %v847_v49  ;;  %873 = vmatprep.mubr.msk.bf16.mxu0 %vm511_vm6, %v845_v52  ;;  %v382_v60 = vshll.u32 %v190_v35, 16 }
  0x33   : > { %491 = vrot.lane.b32.xlu0 %v1186_v29, %s947_s16  ;;  %505 = vrot.lane.b32.xlu1 %v843_v1, %s948_s17  ;;  %v862_v59 = vcombine.low %v1211_v50, %v1215_v51  ;;  %v370_v2 = vrot.slane %v368_v55, 5  ;;  %v851_v33 = vcombine.low %v1121_v18, %v1180_v25  ;;  %v381_v62 = vrot.slane %v379_v58, 4 }
  0x34   : > { %v366_v56 = vrot.slane %v365_v53, 4  ;;  %v384_v63 = vrot.slane %v382_v60, 5  ;;  %v849_v0 = vcombine.low %v1136_v36, %v1039_v21  ;;  %v388_v8 = vshll.u32 %v191_v39, 16 }
  0x35   : > { %v853_v18 = vcombine.low %v250_v45, %v1145_v44  ;;  %v859_v11 = vcombine.low %v357_v31, %v1211_v50  ;;  %v857_v15 = vcombine.low %v341_v38, %v1070_v37  ;;  %v860_v36 = vcombine.low %v1180_v25, %v190_v35 }
  0x36   : > { %v371_v61 = vsel %vm1095_vm5, %v366_v56, %v370_v2  ;;  %v385_v4 = vor.u32 %v384_v63, %v381_v62  ;;  %v390_v13 = vrot.slane %v388_v8, 5  ;;  %v838_v44 = vcombine.low %v1039_v21, %v1003_v5 }
  0x37   : > { %501 = vrot.lane.b32.xlu0 %v841_v19, %s948_s17  ;;  %428 = vrot.lane.b32.xlu1 %v843_v1, %s945_s8  ;;  %v855_v3 = vcombine.low %v306_v30, %v371_v61 }
  0x38   : > { %v386_v12 = vrot.slane %v385_v4, 4 }
  0x3a   : > { %v391_v16 = vsel %vm1095_vm5, %v386_v12, %v390_v13 }
  0x3b   : > { %424 = vrot.lane.b32.xlu0 %v841_v19, %s945_s8  ;;  %448 = vrot.lane.b32.xlu1 %v847_v49, %s943_s27  ;;  %v861_v17 = vcombine.low %v371_v61, %v391_v16 }
  0x3f   : > { %444 = vrot.lane.b32.xlu0 %v845_v52, %s943_s27  ;;  %461 = vrot.lane.b32.xlu1 %v851_v33, %s942_s26 }
  0x43   : > { %457 = vrot.lane.b32.xlu0 %v849_v0, %s942_s26  ;;  %474 = vrot.lane.b32.xlu1 %v855_v3, %s946_s15 }
  0x47   : > { %470 = vrot.lane.b32.xlu0 %v853_v18, %s946_s15  ;;  %487 = vrot.lane.b32.xlu1 %v859_v11, %s944_s30  ;;  %v863_v11 = vld [vmem:[%s1321_s2] ss:$0 sm:$0xff] }
  0x4b   : > { %483 = vrot.lane.b32.xlu0 %v857_v15, %s944_s30  ;;  %497 = vrot.lane.b32.xlu1 %v860_v36, %s947_s16 }
  0x4f   : > { %493 = vrot.lane.b32.xlu0 %v838_v44, %s947_s16  ;;  %507 = vrot.lane.b32.xlu1 %v861_v17, %s948_s17 }
  0x53   : > { %503 = vrot.lane.b32.xlu0 %v1159_v57, %s948_s17 }
  0x86   : > { %v460_v37 = vpop.permute.xlu1 %459 }
  0x87   : > { %v456_v20 = vpop.permute.xlu0 %455 }
  0x8b   : > { %v443_v23 = vpop.permute.xlu1 %442 }
  0x8c   : > { %v482_v54 = vpop.permute.xlu0 %481 }
  0x8f   : > { %v447_v24 = vpop.permute.xlu1 %446 }
  0x93   : > { %v486_v26 = vpop.permute.xlu1 %485 }
  0x97   : > { %v423_v25 = vpop.permute.xlu0 %422 }
  0x98   : > { %v514_v21 = vsel %vm511_vm6, %v836_v22, %v423_v25 }
  0x99   : > { %v526_v31 = vsel %vm524_vm7, %v514_v21, %v443_v23 }
  0x9a   : > { %v535_v34 = vsel %vm533_vm8, %v526_v31, %v456_v20 }
  0x9c   : > { %v427_v6 = vpop.permute.xlu0 %426 }
  0x9d   : > { %v520_v28 = vsel %vm511_vm6, %v838_v44, %v427_v6  ;;  %v473_v5 = vpop.permute.xlu1 %472 }
  0x9e   : > { %v530_v30 = vsel %vm524_vm7, %v520_v28, %v447_v24 }
  0x9f   : > { %v539_v57 = vsel %vm533_vm8, %v530_v30, %v460_v37 }
  0xa0   : > { %v548_v32 = vsel %vm542_vm9, %v539_v57, %v473_v5 }
  0xa1   : > { %v469_v1 = vpop.permute.xlu0 %468  ;;  %v496_v27 = vpop.permute.xlu1 %495  ;;  %v557_v7 = vsel %vm551_vm10, %v548_v32, %v486_v26 }
  0xa2   : > { %v544_v10 = vsel %vm542_vm9, %v535_v34, %v469_v1  ;;  %v566_v22 = vsel %vm560_vm11, %v557_v7, %v496_v27 }
  0xa3   : > { %v553_v39 = vsel %vm551_vm10, %v544_v10, %v482_v54 }
  0xa5   : > { %v492_v9 = vpop.permute.xlu0 %491  ;;  %v506_v35 = vpop.permute.xlu1 %505 }
  0xa6   : > { %v577_v38 = vsel %vm569_vm12, %v566_v22, %v506_v35  ;;  %v562_v40 = vsel %vm560_vm11, %v553_v39, %v492_v9 }
  0xa7   : > { %722 = vmatmul.mubr.bf16.vlgmr.msra.gmra.mrb[0].mxu1 %v577_v38 }
  0xa8   : > { %876 = vmatprep.mubr.msk.bf16.mxu1 %vm511_vm6, %v862_v59 }
  0xa9   : > { %v502_v42 = vpop.permute.xlu0 %501  ;;  %v429_v43 = vpop.permute.xlu1 %428 }
  0xaa   : > { %v571_v45 = vsel %vm569_vm12, %v562_v40, %v502_v42  ;;  %v523_v51 = vsel %vm511_vm6, %v1173_v14, %v429_v43 }
  0xab   : > { %706 = vmatmul.mubr.bf16.vlgmr.msra.gmra.mrb[0].mxu0 %v571_v45 }
  0xac   : > { %874 = vmatprep.mubr.msk.bf16.mxu0 %vm511_vm6, %v1079_v41 }
  0xad   : > { %v425_v46 = vpop.permute.xlu0 %424  ;;  %v449_v47 = vpop.permute.xlu1 %448 }
  0xae   : > { %v532_v55 = vsel %vm524_vm7, %v523_v51, %v449_v47  ;;  %v517_v41 = vsel %vm511_vm6, %v1186_v29, %v425_v46 }
  0xb1   : > { %v445_v48 = vpop.permute.xlu0 %444  ;;  %v462_v49 = vpop.permute.xlu1 %461 }
  0xb2   : > { %v541_v2 = vsel %vm533_vm8, %v532_v55, %v462_v49  ;;  %v528_v33 = vsel %vm524_vm7, %v517_v41, %v445_v48 }
  0xb5   : > { %v458_v19 = vpop.permute.xlu0 %457  ;;  %v475_v52 = vpop.permute.xlu1 %474 }
  0xb6   : > { %v550_v58 = vsel %vm542_vm9, %v541_v2, %v475_v52  ;;  %v537_v63 = vsel %vm533_vm8, %v528_v33, %v458_v19 }
  0xb9   : > { %v471_v53 = vpop.permute.xlu0 %470  ;;  %v488_v50 = vpop.permute.xlu1 %487 }
  0xba   : > { %v559_v60 = vsel %vm551_vm10, %v550_v58, %v488_v50  ;;  %v546_v3 = vsel %vm542_vm9, %v537_v63, %v471_v53 }
  0xbd   : > { %v484_v59 = vpop.permute.xlu0 %483  ;;  %v498_v56 = vpop.permute.xlu1 %497 }
  0xbe   : > { %v568_v61 = vsel %vm560_vm11, %v559_v60, %v498_v56  ;;  %v555_v4 = vsel %vm551_vm10, %v546_v3, %v484_v59 }
  0xc1   : > { %v494_v62 = vpop.permute.xlu0 %493  ;;  %v508_v14 = vpop.permute.xlu1 %507 }
  0xc2   : > { %v580_v0 = vsel %vm569_vm12, %v568_v61, %v508_v14  ;;  %v564_v29 = vsel %vm560_vm11, %v555_v4, %v494_v62 }
  0xc3   : > { %730 = vmatmul.mubr.bf16.gmra.mrb[4].mxu1 %v580_v0 }
  0xc5   : > { %v504_v8 = vpop.permute.xlu0 %503 }
  0xc6   : > { %v574_v18 = vsel %vm569_vm12, %v564_v29, %v504_v8 }
  0xc7   : > { %714 = vmatmul.mubr.bf16.gmra.mrb[4].mxu0 %v574_v18 }
 0x17a   : > { %v723_v12 = vpop.f32.mrb[0].mxu1 }
 0x17b   : > { %v724_v13 = vadd.f32 %v863_v11, %v723_v12  ;;  %v725_v15 = vpop.f32.mrb[1].mxu1 }
 0x17c   : > { %v726_v36 = vpop.f32.mrb[2].mxu1 }
 0x17d   : > { %v742_v16 = vmax.f32 %v724_v13, 0.0  ;;  %v727_v44 = vadd.f32 %v863_v11, %v726_v36  ;;  %v728_v17 = vpop.f32.mrb[3].mxu1 }
 0x17e   : > { %v707_v37 = vpop.f32.mrb[0].mxu0 }
 0x17f   : > { %v750_v20 = vpack.c.bf16 %v742_v16, %v742_v16  ;;  %v708_v23 = vadd.f32 %v863_v11, %v707_v37  ;;  %v709_v54 = vpop.f32.mrb[1].mxu0  ;;  %v743_v24 = vmax.f32 %v727_v44, 0.0 }
 0x180   : > { %v710_v25 = vpop.f32.mrb[2].mxu0 }
 0x181   : > { %759 = vst.msk [vmem:[%s1298_s23 + $0x10] sm:$0xf] %vm754_vm13, %v750_v20  ;;  %v738_v26 = vmax.f32 %v708_v23, 0.0  ;;  %v751_v6 = vpack.c.bf16 %v743_v24, %v743_v24  ;;  %v711_v28 = vadd.f32 %v863_v11, %v710_v25  ;;  %v712_v5 = vpop.f32.mrb[3].mxu0 }
 0x183   : > { %v746_v21 = vpack.c.bf16 %v738_v26, %v738_v26  ;;  %760 = vst.msk [vmem:[%s1298_s23 + $0x14] sm:$0xf] %vm754_vm13, %v751_v6  ;;  %v739_v30 = vmax.f32 %v711_v28, 0.0 }
 0x185   : > { %755 = vst.msk [vmem:[%s1298_s23] sm:$0xf] %vm754_vm13, %v746_v21  ;;  %v747_v57 = vpack.c.bf16 %v739_v30, %v739_v30 }
 0x187   : > { %756 = vst.msk [vmem:[%s1298_s23 + $0x4] sm:$0xf] %vm754_vm13, %v747_v57 }
 0x196   : > { %v731_v31 = vpop.f32.mrb[4].mxu1 }
 0x197   : > { %v732_v32 = vadd.f32 %v863_v11, %v731_v31  ;;  %v733_v1 = vpop.f32.mrb[5].mxu1 }
 0x198   : > { %v734_v27 = vpop.f32.mrb[6].mxu1 }
 0x199   : > { %v744_v34 = vmax.f32 %v732_v32, 0.0  ;;  %v735_v7 = vadd.f32 %v863_v11, %v734_v27  ;;  %v736_v10 = vpop.f32.mrb[7].mxu1 }
 0x19a   : > { %v715_v22 = vpop.f32.mrb[4].mxu0 }
 0x19b   : > { %v752_v9 = vpack.c.bf16 %v744_v34, %v744_v34  ;;  %v716_v35 = vadd.f32 %v863_v11, %v715_v22  ;;  %v717_v38 = vpop.f32.mrb[5].mxu0  ;;  %v745_v39 = vmax.f32 %v735_v7, 0.0 }
 0x19c   : > { %v718_v40 = vpop.f32.mrb[6].mxu0 }
 0x19d   : > { %761 = vst.msk [vmem:[%s1298_s23 + $0x18] sm:$0xf] %vm754_vm13, %v752_v9  ;;  %v740_v42 = vmax.f32 %v716_v35, 0.0  ;;  %v753_v43 = vpack.c.bf16 %v745_v39, %v745_v39  ;;  %v719_v45 = vadd.f32 %v863_v11, %v718_v40  ;;  %v720_v46 = vpop.f32.mrb[7].mxu0 }
 0x19f   : > { %v748_v47 = vpack.c.bf16 %v740_v42, %v740_v42  ;;  %762 = vst.msk [vmem:[%s1298_s23 + $0x1c] sm:$0xf] %vm754_vm13, %v753_v43  ;;  %v741_v48 = vmax.f32 %v719_v45, 0.0 }
 0x1a1   : > { %757 = vst.msk [vmem:[%s1298_s23 + $0x8] sm:$0xf] %vm754_vm13, %v748_v47  ;;  %v749_v49 = vpack.c.bf16 %v741_v48, %v741_v48 }
 0x1a3   : > { %758 = vst.msk [vmem:[%s1298_s23 + $0xc] sm:$0xf] %vm754_vm13, %v749_v49 }
 0x1a4 PF: > { %s13_s12 = sadd.s32 1, %s939_s12  }
 0x1a5   : > { %p10_p4 = scmp.ge.s32.totalorder %s13_s12, 4  }
 0x1a7   :  { %12 = sbr.rel (!%p10_p4) target bundleno = 1 (0x1), region = 62 }

// kernel: transunet_forward.43
= control target key start
LH: loop header
LB: loop body
LE: loop exit
PB: predicated region body
PF: predicated region fallthrough
CT: control target
= control target key end

     0   :  { %s1077_s14 = smov 0   ;;  %s1079_s15 = smov 0   ;;  %s1254_s0 = inlined_call_operand.vmem [shape: bf16[512,8], index: 0, kind: input, shape index: {}]   ;;  %s1255_s1 = inlined_call_operand.vmem [shape: bf16[8,1], index: 1, kind: input, shape index: {}]   ;;  %s1256_s2 = inlined_call_operand.<no memory space> [shape: f32[1,1], index: 2, kind: input, shape index: {}]   ;;  %s1257_s3 = inlined_call_operand.vmem [shape: bf16[512,1], index: 3, kind: output, shape index: {}]  }
   0x1   :  { %v8_v0 = vstv %s1256_s2  ;;  %s1081_s16 = smov 0  }
   0x2   :  { %9 = vst [vmem:[#allocation2] sm:$0x1] %v8_v0 }
   0x3 LB: > { %s27_s2 = sadd.s32 1, %s1048_s15  ;;  %p831_p0 = scmp.ge.s32.totalorder %s1052_s16, 1  ;;  %s1052_s16 = sphi %s1081_s16, %s15_s16   ;;  %s1048_s15 = sphi %s1079_s15, %s1259_s15   ;;  %s1044_s14 = sphi %s1077_s14, %s1258_s14  }
   0x4   : > { %p29_p1 = scmp.ge.s32.totalorder %s27_s2, 2  ;;  %p171_p2 = scmp.lt.s32.totalorder %s1052_s16, 3 }
   0x6   : > { %s1261_s2 = smov (%p29_p1, %s27_s2), 0  ;;  %p172_p3 = pnand %p831_p0, %p171_p2 }
   0x7   : > { %v260_v1 = vld [vmem:[%s1255_s1] sm:$0xf] (!%p172_p3)  ;;  %vm397_vm0 = vcmask (!%p172_p3), 1043456   ;;  %s832_s19 = sshll.u32 (!%p172_p3), %s1044_s14, 5  ;;  %vm348_vm1 = vcmask (!%p172_p3), 64512   ;;  %vm690_vm2 = vcmask (!%p172_p3), 3072  }
   0x8   : > { %175 = sbr.rel (%p172_p3) target bundleno = 265 (0x109), region = 32  ;;  %988 = vmatprep.subr.msk.bf16.mxu0 (!%p172_p3), %vm397_vm0, %v260_v1  ;;  %989 = vmatprep.subr.msk.bf16.mxu1 (!%p172_p3), %vm397_vm0, %v260_v1  ;;  %v399_v2 = vsel (!%p172_p3), %vm397_vm0, %v260_v1, 0  ;;  %p206_p4 = scmp.lt.s32.totalorder (!%p172_p3), %s832_s19, 63 }
   0x9   : > { %953 = vmatpush3.bf16.msra.mxu0 (!%p172_p3), %v399_v2  ;;  %987 = vmatpush3.bf16.msra.mxu1 (!%p172_p3), %v399_v2  ;;  %v1140_v19 = vld [vmem:[#allocation2] ss:$0 sm:$0xff] (!%p172_p3) }
   0xf   : > { %s1263_s19 = smov (!%p206_p4, %s832_s19), 63 }
  0x10   : > { %s833_s20 = sshll.u32 %s1263_s19, 2 }
  0x11   : > { %s1106_s23 = scalar_lea.vmem %s1254_s0, %s833_s20  ;;  %s1148_s26 = scalar_lea.vmem %s1257_s3, %s833_s20 }
  0x12   : > { %v1014_v3 = vld [vmem:[%s1106_s23] sm:$0xff]   ;;  %v1016_v5 = vld [vmem:[%s1106_s23 + $0x8] sm:$0xff]   ;;  %v1018_v7 = vld [vmem:[%s1106_s23 + $0x10] sm:$0xff]  }
  0x13   : > { %v1015_v4 = vld [vmem:[%s1106_s23 + $0x40] sm:$0xff]   ;;  %954 = vmatprep.mubr.msk.bf16.mxu0 %vm348_vm1, %v1014_v3  ;;  %v1017_v6 = vld [vmem:[%s1106_s23 + $0x48] sm:$0xff]   ;;  %v1019_v8 = vld [vmem:[%s1106_s23 + $0x50] sm:$0xff]  }
  0x14   : > { %970 = vmatprep.mubr.msk.bf16.mxu1 %vm348_vm1, %v1015_v4  ;;  %955 = vmatmul.mubr.msk.bf16.vlgmr.msra.gmra.mrb[0].mxu0 %vm348_vm1, %v1016_v5  ;;  %v1020_v9 = vld [vmem:[%s1106_s23 + $0x18] sm:$0xff]   ;;  %v1022_v11 = vld [vmem:[%s1106_s23 + $0x20] sm:$0xff]   ;;  %v1024_v13 = vld [vmem:[%s1106_s23 + $0x28] sm:$0xff]  }
  0x15   : > { %971 = vmatmul.mubr.msk.bf16.vlgmr.msra.gmra.mrb[0].mxu1 %vm348_vm1, %v1017_v6  ;;  %958 = vmatprep.mubr.msk.bf16.mxu0 %vm348_vm1, %v1018_v7  ;;  %v1021_v10 = vld [vmem:[%s1106_s23 + $0x58] sm:$0xff]   ;;  %v1023_v12 = vld [vmem:[%s1106_s23 + $0x60] sm:$0xff]   ;;  %v1025_v14 = vld [vmem:[%s1106_s23 + $0x68] sm:$0xff]  }
  0x16   : > { %974 = vmatprep.mubr.msk.bf16.mxu1 %vm348_vm1, %v1019_v8  ;;  %v1026_v15 = vld [vmem:[%s1106_s23 + $0x30] sm:$0xff]   ;;  %v1028_v17 = vld [vmem:[%s1106_s23 + $0x38] sm:$0xff]  }
  0x17   : > { %v1027_v16 = vld [vmem:[%s1106_s23 + $0x70] sm:$0xff]   ;;  %v1029_v18 = vld [vmem:[%s1106_s23 + $0x78] sm:$0xff]  }
  0x1c   : > { %959 = vmatmul.mubr.msk.bf16.gmra.mrb[4].mxu0 %vm348_vm1, %v1020_v9 }
  0x1d   : > { %975 = vmatmul.mubr.msk.bf16.gmra.mrb[4].mxu1 %vm348_vm1, %v1021_v10  ;;  %962 = vmatprep.mubr.msk.bf16.mxu0 %vm348_vm1, %v1022_v11 }
  0x1e   : > { %978 = vmatprep.mubr.msk.bf16.mxu1 %vm348_vm1, %v1023_v12 }
  0x24   : > { %963 = vmatmul.mubr.msk.bf16.gmra.mrb[8].mxu0 %vm348_vm1, %v1024_v13 }
  0x25   : > { %979 = vmatmul.mubr.msk.bf16.gmra.mrb[8].mxu1 %vm348_vm1, %v1025_v14  ;;  %966 = vmatprep.mubr.msk.bf16.mxu0 %vm348_vm1, %v1026_v15 }
  0x26   : > { %982 = vmatprep.mubr.msk.bf16.mxu1 %vm348_vm1, %v1027_v16 }
  0x2c   : > { %967 = vmatmul.mubr.msk.bf16.gmra.mrb[12].mxu0 %vm348_vm1, %v1028_v17 }
  0x2d   : > { %983 = vmatmul.mubr.msk.bf16.gmra.mrb[12].mxu1 %vm348_vm1, %v1029_v18 }
  0xe7   : > { %v956_v20 = vpop.f32.mrb[0].mxu0 }
  0xe8   : > { %v444_v21 = vadd.f32 %v956_v20, %v1140_v19  ;;  %v972_v22 = vpop.f32.mrb[0].mxu1  ;;  %v435_v23 = vpop.f32.mrb[1].mxu0 }
  0xe9   : > { %v508_v24 = vadd.f32 %v972_v22, %v1140_v19  ;;  %v436_v25 = vadd.f32 %v1140_v19, %v435_v23  ;;  %v499_v26 = vpop.f32.mrb[1].mxu1  ;;  %v957_v27 = vpop.f32.mrb[2].mxu0 }
  0xea   : > { %v905_v28 = vpack.c.bf16 %v444_v21, %v444_v21  ;;  %v500_v29 = vadd.f32 %v1140_v19, %v499_v26  ;;  %v447_v30 = vadd.f32 %v957_v27, %v1140_v19  ;;  %v973_v31 = vpop.f32.mrb[2].mxu1  ;;  %v438_v32 = vpop.f32.mrb[3].mxu0 }
  0xeb   : > { %v921_v33 = vpack.c.bf16 %v508_v24, %v508_v24  ;;  %v903_v34 = vpack.c.bf16 %v436_v25, %v436_v25  ;;  %v511_v35 = vadd.f32 %v973_v31, %v1140_v19  ;;  %v439_v36 = vadd.f32 %v1140_v19, %v438_v32  ;;  %v502_v37 = vpop.f32.mrb[3].mxu1 }
  0xec   : > { %693 = vst.msk [vmem:[%s1148_s26 + $0x8] sm:$0xf] %vm690_vm2, %v905_v28  ;;  %v919_v38 = vpack.c.bf16 %v500_v29, %v500_v29  ;;  %v906_v39 = vpack.c.bf16 %v447_v30, %v447_v30  ;;  %v503_v40 = vadd.f32 %v1140_v19, %v502_v37 }
  0xed   : > { %709 = vst.msk [vmem:[%s1148_s26 + $0x48] sm:$0xf] %vm690_vm2, %v921_v33  ;;  %691 = vst.msk [vmem:[%s1148_s26] sm:$0xf] %vm690_vm2, %v903_v34  ;;  %v922_v41 = vpack.c.bf16 %v511_v35, %v511_v35  ;;  %v904_v42 = vpack.c.bf16 %v439_v36, %v439_v36 }
  0xee   : > { %707 = vst.msk [vmem:[%s1148_s26 + $0x40] sm:$0xf] %vm690_vm2, %v919_v38  ;;  %694 = vst.msk [vmem:[%s1148_s26 + $0xc] sm:$0xf] %vm690_vm2, %v906_v39  ;;  %v920_v43 = vpack.c.bf16 %v503_v40, %v503_v40 }
  0xef   : > { %710 = vst.msk [vmem:[%s1148_s26 + $0x4c] sm:$0xf] %vm690_vm2, %v922_v41  ;;  %692 = vst.msk [vmem:[%s1148_s26 + $0x4] sm:$0xf] %vm690_vm2, %v904_v42  ;;  %v960_v44 = vpop.f32.mrb[4].mxu0 }
  0xf0   : > { %708 = vst.msk [vmem:[%s1148_s26 + $0x44] sm:$0xf] %vm690_vm2, %v920_v43  ;;  %v460_v45 = vadd.f32 %v960_v44, %v1140_v19  ;;  %v976_v46 = vpop.f32.mrb[4].mxu1  ;;  %v451_v47 = vpop.f32.mrb[5].mxu0 }
  0xf1   : > { %v524_v48 = vadd.f32 %v976_v46, %v1140_v19  ;;  %v452_v49 = vadd.f32 %v1140_v19, %v451_v47  ;;  %v515_v50 = vpop.f32.mrb[5].mxu1  ;;  %v961_v51 = vpop.f32.mrb[6].mxu0 }
  0xf2   : > { %v909_v52 = vpack.c.bf16 %v460_v45, %v460_v45  ;;  %v516_v53 = vadd.f32 %v1140_v19, %v515_v50  ;;  %v463_v54 = vadd.f32 %v961_v51, %v1140_v19  ;;  %v977_v55 = vpop.f32.mrb[6].mxu1  ;;  %v454_v56 = vpop.f32.mrb[7].mxu0 }
  0xf3   : > { %v925_v57 = vpack.c.bf16 %v524_v48, %v524_v48  ;;  %v907_v58 = vpack.c.bf16 %v452_v49, %v452_v49  ;;  %v527_v59 = vadd.f32 %v977_v55, %v1140_v19  ;;  %v455_v60 = vadd.f32 %v1140_v19, %v454_v56  ;;  %v518_v61 = vpop.f32.mrb[7].mxu1 }
  0xf4   : > { %697 = vst.msk [vmem:[%s1148_s26 + $0x18] sm:$0xf] %vm690_vm2, %v909_v52  ;;  %v923_v62 = vpack.c.bf16 %v516_v53, %v516_v53  ;;  %v910_v63 = vpack.c.bf16 %v463_v54, %v463_v54  ;;  %v519_v0 = vadd.f32 %v1140_v19, %v518_v61 }
  0xf5   : > { %713 = vst.msk [vmem:[%s1148_s26 + $0x58] sm:$0xf] %vm690_vm2, %v925_v57  ;;  %695 = vst.msk [vmem:[%s1148_s26 + $0x10] sm:$0xf] %vm690_vm2, %v907_v58  ;;  %v926_v1 = vpack.c.bf16 %v527_v59, %v527_v59  ;;  %v908_v2 = vpack.c.bf16 %v455_v60, %v455_v60 }
  0xf6   : > { %711 = vst.msk [vmem:[%s1148_s26 + $0x50] sm:$0xf] %vm690_vm2, %v923_v62  ;;  %698 = vst.msk [vmem:[%s1148_s26 + $0x1c] sm:$0xf] %vm690_vm2, %v910_v63  ;;  %v924_v3 = vpack.c.bf16 %v519_v0, %v519_v0 }
  0xf7   : > { %714 = vst.msk [vmem:[%s1148_s26 + $0x5c] sm:$0xf] %vm690_vm2, %v926_v1  ;;  %696 = vst.msk [vmem:[%s1148_s26 + $0x14] sm:$0xf] %vm690_vm2, %v908_v2  ;;  %v964_v4 = vpop.f32.mrb[8].mxu0 }
  0xf8   : > { %712 = vst.msk [vmem:[%s1148_s26 + $0x54] sm:$0xf] %vm690_vm2, %v924_v3  ;;  %v476_v5 = vadd.f32 %v964_v4, %v1140_v19  ;;  %v980_v6 = vpop.f32.mrb[8].mxu1  ;;  %v467_v7 = vpop.f32.mrb[9].mxu0 }
  0xf9   : > { %v540_v8 = vadd.f32 %v980_v6, %v1140_v19  ;;  %v468_v9 = vadd.f32 %v1140_v19, %v467_v7  ;;  %v531_v10 = vpop.f32.mrb[9].mxu1  ;;  %v965_v11 = vpop.f32.mrb[10].mxu0 }
  0xfa   : > { %v913_v12 = vpack.c.bf16 %v476_v5, %v476_v5  ;;  %v532_v13 = vadd.f32 %v1140_v19, %v531_v10  ;;  %v479_v14 = vadd.f32 %v965_v11, %v1140_v19  ;;  %v981_v15 = vpop.f32.mrb[10].mxu1  ;;  %v470_v16 = vpop.f32.mrb[11].mxu0 }
  0xfb   : > { %v929_v17 = vpack.c.bf16 %v540_v8, %v540_v8  ;;  %v911_v18 = vpack.c.bf16 %v468_v9, %v468_v9  ;;  %v543_v20 = vadd.f32 %v981_v15, %v1140_v19  ;;  %v471_v21 = vadd.f32 %v1140_v19, %v470_v16  ;;  %v534_v22 = vpop.f32.mrb[11].mxu1 }
  0xfc   : > { %701 = vst.msk [vmem:[%s1148_s26 + $0x28] sm:$0xf] %vm690_vm2, %v913_v12  ;;  %v927_v23 = vpack.c.bf16 %v532_v13, %v532_v13  ;;  %v914_v24 = vpack.c.bf16 %v479_v14, %v479_v14  ;;  %v535_v25 = vadd.f32 %v1140_v19, %v534_v22 }
  0xfd   : > { %717 = vst.msk [vmem:[%s1148_s26 + $0x68] sm:$0xf] %vm690_vm2, %v929_v17  ;;  %699 = vst.msk [vmem:[%s1148_s26 + $0x20] sm:$0xf] %vm690_vm2, %v911_v18  ;;  %v930_v26 = vpack.c.bf16 %v543_v20, %v543_v20  ;;  %v912_v27 = vpack.c.bf16 %v471_v21, %v471_v21 }
  0xfe   : > { %715 = vst.msk [vmem:[%s1148_s26 + $0x60] sm:$0xf] %vm690_vm2, %v927_v23  ;;  %702 = vst.msk [vmem:[%s1148_s26 + $0x2c] sm:$0xf] %vm690_vm2, %v914_v24  ;;  %v928_v28 = vpack.c.bf16 %v535_v25, %v535_v25 }
  0xff   : > { %718 = vst.msk [vmem:[%s1148_s26 + $0x6c] sm:$0xf] %vm690_vm2, %v930_v26  ;;  %700 = vst.msk [vmem:[%s1148_s26 + $0x24] sm:$0xf] %vm690_vm2, %v912_v27  ;;  %v968_v29 = vpop.f32.mrb[12].mxu0 }
 0x100   : > { %716 = vst.msk [vmem:[%s1148_s26 + $0x64] sm:$0xf] %vm690_vm2, %v928_v28  ;;  %v492_v30 = vadd.f32 %v968_v29, %v1140_v19  ;;  %v984_v31 = vpop.f32.mrb[12].mxu1  ;;  %v483_v32 = vpop.f32.mrb[13].mxu0 }
 0x101   : > { %v556_v33 = vadd.f32 %v984_v31, %v1140_v19  ;;  %v484_v34 = vadd.f32 %v1140_v19, %v483_v32  ;;  %v547_v35 = vpop.f32.mrb[13].mxu1  ;;  %v969_v36 = vpop.f32.mrb[14].mxu0 }
 0x102   : > { %v917_v37 = vpack.c.bf16 %v492_v30, %v492_v30  ;;  %v548_v38 = vadd.f32 %v1140_v19, %v547_v35  ;;  %v495_v39 = vadd.f32 %v969_v36, %v1140_v19  ;;  %v985_v40 = vpop.f32.mrb[14].mxu1  ;;  %v486_v41 = vpop.f32.mrb[15].mxu0 }
 0x103   : > { %v933_v42 = vpack.c.bf16 %v556_v33, %v556_v33  ;;  %v915_v43 = vpack.c.bf16 %v484_v34, %v484_v34  ;;  %v559_v44 = vadd.f32 %v985_v40, %v1140_v19  ;;  %v487_v45 = vadd.f32 %v1140_v19, %v486_v41  ;;  %v550_v46 = vpop.f32.mrb[15].mxu1 }
 0x104   : > { %705 = vst.msk [vmem:[%s1148_s26 + $0x38] sm:$0xf] %vm690_vm2, %v917_v37  ;;  %v931_v47 = vpack.c.bf16 %v548_v38, %v548_v38  ;;  %v918_v48 = vpack.c.bf16 %v495_v39, %v495_v39  ;;  %v551_v49 = vadd.f32 %v1140_v19, %v550_v46 }
 0x105   : > { %721 = vst.msk [vmem:[%s1148_s26 + $0x78] sm:$0xf] %vm690_vm2, %v933_v42  ;;  %703 = vst.msk [vmem:[%s1148_s26 + $0x30] sm:$0xf] %vm690_vm2, %v915_v43  ;;  %v934_v50 = vpack.c.bf16 %v559_v44, %v559_v44  ;;  %v916_v51 = vpack.c.bf16 %v487_v45, %v487_v45 }
 0x106   : > { %719 = vst.msk [vmem:[%s1148_s26 + $0x70] sm:$0xf] %vm690_vm2, %v931_v47  ;;  %706 = vst.msk [vmem:[%s1148_s26 + $0x3c] sm:$0xf] %vm690_vm2, %v918_v48  ;;  %v932_v52 = vpack.c.bf16 %v551_v49, %v551_v49 }
 0x107   : > { %722 = vst.msk [vmem:[%s1148_s26 + $0x7c] sm:$0xf] %vm690_vm2, %v934_v50  ;;  %704 = vst.msk [vmem:[%s1148_s26 + $0x34] sm:$0xf] %vm690_vm2, %v916_v51 }
 0x108   : > { %720 = vst.msk [vmem:[%s1148_s26 + $0x74] sm:$0xf] %vm690_vm2, %v932_v52 }
 0x109 PF: > { %s15_s16 = sadd.s32 1, %s1052_s16   ;;  %s1258_s14 = smov %s1048_s15 }
 0x10a   : > { %p12_p5 = scmp.ge.s32.totalorder %s15_s16, 4   ;;  %s1259_s15 = smov %s1261_s2 }
 0x10c   :  { %14 = sbr.rel (!%p12_p5) target bundleno = 3 (0x3), region = 68 }

// kernel: transunet_forward.44
= control target key start
LH: loop header
LB: loop body
LE: loop exit
PB: predicated region body
PF: predicated region fallthrough
CT: control target
= control target key end

     0   :  { %s509_s12 = smov 0   ;;  %s511_s13 = smov 0   ;;  %s548_s0 = inlined_call_operand.vmem [shape: bf16[32,16], index: 0, kind: input, shape index: {}]   ;;  %s549_s1 = inlined_call_operand.vmem [shape: bf16[16,32], index: 1, kind: input, shape index: {}]   ;;  %s550_s2 = inlined_call_operand.vmem [shape: f32[1,32], index: 2, kind: input, shape index: {}]   ;;  %s551_s3 = inlined_call_operand.vmem [shape: bf16[32,32], index: 3, kind: output, shape index: {}]  }
   0x1   :  { %s513_s14 = smov 0  }
   0x2 LB: > { %s25_s15 = sadd.s32 1, %s481_s13  ;;  %p412_p0 = scmp.ge.s32.totalorder %s485_s14, 1  ;;  %s485_s14 = sphi %s513_s14, %s13_s14   ;;  %s481_s13 = sphi %s511_s13, %s553_s13   ;;  %s477_s12 = sphi %s509_s12, %s552_s12  }
   0x3   : > { %p27_p1 = scmp.ge.s32.totalorder %s25_s15, 2  ;;  %p169_p2 = scmp.lt.s32.totalorder %s485_s14, 3 }
   0x5   : > { %s555_s15 = smov (%p27_p1, %s25_s15), 0  ;;  %p170_p3 = pnand %p412_p0, %p169_p2 }
   0x6   : > { %v461_v0 = vld [vmem:[%s549_s1] sm:$0xff] (!%p170_p3)   ;;  %v487_v1 = vmov (!%p170_p3), 0.0   ;;  %s413_s18 = sshll.u32 (!%p170_p3), %s477_s12, 1  ;;  %vm488_vm0 = vmmov (!%p170_p3), 0   ;;  %vm248_vm1 = vcmask (!%p170_p3), 130048   ;;  %vm301_vm2 = vcmask (!%p170_p3), 257024  }
   0x7   : > { %173 = sbr.rel (%p170_p3) target bundleno = 237 (0xed), region = 32  ;;  %429 = vmatprep.subr.bf16.mxu0 (!%p170_p3), %v487_v1  ;;  %431 = vmatprep.mubr.msk.bf16.mxu0 (!%p170_p3), %vm488_vm0, %v487_v1  ;;  %p204_p4 = scmp.lt.s32.totalorder (!%p170_p3), %s413_s18, 3  ;;  %v417_v3 = vld [vmem:[%s550_s2] ss:$0 sm:$0xff] (!%p170_p3) }
   0x8   : > { %430 = vmatpush3.bf16.msra.mxu0 (!%p170_p3), %v461_v0 }
   0xe   : > { %s557_s18 = smov (!%p204_p4, %s413_s18), 3 }
   0xf   : > { %s414_s19 = sshll.u32 %s557_s18, 2 }
  0x10   : > { %s207_s22 = scalar_lea.vmem %s548_s0, %s414_s19  ;;  %s223_s27 = scalar_lea.vmem %s551_s3, %s414_s19 }
  0x11   : > { %v462_v2 = vld [vmem:[%s207_s22] sm:$0xff]  }
  0x12   : > { %432 = vmatmul.mubr.msk.bf16.vlgmr.msra.gmra.mrb[0].mxu0 %vm248_vm1, %v462_v2 }
  0xe5   : > { %v286_v4 = vpop.f32.mrb[0].mxu0 }
  0xe6   : > { %v287_v5 = vadd.f32 %v417_v3, %v286_v4  ;;  %v433_v6 = vpop.f32.mrb[1].mxu0 }
  0xe7   : > { %v289_v7 = vpop.f32.mrb[2].mxu0 }
  0xe8   : > { %v425_v8 = vpack.c.bf16 %v287_v5, %v287_v5  ;;  %v290_v9 = vadd.f32 %v417_v3, %v289_v7  ;;  %v434_v10 = vpop.f32.mrb[3].mxu0 }
  0xea   : > { %302 = vst.msk [vmem:[%s223_s27] sm:$0xf] %vm301_vm2, %v425_v8  ;;  %v426_v11 = vpack.c.bf16 %v290_v9, %v290_v9 }
  0xec   : > { %303 = vst.msk [vmem:[%s223_s27 + $0x4] sm:$0xf] %vm301_vm2, %v426_v11 }
  0xed PF: > { %s13_s14 = sadd.s32 1, %s485_s14   ;;  %s552_s12 = smov %s481_s13 }
  0xee   : > { %p10_p5 = scmp.ge.s32.totalorder %s13_s14, 4   ;;  %s553_s13 = smov %s555_s15 }
  0xf0   :  { %12 = sbr.rel (!%p10_p5) target bundleno = 2 (0x2), region = 68 }

// kernel: transunet_forward.42
= control target key start
LH: loop header
LB: loop body
LE: loop exit
PB: predicated region body
PF: predicated region fallthrough
CT: control target
= control target key end

     0   :  { %s2351_s12 = smov 0   ;;  %s3577_s0 = inlined_call_operand.vmem [shape: bf16[2,18,18,8], index: 0, kind: input, shape index: {}]   ;;  %s3578_s1 = inlined_call_operand.vmem [shape: bf16[72,8], index: 1, kind: input, shape index: {}]   ;;  %s3579_s2 = inlined_call_operand.vmem [shape: f32[1,8], index: 2, kind: input, shape index: {}]   ;;  %s3580_s3 = inlined_call_operand.vmem [shape: bf16[2,16,16,8], index: 3, kind: output, shape index: {}]  }
   0x1 LB: > { %s2031_s13 = sadd.s32 4294967295, %s2321_s12   ;;  %p2035_p0 = scmp.ge.s32.totalorder %s2321_s12, 1  ;;  %s2321_s12 = sphi %s2351_s12, %s13_s12  }
   0x2   : > { %p137_p1 = scmp.lt.s32.totalorder %s2321_s12, 3 }
   0x4   : > { %p138_p2 = pnand %p2035_p0, %p137_p1 }
   0x6   : > { %141 = sbr.rel (%p138_p2) target bundleno = 627 (0x273), region = 32 }
   0xd   : > { %p161_p3 = scmp.lt.s32.totalorder %s2031_s13, 1  ;;  %vm661_vm0 = vcmask 1042432   ;;  %vm662_vm1 = vcmask 1046532   ;;  %vm226_vm2 = vsmask.f32 3328  ;;  %s2323_s18 = smov 24  }
   0xe   : > { %vm227_vm3 = vsmask.f32 7440  ;;  %vm2397_vm4 = vmor %vm661_vm0, %vm662_vm1  ;;  %s2324_s19 = smov 16   ;;  %s2325_s20 = smov 8   ;;  %vm1618_vm6 = vcmask 1043456   ;;  %vm1262_vm7 = vcmask 64512  }
   0xf   : > { %s3607_s13 = smov (!%p161_p3, %s2031_s13), 1  ;;  %vm2442_vm5 = vmor %vm226_vm2, %vm227_vm3  ;;  %s2326_s21 = smov 32   ;;  %vm1311_vm8 = vcmask 130048   ;;  %vm1344_vm9 = vcmask 195584   ;;  %vm1377_vm10 = vcmask 261120   ;;  %vm1410_vm11 = vcmask 326656  }
  0x10   : > { %s2275_s14 = smul.u32 216, %s3607_s13  ;;  %s2327_s22 = smov 40   ;;  %vm1443_vm12 = vcmask 392192   ;;  %vm1476_vm13 = vcmask 457728   ;;  %vm1509_vm14 = vcmask 523264   ;;  %vm1585_vm15 = vcmask 588800  }
  0x11   : > { %s2328_s25 = smov 48   ;;  %s2329_s30 = smov 56   ;;  %vm1943_vm0 = vcmask 60416  }
  0x12   : > { %s2365_s17 = scalar_lea.vmem %s3577_s0, %s2275_s14  ;;  %s2330_s6 = smov 64  }
  0x13   : > { %v2368_v0 = vld [vmem:[%s2365_s17 + $0x6c] sm:$0xf]  ;;  %v2371_v1 = vld [vmem:[%s2365_s17 + $0x70] sm:$0xf]  ;;  %v2385_v12 = vld [vmem:[%s2365_s17 + $0x60] sm:$0xf] }
  0x14   : > { %v175_v2 = vld [vmem:[%s2365_s17 + $0xc] sm:$0xf]  ;;  %v459_v3 = vshrl.u32 %v2371_v1, 16  ;;  %v2377_v4 = vcombine.low %v2368_v0, %v2371_v1  ;;  %v446_v5 = vshrl.u32 %v2368_v0, 16  ;;  %v449_v6 = vshll.u32 %v2368_v0, 16  ;;  %s2167_s11 = sshll.u32 %s3607_s13, 7 }
  0x15   : > { %v176_v7 = vld [vmem:[%s2365_s17 + $0x10] sm:$0xf]  ;;  %v254_v11 = vshrl.u32 %v175_v2, 16  ;;  %v257_v13 = vshll.u32 %v175_v2, 16  ;;  %v2390_v14 = vld [vmem:[%s2365_s17 + $0x64] sm:$0xf]  ;;  %s3479_s16 = scalar_lea.vmem %s3580_s3, %s2167_s11 }
  0x16   : > { %v263_v8 = vshll.u32 %v176_v7, 16  ;;  %v267_v9 = vshrl.u32 %v176_v7, 16  ;;  %v2382_v10 = vcombine.low %v175_v2, %v176_v7  ;;  %1071 = vrot.lane.b32.xlu1 %v2377_v4, %s2323_s18  ;;  %v2393_v15 = vld [vmem:[%s2365_s17 + $0x68] sm:$0x1]  ;;  %v2047_v17 = vrot.slane %v2385_v12, 9 }
  0x17   : > { %v256_v19 = vrot.slane %v254_v11, 4  ;;  %v722_v20 = vrot.slane %v2390_v14, 5  ;;  %v725_v21 = vrot.slane %v2393_v15, 5  ;;  %v2407_v22 = vld [vmem:[%s2365_s17] sm:$0xf]  ;;  %v259_v23 = vrot.slane %v257_v13, 5 }
  0x18   : > { %v269_v18 = vrot.slane %v267_v9, 4  ;;  %1055 = vrot.lane.b32.xlu0 %v2382_v10, %s2323_s18  ;;  %v2410_v24 = vld [vmem:[%s2365_s17 + $0x4] sm:$0xf]  ;;  %v174_v25 = vld [vmem:[%s2365_s17 + $0x8] sm:$0x1]  ;;  %v2039_v26 = vrot.slane %v2407_v22, 9 }
  0x19   : > { %v723_v27 = vsel %vm2397_vm4, %v2047_v17, %v722_v20  ;;  %v724_v28 = vrot.slane %v722_v20, 4  ;;  %v666_v29 = vrot.slane %v2410_v24, 5  ;;  %v669_v30 = vrot.slane %v174_v25, 5  ;;  %v2418_v31 = vld [vmem:[%s2365_s17 + $0x74] sm:$0x1] }
  0x1a   : > { %v2048_v32 = vrot.slane %v2368_v0, 9  ;;  %v729_v33 = vrot.slane %v2371_v1, 5  ;;  %v732_v34 = vrot.slane %v2418_v31, 5  ;;  %v177_v35 = vld [vmem:[%s2365_s17 + $0x14] sm:$0x1]  ;;  %v2040_v36 = vrot.slane %v175_v2, 9 }
  0x1b   : > { %v726_v37 = vsel %vm2397_vm4, %v724_v28, %v725_v21  ;;  %v667_v38 = vsel %vm2397_vm4, %v2039_v26, %v666_v29  ;;  %v668_v39 = vrot.slane %v666_v29, 4  ;;  %v673_v40 = vrot.slane %v176_v7, 5 }
  0x1c   : > { %v2428_v41 = vcombine.low %v723_v27, %v726_v37  ;;  %v730_v42 = vsel %vm2397_vm4, %v2048_v32, %v729_v33  ;;  %v731_v43 = vrot.slane %v729_v33, 4  ;;  %v676_v44 = vrot.slane %v177_v35, 5 }
  0x1d   : > { %v670_v45 = vsel %vm2397_vm4, %v668_v39, %v669_v30  ;;  %v674_v46 = vsel %vm2397_vm4, %v2040_v36, %v673_v40  ;;  %v675_v47 = vrot.slane %v673_v40, 4  ;;  %v260_v48 = vor.u32 %v259_v23, %v256_v19  ;;  %v2486_v39 = vld [vmem:[%s2365_s17 + $0x7c] sm:$0xf] }
  0x1e   : > { %1036 = vrot.lane.b32.xlu1 %v2428_v41, %s2324_s19  ;;  %v2089_v49 = vcombine.low %v667_v38, %v670_v45  ;;  %v733_v50 = vsel %vm2397_vm4, %v731_v43, %v732_v34  ;;  %v265_v52 = vrot.slane %v263_v8, 5  ;;  %v273_v53 = vshll.u32 %v177_v35, 16  ;;  %v2481_v35 = vld [vmem:[%s2365_s17 + $0x78] sm:$0xf] }
  0x1f   : > { %v2446_v54 = vcombine.low %v730_v42, %v733_v50  ;;  %v677_v55 = vsel %vm2397_vm4, %v675_v47, %v676_v44  ;;  %v261_v56 = vrot.slane %v260_v48, 4  ;;  %v230_v57 = vshrl.u32 %v2407_v22, 16  ;;  %v2498_v50 = vld [vmem:[%s2365_s17 + $0x1c] sm:$0xf] }
  0x20   : > { %1020 = vrot.lane.b32.xlu0 %v2089_v49, %s2324_s19  ;;  %v2452_v58 = vcombine.low %v674_v46, %v677_v55  ;;  %v270_v59 = vor.u32 %v269_v18, %v265_v52  ;;  %v275_v60 = vrot.slane %v273_v53, 5  ;;  %v233_v61 = vshll.u32 %v2407_v22, 16  ;;  %v2495_v49 = vld [vmem:[%s2365_s17 + $0x18] sm:$0xf] }
  0x21   : > { %3592 = vst [vmem:[#allocation2_spill] sm:$0xff] %v2446_v54  ;;  %v266_v62 = vsel %vm2442_vm5, %v261_v56, %v265_v52  ;;  %v232_v63 = vrot.slane %v230_v57, 4  ;;  %v239_v2 = vshll.u32 %v2410_v24, 16  ;;  %v243_v7 = vshrl.u32 %v2410_v24, 16 }
  0x22   : > { %1038 = vrot.lane.b32.xlu1 %v2446_v54, %s2324_s19  ;;  %v271_v8 = vrot.slane %v270_v59, 4  ;;  %v235_v9 = vrot.slane %v233_v61, 5  ;;  %v249_v11 = vshll.u32 %v174_v25, 16  ;;  %v448_v13 = vrot.slane %v446_v5, 4 }
  0x23   : > { %v241_v17 = vrot.slane %v239_v2, 5  ;;  %v245_v18 = vrot.slane %v243_v7, 4  ;;  %v451_v19 = vrot.slane %v449_v6, 5  ;;  %v455_v20 = vshll.u32 %v2371_v1, 16 }
  0x24   : > { %1022 = vrot.lane.b32.xlu0 %v2452_v58, %s2324_s19  ;;  %v276_v21 = vsel %vm2442_vm5, %v271_v8, %v275_v60  ;;  %v236_v23 = vor.u32 %v235_v9, %v232_v63  ;;  %v251_v26 = vrot.slane %v249_v11, 5  ;;  %v461_v25 = vrot.slane %v459_v3, 4  ;;  %v204_v60 = vld [vmem:[%s2365_s17 + $0x80] sm:$0x1] }
  0x25   : > { %v2472_v5 = vcombine.low %v266_v62, %v276_v21  ;;  %v246_v27 = vor.u32 %v245_v18, %v241_v17  ;;  %v452_v28 = vor.u32 %v451_v19, %v448_v13  ;;  %v457_v0 = vrot.slane %v455_v20, 5  ;;  %v2522_v20 = vld [vmem:[%s2365_s17 + $0x20] sm:$0x1] }
  0x26   : > { %v237_v6 = vrot.slane %v236_v23, 4  ;;  %v465_v29 = vshll.u32 %v2418_v31, 16  ;;  %v422_v30 = vshrl.u32 %v2385_v12, 16  ;;  %v425_v32 = vshll.u32 %v2385_v12, 16 }
  0x27   : > { %942 = vrot.lane.b32.xlu1 %v2472_v5, %s2325_s20  ;;  %v247_v1 = vrot.slane %v246_v27, 4  ;;  %v453_v33 = vrot.slane %v452_v28, 4  ;;  %v462_v3 = vor.u32 %v461_v25, %v457_v0  ;;  %v431_v34 = vshll.u32 %v2390_v14, 16 }
  0x28   : > { %v242_v31 = vsel %vm2442_vm5, %v237_v6, %v241_v17  ;;  %v467_v36 = vrot.slane %v465_v29, 5  ;;  %v424_v37 = vrot.slane %v422_v30, 4  ;;  %v427_v38 = vrot.slane %v425_v32, 5 }
  0x29   : > { %v252_v40 = vsel %vm2442_vm5, %v247_v1, %v251_v26  ;;  %v458_v42 = vsel %vm2442_vm5, %v453_v33, %v457_v0  ;;  %v463_v43 = vrot.slane %v462_v3, 4  ;;  %v433_v44 = vrot.slane %v431_v34, 5 }
  0x2a   : > { %v2073_v45 = vcombine.low %v242_v31, %v252_v40  ;;  %v428_v46 = vor.u32 %v427_v38, %v424_v37  ;;  %v435_v47 = vshrl.u32 %v2390_v14, 16  ;;  %v441_v48 = vshll.u32 %v2393_v15, 16 }
  0x2b   : > { %v468_v52 = vsel %vm2442_vm5, %v463_v43, %v467_v36  ;;  %v470_v53 = vshrl.u32 %v2481_v35, 16  ;;  %v473_v55 = vshll.u32 %v2481_v35, 16  ;;  %v483_v56 = vshrl.u32 %v2486_v39, 16 }
  0x2c   : > { %940 = vrot.lane.b32.xlu0 %v2073_v45, %s2325_s20  ;;  %v2506_v57 = vcombine.low %v458_v42, %v468_v52  ;;  %v429_v59 = vrot.slane %v428_v46, 4  ;;  %v437_v15 = vrot.slane %v435_v47, 4  ;;  %v443_v61 = vrot.slane %v441_v48, 5  ;;  %v2549_v52 = vld [vmem:[%s2365_s17 + $0x84] sm:$0xf] }
  0x2d   : > { %v278_v62 = vshrl.u32 %v2495_v49, 16  ;;  %v281_v63 = vshll.u32 %v2495_v49, 16  ;;  %v291_v2 = vshrl.u32 %v2498_v50, 16  ;;  %v2518_v9 = vcombine.low %v2481_v35, %v2486_v39 }
  0x2e   : > { %3593 = vst [vmem:[#allocation3_spill] sm:$0xff] %v2506_v57  ;;  %958 = vrot.lane.b32.xlu1 %v2506_v57, %s2325_s20  ;;  %v434_v7 = vsel %vm2442_vm5, %v429_v59, %v433_v44  ;;  %v438_v8 = vor.u32 %v437_v15, %v433_v44  ;;  %v472_v11 = vrot.slane %v470_v53, 4  ;;  %v475_v13 = vrot.slane %v473_v55, 5  ;;  %v2552_v53 = vld [vmem:[%s2365_s17 + $0x88] sm:$0xf] }
  0x2f   : > { %v479_v17 = vshll.u32 %v2486_v39, 16  ;;  %v485_v18 = vrot.slane %v483_v56, 4  ;;  %v489_v19 = vshll.u32 %v204_v60, 16  ;;  %v280_v23 = vrot.slane %v278_v62, 4 }
  0x30   : > { %v439_v21 = vrot.slane %v438_v8, 4  ;;  %v283_v26 = vrot.slane %v281_v63, 5  ;;  %v287_v25 = vshll.u32 %v2498_v50, 16  ;;  %v476_v27 = vor.u32 %v475_v13, %v472_v11  ;;  %v2582_v13 = vld [vmem:[%s2365_s17 + $0x24] sm:$0xf] }
  0x31   : > { %v481_v28 = vrot.slane %v479_v17, 5  ;;  %v293_v0 = vrot.slane %v291_v2, 4  ;;  %v297_v32 = vshll.u32 %v2522_v20, 16  ;;  %v491_v34 = vrot.slane %v489_v19, 5  ;;  %v2585_v17 = vld [vmem:[%s2365_s17 + $0x28] sm:$0xf] }
  0x32   : > { %v444_v6 = vsel %vm2442_vm5, %v439_v21, %v443_v61  ;;  %1073 = vrot.lane.b32.xlu1 %v2518_v9, %s2323_s18  ;;  %v284_v29 = vor.u32 %v283_v26, %v280_v23  ;;  %v289_v30 = vrot.slane %v287_v25, 5  ;;  %v477_v33 = vrot.slane %v476_v27, 4  ;;  %v2588_v23 = vld [vmem:[%s2365_s17 + $0x8c] sm:$0x1] }
  0x33   : > { %v2530_v1 = vcombine.low %v434_v7, %v444_v6  ;;  %v486_v3 = vor.u32 %v485_v18, %v481_v28  ;;  %v736_v36 = vrot.slane %v2486_v39, 5  ;;  %v2537_v37 = vcombine.low %v2495_v49, %v2498_v50 }
  0x34   : > { %v294_v31 = vor.u32 %v293_v0, %v289_v30  ;;  %v482_v38 = vsel %vm2442_vm5, %v477_v33, %v481_v28  ;;  %v285_v42 = vrot.slane %v284_v29, 4  ;;  %v299_v44 = vrot.slane %v297_v32, 5 }
  0x35   : > { %956 = vrot.lane.b32.xlu0 %v2530_v1, %s2325_s20  ;;  %v487_v40 = vrot.slane %v486_v3, 4  ;;  %v2049_v39 = vrot.slane %v2481_v35, 9  ;;  %v738_v46 = vrot.slane %v736_v36, 4  ;;  %v739_v47 = vrot.slane %v204_v60, 5 }
  0x36   : > { %1106 = vrot.lane.b32.xlu1 %v2506_v57, %s2326_s21  ;;  %v295_v43 = vrot.slane %v294_v31, 4  ;;  %v290_v35 = vsel %vm2442_vm5, %v285_v42, %v289_v30  ;;  %v680_v59 = vrot.slane %v2498_v50, 5  ;;  %v494_v60 = vshrl.u32 %v2549_v52, 16  ;;  %v2306_v30 = vld [vmem:[%s3578_s1] sm:$0xff]  }
  0x37   : > { %v492_v45 = vsel %vm2442_vm5, %v487_v40, %v491_v34  ;;  %v737_v56 = vsel %vm2397_vm4, %v2049_v39, %v736_v36  ;;  %v740_v15 = vsel %vm2397_vm4, %v738_v46, %v739_v47  ;;  %v497_v61 = vshll.u32 %v2549_v52, 16  ;;  %2221 = vmatprep.subr.bf16.mxu0 %v2306_v30  ;;  %2263 = vmatprep.subr.bf16.mxu1 %v2306_v30 }
  0x38   : > { %v2546_v48 = vcombine.low %v482_v38, %v492_v45  ;;  %v300_v55 = vsel %vm2442_vm5, %v295_v43, %v299_v44  ;;  %v507_v62 = vshrl.u32 %v2552_v53, 16  ;;  %v503_v63 = vshll.u32 %v2552_v53, 16  ;;  %v183_v43 = vld [vmem:[%s2365_s17 + $0x2c] sm:$0x1]  ;;  %2222 = vmatpush3.bf16.msra.mxu0 %v2306_v30  ;;  %2268 = vmatpush3.bf16.msra.mxu1 %v2306_v30 }
  0x39   : > { %1057 = vrot.lane.b32.xlu0 %v2537_v37, %s2323_s18  ;;  %v2573_v2 = vcombine.low %v290_v35, %v300_v55  ;;  %v2041_v7 = vrot.slane %v2495_v49, 9  ;;  %v2578_v50 = vcombine.low %v737_v56, %v740_v15  ;;  %v682_v8 = vrot.slane %v680_v59, 4  ;;  %v2308_v35 = vld [vmem:[%s3578_s1 + $0x10] sm:$0xff]  }
  0x3a   : > { %1108 = vrot.lane.b32.xlu1 %v2546_v48, %s2326_s21  ;;  %v683_v11 = vrot.slane %v2522_v20, 5  ;;  %v496_v18 = vrot.slane %v494_v60, 4  ;;  %v499_v19 = vrot.slane %v497_v61, 5  ;;  %v509_v21 = vrot.slane %v507_v62, 4  ;;  %v2309_v62 = vld [vmem:[%s3578_s1 + $0x18] sm:$0xff]  }
  0x3b   : > { %v681_v49 = vsel %vm2397_vm4, %v2041_v7, %v680_v59  ;;  %v302_v26 = vshrl.u32 %v2582_v13, 16  ;;  %v305_v25 = vshll.u32 %v2582_v13, 16  ;;  %v315_v27 = vshrl.u32 %v2585_v17, 16 }
  0x3c   : > { %v684_v20 = vsel %vm2397_vm4, %v682_v8, %v683_v11  ;;  %v311_v28 = vshll.u32 %v2585_v17, 16  ;;  %v500_v0 = vor.u32 %v499_v19, %v496_v18  ;;  %v513_v29 = vshll.u32 %v2588_v23, 16 }
  0x3d   : > { %1090 = vrot.lane.b32.xlu0 %v2472_v5, %s2326_s21  ;;  %v505_v5 = vrot.slane %v503_v63, 5  ;;  %v2608_v32 = vcombine.low %v681_v49, %v684_v20  ;;  %v2612_v33 = vcombine.low %v2549_v52, %v2552_v53  ;;  %v304_v3 = vrot.slane %v302_v26, 4  ;;  %v2682_v20 = vld [vmem:[%s2365_s17 + $0x90] sm:$0xf] }
  0x3e   : > { %1141 = vrot.lane.b32.xlu1 %v2446_v54, %s2327_s22  ;;  %v307_v34 = vrot.slane %v305_v25, 5  ;;  %v313_v31 = vrot.slane %v311_v28, 5  ;;  %v317_v36 = vrot.slane %v315_v27, 4  ;;  %v501_v38 = vrot.slane %v500_v0, 4  ;;  %v2685_v25 = vld [vmem:[%s2365_s17 + $0x94] sm:$0xf] }
  0x3f   : > { %v510_v6 = vor.u32 %v509_v21, %v505_v5  ;;  %v515_v42 = vrot.slane %v513_v29, 5  ;;  %v321_v45 = vshll.u32 %v183_v43, 16  ;;  %v2635_v55 = vcombine.low %v2582_v13, %v2585_v17  ;;  %v2705_v29 = vld [vmem:[%s2365_s17 + $0x34] sm:$0xf] }
  0x40   : > { %v308_v44 = vor.u32 %v307_v34, %v304_v3  ;;  %v318_v39 = vor.u32 %v317_v36, %v313_v31  ;;  %v506_v46 = vsel %vm2442_vm5, %v501_v38, %v505_v5  ;;  %v743_v61 = vrot.slane %v2552_v53, 5  ;;  %v210_v36 = vld [vmem:[%s2365_s17 + $0x98] sm:$0x1] }
  0x41   : > { %1092 = vrot.lane.b32.xlu0 %v2573_v2, %s2326_s21  ;;  %v511_v40 = vrot.slane %v510_v6, 4  ;;  %3594 = vst [vmem:[#allocation4_spill] sm:$0xff] %v2635_v55  ;;  %v323_v60 = vrot.slane %v321_v45, 5  ;;  %v2050_v53 = vrot.slane %v2549_v52, 9  ;;  %v746_v11 = vrot.slane %v2588_v23, 5 }
  0x42   : > { %1143 = vrot.lane.b32.xlu1 %v2578_v50, %s2327_s22  ;;  %v309_v59 = vrot.slane %v308_v44, 4  ;;  %v319_v15 = vrot.slane %v318_v39, 4  ;;  %v745_v8 = vrot.slane %v743_v61, 4  ;;  %v687_v19 = vrot.slane %v2585_v17, 5  ;;  %v2312_v45 = vld [vmem:[%s3578_s1 + $0x20] ss:$0 sps:$4 sm:$0xff]  }
  0x43   : > { %v516_v47 = vsel %vm2442_vm5, %v511_v40, %v515_v42  ;;  %v744_v52 = vsel %vm2397_vm4, %v2050_v53, %v743_v61  ;;  %v2042_v23 = vrot.slane %v2582_v13, 9  ;;  %v690_v26 = vrot.slane %v183_v43, 5 }
  0x44   : > { %v2639_v56 = vcombine.low %v506_v46, %v516_v47  ;;  %v314_v63 = vsel %vm2442_vm5, %v309_v59, %v313_v31  ;;  %v324_v7 = vsel %vm2442_vm5, %v319_v15, %v323_v60  ;;  %v747_v5 = vsel %vm2397_vm4, %v745_v8, %v746_v11 }
  0x45   : > { %1125 = vrot.lane.b32.xlu0 %v2452_v58, %s2327_s22  ;;  %v2307_v58 = vld [vmem:[%s3578_s1 + $0x8] sm:$0xff]   ;;  %v2657_v18 = vcombine.low %v314_v63, %v324_v7  ;;  %v2670_v21 = vcombine.low %v744_v52, %v747_v5  ;;  %v689_v49 = vrot.slane %v687_v19, 4  ;;  %v688_v17 = vsel %vm2397_vm4, %v2042_v23, %v687_v19 }
  0x46   : > { %1176 = vrot.lane.b32.xlu1 %v2518_v9, %s2328_s25  ;;  %2223 = vmatprep.subr.bf16.mxu0 %v2307_v58  ;;  %v518_v27 = vshrl.u32 %v2682_v20, 16  ;;  %v521_v28 = vshll.u32 %v2682_v20, 16  ;;  %v531_v0 = vshrl.u32 %v2685_v25, 16  ;;  %v527_v6 = vshll.u32 %v2685_v25, 16 }
  0x47   : > { %2264 = vmatprep.subr.bf16.mxu1 %v2307_v58  ;;  %2224 = vmatpush3.bf16.msra.mxu0 %v2307_v58  ;;  %v335_v42 = vshll.u32 %v2705_v29, 16  ;;  %v537_v44 = vshll.u32 %v210_v36, 16  ;;  %v2720_v39 = vcombine.low %v2682_v20, %v2685_v25  ;;  %v750_v19 = vrot.slane %v2685_v25, 5 }
  0x48   : > { %2269 = vmatpush3.bf16.msra.mxu1 %v2307_v58  ;;  %2225 = vmatprep.subr.bf16.mxu0 %v2308_v35  ;;  %v520_v30 = vrot.slane %v518_v27, 4  ;;  %v523_v3 = vrot.slane %v521_v28, 5  ;;  %v529_v34 = vrot.slane %v527_v6, 5  ;;  %v533_v31 = vrot.slane %v531_v0, 4  ;;  %v2749_v27 = vld [vmem:[%s2365_s17 + $0x9c] sm:$0xf] }
  0x49   : > { %1127 = vrot.lane.b32.xlu0 %v2608_v32, %s2327_s22  ;;  %2265 = vmatprep.subr.bf16.mxu1 %v2308_v35  ;;  %3595 = vst [vmem:[#allocation5_spill] sm:$0xff] %v2720_v39  ;;  %v539_v61 = vrot.slane %v537_v44, 5  ;;  %v2051_v5 = vrot.slane %v2682_v20, 9  ;;  %v753_v25 = vrot.slane %v210_v36, 5  ;;  %v2752_v28 = vld [vmem:[%s2365_s17 + $0xa0] sm:$0xf] }
  0x4a   : > { %1178 = vrot.lane.b32.xlu1 %v2612_v33, %s2328_s25  ;;  %v524_v43 = vor.u32 %v523_v3, %v520_v30  ;;  %v534_v58 = vor.u32 %v533_v31, %v529_v34  ;;  %v694_v0 = vrot.slane %v2705_v29, 5  ;;  %v542_v30 = vshrl.u32 %v2749_v27, 16 }
  0x4b   : > { %2226 = vmatpush3.bf16.msra.mxu0 %v2308_v35  ;;  %v751_v6 = vsel %vm2397_vm4, %v2051_v5, %v750_v19  ;;  %v551_v31 = vshll.u32 %v2752_v28, 16 }
  0x4c   : > { %2270 = vmatpush3.bf16.msra.mxu1 %v2308_v35  ;;  %2227 = vmatprep.subr.bf16.mxu0 %v2309_v62  ;;  %v337_v35 = vrot.slane %v335_v42, 5  ;;  %v525_v15 = vrot.slane %v524_v43, 4  ;;  %v535_v60 = vrot.slane %v534_v58, 4  ;;  %v2781_v43 = vld [vmem:[%s2365_s17 + $0x3c] sm:$0xf]  ;;  %v544_v44 = vrot.slane %v542_v30, 4 }
  0x4d   : > { %1160 = vrot.lane.b32.xlu0 %v2537_v37, %s2328_s25  ;;  %2266 = vmatprep.subr.bf16.mxu1 %v2309_v62  ;;  %v2784_v58 = vld [vmem:[%s2365_s17 + $0x40] sm:$0xf] }
  0x4e   : > { %1211 = vrot.lane.b32.xlu1 %v2546_v48, %s2329_s30  ;;  %v530_v8 = vsel %vm2442_vm5, %v525_v15, %v529_v34  ;;  %v540_v11 = vsel %vm2442_vm5, %v535_v60, %v539_v61  ;;  %v555_v34 = vshrl.u32 %v2752_v28, 16  ;;  %v363_v15 = vshrl.u32 %v2784_v58, 16 }
  0x4f   : > { %2228 = vmatpush3.bf16.msra.mxu0 %v2309_v62  ;;  %v2746_v23 = vcombine.low %v530_v8, %v540_v11  ;;  %v359_v60 = vshll.u32 %v2784_v58, 16 }
  0x50   : > { %2271 = vmatpush3.bf16.msra.mxu1 %v2309_v62  ;;  %v186_v62 = vld [vmem:[%s2365_s17 + $0x38] sm:$0x1]  ;;  %2273 = vmatprep.subr.msk.bf16.mxu0 %vm1618_vm6, %v2312_v45 }
  0x51   : > { %1162 = vrot.lane.b32.xlu0 %v2635_v55, %s2328_s25  ;;  %v345_v53 = vshll.u32 %v186_v62, 16  ;;  %2274 = vmatprep.subr.msk.bf16.mxu1 %vm1618_vm6, %v2312_v45  ;;  %v361_v11 = vrot.slane %v359_v60, 5 }
  0x52   : > { %1213 = vrot.lane.b32.xlu1 %v2639_v56, %s2329_s30 }
  0x55   : > { %1195 = vrot.lane.b32.xlu0 %v2573_v2, %s2329_s30 }
  0x56   : > { %1246 = vrot.lane.b32.xlu1 %v2578_v50, %s2330_s6 }
  0x59   : > { %1197 = vrot.lane.b32.xlu0 %v2657_v18, %s2329_s30 }
  0x5a   : > { %960 = vrot.lane.b32.xlu1 %v2546_v48, %s2325_s20  ;;  %v691_v48 = vsel %vm2397_vm4, %v689_v49, %v690_v26 }
  0x5b   : > { %v2689_v13 = vcombine.low %v688_v17, %v691_v48  ;;  %v347_v17 = vrot.slane %v345_v53, 5  ;;  %v752_v48 = vrot.slane %v750_v19, 4  ;;  %v365_v19 = vrot.slane %v363_v15, 4 }
  0x5d   : > { %1230 = vrot.lane.b32.xlu0 %v2608_v32, %s2330_s6  ;;  %v754_v3 = vsel %vm2397_vm4, %v752_v48, %v753_v25  ;;  %v366_v25 = vor.u32 %v365_v19, %v361_v11 }
  0x5e   : > { %1248 = vrot.lane.b32.xlu1 %v2670_v21, %s2330_s6  ;;  %v2778_v42 = vcombine.low %v751_v6, %v754_v3  ;;  %v2824_v6 = vcombine.low %v2781_v43, %v2784_v58 }
  0x60   : > { %3598 = vst [vmem:[#allocation8_spill] sm:$0xff] %v2824_v6 }
  0x61   : > { %944 = vrot.lane.b32.xlu0 %v2573_v2, %s2325_s20  ;;  %v2702_v2 = vld [vmem:[%s2365_s17 + $0x30] sm:$0xf] }
  0x62   : > { %962 = vrot.lane.b32.xlu1 %v2639_v56, %s2325_s20  ;;  %v326_v38 = vshrl.u32 %v2702_v2, 16  ;;  %v329_v40 = vshll.u32 %v2702_v2, 16  ;;  %v2741_v52 = vcombine.low %v2702_v2, %v2705_v29 }
  0x64   : > { %v328_v46 = vrot.slane %v326_v38, 4  ;;  %v331_v47 = vrot.slane %v329_v40, 5  ;;  %3596 = vst [vmem:[#allocation6_spill] sm:$0xff] %v2741_v52  ;;  %v2043_v38 = vrot.slane %v2702_v2, 9  ;;  %v696_v40 = vrot.slane %v694_v0, 4 }
  0x65   : > { %1232 = vrot.lane.b32.xlu0 %v2689_v13, %s2330_s6 }
  0x66   : > { %1040 = vrot.lane.b32.xlu1 %v2578_v50, %s2324_s19  ;;  %v339_v50 = vshrl.u32 %v2705_v29, 16  ;;  %v332_v63 = vor.u32 %v331_v47, %v328_v46  ;;  %v545_v29 = vshll.u32 %v2749_v27, 16  ;;  %v553_v46 = vrot.slane %v551_v31, 5 }
  0x67   : > { %v557_v47 = vrot.slane %v555_v34, 4  ;;  %v695_v2 = vsel %vm2397_vm4, %v2043_v38, %v694_v0  ;;  %v757_v38 = vrot.slane %v2752_v28, 5 }
  0x68   : > { %v341_v59 = vrot.slane %v339_v50, 4  ;;  %v333_v49 = vrot.slane %v332_v63, 4  ;;  %v697_v50 = vrot.slane %v186_v62, 5 }
  0x69   : > { %946 = vrot.lane.b32.xlu0 %v2657_v18, %s2325_s20  ;;  %v558_v62 = vor.u32 %v557_v47, %v553_v46 }
  0x6a   : > { %1042 = vrot.lane.b32.xlu1 %v2670_v21, %s2324_s19  ;;  %v342_v7 = vor.u32 %v341_v59, %v337_v35  ;;  %v353_v59 = vshll.u32 %v2781_v43, 16 }
  0x6c   : > { %v343_v26 = vrot.slane %v342_v7, 4  ;;  %v2805_v7 = vcombine.low %v2749_v27, %v2752_v28  ;;  %v355_v8 = vrot.slane %v353_v59, 5 }
  0x6d   : > { %1024 = vrot.lane.b32.xlu0 %v2608_v32, %s2324_s19  ;;  %v1620_v32 = vsel %vm1618_vm6, %v2312_v45, 0  ;;  %v547_v45 = vrot.slane %v545_v29, 5  ;;  %v367_v29 = vrot.slane %v366_v25, 4 }
  0x6e   : > { %1075 = vrot.lane.b32.xlu1 %v2612_v33, %s2323_s18  ;;  %2230 = vmatpush3.bf16.msra.mxu0 %v1620_v32  ;;  %v348_v20 = vsel %vm2442_vm5, %v343_v26, %v347_v17  ;;  %3597 = vst [vmem:[#allocation7_spill] sm:$0xff] %v2805_v7  ;;  %v189_v17 = vld [vmem:[%s2365_s17 + $0x44] sm:$0x1] }
  0x6f   : > { %2272 = vmatpush3.bf16.msra.mxu1 %v1620_v32  ;;  %v548_v61 = vor.u32 %v547_v45, %v544_v44  ;;  %v369_v0 = vshll.u32 %v189_v17, 16  ;;  %v2052_v45 = vrot.slane %v2749_v27, 9 }
  0x71   : > { %1026 = vrot.lane.b32.xlu0 %v2689_v13, %s2324_s19  ;;  %v549_v5 = vrot.slane %v548_v61, 4  ;;  %v371_v34 = vrot.slane %v369_v0, 5  ;;  %v758_v27 = vsel %vm2397_vm4, %v2052_v45, %v757_v38  ;;  %v704_v61 = vrot.slane %v189_v17, 5  ;;  %v2910_v0 = vld [vmem:[%s2365_s17 + $0x4c] sm:$0xf] }
  0x72   : > { %1077 = vrot.lane.b32.xlu1 %v2720_v39, %s2323_s18  ;;  %v383_v45 = vshll.u32 %v2910_v0, 16 }
  0x73   : > { %v372_v44 = vsel %vm2442_vm5, %v367_v29, %v371_v34 }
  0x75   : > { %1059 = vrot.lane.b32.xlu0 %v2635_v55, %s2323_s18 }
  0x76   : > { %1110 = vrot.lane.b32.xlu1 %v2639_v56, %s2326_s21  ;;  %v338_v56 = vsel %vm2442_vm5, %v333_v49, %v337_v35  ;;  %v350_v35 = vshrl.u32 %v2781_v43, 16  ;;  %v559_v49 = vrot.slane %v558_v62, 4 }
  0x77   : > { %v2773_v36 = vcombine.low %v338_v56, %v348_v20  ;;  %v554_v56 = vsel %vm2442_vm5, %v549_v5, %v553_v46  ;;  %v759_v46 = vrot.slane %v757_v38, 4  ;;  %v216_v38 = vld [vmem:[%s2365_s17 + $0xb0] sm:$0x1] }
  0x78   : > { %v352_v53 = vrot.slane %v350_v35, 4  ;;  %v701_v35 = vrot.slane %v2784_v58, 5  ;;  %v2044_v58 = vrot.slane %v2781_v43, 9  ;;  %v2881_v43 = vld [vmem:[%s2365_s17 + $0xa8] sm:$0xf] }
  0x79   : > { %1061 = vrot.lane.b32.xlu0 %v2741_v52, %s2323_s18  ;;  %v566_v5 = vshrl.u32 %v2881_v43, 16 }
  0x7a   : > { %1112 = vrot.lane.b32.xlu1 %v2746_v23, %s2326_s21  ;;  %v356_v48 = vor.u32 %v355_v8, %v352_v53  ;;  %v703_v60 = vrot.slane %v701_v35, 4  ;;  %v2884_v8 = vld [vmem:[%s2365_s17 + $0xac] sm:$0xf] }
  0x7b   : > { %v575_v17 = vshll.u32 %v2884_v8, 16 }
  0x7c   : > { %v357_v3 = vrot.slane %v356_v48, 4 }
  0x7d   : > { %1094 = vrot.lane.b32.xlu0 %v2657_v18, %s2326_s21  ;;  %v213_v18 = vld [vmem:[%s2365_s17 + $0xa4] sm:$0x1] }
  0x7e   : > { %1145 = vrot.lane.b32.xlu1 %v2670_v21, %s2327_s22  ;;  %v698_v21 = vsel %vm2397_vm4, %v696_v40, %v697_v50  ;;  %v561_v32 = vshll.u32 %v213_v18, 16  ;;  %v362_v50 = vsel %vm2442_vm5, %v357_v3, %v361_v11  ;;  %v760_v47 = vrot.slane %v213_v18, 5 }
  0x7f   : > { %v2801_v63 = vcombine.low %v695_v2, %v698_v21  ;;  %v2848_v28 = vcombine.low %v362_v50, %v372_v44  ;;  %v577_v3 = vrot.slane %v575_v17, 5  ;;  %v387_v44 = vshrl.u32 %v2910_v0, 16 }
  0x80   : > { %v563_v26 = vrot.slane %v561_v32, 5  ;;  %v761_v18 = vsel %vm2397_vm4, %v759_v46, %v760_v47  ;;  %v702_v32 = vsel %vm2397_vm4, %v2044_v58, %v701_v35  ;;  %v2931_v58 = vcombine.low %v2881_v43, %v2884_v8 }
  0x81   : > { %1096 = vrot.lane.b32.xlu0 %v2773_v36, %s2326_s21  ;;  %v2865_v15 = vcombine.low %v758_v27, %v761_v18  ;;  %v585_v27 = vshll.u32 %v216_v38, 16 }
  0x82   : > { %1147 = vrot.lane.b32.xlu1 %v2778_v42, %s2327_s22  ;;  %v564_v20 = vsel %vm2442_vm5, %v559_v49, %v563_v26  ;;  %v569_v49 = vshll.u32 %v2881_v43, 16  ;;  %v579_v26 = vshrl.u32 %v2884_v8, 16 }
  0x83   : > { %v2828_v30 = vcombine.low %v554_v56, %v564_v20  ;;  %v568_v56 = vrot.slane %v566_v5, 4  ;;  %v587_v17 = vrot.slane %v585_v27, 5 }
  0x84   : > { %v571_v20 = vrot.slane %v569_v49, 5  ;;  %v581_v29 = vrot.slane %v579_v26, 4 }
  0x85   : > { %1129 = vrot.lane.b32.xlu0 %v2689_v13, %s2327_s22 }
  0x86   : > { %1180 = vrot.lane.b32.xlu1 %v2720_v39, %s2328_s25  ;;  %v572_v47 = vor.u32 %v571_v20, %v568_v56  ;;  %v582_v35 = vor.u32 %v581_v29, %v577_v3  ;;  %v2938_v56 = vld [vmem:[%s2365_s17 + $0x50] sm:$0x1] }
  0x88   : > { %v2814_v13 = vpop.permute.xlu1 %1071  ;;  %v573_v49 = vrot.slane %v572_v47, 4  ;;  %v583_v26 = vrot.slane %v582_v35, 4  ;;  %v764_v47 = vrot.slane %v2884_v8, 5 }
  0x89   : > { %1131 = vrot.lane.b32.xlu0 %v2801_v63, %s2327_s22 }
  0x8a   : > { %1182 = vrot.lane.b32.xlu1 %v2805_v7, %s2328_s25  ;;  %v2830_v31 = vpop.permute.xlu0 %1055 }
  0x8d   : > { %1164 = vrot.lane.b32.xlu0 %v2741_v52, %s2328_s25  ;;  %v2975_v52 = vld [vmem:[%s2365_s17 + $0xb8] sm:$0xf] }
  0x8e   : > { %1215 = vrot.lane.b32.xlu1 %v2746_v23, %s2329_s30 }
  0x90   : > { %v2833_v40 = vpop.permute.xlu1 %1036 }
  0x91   : > { %1166 = vrot.lane.b32.xlu0 %v2824_v6, %s2328_s25 }
  0x92   : > { %1217 = vrot.lane.b32.xlu1 %v2828_v30, %s2329_s30  ;;  %v2850_v21 = vpop.permute.xlu0 %1020 }
  0x94   : > { %v2844_v2 = vpop.permute.xlu1 %1038 }
  0x95   : > { %1199 = vrot.lane.b32.xlu0 %v2773_v36, %s2329_s30 }
  0x96   : > { %1250 = vrot.lane.b32.xlu1 %v2778_v42, %s2330_s6  ;;  %v2868_v62 = vpop.permute.xlu0 %1022 }
  0x99   : > { %1201 = vrot.lane.b32.xlu0 %v2848_v28, %s2329_s30  ;;  %v2863_v59 = vpop.permute.xlu1 %942 }
  0x9a   : > { %964 = vrot.lane.b32.xlu1 %v2746_v23, %s2325_s20  ;;  %v705_v23 = vsel %vm2397_vm4, %v703_v60, %v704_v61 }
  0x9b   : > { %v2890_v19 = vcombine.low %v702_v32, %v705_v23  ;;  %v385_v32 = vrot.slane %v383_v45, 5  ;;  %v389_v23 = vrot.slane %v387_v44, 4  ;;  %v578_v44 = vsel %vm2442_vm5, %v573_v49, %v577_v3 }
  0x9c   : > { %v588_v45 = vsel %vm2442_vm5, %v583_v26, %v587_v17  ;;  %v766_v26 = vrot.slane %v764_v47, 4  ;;  %v767_v17 = vrot.slane %v216_v38, 5 }
  0x9d   : > { %1234 = vrot.lane.b32.xlu0 %v2801_v63, %s2330_s6  ;;  %v390_v29 = vor.u32 %v389_v23, %v385_v32  ;;  %v2965_v3 = vcombine.low %v578_v44, %v588_v45  ;;  %v603_v44 = vshrl.u32 %v2975_v52, 16 }
  0x9e   : > { %1252 = vrot.lane.b32.xlu1 %v2865_v15, %s2330_s6  ;;  %v2888_v11 = vpop.permute.xlu0 %940 }
  0x9f   : > { %v391_v23 = vrot.slane %v390_v29, 4 }
  0xa0   : > { %v2878_v53 = vpop.permute.xlu1 %958 }
  0xa1   : > { %948 = vrot.lane.b32.xlu0 %v2773_v36, %s2325_s20  ;;  %v2905_v36 = vld [vmem:[%s2365_s17 + $0x48] sm:$0xf] }
  0xa2   : > { %966 = vrot.lane.b32.xlu1 %v2828_v30, %s2325_s20  ;;  %v377_v50 = vshll.u32 %v2905_v36, 16  ;;  %v2960_v27 = vcombine.low %v2905_v36, %v2910_v0 }
  0xa4   : > { %v2898_v48 = vpop.permute.xlu1 %1073  ;;  %v379_v61 = vrot.slane %v377_v50, 5 }
  0xa5   : > { %1236 = vrot.lane.b32.xlu0 %v2890_v19, %s2330_s6 }
  0xa6   : > { %1044 = vrot.lane.b32.xlu1 %v2778_v42, %s2324_s19  ;;  %v374_v42 = vshrl.u32 %v2905_v36, 16 }
  0xa7   : > { %v2907_v25 = vpop.permute.xlu0 %956 }
  0xa8   : > { %v2912_v34 = vpop.permute.xlu1 %1106  ;;  %v376_v60 = vrot.slane %v374_v42, 4  ;;  %v393_v42 = vshll.u32 %v2938_v56, 16 }
  0xa9   : > { %950 = vrot.lane.b32.xlu0 %v2848_v28, %s2325_s20 }
  0xaa   : > { %1046 = vrot.lane.b32.xlu1 %v2865_v15, %s2324_s19  ;;  %v395_v49 = vrot.slane %v393_v42, 5 }
  0xab   : > { %v2923_v46 = vpop.permute.xlu0 %1057 }
  0xac   : > { %v2925_v18 = vpop.permute.xlu1 %1108 }
  0xad   : > { %1028 = vrot.lane.b32.xlu0 %v2801_v63, %s2324_s19  ;;  %v380_v63 = vor.u32 %v379_v61, %v376_v60  ;;  %v2053_v60 = vrot.slane %v2881_v43, 9  ;;  %v2979_v43 = vcombine.low %v2385_v12, %v2390_v14 }
  0xae   : > { %1079 = vrot.lane.b32.xlu1 %v2805_v7, %s2323_s18  ;;  %v2970_v7 = vld [vmem:[%s2365_s17 + $0xb4] sm:$0xf] }
  0xaf   : > { %v2935_v5 = vpop.permute.xlu0 %1090  ;;  %v381_v61 = vrot.slane %v380_v63, 4  ;;  %v396_v63 = vsel %vm2442_vm5, %v391_v23, %v395_v49  ;;  %v765_v29 = vsel %vm2397_vm4, %v2053_v60, %v764_v47  ;;  %v590_v12 = vshrl.u32 %v2970_v7, 16 }
  0xb0   : > { %v2940_v20 = vpop.permute.xlu1 %1141  ;;  %v593_v42 = vshll.u32 %v2970_v7, 16  ;;  %v711_v23 = vrot.slane %v2938_v56, 5  ;;  %v2057_v49 = vcombine.low %v2407_v22, %v2410_v24  ;;  %v605_v22 = vrot.slane %v603_v44, 4 }
  0xb1   : > { %1030 = vrot.lane.b32.xlu0 %v2890_v19, %s2324_s19  ;;  %v386_v38 = vsel %vm2442_vm5, %v381_v61, %v385_v32  ;;  %v599_v32 = vshll.u32 %v2975_v52, 16  ;;  %v2045_v61 = vrot.slane %v2905_v36, 9  ;;  %v592_v56 = vrot.slane %v590_v12, 4 }
  0xb2   : > { %1081 = vrot.lane.b32.xlu1 %v2931_v58, %s2323_s18  ;;  %v3005_v47 = vcombine.low %v386_v38, %v396_v63  ;;  %v3023_v38 = vld [vmem:[%s2365_s17 + $0x58] sm:$0xf]  ;;  %v595_v63 = vrot.slane %v593_v42, 5  ;;  %v3054_v57 = vcombine.low %v2970_v7, %v2975_v52  ;;  %v1265_v55 = vsel %vm1262_vm7, %v2057_v49, %v2888_v11 }
  0xb3   : > { %v2947_v50 = vpop.permute.xlu0 %1092  ;;  %v3025_v39 = vrot.slane %v599_v32, 5  ;;  %v407_v44 = vshll.u32 %v3023_v38, 16 }
  0xb4   : > { %v2954_v35 = vpop.permute.xlu1 %1143  ;;  %v596_v32 = vor.u32 %v595_v63, %v592_v56 }
  0xb5   : > { %1063 = vrot.lane.b32.xlu0 %v2824_v6, %s2323_s18 }
  0xb6   : > { %1114 = vrot.lane.b32.xlu1 %v2828_v30, %s2326_s21  ;;  %v708_v30 = vrot.slane %v2910_v0, 5  ;;  %v768_v0 = vsel %vm2397_vm4, %v766_v26, %v767_v17  ;;  %v1289_v26 = vsel %vm1262_vm7, %v2979_v43, %v2907_v25  ;;  %v3018_v17 = vld [vmem:[%s2365_s17 + $0x54] sm:$0xf]  ;;  %v3030_v25 = vld [vmem:[%s2365_s17 + $0xbc] sm:$0x1] }
  0xb7   : > { %v2967_v8 = vpop.permute.xlu0 %1125  ;;  %v3015_v36 = vcombine.low %v765_v29, %v768_v0  ;;  %v1329_v29 = vsel %vm1311_vm8, %v1289_v26, %v2833_v40  ;;  %v398_v0 = vshrl.u32 %v3018_v17, 16  ;;  %v401_v42 = vshll.u32 %v3018_v17, 16 }
  0xb8   : > { %v2972_v6 = vpop.permute.xlu1 %1176  ;;  %v710_v60 = vrot.slane %v708_v30, 4 }
  0xb9   : > { %1065 = vrot.lane.b32.xlu0 %v2960_v27, %s2323_s18  ;;  %v400_v63 = vrot.slane %v398_v0, 4 }
  0xba   : > { %1116 = vrot.lane.b32.xlu1 %v2965_v3, %s2326_s21  ;;  %v712_v12 = vsel %vm2397_vm4, %v710_v60, %v711_v23  ;;  %v609_v60 = vshll.u32 %v3030_v25, 16  ;;  %v1362_v23 = vsel %vm1344_vm9, %v1329_v29, %v2814_v13  ;;  %v3069_v29 = vrot.slane %v407_v44, 5 }
  0xbb   : > { %v2993_v14 = vpop.permute.xlu0 %1127  ;;  %v1395_v56 = vsel %vm1377_vm10, %v1362_v23, %v2912_v34 }
  0xbc   : > { %v3000_v45 = vpop.permute.xlu1 %1178  ;;  %v1428_v13 = vsel %vm1410_vm11, %v1395_v56, %v2940_v20  ;;  %v611_v0 = vrot.slane %v609_v60, 5  ;;  %v1292_v20 = vsel %vm1262_vm7, %v2377_v4, %v2878_v53 }
  0xbd   : > { %1098 = vrot.lane.b32.xlu0 %v2848_v28, %s2326_s21  ;;  %v1461_v34 = vsel %vm1443_vm12, %v1428_v13, %v2972_v6 }
  0xbe   : > { %1149 = vrot.lane.b32.xlu1 %v2865_v15, %s2327_s22  ;;  %v709_v15 = vsel %vm2397_vm4, %v2045_v61, %v708_v30  ;;  %v411_v30 = vshrl.u32 %v3023_v38, 16  ;;  %v606_v61 = vor.u32 %v605_v22, %v3025_v39  ;;  %v403_v22 = vrot.slane %v401_v42, 5 }
  0xbf   : > { %v3020_v28 = vpop.permute.xlu0 %1160  ;;  %v3050_v26 = vcombine.low %v709_v15, %v712_v12  ;;  %v3067_v15 = vld [vmem:[%s2365_s17 + $0x5c] sm:$0x1]  ;;  %v597_v12 = vrot.slane %v596_v32, 4  ;;  %v1313_v42 = vsel %vm1311_vm8, %v1265_v55, %v2850_v21  ;;  %v1331_v21 = vsel %vm1311_vm8, %v1292_v20, %v2844_v2 }
  0xc0   : > { %v1212_v24 = vpop.permute.xlu1 %1211  ;;  %v413_v11 = vrot.slane %v411_v30, 4  ;;  %v404_v6 = vor.u32 %v403_v22, %v400_v63  ;;  %v417_v44 = vshll.u32 %v3067_v15, 16  ;;  %v1346_v53 = vsel %vm1344_vm9, %v1313_v42, %v2830_v31 }
  0xc1   : > { %1100 = vrot.lane.b32.xlu0 %v3005_v47, %s2326_s21  ;;  %v1494_v23 = vsel %vm1476_vm13, %v1461_v34, %v1212_v24  ;;  %v602_v32 = vsel %vm2442_vm5, %v597_v12, %v3025_v39  ;;  %v1364_v60 = vsel %vm1344_vm9, %v1331_v21, %v2898_v48  ;;  %v1379_v63 = vsel %vm1377_vm10, %v1346_v53, %v2935_v5 }
  0xc2   : > { %1151 = vrot.lane.b32.xlu1 %v3015_v36, %s2327_s22  ;;  %v414_v55 = vor.u32 %v413_v11, %v3069_v29  ;;  %v3102_v2 = vcombine.low %v3018_v17, %v3023_v38  ;;  %v1397_v31 = vsel %vm1377_vm10, %v1364_v60, %v2925_v18  ;;  %v1412_v39 = vsel %vm1410_vm11, %v1379_v63, %v2967_v8 }
  0xc3   : > { %v3044_v40 = vpop.permute.xlu0 %1162  ;;  %v405_v13 = vrot.slane %v404_v6, 4  ;;  %v419_v48 = vrot.slane %v417_v44, 5  ;;  %v1430_v5 = vsel %vm1410_vm11, %v1397_v31, %v2954_v35  ;;  %v1445_v11 = vsel %vm1443_vm12, %v1412_v39, %v3020_v28  ;;  %v221_v39 = vld [vmem:[%s2365_s17 + $0xc4] sm:$0xf] }
  0xc4   : > { %v1214_v54 = vpop.permute.xlu1 %1213  ;;  %v415_v18 = vrot.slane %v414_v55, 4  ;;  %v1268_v8 = vsel %vm1262_vm7, %v2382_v10, %v2863_v59  ;;  %v1463_v12 = vsel %vm1443_vm12, %v1430_v5, %v3000_v45  ;;  %v771_v35 = vrot.slane %v2975_v52, 5 }
  0xc5   : > { %1133 = vrot.lane.b32.xlu0 %v2890_v19, %s2327_s22  ;;  %v607_v19 = vrot.slane %v606_v61, 4  ;;  %v1496_v28 = vsel %vm1476_vm13, %v1463_v12, %v1214_v54  ;;  %v1315_v59 = vsel %vm1311_vm8, %v1268_v8, %v2868_v62  ;;  %v410_v54 = vsel %vm2442_vm5, %v405_v13, %v3069_v29 }
  0xc6   : > { %1184 = vrot.lane.b32.xlu1 %v2931_v58, %s2328_s25  ;;  %v420_v52 = vsel %vm2442_vm5, %v415_v18, %v419_v48  ;;  %v1348_v45 = vsel %vm1344_vm9, %v1315_v59, %v2923_v46  ;;  %v773_v62 = vrot.slane %v771_v35, 4  ;;  %v790_v18 = vshrl.u32 %v221_v39, 16 }
  0xc7   : > { %v1196_v49 = vpop.permute.xlu0 %1195  ;;  %v612_v61 = vsel %vm2442_vm5, %v607_v19, %v611_v0  ;;  %v3157_v44 = vcombine.low %v410_v54, %v420_v52  ;;  %v786_v8 = vshll.u32 %v221_v39, 16 }
  0xc8   : > { %v1247_v56 = vpop.permute.xlu1 %1246  ;;  %v3118_v34 = vcombine.low %v602_v32, %v612_v61  ;;  %v1478_v19 = vsel %vm1476_vm13, %v1445_v11, %v1196_v49  ;;  %v718_v32 = vrot.slane %v3067_v15, 5  ;;  %v220_v15 = vld [vmem:[%s2365_s17 + $0xc0] sm:$0xf] }
  0xc9   : > { %1135 = vrot.lane.b32.xlu0 %v3050_v26, %s2327_s22  ;;  %v1527_v30 = vsel %vm1509_vm14, %v1494_v23, %v1247_v56  ;;  %v2054_v23 = vrot.slane %v2970_v7, 9  ;;  %v774_v56 = vrot.slane %v3030_v25, 5  ;;  %v715_v7 = vrot.slane %v3023_v38, 5 }
  0xca   : > { %1186 = vrot.lane.b32.xlu1 %v3054_v57, %s2328_s25  ;;  %2247 = vmatprep.mubr.msk.bf16.mxu1 %vm1585_vm15, %v1527_v30  ;;  %v1381_v30 = vsel %vm1377_vm10, %v1348_v45, %v2947_v50  ;;  %v777_v5 = vshrl.u32 %v220_v15, 16  ;;  %v780_v11 = vshll.u32 %v220_v15, 16  ;;  %v2105_v45 = vcombine.low %v220_v15, %v221_v39 }
  0xcb   : > { %v1198_v24 = vpop.permute.xlu0 %1197  ;;  %v1414_v29 = vsel %vm1410_vm11, %v1381_v30, %v2993_v14  ;;  %v772_v55 = vsel %vm2397_vm4, %v2054_v23, %v771_v35  ;;  %v775_v14 = vsel %vm2397_vm4, %v773_v62, %v774_v56  ;;  %v788_v35 = vrot.slane %v786_v8, 5 }
  0xcc   : > { %v3104_v22 = vpop.permute.xlu1 %960  ;;  %v1447_v46 = vsel %vm1443_vm12, %v1414_v29, %v3044_v40  ;;  %v3177_v38 = vcombine.low %v772_v55, %v775_v14  ;;  %v2046_v40 = vrot.slane %v3018_v17, 9 }
  0xcd   : > { %1168 = vrot.lane.b32.xlu0 %v2960_v27, %s2328_s25  ;;  %v1480_v50 = vsel %vm1476_vm13, %v1447_v46, %v1198_v24  ;;  %v717_v24 = vrot.slane %v715_v7, 4 }
  0xce   : > { %1219 = vrot.lane.b32.xlu1 %v2965_v3, %s2329_s30 }
  0xcf   : > { %v1231_v0 = vpop.permute.xlu0 %1230  ;;  %v719_v63 = vsel %vm2397_vm4, %v717_v24, %v718_v32  ;;  %v3252_v32 = vld [vmem:[%s2365_s17 + $0xcc] sm:$0xf] }
  0xd0   : > { %v1511_v42 = vsel %vm1509_vm14, %v1478_v19, %v1231_v0  ;;  %v1249_v20 = vpop.permute.xlu1 %1248  ;;  %v779_v19 = vrot.slane %v777_v5, 4  ;;  %v782_v0 = vrot.slane %v780_v11, 5 }
  0xd1   : > { %1170 = vrot.lane.b32.xlu0 %v3102_v2, %s2328_s25  ;;  %2231 = vmatprep.mubr.msk.bf16.mxu0 %vm1585_vm15, %v1511_v42  ;;  %v1529_v10 = vsel %vm1509_vm14, %v1496_v28, %v1249_v20  ;;  %v792_v28 = vrot.slane %v790_v18, 4  ;;  %v222_v20 = vld [vmem:[%s2365_s17 + $0xc8] sm:$0x1] }
  0xd2   : > { %1221 = vrot.lane.b32.xlu1 %v3118_v34, %s2329_s30  ;;  %2248 = vmatmul.mubr.msk.bf16.vlgmr.msra.gmra.mrb[0].mxu1 %vm1585_vm15, %v1529_v10  ;;  %v783_v59 = vor.u32 %v782_v0, %v779_v19  ;;  %v808_v24 = vrot.slane %v222_v20, 5 }
  0xd3   : > { %v3145_v49 = vpop.permute.xlu0 %944  ;;  %v793_v54 = vor.u32 %v792_v28, %v788_v35 }
  0xd4   : > { %v3151_v6 = vpop.permute.xlu1 %962  ;;  %v784_v62 = vrot.slane %v783_v59, 4 }
  0xd5   : > { %1203 = vrot.lane.b32.xlu0 %v3005_v47, %s2329_s30  ;;  %v794_v56 = vrot.slane %v793_v54, 4 }
  0xd6   : > { %1254 = vrot.lane.b32.xlu1 %v3015_v36, %s2330_s6 }
  0xd7   : > { %v1233_v25 = vpop.permute.xlu0 %1232 }
  0xd8   : > { %v1513_v21 = vsel %vm1509_vm14, %v1480_v50, %v1233_v25  ;;  %v3170_v53 = vpop.permute.xlu1 %1040  ;;  %v805_v50 = vrot.slane %v221_v39, 5  ;;  %v814_v39 = vshll.u32 %v3252_v32, 16 }
  0xd9   : > { %1205 = vrot.lane.b32.xlu0 %v3157_v44, %s2329_s30  ;;  %2232 = vmatmul.mubr.msk.bf16.vlgmr.msra.gmra.mrb[0].mxu0 %vm1585_vm15, %v1513_v21  ;;  %v2055_v21 = vrot.slane %v220_v15, 9 }
  0xda   : > { %968 = vrot.lane.b32.xlu1 %v2965_v3, %s2325_s20  ;;  %v716_v3 = vsel %vm2397_vm4, %v2046_v40, %v715_v7  ;;  %v807_v40 = vrot.slane %v805_v50, 4  ;;  %v816_v28 = vrot.slane %v814_v39, 5 }
  0xdb   : > { %v3181_v61 = vpop.permute.xlu0 %946  ;;  %v3201_v13 = vcombine.low %v716_v3, %v719_v63  ;;  %v3255_v63 = vld [vmem:[%s2365_s17 + $0xd0] sm:$0xf]  ;;  %v806_v15 = vsel %vm2397_vm4, %v2055_v21, %v805_v50 }
  0xdc   : > { %v3183_v60 = vpop.permute.xlu1 %1042  ;;  %v809_v11 = vsel %vm2397_vm4, %v807_v40, %v808_v24  ;;  %v824_v18 = vshrl.u32 %v3255_v63, 16  ;;  %v820_v8 = vshll.u32 %v3255_v63, 16 }
  0xdd   : > { %1238 = vrot.lane.b32.xlu0 %v3050_v26, %s2330_s6  ;;  %v3275_v0 = vcombine.low %v806_v15, %v809_v11 }
  0xde   : > { %1256 = vrot.lane.b32.xlu1 %v3177_v38, %s2330_s6  ;;  %v822_v59 = vrot.slane %v820_v8, 5  ;;  %v826_v54 = vrot.slane %v824_v18, 4 }
  0xdf   : > { %v3193_v17 = vpop.permute.xlu0 %1024 }
  0xe0   : > { %v3195_v31 = vpop.permute.xlu1 %1075 }
  0xe1   : > { %952 = vrot.lane.b32.xlu0 %v3005_v47, %s2325_s20 }
  0xe2   : > { %970 = vrot.lane.b32.xlu1 %v3118_v34, %s2325_s20 }
  0xe3   : > { %v3205_v48 = vpop.permute.xlu0 %1026 }
  0xe4   : > { %v3207_v12 = vpop.permute.xlu1 %1077 }
  0xe5   : > { %1240 = vrot.lane.b32.xlu0 %v3201_v13, %s2330_s6 }
  0xe6   : > { %1048 = vrot.lane.b32.xlu1 %v3015_v36, %s2324_s19  ;;  %v796_v36 = vshll.u32 %v222_v20, 16 }
  0xe7   : > { %v3213_v47 = vpop.permute.xlu0 %1059 }
  0xe8   : > { %v3215_v42 = vpop.permute.xlu1 %1110  ;;  %v798_v30 = vrot.slane %v796_v36, 5 }
  0xe9   : > { %954 = vrot.lane.b32.xlu0 %v3157_v44, %s2325_s20 }
  0xea   : > { %1050 = vrot.lane.b32.xlu1 %v3177_v38, %s2324_s19  ;;  %v799_v7 = vsel %vm2442_vm5, %v794_v56, %v798_v30 }
  0xeb   : > { %v3222_v10 = vpop.permute.xlu0 %1061 }
  0xec   : > { %v3224_v52 = vpop.permute.xlu1 %1112 }
  0xed   : > { %1032 = vrot.lane.b32.xlu0 %v3050_v26, %s2324_s19  ;;  %v789_v26 = vsel %vm2442_vm5, %v784_v62, %v788_v35  ;;  %v3278_v62 = vld [vmem:[%s2365_s17 + $0xd4] sm:$0x1] }
  0xee   : > { %1083 = vrot.lane.b32.xlu1 %v3054_v57, %s2323_s18  ;;  %v3247_v55 = vcombine.low %v789_v26, %v799_v7  ;;  %v827_v26 = vor.u32 %v826_v54, %v822_v59  ;;  %v830_v7 = vshll.u32 %v3278_v62, 16  ;;  %v842_v54 = vrot.slane %v3278_v62, 5 }
  0xef   : > { %v3230_v23 = vpop.permute.xlu0 %1094 }
  0xf0   : > { %v1146_v29 = vpop.permute.xlu1 %1145  ;;  %v828_v39 = vrot.slane %v827_v26, 4 }
  0xf1   : > { %1034 = vrot.lane.b32.xlu0 %v3201_v13, %s2324_s19 }
  0xf2   : > { %1085 = vrot.lane.b32.xlu1 %v2105_v45, %s2323_s18 }
  0xf3   : > { %v3235_v46 = vpop.permute.xlu0 %1096 }
  0xf4   : > { %v3241_v25 = vpop.permute.xlu1 %1147 }
  0xf5   : > { %1067 = vrot.lane.b32.xlu0 %v3102_v2, %s2323_s18 }
  0xf6   : > { %1118 = vrot.lane.b32.xlu1 %v3118_v34, %s2326_s21  ;;  %v811_v34 = vshrl.u32 %v3252_v32, 16 }
  0xf7   : > { %v3249_v14 = vpop.permute.xlu0 %1129 }
  0xf8   : > { %v1181_v3 = vpop.permute.xlu1 %1180  ;;  %v813_v35 = vrot.slane %v811_v34, 4 }
  0xf9   : > { %1069 = vrot.lane.b32.xlu0 %v2979_v43, %s2323_s18 }
  0xfa   : > { %1120 = vrot.lane.b32.xlu1 %v3247_v55, %s2326_s21 }
  0xfb   : > { %v3263_v5 = vpop.permute.xlu0 %1131 }
  0xfc   : > { %v1183_v19 = vpop.permute.xlu1 %1182 }
  0xfd   : > { %1102 = vrot.lane.b32.xlu0 %v3157_v44, %s2326_s21  ;;  %v1295_v44 = vsel %vm1262_vm7, %v2518_v9, %v3104_v22  ;;  %v2108_v22 = vcombine.low %v3252_v32, %v3255_v63 }
  0xfe   : > { %1153 = vrot.lane.b32.xlu1 %v3177_v38, %s2327_s22  ;;  %v817_v38 = vor.u32 %v816_v28, %v813_v35  ;;  %v1333_v56 = vsel %vm1311_vm8, %v1295_v44, %v3170_v53 }
  0xff   : > { %v1165_v20 = vpop.permute.xlu0 %1164  ;;  %v1366_v50 = vsel %vm1344_vm9, %v1333_v56, %v3195_v31  ;;  %v832_v31 = vrot.slane %v830_v7, 5 }
 0x100   : > { %v1216_v36 = vpop.permute.xlu1 %1215  ;;  %v1399_v40 = vsel %vm1377_vm10, %v1366_v50, %v3215_v42  ;;  %v818_v53 = vrot.slane %v817_v38, 4 }
 0x101   : > { %1104 = vrot.lane.b32.xlu0 %v2530_v1, %s2326_s21  ;;  %v1432_v9 = vsel %vm1410_vm11, %v1399_v40, %v1146_v29  ;;  %v3601_v40 = vld [vmem:[#allocation2_spill] sm:$0xff] }
 0x102   : > { %1155 = vrot.lane.b32.xlu1 %v3275_v0, %s2327_s22  ;;  %v1465_v24 = vsel %vm1443_vm12, %v1432_v9, %v1181_v3  ;;  %v823_v3 = vsel %vm2442_vm5, %v818_v53, %v822_v59 }
 0x103   : > { %v3289_v30 = vpop.permute.xlu0 %1166  ;;  %v1498_v15 = vsel %vm1476_vm13, %v1465_v24, %v1216_v36 }
 0x104   : > { %v1218_v21 = vpop.permute.xlu1 %1217 }
 0x105   : > { %1137 = vrot.lane.b32.xlu0 %v3201_v13, %s2327_s22  ;;  %v1271_v13 = vsel %vm1262_vm7, %v2537_v37, %v3145_v49 }
 0x106   : > { %1188 = vrot.lane.b32.xlu1 %v2105_v45, %s2328_s25  ;;  %v1298_v45 = vsel %vm1262_vm7, %v2612_v33, %v3151_v6  ;;  %v1317_v29 = vsel %vm1311_vm8, %v1271_v13, %v3193_v17  ;;  %v833_v33 = vsel %vm2442_vm5, %v828_v39, %v832_v31  ;;  %v839_v6 = vrot.slane %v3255_v63, 5 }
 0x107   : > { %v1200_v34 = vpop.permute.xlu0 %1199  ;;  %v1335_v37 = vsel %vm1311_vm8, %v1298_v45, %v3183_v60  ;;  %v1350_v49 = vsel %vm1344_vm9, %v1317_v29, %v3213_v47 }
 0x108   : > { %v1251_v11 = vpop.permute.xlu1 %1250  ;;  %v1368_v17 = vsel %vm1344_vm9, %v1335_v37, %v3207_v12  ;;  %v1383_v8 = vsel %vm1377_vm10, %v1350_v49, %v3230_v23  ;;  %v2109_v12 = vcombine.low %v823_v3, %v833_v33  ;;  %v2056_v23 = vrot.slane %v3252_v32, 9  ;;  %v3602_v49 = vld [vmem:[#allocation5_spill] sm:$0xff] }
 0x109   : > { %1139 = vrot.lane.b32.xlu0 %v2428_v41, %s2327_s22  ;;  %v1531_v42 = vsel %vm1509_vm14, %v1498_v15, %v1251_v11  ;;  %v1401_v60 = vsel %vm1377_vm10, %v1368_v17, %v3224_v52  ;;  %v1416_v47 = vsel %vm1410_vm11, %v1383_v8, %v3249_v14  ;;  %v841_v14 = vrot.slane %v839_v6, 4 }
 0x10a   : > { %1190 = vrot.lane.b32.xlu1 %v2108_v22, %s2328_s25  ;;  %2251 = vmatprep.mubr.msk.bf16.mxu1 %vm1585_vm15, %v1531_v42  ;;  %v1434_v51 = vsel %vm1410_vm11, %v1401_v60, %v3241_v25  ;;  %v1449_v63 = vsel %vm1443_vm12, %v1416_v47, %v1165_v20  ;;  %v3599_v20 = vld [vmem:[#allocation4_spill] sm:$0xff] }
 0x10b   : > { %v1202_v18 = vpop.permute.xlu0 %1201  ;;  %v1467_v28 = vsel %vm1443_vm12, %v1434_v51, %v1183_v19  ;;  %v1482_v52 = vsel %vm1476_vm13, %v1449_v63, %v1200_v34 }
 0x10c   : > { %v3330_v35 = vpop.permute.xlu1 %964 }
 0x10d   : > { %1172 = vrot.lane.b32.xlu0 %v2979_v43, %s2328_s25  ;;  %v1500_v43 = vsel %vm1476_vm13, %v1467_v28, %v1218_v21  ;;  %v3600_v21 = vld [vmem:[#allocation3_spill] sm:$0xff]  ;;  %v3603_v28 = vld [vmem:[#allocation6_spill] sm:$0xff] }
 0x10e   : > { %1223 = vrot.lane.b32.xlu1 %v3247_v55, %s2329_s30  ;;  %v1274_v55 = vsel %vm1262_vm7, %v3599_v20, %v3181_v61  ;;  %v840_v61 = vsel %vm2397_vm4, %v2056_v23, %v839_v6 }
 0x10f   : > { %v1235_v59 = vpop.permute.xlu0 %1234  ;;  %v1319_v19 = vsel %vm1311_vm8, %v1274_v55, %v3205_v48 }
 0x110   : > { %v1515_v25 = vsel %vm1509_vm14, %v1482_v52, %v1235_v59  ;;  %v1253_v36 = vpop.permute.xlu1 %1252  ;;  %v1352_v62 = vsel %vm1344_vm9, %v1319_v19, %v3222_v10  ;;  %v3604_v59 = vld [vmem:[#allocation7_spill] sm:$0xff] }
 0x111   : > { %1174 = vrot.lane.b32.xlu0 %v2377_v4, %s2328_s25  ;;  %2235 = vmatprep.mubr.msk.bf16.mxu0 %vm1585_vm15, %v1515_v25  ;;  %v1533_v32 = vsel %vm1509_vm14, %v1500_v43, %v1253_v36  ;;  %v843_v4 = vsel %vm2397_vm4, %v841_v14, %v842_v54  ;;  %v1385_v38 = vsel %vm1377_vm10, %v1352_v62, %v3235_v46 }
 0x112   : > { %1225 = vrot.lane.b32.xlu1 %v2109_v12, %s2329_s30  ;;  %2252 = vmatmul.mubr.msk.bf16.gmra.mrb[4].mxu1 %vm1585_vm15, %v1533_v32  ;;  %v1418_v48 = vsel %vm1410_vm11, %v1385_v38, %v3263_v5  ;;  %v2110_v26 = vcombine.low %v840_v61, %v843_v4 }
 0x113   : > { %v949_v44 = vpop.permute.xlu0 %948  ;;  %v1451_v10 = vsel %vm1443_vm12, %v1418_v48, %v3289_v30 }
 0x114   : > { %v967_v56 = vpop.permute.xlu1 %966  ;;  %v1484_v16 = vsel %vm1476_vm13, %v1451_v10, %v1202_v18  ;;  %v1301_v18 = vsel %vm1262_vm7, %v3602_v49, %v3330_v35  ;;  %v1277_v52 = vsel %vm1262_vm7, %v3603_v28, %v949_v44 }
 0x115   : > { %1207 = vrot.lane.b32.xlu0 %v2530_v1, %s2329_s30  ;;  %v1304_v14 = vsel %vm1262_vm7, %v3604_v59, %v967_v56 }
 0x116   : > { %1258 = vrot.lane.b32.xlu1 %v3275_v0, %s2330_s6 }
 0x117   : > { %v1237_v7 = vpop.permute.xlu0 %1236 }
 0x118   : > { %v1517_v50 = vsel %vm1509_vm14, %v1484_v16, %v1237_v7  ;;  %v1045_v46 = vpop.permute.xlu1 %1044  ;;  %v3605_v16 = vld [vmem:[#allocation8_spill] sm:$0xff] }
 0x119   : > { %1209 = vrot.lane.b32.xlu0 %v3600_v21, %s2329_s30  ;;  %2236 = vmatmul.mubr.msk.bf16.gmra.mrb[4].mxu0 %vm1585_vm15, %v1517_v50  ;;  %v1337_v33 = vsel %vm1311_vm8, %v1301_v18, %v1045_v46 }
 0x11a   : > { %1260 = vrot.lane.b32.xlu1 %v2110_v26, %s2330_s6 }
 0x11b   : > { %v951_v1 = vpop.permute.xlu0 %950 }
 0x11c   : > { %v1047_v5 = vpop.permute.xlu1 %1046  ;;  %v1280_v7 = vsel %vm1262_vm7, %v3605_v16, %v951_v1 }
 0x11d   : > { %1242 = vrot.lane.b32.xlu0 %v2428_v41, %s2330_s6  ;;  %v1339_v43 = vsel %vm1311_vm8, %v1304_v14, %v1047_v5 }
 0x11f   : > { %v1029_v0 = vpop.permute.xlu0 %1028 }
 0x120   : > { %v1080_v30 = vpop.permute.xlu1 %1079  ;;  %v1321_v54 = vsel %vm1311_vm8, %v1277_v52, %v1029_v0 }
 0x121   : > { %1244 = vrot.lane.b32.xlu0 %v3601_v40, %s2330_s6  ;;  %v1370_v17 = vsel %vm1344_vm9, %v1337_v33, %v1080_v30 }
 0x123   : > { %v1031_v9 = vpop.permute.xlu0 %1030 }
 0x124   : > { %v1082_v22 = vpop.permute.xlu1 %1081  ;;  %v1323_v46 = vsel %vm1311_vm8, %v1280_v7, %v1031_v9 }
 0x125   : > { %v1372_v20 = vsel %vm1344_vm9, %v1339_v43, %v1082_v22 }
 0x127   : > { %v1064_v53 = vpop.permute.xlu0 %1063 }
 0x128   : > { %v1115_v24 = vpop.permute.xlu1 %1114  ;;  %v1354_v25 = vsel %vm1344_vm9, %v1321_v54, %v1064_v53 }
 0x129   : > { %v1403_v60 = vsel %vm1377_vm10, %v1370_v17, %v1115_v24 }
 0x12b   : > { %v1066_v34 = vpop.permute.xlu0 %1065 }
 0x12c   : > { %v1117_v39 = vpop.permute.xlu1 %1116  ;;  %v1356_v21 = vsel %vm1344_vm9, %v1323_v46, %v1066_v34 }
 0x12d   : > { %v1405_v19 = vsel %vm1377_vm10, %v1372_v20, %v1117_v39 }
 0x12f   : > { %v1099_v31 = vpop.permute.xlu0 %1098 }
 0x130   : > { %v1150_v15 = vpop.permute.xlu1 %1149  ;;  %v1387_v55 = vsel %vm1377_vm10, %v1354_v25, %v1099_v31 }
 0x131   : > { %v1436_v47 = vsel %vm1410_vm11, %v1403_v60, %v1150_v15 }
 0x133   : > { %v1101_v11 = vpop.permute.xlu0 %1100 }
 0x134   : > { %v1152_v13 = vpop.permute.xlu1 %1151  ;;  %v1389_v0 = vsel %vm1377_vm10, %v1356_v21, %v1101_v11 }
 0x135   : > { %v1438_v44 = vsel %vm1410_vm11, %v1405_v19, %v1152_v13 }
 0x137   : > { %v1134_v42 = vpop.permute.xlu0 %1133 }
 0x138   : > { %v1185_v45 = vpop.permute.xlu1 %1184  ;;  %v1420_v62 = vsel %vm1410_vm11, %v1387_v55, %v1134_v42 }
 0x139   : > { %v1469_v51 = vsel %vm1443_vm12, %v1436_v47, %v1185_v45 }
 0x13b   : > { %v1136_v29 = vpop.permute.xlu0 %1135 }
 0x13c   : > { %v1187_v3 = vpop.permute.xlu1 %1186  ;;  %v1422_v40 = vsel %vm1410_vm11, %v1389_v0, %v1136_v29 }
 0x13d   : > { %v1471_v4 = vsel %vm1443_vm12, %v1438_v44, %v1187_v3 }
 0x13f   : > { %v1169_v41 = vpop.permute.xlu0 %1168 }
 0x140   : > { %v1220_v37 = vpop.permute.xlu1 %1219  ;;  %v1453_v61 = vsel %vm1443_vm12, %v1420_v62, %v1169_v41 }
 0x141   : > { %v1502_v12 = vsel %vm1476_vm13, %v1469_v51, %v1220_v37 }
 0x143   : > { %v1171_v6 = vpop.permute.xlu0 %1170 }
 0x144   : > { %v1222_v8 = vpop.permute.xlu1 %1221  ;;  %v1455_v22 = vsel %vm1443_vm12, %v1422_v40, %v1171_v6 }
 0x145   : > { %v1504_v48 = vsel %vm1476_vm13, %v1471_v4, %v1222_v8 }
 0x147   : > { %v1204_v63 = vpop.permute.xlu0 %1203 }
 0x148   : > { %v1255_v23 = vpop.permute.xlu1 %1254  ;;  %v1486_v38 = vsel %vm1476_vm13, %v1453_v61, %v1204_v63 }
 0x149   : > { %v1535_v35 = vsel %vm1509_vm14, %v1502_v12, %v1255_v23 }
 0x14a   : > { %2255 = vmatprep.mubr.msk.bf16.mxu1 %vm1585_vm15, %v1535_v35 }
 0x14b   : > { %v1206_v36 = vpop.permute.xlu0 %1205 }
 0x14c   : > { %v969_v32 = vpop.permute.xlu1 %968  ;;  %v1488_v1 = vsel %vm1476_vm13, %v1455_v22, %v1206_v36 }
 0x14d   : > { %v1307_v51 = vsel %vm1262_vm7, %v2931_v58, %v969_v32 }
 0x14f   : > { %v1239_v56 = vpop.permute.xlu0 %1238 }
 0x150   : > { %v1519_v10 = vsel %vm1509_vm14, %v1486_v38, %v1239_v56  ;;  %v1257_v26 = vpop.permute.xlu1 %1256 }
 0x151   : > { %2239 = vmatprep.mubr.msk.bf16.mxu0 %vm1585_vm15, %v1519_v10  ;;  %v1537_v50 = vsel %vm1509_vm14, %v1504_v48, %v1257_v26 }
 0x152   : > { %2256 = vmatmul.mubr.msk.bf16.gmra.mrb[8].mxu1 %vm1585_vm15, %v1537_v50 }
 0x153   : > { %v953_v5 = vpop.permute.xlu0 %952 }
 0x154   : > { %v971_v30 = vpop.permute.xlu1 %970  ;;  %v1283_v20 = vsel %vm1262_vm7, %v2960_v27, %v953_v5 }
 0x155   : > { %v1310_v35 = vsel %vm1262_vm7, %v3054_v57, %v971_v30 }
 0x157   : > { %v1241_v53 = vpop.permute.xlu0 %1240 }
 0x158   : > { %v1521_v24 = vsel %vm1509_vm14, %v1488_v1, %v1241_v53  ;;  %v1049_v39 = vpop.permute.xlu1 %1048  ;;  %v3470_v1 = vld [vmem:[%s3579_s2] ss:$0 sm:$0xff] }
 0x159   : > { %2240 = vmatmul.mubr.msk.bf16.gmra.mrb[8].mxu0 %vm1585_vm15, %v1521_v24  ;;  %v1341_v63 = vsel %vm1311_vm8, %v1307_v51, %v1049_v39 }
 0x15b   : > { %v955_v9 = vpop.permute.xlu0 %954 }
 0x15c   : > { %v1051_v31 = vpop.permute.xlu1 %1050  ;;  %v1286_v56 = vsel %vm1262_vm7, %v3102_v2, %v955_v9 }
 0x15d   : > { %v1343_v14 = vsel %vm1311_vm8, %v1310_v35, %v1051_v31 }
 0x15f   : > { %v1033_v15 = vpop.permute.xlu0 %1032 }
 0x160   : > { %v1084_v34 = vpop.permute.xlu1 %1083  ;;  %v1325_v57 = vsel %vm1311_vm8, %v1283_v20, %v1033_v15 }
 0x161   : > { %v1374_v23 = vsel %vm1344_vm9, %v1341_v63, %v1084_v34 }
 0x163   : > { %v1035_v13 = vpop.permute.xlu0 %1034 }
 0x164   : > { %v1086_v42 = vpop.permute.xlu1 %1085  ;;  %v1327_v26 = vsel %vm1311_vm8, %v1286_v56, %v1035_v13 }
 0x165   : > { %v1376_v58 = vsel %vm1344_vm9, %v1343_v14, %v1086_v42 }
 0x167   : > { %v1068_v11 = vpop.permute.xlu0 %1067 }
 0x168   : > { %v1119_v45 = vpop.permute.xlu1 %1118  ;;  %v1358_v62 = vsel %vm1344_vm9, %v1325_v57, %v1068_v11 }
 0x169   : > { %v1407_v52 = vsel %vm1377_vm10, %v1374_v23, %v1119_v45 }
 0x16b   : > { %v1070_v3 = vpop.permute.xlu0 %1069 }
 0x16c   : > { %v1121_v29 = vpop.permute.xlu1 %1120  ;;  %v1360_v7 = vsel %vm1344_vm9, %v1327_v26, %v1070_v3 }
 0x16d   : > { %v1409_v55 = vsel %vm1377_vm10, %v1376_v58, %v1121_v29 }
 0x16f   : > { %v1103_v41 = vpop.permute.xlu0 %1102 }
 0x170   : > { %v1154_v37 = vpop.permute.xlu1 %1153  ;;  %v1391_v4 = vsel %vm1377_vm10, %v1358_v62, %v1103_v41 }
 0x171   : > { %v1440_v59 = vsel %vm1410_vm11, %v1407_v52, %v1154_v37 }
 0x173   : > { %v1105_v49 = vpop.permute.xlu0 %1104 }
 0x174   : > { %v1156_v18 = vpop.permute.xlu1 %1155  ;;  %v1393_v21 = vsel %vm1377_vm10, %v1360_v7, %v1105_v49 }
 0x175   : > { %v1442_v19 = vsel %vm1410_vm11, %v1409_v55, %v1156_v18 }
 0x177   : > { %v1138_v33 = vpop.permute.xlu0 %1137 }
 0x178   : > { %v1189_v6 = vpop.permute.xlu1 %1188  ;;  %v1424_v48 = vsel %vm1410_vm11, %v1391_v4, %v1138_v33 }
 0x179   : > { %v1473_v54 = vsel %vm1443_vm12, %v1440_v59, %v1189_v6 }
 0x17b   : > { %v1140_v17 = vpop.permute.xlu0 %1139 }
 0x17c   : > { %v1191_v8 = vpop.permute.xlu1 %1190  ;;  %v1426_v5 = vsel %vm1410_vm11, %v1393_v21, %v1140_v17 }
 0x17d   : > { %v1475_v44 = vsel %vm1443_vm12, %v1442_v19, %v1191_v8 }
 0x17f   : > { %v1173_v60 = vpop.permute.xlu0 %1172 }
 0x180   : > { %v1224_v47 = vpop.permute.xlu1 %1223  ;;  %v1457_v16 = vsel %vm1443_vm12, %v1424_v48, %v1173_v60 }
 0x181   : > { %v1506_v25 = vsel %vm1476_vm13, %v1473_v54, %v1224_v47 }
 0x183   : > { %v1175_v12 = vpop.permute.xlu0 %1174 }
 0x184   : > { %v1226_v28 = vpop.permute.xlu1 %1225  ;;  %v1459_v0 = vsel %vm1443_vm12, %v1426_v5, %v1175_v12 }
 0x185   : > { %v1508_v38 = vsel %vm1476_vm13, %v1475_v44, %v1226_v28 }
 0x187   : > { %v1208_v43 = vpop.permute.xlu0 %1207 }
 0x188   : > { %v1259_v36 = vpop.permute.xlu1 %1258  ;;  %v1490_v50 = vsel %vm1476_vm13, %v1457_v16, %v1208_v43 }
 0x189   : > { %v1539_v32 = vsel %vm1509_vm14, %v1506_v25, %v1259_v36 }
 0x18a   : > { %2259 = vmatprep.mubr.msk.bf16.mxu1 %vm1585_vm15, %v1539_v32 }
 0x18b   : > { %v1210_v61 = vpop.permute.xlu0 %1209 }
 0x18c   : > { %v1261_v27 = vpop.permute.xlu1 %1260  ;;  %v1492_v30 = vsel %vm1476_vm13, %v1459_v0, %v1210_v61 }
 0x18d   : > { %v1541_v10 = vsel %vm1509_vm14, %v1508_v38, %v1261_v27 }
 0x18e   : > { %2260 = vmatmul.mubr.msk.bf16.gmra.mrb[12].mxu1 %vm1585_vm15, %v1541_v10 }
 0x18f   : > { %v1243_v46 = vpop.permute.xlu0 %1242 }
 0x190   : > { %v1523_v2 = vsel %vm1509_vm14, %v1490_v50, %v1243_v46 }
 0x191   : > { %2243 = vmatprep.mubr.msk.bf16.mxu0 %vm1585_vm15, %v1523_v2 }
 0x193   : > { %v1245_v40 = vpop.permute.xlu0 %1244 }
 0x194   : > { %v1525_v22 = vsel %vm1509_vm14, %v1492_v30, %v1245_v40 }
 0x195   : > { %2244 = vmatmul.mubr.msk.bf16.gmra.mrb[12].mxu0 %vm1585_vm15, %v1525_v22 }
 0x1a5   : > { %v2249_v53 = vpop.f32.mrb[0].mxu1 }
 0x1a6   : > { %v1729_v24 = vadd.f32 %v2249_v53, %v3470_v1  ;;  %v1720_v39 = vpop.f32.mrb[1].mxu1 }
 0x1a7   : > { %v1721_v9 = vadd.f32 %v3470_v1, %v1720_v39  ;;  %v2250_v31 = vpop.f32.mrb[2].mxu1 }
 0x1a8   : > { %v1801_v15 = vmax.f32 %v1729_v24, 0.0  ;;  %v1732_v34 = vadd.f32 %v2250_v31, %v3470_v1  ;;  %v1723_v13 = vpop.f32.mrb[3].mxu1 }
 0x1a9   : > { %v1799_v42 = vmax.f32 %v1721_v9, 0.0  ;;  %v1724_v11 = vadd.f32 %v3470_v1, %v1723_v13 }
 0x1aa   : > { %v2186_v45 = vpack.c.bf16 %v1801_v15, %v1801_v15  ;;  %v1802_v3 = vmax.f32 %v1732_v34, 0.0 }
 0x1ab   : > { %v2184_v29 = vpack.c.bf16 %v1799_v42, %v1799_v42  ;;  %v1800_v41 = vmax.f32 %v1724_v11, 0.0 }
 0x1ac   : > { %v2233_v37 = vpop.f32.mrb[0].mxu0  ;;  %1962 = vst.msk [vmem:[%s3479_s16 + $0x48] sm:$0xf] %vm1943_vm0, %v2186_v45  ;;  %v2187_v49 = vpack.c.bf16 %v1802_v3, %v1802_v3 }
 0x1ad   : > { %v1665_v18 = vadd.f32 %v2233_v37, %v3470_v1  ;;  %v1656_v33 = vpop.f32.mrb[1].mxu0  ;;  %1960 = vst.msk [vmem:[%s3479_s16 + $0x40] sm:$0xf] %vm1943_vm0, %v2184_v29  ;;  %v2185_v6 = vpack.c.bf16 %v1800_v41, %v1800_v41 }
 0x1ae   : > { %v1657_v17 = vadd.f32 %v3470_v1, %v1656_v33  ;;  %v2234_v8 = vpop.f32.mrb[2].mxu0  ;;  %1963 = vst.msk [vmem:[%s3479_s16 + $0x4c] sm:$0xf] %vm1943_vm0, %v2187_v49 }
 0x1af   : > { %v1785_v60 = vmax.f32 %v1665_v18, 0.0  ;;  %v1668_v47 = vadd.f32 %v2234_v8, %v3470_v1  ;;  %v1659_v51 = vpop.f32.mrb[3].mxu0  ;;  %1961 = vst.msk [vmem:[%s3479_s16 + $0x44] sm:$0xf] %vm1943_vm0, %v2185_v6 }
 0x1b0   : > { %v1783_v63 = vmax.f32 %v1657_v17, 0.0  ;;  %v1660_v12 = vadd.f32 %v3470_v1, %v1659_v51 }
 0x1b1   : > { %v2170_v23 = vpack.c.bf16 %v1785_v60, %v1785_v60  ;;  %v1786_v28 = vmax.f32 %v1668_v47, 0.0 }
 0x1b2   : > { %v2168_v52 = vpack.c.bf16 %v1783_v63, %v1783_v63  ;;  %v1784_v35 = vmax.f32 %v1660_v12, 0.0 }
 0x1b3   : > { %1946 = vst.msk [vmem:[%s3479_s16 + $0x8] sm:$0xf] %vm1943_vm0, %v2170_v23  ;;  %v2171_v59 = vpack.c.bf16 %v1786_v28, %v1786_v28 }
 0x1b4   : > { %1944 = vst.msk [vmem:[%s3479_s16] sm:$0xf] %vm1943_vm0, %v2168_v52  ;;  %v2169_v14 = vpack.c.bf16 %v1784_v35, %v1784_v35 }
 0x1b5   : > { %1947 = vst.msk [vmem:[%s3479_s16 + $0xc] sm:$0xf] %vm1943_vm0, %v2171_v59 }
 0x1b6   : > { %1945 = vst.msk [vmem:[%s3479_s16 + $0x4] sm:$0xf] %vm1943_vm0, %v2169_v14 }
 0x1e5   : > { %v2253_v54 = vpop.f32.mrb[4].mxu1 }
 0x1e6   : > { %v1745_v43 = vadd.f32 %v2253_v54, %v3470_v1  ;;  %v1736_v58 = vpop.f32.mrb[5].mxu1 }
 0x1e7   : > { %v1737_v25 = vadd.f32 %v3470_v1, %v1736_v58  ;;  %v2254_v36 = vpop.f32.mrb[6].mxu1 }
 0x1e8   : > { %v1805_v20 = vmax.f32 %v1745_v43, 0.0  ;;  %v1748_v55 = vadd.f32 %v2254_v36, %v3470_v1  ;;  %v1739_v32 = vpop.f32.mrb[7].mxu1 }
 0x1e9   : > { %v1803_v57 = vmax.f32 %v1737_v25, 0.0  ;;  %v1740_v19 = vadd.f32 %v3470_v1, %v1739_v32 }
 0x1ea   : > { %v2190_v62 = vpack.c.bf16 %v1805_v20, %v1805_v20  ;;  %v1806_v44 = vmax.f32 %v1748_v55, 0.0 }
 0x1eb   : > { %v2188_v61 = vpack.c.bf16 %v1803_v57, %v1803_v57  ;;  %v1804_v4 = vmax.f32 %v1740_v19, 0.0 }
 0x1ec   : > { %v2237_v38 = vpop.f32.mrb[4].mxu0  ;;  %1966 = vst.msk [vmem:[%s3479_s16 + $0x58] sm:$0xf] %vm1943_vm0, %v2190_v62  ;;  %v2191_v27 = vpack.c.bf16 %v1806_v44, %v1806_v44 }
 0x1ed   : > { %v1681_v56 = vadd.f32 %v2237_v38, %v3470_v1  ;;  %v1672_v48 = vpop.f32.mrb[5].mxu0  ;;  %1964 = vst.msk [vmem:[%s3479_s16 + $0x50] sm:$0xf] %vm1943_vm0, %v2188_v61  ;;  %v2189_v10 = vpack.c.bf16 %v1804_v4, %v1804_v4 }
 0x1ee   : > { %v1673_v26 = vadd.f32 %v3470_v1, %v1672_v48  ;;  %v2238_v16 = vpop.f32.mrb[6].mxu0  ;;  %1967 = vst.msk [vmem:[%s3479_s16 + $0x5c] sm:$0xf] %vm1943_vm0, %v2191_v27 }
 0x1ef   : > { %v1789_v7 = vmax.f32 %v1681_v56, 0.0  ;;  %v1684_v50 = vadd.f32 %v2238_v16, %v3470_v1  ;;  %v1675_v46 = vpop.f32.mrb[7].mxu0  ;;  %1965 = vst.msk [vmem:[%s3479_s16 + $0x54] sm:$0xf] %vm1943_vm0, %v2189_v10 }
 0x1f0   : > { %v1787_v21 = vmax.f32 %v1673_v26, 0.0  ;;  %v1676_v2 = vadd.f32 %v3470_v1, %v1675_v46 }
 0x1f1   : > { %v2174_v5 = vpack.c.bf16 %v1789_v7, %v1789_v7  ;;  %v1790_v0 = vmax.f32 %v1684_v50, 0.0 }
 0x1f2   : > { %v2172_v30 = vpack.c.bf16 %v1787_v21, %v1787_v21  ;;  %v1788_v40 = vmax.f32 %v1676_v2, 0.0 }
 0x1f3   : > { %1950 = vst.msk [vmem:[%s3479_s16 + $0x18] sm:$0xf] %vm1943_vm0, %v2174_v5  ;;  %v2175_v22 = vpack.c.bf16 %v1790_v0, %v1790_v0 }
 0x1f4   : > { %1948 = vst.msk [vmem:[%s3479_s16 + $0x10] sm:$0xf] %vm1943_vm0, %v2172_v30  ;;  %v2173_v53 = vpack.c.bf16 %v1788_v40, %v1788_v40 }
 0x1f5   : > { %1951 = vst.msk [vmem:[%s3479_s16 + $0x1c] sm:$0xf] %vm1943_vm0, %v2175_v22 }
 0x1f6   : > { %1949 = vst.msk [vmem:[%s3479_s16 + $0x14] sm:$0xf] %vm1943_vm0, %v2173_v53 }
 0x225   : > { %v2257_v24 = vpop.f32.mrb[8].mxu1 }
 0x226   : > { %v1761_v39 = vadd.f32 %v2257_v24, %v3470_v1  ;;  %v1752_v9 = vpop.f32.mrb[9].mxu1 }
 0x227   : > { %v1753_v31 = vadd.f32 %v3470_v1, %v1752_v9  ;;  %v2258_v15 = vpop.f32.mrb[10].mxu1 }
 0x228   : > { %v1809_v34 = vmax.f32 %v1761_v39, 0.0  ;;  %v1764_v13 = vadd.f32 %v2258_v15, %v3470_v1  ;;  %v1755_v42 = vpop.f32.mrb[11].mxu1 }
 0x229   : > { %v1807_v11 = vmax.f32 %v1753_v31, 0.0  ;;  %v1756_v45 = vadd.f32 %v3470_v1, %v1755_v42 }
 0x22a   : > { %v2194_v3 = vpack.c.bf16 %v1809_v34, %v1809_v34  ;;  %v1810_v29 = vmax.f32 %v1764_v13, 0.0 }
 0x22b   : > { %v2192_v41 = vpack.c.bf16 %v1807_v11, %v1807_v11  ;;  %v1808_v37 = vmax.f32 %v1756_v45, 0.0 }
 0x22c   : > { %v2241_v49 = vpop.f32.mrb[8].mxu0  ;;  %1970 = vst.msk [vmem:[%s3479_s16 + $0x68] sm:$0xf] %vm1943_vm0, %v2194_v3  ;;  %v2195_v18 = vpack.c.bf16 %v1810_v29, %v1810_v29 }
 0x22d   : > { %v1697_v33 = vadd.f32 %v2241_v49, %v3470_v1  ;;  %v1688_v6 = vpop.f32.mrb[9].mxu0  ;;  %1968 = vst.msk [vmem:[%s3479_s16 + $0x60] sm:$0xf] %vm1943_vm0, %v2192_v41  ;;  %v2193_v17 = vpack.c.bf16 %v1808_v37, %v1808_v37 }
 0x22e   : > { %v1689_v8 = vadd.f32 %v3470_v1, %v1688_v6  ;;  %v2242_v60 = vpop.f32.mrb[10].mxu0  ;;  %1971 = vst.msk [vmem:[%s3479_s16 + $0x6c] sm:$0xf] %vm1943_vm0, %v2195_v18 }
 0x22f   : > { %v1793_v47 = vmax.f32 %v1697_v33, 0.0  ;;  %v1700_v51 = vadd.f32 %v2242_v60, %v3470_v1  ;;  %v1691_v63 = vpop.f32.mrb[11].mxu0  ;;  %1969 = vst.msk [vmem:[%s3479_s16 + $0x64] sm:$0xf] %vm1943_vm0, %v2193_v17 }
 0x230   : > { %v1791_v12 = vmax.f32 %v1689_v8, 0.0  ;;  %v1692_v23 = vadd.f32 %v3470_v1, %v1691_v63 }
 0x231   : > { %v2178_v28 = vpack.c.bf16 %v1793_v47, %v1793_v47  ;;  %v1794_v52 = vmax.f32 %v1700_v51, 0.0 }
 0x232   : > { %v2176_v35 = vpack.c.bf16 %v1791_v12, %v1791_v12  ;;  %v1792_v59 = vmax.f32 %v1692_v23, 0.0 }
 0x233   : > { %1954 = vst.msk [vmem:[%s3479_s16 + $0x28] sm:$0xf] %vm1943_vm0, %v2178_v28  ;;  %v2179_v14 = vpack.c.bf16 %v1794_v52, %v1794_v52 }
 0x234   : > { %1952 = vst.msk [vmem:[%s3479_s16 + $0x20] sm:$0xf] %vm1943_vm0, %v2176_v35  ;;  %v2177_v54 = vpack.c.bf16 %v1792_v59, %v1792_v59 }
 0x235   : > { %1955 = vst.msk [vmem:[%s3479_s16 + $0x2c] sm:$0xf] %vm1943_vm0, %v2179_v14 }
 0x236   : > { %1953 = vst.msk [vmem:[%s3479_s16 + $0x24] sm:$0xf] %vm1943_vm0, %v2177_v54 }
 0x261   : > { %v2261_v43 = vpop.f32.mrb[12].mxu1 }
 0x262   : > { %v1777_v58 = vadd.f32 %v2261_v43, %v3470_v1  ;;  %v1768_v25 = vpop.f32.mrb[13].mxu1 }
 0x263   : > { %v1769_v36 = vadd.f32 %v3470_v1, %v1768_v25  ;;  %v2262_v20 = vpop.f32.mrb[14].mxu1 }
 0x264   : > { %v1813_v55 = vmax.f32 %v1777_v58, 0.0  ;;  %v1780_v32 = vadd.f32 %v2262_v20, %v3470_v1  ;;  %v1771_v57 = vpop.f32.mrb[15].mxu1 }
 0x265   : > { %v1811_v19 = vmax.f32 %v1769_v36, 0.0  ;;  %v1772_v62 = vadd.f32 %v3470_v1, %v1771_v57 }
 0x266   : > { %v2198_v44 = vpack.c.bf16 %v1813_v55, %v1813_v55  ;;  %v1814_v61 = vmax.f32 %v1780_v32, 0.0 }
 0x267   : > { %v2196_v4 = vpack.c.bf16 %v1811_v19, %v1811_v19  ;;  %v1812_v38 = vmax.f32 %v1772_v62, 0.0 }
 0x268   : > { %v2245_v27 = vpop.f32.mrb[12].mxu0  ;;  %1974 = vst.msk [vmem:[%s3479_s16 + $0x78] sm:$0xf] %vm1943_vm0, %v2198_v44  ;;  %v2199_v56 = vpack.c.bf16 %v1814_v61, %v1814_v61 }
 0x269   : > { %v1713_v48 = vadd.f32 %v2245_v27, %v3470_v1  ;;  %v1704_v10 = vpop.f32.mrb[13].mxu0  ;;  %1972 = vst.msk [vmem:[%s3479_s16 + $0x70] sm:$0xf] %vm1943_vm0, %v2196_v4  ;;  %v2197_v26 = vpack.c.bf16 %v1812_v38, %v1812_v38 }
 0x26a   : > { %v1705_v16 = vadd.f32 %v3470_v1, %v1704_v10  ;;  %v2246_v7 = vpop.f32.mrb[14].mxu0  ;;  %1975 = vst.msk [vmem:[%s3479_s16 + $0x7c] sm:$0xf] %vm1943_vm0, %v2199_v56 }
 0x26b   : > { %v1797_v50 = vmax.f32 %v1713_v48, 0.0  ;;  %v1716_v46 = vadd.f32 %v2246_v7, %v3470_v1  ;;  %v1707_v21 = vpop.f32.mrb[15].mxu0  ;;  %1973 = vst.msk [vmem:[%s3479_s16 + $0x74] sm:$0xf] %vm1943_vm0, %v2197_v26 }
 0x26c   : > { %v1795_v2 = vmax.f32 %v1705_v16, 0.0  ;;  %v1708_v5 = vadd.f32 %v3470_v1, %v1707_v21 }
 0x26d   : > { %v2182_v0 = vpack.c.bf16 %v1797_v50, %v1797_v50  ;;  %v1798_v30 = vmax.f32 %v1716_v46, 0.0 }
 0x26e   : > { %v2180_v40 = vpack.c.bf16 %v1795_v2, %v1795_v2  ;;  %v1796_v22 = vmax.f32 %v1708_v5, 0.0 }
 0x26f   : > { %1958 = vst.msk [vmem:[%s3479_s16 + $0x38] sm:$0xf] %vm1943_vm0, %v2182_v0  ;;  %v2183_v53 = vpack.c.bf16 %v1798_v30, %v1798_v30 }
 0x270   : > { %1956 = vst.msk [vmem:[%s3479_s16 + $0x30] sm:$0xf] %vm1943_vm0, %v2180_v40  ;;  %v2181_v24 = vpack.c.bf16 %v1796_v22, %v1796_v22 }
 0x271   : > { %1959 = vst.msk [vmem:[%s3479_s16 + $0x3c] sm:$0xf] %vm1943_vm0, %v2183_v53 }
 0x272   : > { %1957 = vst.msk [vmem:[%s3479_s16 + $0x34] sm:$0xf] %vm1943_vm0, %v2181_v24 }
 0x273 PF: > { %s13_s12 = sadd.s32 1, %s2321_s12  }
 0x274   : > { %p10_p4 = scmp.ge.s32.totalorder %s13_s12, 4  }
 0x276   :  { %12 = sbr.rel (!%p10_p4) target bundleno = 1 (0x1), region = 62 }

// kernel: transunet_forward.45
= control target key start
LH: loop header
LB: loop body
LE: loop exit
PB: predicated region body
PF: predicated region fallthrough
CT: control target
= control target key end

     0   :  { %s525_s12 = smov 0   ;;  %s527_s13 = smov 0   ;;  %s568_s0 = inlined_call_operand.vmem [shape: bf16[32,16], index: 0, kind: input, shape index: {}]   ;;  %s569_s1 = inlined_call_operand.vmem [shape: bf16[16,64], index: 1, kind: input, shape index: {}]   ;;  %s570_s2 = inlined_call_operand.vmem [shape: f32[1,64], index: 2, kind: input, shape index: {}]   ;;  %s571_s3 = inlined_call_operand.vmem [shape: f32[32,64], index: 3, kind: output, shape index: {}]  }
   0x1   :  { %s529_s14 = smov 0  }
   0x2 LB: > { %s25_s15 = sadd.s32 1, %s497_s13  ;;  %p424_p0 = scmp.ge.s32.totalorder %s501_s14, 1  ;;  %s501_s14 = sphi %s529_s14, %s13_s14   ;;  %s497_s13 = sphi %s527_s13, %s573_s13   ;;  %s493_s12 = sphi %s525_s12, %s572_s12  }
   0x3   : > { %p27_p1 = scmp.ge.s32.totalorder %s25_s15, 2  ;;  %p169_p2 = scmp.lt.s32.totalorder %s501_s14, 3 }
   0x5   : > { %s575_s15 = smov (%p27_p1, %s25_s15), 0  ;;  %p170_p3 = pnand %p424_p0, %p169_p2 }
   0x6   : > { %v469_v0 = vld [vmem:[%s569_s1] sm:$0xff] (!%p170_p3)   ;;  %v503_v1 = vmov (!%p170_p3), 0.0   ;;  %s425_s18 = sshll.u32 (!%p170_p3), %s493_s12, 1  ;;  %vm504_vm0 = vmmov (!%p170_p3), 0   ;;  %vm248_vm1 = vcmask (!%p170_p3), 130048   ;;  %vm313_vm2 = vcmask (!%p170_p3), 523264  }
   0x7   : > { %173 = sbr.rel (%p170_p3) target bundleno = 268 (0x10c), region = 32  ;;  %437 = vmatprep.subr.bf16.mxu0 (!%p170_p3), %v503_v1  ;;  %439 = vmatprep.mubr.msk.bf16.mxu0 (!%p170_p3), %vm504_vm0, %v503_v1  ;;  %p204_p4 = scmp.lt.s32.totalorder (!%p170_p3), %s425_s18, 3  ;;  %v429_v3 = vld [vmem:[%s570_s2] ss:$0 sm:$0xff] (!%p170_p3) }
   0x8   : > { %438 = vmatpush3.bf16.msra.mxu0 (!%p170_p3), %v469_v0 }
   0xe   : > { %s577_s18 = smov (!%p204_p4, %s425_s18), 3 }
   0xf   : > { %s426_s19 = sshll.u32 %s577_s18, 2  ;;  %s428_s25 = sshll.u32 %s577_s18, 3 }
  0x10   : > { %s207_s22 = scalar_lea.vmem %s568_s0, %s426_s19  ;;  %s223_s28 = scalar_lea.vmem %s571_s3, %s428_s25 }
  0x11   : > { %v470_v2 = vld [vmem:[%s207_s22] sm:$0xff]  }
  0x12   : > { %440 = vmatmul.mubr.msk.bf16.vlgmr.msra.gmra.mrb[0].mxu0 %vm248_vm1, %v470_v2 }
  0xe5   : > { %v286_v4 = vpop.f32.mrb[0].mxu0 }
  0xe6   : > { %v287_v5 = vadd.f32 %v429_v3, %v286_v4  ;;  %v441_v6 = vpop.f32.mrb[1].mxu0 }
  0xe7   : > { %v289_v7 = vpop.f32.mrb[2].mxu0 }
  0xe8   : > { %v293_v8 = vand.u32 2147483647, %v287_v5  ;;  %v290_v9 = vadd.f32 %v429_v3, %v289_v7  ;;  %v442_v10 = vpop.f32.mrb[3].mxu0  ;;  %vm301_vm3 = vcmp.ge.f32.partialorder %v287_v5, 0.0 }
  0xea   : > { %v295_v11 = vsub.f32 0.0, %v293_v8  ;;  %v294_v12 = vand.u32 2147483647, %v290_v9  ;;  %vm302_vm4 = vcmp.ge.f32.partialorder %v290_v9, 0.0 }
  0xec   : > { %v297_v13 = vmul.f32 1.442695, %v295_v11  ;;  %v296_v14 = vsub.f32 0.0, %v294_v12 }
  0xee   : > { %471 = vpow2.f32 %v297_v13  ;;  %v299_v15 = vmul.f32 1.442695, %v296_v14 }
  0xf0   : > { %473 = vpow2.f32 %v299_v15 }
  0xf8   : > { %v472_v16 = vpop.eup %471 }
  0xf9   : > { %v303_v17 = vadd.f32 1.0, %v472_v16 }
  0xfa   : > { %v474_v18 = vpop.eup %473 }
  0xfb   : > { %475 = vrcp.f32 %v303_v17  ;;  %v304_v19 = vadd.f32 1.0, %v474_v18 }
  0xfd   : > { %477 = vrcp.f32 %v304_v19 }
 0x105   : > { %v476_v20 = vpop.eup %475 }
 0x106   : > { %v309_v21 = vmul.f32 %v476_v20, %v472_v16 }
 0x107   : > { %v478_v22 = vpop.eup %477 }
 0x108   : > { %v311_v23 = vsel %vm301_vm3, %v476_v20, %v309_v21  ;;  %v310_v24 = vmul.f32 %v478_v22, %v474_v18 }
 0x109   : > { %314 = vst.msk [vmem:[%s223_s28] sm:$0xff] %vm313_vm2, %v311_v23 }
 0x10a   : > { %v312_v25 = vsel %vm302_vm4, %v478_v22, %v310_v24 }
 0x10b   : > { %315 = vst.msk [vmem:[%s223_s28 + $0x8] sm:$0xff] %vm313_vm2, %v312_v25 }
 0x10c PF: > { %s13_s14 = sadd.s32 1, %s501_s14   ;;  %s572_s12 = smov %s497_s13 }
 0x10d   : > { %p10_p5 = scmp.ge.s32.totalorder %s13_s14, 4   ;;  %s573_s13 = smov %s575_s15 }
 0x10f   :  { %12 = sbr.rel (!%p10_p5) target bundleno = 2 (0x2), region = 68 }

</bundles_post_ra>
